<compile_context>
chip_gen: v5e
topology: v5e:2x2
jax: 0.10.0
libtpu: 0.0.40
codegen_flags: <defaults>
</compile_context>

<pallas_src>
import math
from functools import partial

import jax
import jax.numpy as jnp
from jax import lax
from jax.experimental import pallas as pl
from jax.experimental.pallas import tpu as pltpu

LN_EPS = 1e-5          # PyTorch nn.LayerNorm default
NEG_INF = -1e9         # additive mask value (avoids NaN on fully-masked rows)
EXACT_SOFTMAX = False  # True -> exact reciprocal for strict parity vs PyTorch
LATENT_PAD = 128       # LFQ latent projections padded to one full lane width

_SEQ = pltpu.CompilerParams(dimension_semantics=("arbitrary",))

_ENC_KEYS = ("wqkv", "bqkv", "wo", "bo", "g1", "b1",
             "w1", "bf1", "w2", "bf2", "g2", "b2")
_DEC_KEYS = ("wqkv", "bqkv", "wo1", "bo1", "g1", "b1",
             "wq", "bq", "wkv", "bkv", "wo2", "bo2", "g2", "b2",
             "w1", "bf1", "w2", "bf2", "g3", "b3")
_IDEA_KEYS = ("wpi", "bpi", "wpo", "bpo", "wsp", "bsp")


# ----------------------------- in-kernel helpers ----------------------------

def _layernorm(x_f32, g, b):
    """LayerNorm over the last dim, f32 math. g, b are (1, D)."""
    mu = jnp.mean(x_f32, axis=-1, keepdims=True)
    xc = x_f32 - mu
    var = jnp.mean(xc * xc, axis=-1, keepdims=True)
    return xc * lax.rsqrt(var + LN_EPS) * g + b


def _softmax(s):
    """Row softmax, f32 math; approximate reciprocal on the EUP by default."""
    m = jnp.max(s, axis=-1, keepdims=True)
    p = jnp.exp(s - m)
    d = jnp.sum(p, axis=-1, keepdims=True)
    if EXACT_SOFTMAX:
        return p / d
    return p * pl.reciprocal(d, approx=True)


def _mha_fold_out(q_bf, k_bf, v_bf, bias, wo_bf, num_heads, head_dim):
    """Multi-head attention for one batch slice with the output projection
    folded into the head loop.

    q (Sq, D) bf16 is already scaled by 1/sqrt(head_dim); k/v are (Sk, D) bf16;
    bias broadcasts to (Sq, Sk) f32; wo is (D, D) bf16.  Heads are static lane
    slices; each head's (p @ v_h) @ wo[h*hd:(h+1)*hd, :] is accumulated into a
    single f32 (Sq, D) accumulator (no lane-axis concat, no separate wo matmul).
    """
    sq = q_bf.shape[0]
    d_model = wo_bf.shape[1]
    acc = jnp.zeros((sq, d_model), jnp.float32)
    for h in range(num_heads):
        cs = slice(h * head_dim, (h + 1) * head_dim)
        s = lax.dot_general(q_bf[:, cs], k_bf[:, cs], (((1,), (1,)), ((), ())),
                            preferred_element_type=jnp.float32) + bias
        p = _softmax(s).astype(jnp.bfloat16)
        pv = jnp.dot(p, v_bf[:, cs], preferred_element_type=jnp.float32)
        acc = acc + jnp.dot(pv.astype(jnp.bfloat16), wo_bf[cs, :],
                            preferred_element_type=jnp.float32)
    return acc


# ------------------------------ fused kernels -------------------------------

def _encoder_stack_kernel(x_ref, bias_ref,
                          wqkv_ref, bqkv_ref, wo_ref, bo_ref, g1_ref, b1_ref,
                          w1_ref, bf1_ref, w2_ref, bf2_ref, g2_ref, b2_ref,
                          wpi_ref, bpi_ref, wpo_ref, bpo_ref, wsp_ref, bsp_ref,
                          pos_ref,
                          o_ref, act_ref,
                          *, num_heads, head_dim, scale, inv_sqrt_latent):
    l = pl.program_id(0)

    @pl.when(l == 0)
    def _():
        act_ref[...] = x_ref[...]

    B, S, D = act_ref.shape
    R = B * S
    x = act_ref[...].reshape(R, D)                       # (B*S, D) bf16

    # fused QKV projection over all B*S rows; scale q once, cast q/k/v once
    qkv = (jnp.dot(x, wqkv_ref[0], preferred_element_type=jnp.float32)
           + bqkv_ref[0])
    q = (qkv[:, :D] * scale).astype(jnp.bfloat16)
    k = qkv[:, D:2 * D].astype(jnp.bfloat16)
    v = qkv[:, 2 * D:].astype(jnp.bfloat16)
    wo = wo_ref[0]

    sa_parts = []
    for b in range(B):
        rs = slice(b * S, (b + 1) * S)
        sa_parts.append(_mha_fold_out(q[rs], k[rs], v[rs], bias_ref[b],
                                      wo, num_heads, head_dim))
    sa = jnp.concatenate(sa_parts, axis=0) + bo_ref[0]   # (B*S, D) f32
    h1 = _layernorm(x.astype(jnp.float32) + sa, g1_ref[0], b1_ref[0])

    ff = jnp.maximum(jnp.dot(h1.astype(jnp.bfloat16), w1_ref[0],
                             preferred_element_type=jnp.float32) + bf1_ref[0],
                     0.0)
    ff = (jnp.dot(ff.astype(jnp.bfloat16), w2_ref[0],
                  preferred_element_type=jnp.float32) + bf2_ref[0])
    y = _layernorm(h1 + ff, g2_ref[0], b2_ref[0])
    act_ref[...] = y.astype(act_ref.dtype).reshape(B, S, D)

    # final step: LFQ quantize (eval) -> project_out -> proj_from_idea_split
    # -> add idea positional encodings.  Latent projections are 128-lane
    # padded (extra wpi cols / wpo rows are zero, so padded bits cancel).
    # TODO(synk): LFQ training-time entropy/commitment aux losses (zero in
    # eval) and the straight-through estimator are not implemented.
    @pl.when(l == pl.num_programs(0) - 1)
    def _():
        z = (jnp.dot(y.astype(jnp.bfloat16), wpi_ref[...],
                     preferred_element_type=jnp.float32) + bpi_ref[...])
        codes = jnp.where(z > 0.0, inv_sqrt_latent, -inv_sqrt_latent)
        d = (jnp.dot(codes.astype(jnp.bfloat16), wpo_ref[...],
                     preferred_element_type=jnp.float32) + bpo_ref[...])
        idea = (jnp.dot(d.astype(jnp.bfloat16), wsp_ref[...],
                        preferred_element_type=jnp.float32) + bsp_ref[...])
        idea = idea.reshape(B, S, D) + pos_ref[...].astype(jnp.float32)
        o_ref[...] = idea.astype(o_ref.dtype)


def _decoder_stack_kernel(x_ref, mem_ref, tbias_ref, mbias_ref,
                          wqkv_ref, bqkv_ref, wo1_ref, bo1_ref, g1_ref, b1_ref,
                          wq_ref, bq_ref, wkv_ref, bkv_ref, wo2_ref, bo2_ref,
                          g2_ref, b2_ref,
                          w1_ref, bf1_ref, w2_ref, bf2_ref, g3_ref, b3_ref,
                          outw_ref, outb_ref,
                          o_ref, act_ref,
                          *, num_heads, head_dim, scale):
    l = pl.program_id(0)

    @pl.when(l == 0)
    def _():
        act_ref[...] = x_ref[...]

    B, St, D = act_ref.shape
    Sm = mem_ref.shape[1]
    x = act_ref[...].reshape(B * St, D)                  # (B*St, D) bf16
    mem = mem_ref[...].reshape(B * Sm, D)                # (B*Sm, D) bf16

    # causal mask built in-kernel (no HBM-materialized per-head bias)
    rows = lax.broadcasted_iota(jnp.int32, (St, St), 0)
    cols = lax.broadcasted_iota(jnp.int32, (St, St), 1)
    causal = jnp.where(cols > rows, NEG_INF, 0.0).astype(jnp.float32)

    # --- masked causal self-attention (fused QKV) ---
    qkv = (jnp.dot(x, wqkv_ref[0], preferred_element_type=jnp.float32)
           + bqkv_ref[0])
    q = (qkv[:, :D] * scale).astype(jnp.bfloat16)
    k = qkv[:, D:2 * D].astype(jnp.bfloat16)
    v = qkv[:, 2 * D:].astype(jnp.bfloat16)
    wo1 = wo1_ref[0]
    sa_parts = []
    for b in range(B):
        rs = slice(b * St, (b + 1) * St)
        sa_parts.append(_mha_fold_out(q[rs], k[rs], v[rs],
                                      causal + tbias_ref[b], wo1,
                                      num_heads, head_dim))
    sa = jnp.concatenate(sa_parts, axis=0) + bo1_ref[0]
    h1 = _layernorm(x.astype(jnp.float32) + sa, g1_ref[0], b1_ref[0])

    # --- cross attention over the idea memory (fused KV projection) ---
    q2 = ((jnp.dot(h1.astype(jnp.bfloat16), wq_ref[0],
                   preferred_element_type=jnp.float32) + bq_ref[0])
          * scale).astype(jnp.bfloat16)
    kv = (jnp.dot(mem, wkv_ref[0], preferred_element_type=jnp.float32)
          + bkv_ref[0])
    k2 = kv[:, :D].astype(jnp.bfloat16)
    v2 = kv[:, D:].astype(jnp.bfloat16)
    wo2 = wo2_ref[0]
    ca_parts = []
    for b in range(B):
        rq = slice(b * St, (b + 1) * St)
        rk = slice(b * Sm, (b + 1) * Sm)
        ca_parts.append(_mha_fold_out(q2[rq], k2[rk], v2[rk], mbias_ref[b],
                                      wo2, num_heads, head_dim))
    ca = jnp.concatenate(ca_parts, axis=0) + bo2_ref[0]
    h2 = _layernorm(h1 + ca, g2_ref[0], b2_ref[0])

    # --- feed-forward ---
    ff = jnp.maximum(jnp.dot(h2.astype(jnp.bfloat16), w1_ref[0],
                             preferred_element_type=jnp.float32) + bf1_ref[0],
                     0.0)
    ff = (jnp.dot(ff.astype(jnp.bfloat16), w2_ref[0],
                  preferred_element_type=jnp.float32) + bf2_ref[0])
    y = _layernorm(h2 + ff, g3_ref[0], b3_ref[0])
    act_ref[...] = y.astype(act_ref.dtype).reshape(B, St, D)

    # final step: fused vocab projection (project_return)
    # TODO(synk): tile the vocab axis at production vocab sizes (~50257).
    @pl.when(l == pl.num_programs(0) - 1)
    def _():
        V = o_ref.shape[2]
        logits = (jnp.dot(y.astype(jnp.bfloat16), outw_ref[...],
                          preferred_element_type=jnp.float32) + outb_ref[...])
        o_ref[...] = logits.reshape(B, St, V).astype(o_ref.dtype)


# ------------------------------ pallas wrappers ------------------------------

def _const_spec(a):
    """Full-array block with a constant index map (loaded once, layer-invariant)."""
    if a.ndim == 2:
        return pl.BlockSpec(a.shape, lambda l: (0, 0))
    return pl.BlockSpec(a.shape, lambda l: (0, 0, 0))


def _layer_specs(ws):
    """Stacked (L, r, c) weights: stream one layer slice per grid step."""
    return [pl.BlockSpec((1,) + tuple(a.shape[1:]), lambda l: (l, 0, 0))
            for a in ws]


def encode_and_quantize(src, src_bias, idea_pos, enc_p, idea_p,
                        *, num_heads, latent_dim):
    B, S, D = src.shape
    head_dim = D // num_heads
    n_layers = enc_p["wqkv"].shape[0]
    layer_ws = [enc_p[k] for k in _ENC_KEYS]
    idea_ws = [idea_p[k] for k in _IDEA_KEYS]
    return pl.pallas_call(
        partial(_encoder_stack_kernel, num_heads=num_heads, head_dim=head_dim,
                scale=1.0 / math.sqrt(head_dim),
                inv_sqrt_latent=1.0 / math.sqrt(latent_dim)),
        out_shape=jax.ShapeDtypeStruct((B, S, D), src.dtype),
        grid=(n_layers,),
        in_specs=([_const_spec(src), _const_spec(src_bias)]
                  + _layer_specs(layer_ws)
                  + [_const_spec(a) for a in idea_ws]
                  + [_const_spec(idea_pos)]),
        out_specs=pl.BlockSpec((B, S, D), lambda l: (0, 0, 0)),
        scratch_shapes=[pltpu.VMEM((B, S, D), src.dtype)],
        compiler_params=_SEQ,
    )(src, src_bias, *layer_ws, *idea_ws, idea_pos)


def decode_and_project(tgt, memory, tgt_bias, mem_bias, out_w, out_b, dec_p,
                       *, num_heads):
    B, St, D = tgt.shape
    head_dim = D // num_heads
    n_layers = dec_p["wqkv"].shape[0]
    V = out_w.shape[1]
    layer_ws = [dec_p[k] for k in _DEC_KEYS]
    return pl.pallas_call(
        partial(_decoder_stack_kernel, num_heads=num_heads, head_dim=head_dim,
                scale=1.0 / math.sqrt(head_dim)),
        out_shape=jax.ShapeDtypeStruct((B, St, V), jnp.float32),
        grid=(n_layers,),
        in_specs=([_const_spec(tgt), _const_spec(memory),
                   _const_spec(tgt_bias), _const_spec(mem_bias)]
                  + _layer_specs(layer_ws)
                  + [_const_spec(out_w), _const_spec(out_b)]),
        out_specs=pl.BlockSpec((B, St, V), lambda l: (0, 0, 0)),
        scratch_shapes=[pltpu.VMEM((B, St, D), tgt.dtype)],
        compiler_params=_SEQ,
    )(tgt, memory, tgt_bias, mem_bias, *layer_ws, out_w, out_b)


# ------------------------------- full forward --------------------------------

def ideal_translator_forward(params, source_tokens, padding_mask,
                             target_tokens, tgt_padding_mask,
                             *, num_heads, latent_dim):
    B, Ss = source_tokens.shape
    St = target_tokens.shape[1]
    pos = params["pos"]

    # embeddings + positional encodings (gathers are glue, stay in plain JAX)
    src = jnp.take(params["embed"], source_tokens, axis=0) + pos[:Ss][None]
    tgt = jnp.take(params["embed"], target_tokens, axis=0) + pos[:St][None]

    # additive key-padding biases (True = pad -> -1e9)
    src_bias = jnp.where(padding_mask, NEG_INF, 0.0).astype(jnp.float32).reshape(B, 1, Ss)
    tgt_bias = jnp.where(tgt_padding_mask, NEG_INF, 0.0).astype(jnp.float32).reshape(B, 1, St)

    # call 1: text-encoder stack + LFQ quantizer + proj_from_idea_split + pos
    # (idea_tokens_per_token=1 -> idea sequence == source sequence)
    idea = encode_and_quantize(src, src_bias, pos[:Ss][None],
                               params["encoder"], params["idea"],
                               num_heads=num_heads, latent_dim=latent_dim)
    aux_loss = jnp.zeros((), jnp.float32)   # eval-mode LFQ aux losses are zero

    # call 2: decoder stack (causal self-attn, cross-attn) + vocab projection
    logits = decode_and_project(tgt, idea, tgt_bias, src_bias,
                                params["out_w"], params["out_b"],
                                params["decoder"], num_heads=num_heads)
    return logits, aux_loss


# ------------------------------- params init ---------------------------------

def _dense(key, shape, scale=0.02):
    return (scale * jax.random.normal(key, shape, dtype=jnp.float32)).astype(jnp.bfloat16)


def init_params(key, D, F, vocab, max_seq, latent, n_enc, n_dec):
    ks = iter(jax.random.split(key, 20))
    zeros = lambda *s: jnp.zeros(s, jnp.float32)
    ones = lambda *s: jnp.ones(s, jnp.float32)

    enc = {   # per-layer weights stacked along a leading n_enc axis
        "wqkv": _dense(next(ks), (n_enc, D, 3 * D)), "bqkv": zeros(n_enc, 1, 3 * D),
        "wo": _dense(next(ks), (n_enc, D, D)), "bo": zeros(n_enc, 1, D),
        "g1": ones(n_enc, 1, D), "b1": zeros(n_enc, 1, D),
        "w1": _dense(next(ks), (n_enc, D, F)), "bf1": zeros(n_enc, 1, F),
        "w2": _dense(next(ks), (n_enc, F, D)), "bf2": zeros(n_enc, 1, D),
        "g2": ones(n_enc, 1, D), "b2": zeros(n_enc, 1, D),
    }
    dec = {   # per-layer weights stacked along a leading n_dec axis
        "wqkv": _dense(next(ks), (n_dec, D, 3 * D)), "bqkv": zeros(n_dec, 1, 3 * D),
        "wo1": _dense(next(ks), (n_dec, D, D)), "bo1": zeros(n_dec, 1, D),
        "g1": ones(n_dec, 1, D), "b1": zeros(n_dec, 1, D),
        "wq": _dense(next(ks), (n_dec, D, D)), "bq": zeros(n_dec, 1, D),
        "wkv": _dense(next(ks), (n_dec, D, 2 * D)), "bkv": zeros(n_dec, 1, 2 * D),
        "wo2": _dense(next(ks), (n_dec, D, D)), "bo2": zeros(n_dec, 1, D),
        "g2": ones(n_dec, 1, D), "b2": zeros(n_dec, 1, D),
        "w1": _dense(next(ks), (n_dec, D, F)), "bf1": zeros(n_dec, 1, F),
        "w2": _dense(next(ks), (n_dec, F, D)), "bf2": zeros(n_dec, 1, D),
        "g3": ones(n_dec, 1, D), "b3": zeros(n_dec, 1, D),
    }
    # LFQ projections padded to a full 128-lane width: extra wpi columns and
    # wpo rows are zero, so the padded (-1/sqrt(latent)) code bits cancel.
    wpi = jnp.zeros((D, LATENT_PAD), jnp.float32).at[:, :latent].set(
        0.02 * jax.random.normal(next(ks), (D, latent), jnp.float32)).astype(jnp.bfloat16)
    wpo = jnp.zeros((LATENT_PAD, D), jnp.float32).at[:latent, :].set(
        0.02 * jax.random.normal(next(ks), (latent, D), jnp.float32)).astype(jnp.bfloat16)
    idea = {
        "wpi": wpi, "bpi": zeros(1, LATENT_PAD),
        "wpo": wpo, "bpo": zeros(1, D),
        "wsp": _dense(next(ks), (D, D)), "bsp": zeros(1, D),
    }
    return {
        "embed": _dense(next(ks), (vocab, D)),           # nn.Embedding(vocab, D)
        "pos": _dense(next(ks), (max_seq + 1, D)),       # nn.Embedding(max_seq+1, D)
        "encoder": enc, "decoder": dec, "idea": idea,
        "out_w": _dense(next(ks), (D, vocab)),           # project_return: Linear(D, vocab)
        "out_b": zeros(1, vocab),
    }


# ----------------------------------- main -------------------------------------

if __name__ == "__main__":
    B, Ss, St = 2, 8, 8
    D, F, H = 128, 128, 4            # hidden_size, dim_feedforward, num_heads
    vocab, max_seq = 128, 64
    idea_token_vocab_size = 256      # power of 2 -> latent dim = 8
    latent = int(math.log2(idea_token_vocab_size))
    n_enc, n_dec = 2, 2

    key = jax.random.PRNGKey(0)
    kp, ksrc, ktgt = jax.random.split(key, 3)
    params = init_params(kp, D, F, vocab, max_seq, latent, n_enc, n_dec)

    source_tokens = jax.random.randint(ksrc, (B, Ss), 0, vocab, dtype=jnp.int32)
    target_tokens = jax.random.randint(ktgt, (B, St), 0, vocab, dtype=jnp.int32)
    padding_mask = jnp.zeros((B, Ss), dtype=bool).at[:, -2:].set(True)      # True = pad
    tgt_padding_mask = jnp.zeros((B, St), dtype=bool).at[:, -1:].set(True)  # True = pad

    fwd = jax.jit(partial(ideal_translator_forward, num_heads=H, latent_dim=latent))
    logits, aux = fwd(params, source_tokens, padding_mask,
                      target_tokens, tgt_padding_mask)
    jax.block_until_ready(logits)

    assert logits.shape == (B, St, vocab)
    assert aux.shape == ()
    assert bool(jnp.all(jnp.isfinite(logits)))
    print("KERNEL_OK")
</pallas_src>

<mosaic_0001>
module attributes {stable_mosaic.version = 11 : i64} {
  func.func @_encoder_stack_kernel(%arg0: i32, %arg1: memref<2x8x128xbf16, #tpu.memory_space<vmem>>, %arg2: memref<2x1x8xf32, #tpu.memory_space<vmem>>, %arg3: memref<1x128x384xbf16, #tpu.memory_space<vmem>>, %arg4: memref<1x1x384xf32, #tpu.memory_space<vmem>>, %arg5: memref<1x128x128xbf16, #tpu.memory_space<vmem>>, %arg6: memref<1x1x128xf32, #tpu.memory_space<vmem>>, %arg7: memref<1x1x128xf32, #tpu.memory_space<vmem>>, %arg8: memref<1x1x128xf32, #tpu.memory_space<vmem>>, %arg9: memref<1x128x128xbf16, #tpu.memory_space<vmem>>, %arg10: memref<1x1x128xf32, #tpu.memory_space<vmem>>, %arg11: memref<1x128x128xbf16, #tpu.memory_space<vmem>>, %arg12: memref<1x1x128xf32, #tpu.memory_space<vmem>>, %arg13: memref<1x1x128xf32, #tpu.memory_space<vmem>>, %arg14: memref<1x1x128xf32, #tpu.memory_space<vmem>>, %arg15: memref<128x128xbf16, #tpu.memory_space<vmem>>, %arg16: memref<1x128xf32, #tpu.memory_space<vmem>>, %arg17: memref<128x128xbf16, #tpu.memory_space<vmem>>, %arg18: memref<1x128xf32, #tpu.memory_space<vmem>>, %arg19: memref<128x128xbf16, #tpu.memory_space<vmem>>, %arg20: memref<1x128xf32, #tpu.memory_space<vmem>>, %arg21: memref<1x8x128xbf16, #tpu.memory_space<vmem>>, %arg22: memref<2x8x128xbf16, #tpu.memory_space<vmem>>, %arg23: memref<2x8x128xbf16, #tpu.memory_space<vmem>>) attributes {dimension_semantics = [#tpu.dimension_semantics<arbitrary>], iteration_bounds = array<i64: 2>, scalar_prefetch = 0 : i64, scratch_operands = 1 : i64, tpu.core_type = #tpu.core_type<tc>, window_params = [{pipeline_mode = #tpu.pipeline_mode<synchronous>, transform_indices = @transform_0, window_bounds = array<i64: 2, 8, 128>}, {pipeline_mode = #tpu.pipeline_mode<synchronous>, transform_indices = @transform_1, window_bounds = array<i64: 2, 1, 8>}, {transform_indices = @transform_2, window_bounds = array<i64: 1, 128, 384>}, {transform_indices = @transform_3, window_bounds = array<i64: 1, 1, 384>}, {transform_indices = @transform_4, window_bounds = array<i64: 1, 128, 128>}, {transform_indices = @transform_5, window_bounds = array<i64: 1, 1, 128>}, {transform_indices = @transform_6, window_bounds = array<i64: 1, 1, 128>}, {transform_indices = @transform_7, window_bounds = array<i64: 1, 1, 128>}, {transform_indices = @transform_8, window_bounds = array<i64: 1, 128, 128>}, {transform_indices = @transform_9, window_bounds = array<i64: 1, 1, 128>}, {transform_indices = @transform_10, window_bounds = array<i64: 1, 128, 128>}, {transform_indices = @transform_11, window_bounds = array<i64: 1, 1, 128>}, {transform_indices = @transform_12, window_bounds = array<i64: 1, 1, 128>}, {transform_indices = @transform_13, window_bounds = array<i64: 1, 1, 128>}, {pipeline_mode = #tpu.pipeline_mode<synchronous>, transform_indices = @transform_14, window_bounds = array<i64: 128, 128>}, {pipeline_mode = #tpu.pipeline_mode<synchronous>, transform_indices = @transform_15, window_bounds = array<i64: 1, 128>}, {pipeline_mode = #tpu.pipeline_mode<synchronous>, transform_indices = @transform_16, window_bounds = array<i64: 128, 128>}, {pipeline_mode = #tpu.pipeline_mode<synchronous>, transform_indices = @transform_17, window_bounds = array<i64: 1, 128>}, {pipeline_mode = #tpu.pipeline_mode<synchronous>, transform_indices = @transform_18, window_bounds = array<i64: 128, 128>}, {pipeline_mode = #tpu.pipeline_mode<synchronous>, transform_indices = @transform_19, window_bounds = array<i64: 1, 128>}, {pipeline_mode = #tpu.pipeline_mode<synchronous>, transform_indices = @transform_20, window_bounds = array<i64: 1, 8, 128>}, {pipeline_mode = #tpu.pipeline_mode<synchronous>, transform_indices = @transform_21, window_bounds = array<i64: 2, 8, 128>}]} {
    %c0_i32 = arith.constant 0 : i32
    %0 = arith.cmpi eq, %arg0, %c0_i32 : i32
    %1 = arith.extui %0 : i1 to i32
    %c0_i32_0 = arith.constant 0 : i32
    %2 = arith.cmpi ne, %1, %c0_i32_0 : i32
    scf.if %2 {
      %c0_104 = arith.constant 0 : index
      %c0_105 = arith.constant 0 : index
      %c0_106 = arith.constant 0 : index
      %290 = vector.load %arg1[%c0_104, %c0_105, %c0_106] : memref<2x8x128xbf16, #tpu.memory_space<vmem>>, vector<2x8x128xbf16>
      %c0_107 = arith.constant 0 : index
      %c0_108 = arith.constant 0 : index
      %c0_109 = arith.constant 0 : index
      %291 = vector.load %arg23[%c0_107, %c0_108, %c0_109] : memref<2x8x128xbf16, #tpu.memory_space<vmem>>, vector<2x8x128xbf16>
      tpu.vector_store %arg23[%c0_107, %c0_108, %c0_109], %290 {strides = array<i32>} : memref<2x8x128xbf16, #tpu.memory_space<vmem>>, vector<2x8x128xbf16>,
    } else {
    }
    %c0 = arith.constant 0 : index
    %c0_1 = arith.constant 0 : index
    %c0_2 = arith.constant 0 : index
    %3 = vector.load %arg23[%c0, %c0_1, %c0_2] : memref<2x8x128xbf16, #tpu.memory_space<vmem>>, vector<2x8x128xbf16>
    %4 = vector.shape_cast %3 : vector<2x8x128xbf16> to vector<16x128xbf16>
    %c0_3 = arith.constant 0 : index
    %c0_4 = arith.constant 0 : index
    %c0_5 = arith.constant 0 : index
    %5 = vector.load %arg3[%c0_3, %c0_4, %c0_5] : memref<1x128x384xbf16, #tpu.memory_space<vmem>>, vector<1x128x384xbf16>
    %6 = vector.shape_cast %5 : vector<1x128x384xbf16> to vector<128x384xbf16>
    %cst = arith.constant dense<0.000000e+00> : vector<16x384xf32>
    %7 = tpu.matmul %4, %6, %cst {dimension_numbers = #tpu.dot_dimension_numbers<[1], [0], [0], [1], [0, 0, 1, 1], [], []>} : vector<16x128xbf16>, vector<128x384xbf16>, vector<16x384xf32> -> vector<16x384xf32>
    %c0_6 = arith.constant 0 : index
    %c0_7 = arith.constant 0 : index
    %c0_8 = arith.constant 0 : index
    %8 = vector.load %arg4[%c0_6, %c0_7, %c0_8] : memref<1x1x384xf32, #tpu.memory_space<vmem>>, vector<1x1x384xf32>
    %9 = vector.shape_cast %8 : vector<1x1x384xf32> to vector<1x384xf32>
    %10 = vector.broadcast %9 : vector<1x384xf32> to vector<16x384xf32>
    %11 = arith.addf %7, %10 : vector<16x384xf32>
    %12 = vector.extract_strided_slice %11 {offsets = [0, 0], sizes = [16, 128], strides = [1, 1]} : vector<16x384xf32> to vector<16x128xf32>
    %cst_9 = arith.constant 0.176776692 : f32
    %13 = vector.broadcast %cst_9 : f32 to vector<16x128xf32>
    %14 = arith.mulf %12, %13 : vector<16x128xf32>
    %15 = arith.truncf %14 : vector<16x128xf32> to vector<16x128xbf16>
    %16 = vector.extract_strided_slice %11 {offsets = [0, 128], sizes = [16, 128], strides = [1, 1]} : vector<16x384xf32> to vector<16x128xf32>
    %17 = arith.truncf %16 : vector<16x128xf32> to vector<16x128xbf16>
    %18 = vector.extract_strided_slice %11 {offsets = [0, 256], sizes = [16, 128], strides = [1, 1]} : vector<16x384xf32> to vector<16x128xf32>
    %19 = arith.truncf %18 : vector<16x128xf32> to vector<16x128xbf16>
    %c0_10 = arith.constant 0 : index
    %c0_11 = arith.constant 0 : index
    %c0_12 = arith.constant 0 : index
    %20 = vector.load %arg5[%c0_10, %c0_11, %c0_12] : memref<1x128x128xbf16, #tpu.memory_space<vmem>>, vector<1x128x128xbf16>
    %21 = vector.shape_cast %20 : vector<1x128x128xbf16> to vector<128x128xbf16>
    %22 = vector.extract_strided_slice %15 {offsets = [0, 0], sizes = [8, 128], strides = [1, 1]} : vector<16x128xbf16> to vector<8x128xbf16>
    %23 = vector.extract_strided_slice %17 {offsets = [0, 0], sizes = [8, 128], strides = [1, 1]} : vector<16x128xbf16> to vector<8x128xbf16>
    %24 = vector.extract_strided_slice %19 {offsets = [0, 0], sizes = [8, 128], strides = [1, 1]} : vector<16x128xbf16> to vector<8x128xbf16>
    %c0_13 = arith.constant 0 : index
    %c0_14 = arith.constant 0 : index
    %c0_15 = arith.constant 0 : index
    %25 = vector.load %arg2[%c0_13, %c0_14, %c0_15] : memref<2x1x8xf32, #tpu.memory_space<vmem>>, vector<1x1x8xf32>
    %26 = vector.shape_cast %25 : vector<1x1x8xf32> to vector<1x8xf32>
    %cst_16 = arith.constant 0.000000e+00 : f32
    %27 = vector.broadcast %cst_16 : f32 to vector<8x128xf32>
    %28 = vector.extract_strided_slice %22 {offsets = [0, 0], sizes = [8, 32], strides = [1, 1]} : vector<8x128xbf16> to vector<8x32xbf16>
    %29 = vector.extract_strided_slice %23 {offsets = [0, 0], sizes = [8, 32], strides = [1, 1]} : vector<8x128xbf16> to vector<8x32xbf16>
    %cst_17 = arith.constant dense<0.000000e+00> : vector<8x8xf32>
    %30 = tpu.matmul %28, %29, %cst_17 {dimension_numbers = #tpu.dot_dimension_numbers<[1], [1], [0], [0], [0, 0, 1, 0], [], []>} : vector<8x32xbf16>, vector<8x32xbf16>, vector<8x8xf32> -> vector<8x8xf32>
    %31 = vector.broadcast %26 : vector<1x8xf32> to vector<8x8xf32>
    %32 = arith.addf %30, %31 : vector<8x8xf32>
    %cst_18 = arith.constant dense<0xFF800000> : vector<8xf32>
    %33 = vector.multi_reduction <maximumf>, %32, %cst_18 [1] : vector<8x8xf32> to vector<8xf32>
    %34 = vector.shape_cast %33 : vector<8xf32> to vector<8x1xf32>
    %35 = vector.broadcast %34 : vector<8x1xf32> to vector<8x8xf32>
    %36 = arith.subf %32, %35 : vector<8x8xf32>
    %37 = math.exp %36 : vector<8x8xf32>
    %cst_19 = arith.constant dense<0.000000e+00> : vector<8xf32>
    %38 = vector.multi_reduction <add>, %37, %cst_19 [1] : vector<8x8xf32> to vector<8xf32>
    %39 = vector.shape_cast %38 : vector<8xf32> to vector<8x1xf32>
    %40 = tpu.reciprocal %39 {approx = true} : vector<8x1xf32> -> vector<8x1xf32>
    %41 = vector.broadcast %40 : vector<8x1xf32> to vector<8x8xf32>
    %42 = arith.mulf %37, %41 : vector<8x8xf32>
    %43 = arith.truncf %42 : vector<8x8xf32> to vector<8x8xbf16>
    %44 = vector.extract_strided_slice %24 {offsets = [0, 0], sizes = [8, 32], strides = [1, 1]} : vector<8x128xbf16> to vector<8x32xbf16>
    %cst_20 = arith.constant dense<0.000000e+00> : vector<8x32xf32>
    %45 = tpu.matmul %43, %44, %cst_20 {dimension_numbers = #tpu.dot_dimension_numbers<[1], [0], [0], [1], [0, 0, 1, 1], [], []>} : vector<8x8xbf16>, vector<8x32xbf16>, vector<8x32xf32> -> vector<8x32xf32>
    %46 = arith.truncf %45 : vector<8x32xf32> to vector<8x32xbf16>
    %47 = vector.extract_strided_slice %21 {offsets = [0, 0], sizes = [32, 128], strides = [1, 1]} : vector<128x128xbf16> to vector<32x128xbf16>
    %cst_21 = arith.constant dense<0.000000e+00> : vector<8x128xf32>
    %48 = tpu.matmul %46, %47, %cst_21 {dimension_numbers = #tpu.dot_dimension_numbers<[1], [0], [0], [1], [0, 0, 1, 1], [], []>} : vector<8x32xbf16>, vector<32x128xbf16>, vector<8x128xf32> -> vector<8x128xf32>
    %49 = arith.addf %27, %48 : vector<8x128xf32>
    %50 = vector.extract_strided_slice %22 {offsets = [0, 32], sizes = [8, 32], strides = [1, 1]} : vector<8x128xbf16> to vector<8x32xbf16>
    %51 = vector.extract_strided_slice %23 {offsets = [0, 32], sizes = [8, 32], strides = [1, 1]} : vector<8x128xbf16> to vector<8x32xbf16>
    %cst_22 = arith.constant dense<0.000000e+00> : vector<8x8xf32>
    %52 = tpu.matmul %50, %51, %cst_22 {dimension_numbers = #tpu.dot_dimension_numbers<[1], [1], [0], [0], [0, 0, 1, 0], [], []>} : vector<8x32xbf16>, vector<8x32xbf16>, vector<8x8xf32> -> vector<8x8xf32>
    %53 = vector.broadcast %26 : vector<1x8xf32> to vector<8x8xf32>
    %54 = arith.addf %52, %53 : vector<8x8xf32>
    %cst_23 = arith.constant dense<0xFF800000> : vector<8xf32>
    %55 = vector.multi_reduction <maximumf>, %54, %cst_23 [1] : vector<8x8xf32> to vector<8xf32>
    %56 = vector.shape_cast %55 : vector<8xf32> to vector<8x1xf32>
    %57 = vector.broadcast %56 : vector<8x1xf32> to vector<8x8xf32>
    %58 = arith.subf %54, %57 : vector<8x8xf32>
    %59 = math.exp %58 : vector<8x8xf32>
    %cst_24 = arith.constant dense<0.000000e+00> : vector<8xf32>
    %60 = vector.multi_reduction <add>, %59, %cst_24 [1] : vector<8x8xf32> to vector<8xf32>
    %61 = vector.shape_cast %60 : vector<8xf32> to vector<8x1xf32>
    %62 = tpu.reciprocal %61 {approx = true} : vector<8x1xf32> -> vector<8x1xf32>
    %63 = vector.broadcast %62 : vector<8x1xf32> to vector<8x8xf32>
    %64 = arith.mulf %59, %63 : vector<8x8xf32>
    %65 = arith.truncf %64 : vector<8x8xf32> to vector<8x8xbf16>
    %66 = vector.extract_strided_slice %24 {offsets = [0, 32], sizes = [8, 32], strides = [1, 1]} : vector<8x128xbf16> to vector<8x32xbf16>
    %cst_25 = arith.constant dense<0.000000e+00> : vector<8x32xf32>
    %67 = tpu.matmul %65, %66, %cst_25 {dimension_numbers = #tpu.dot_dimension_numbers<[1], [0], [0], [1], [0, 0, 1, 1], [], []>} : vector<8x8xbf16>, vector<8x32xbf16>, vector<8x32xf32> -> vector<8x32xf32>
    %68 = arith.truncf %67 : vector<8x32xf32> to vector<8x32xbf16>
    %69 = vector.extract_strided_slice %21 {offsets = [32, 0], sizes = [32, 128], strides = [1, 1]} : vector<128x128xbf16> to vector<32x128xbf16>
    %cst_26 = arith.constant dense<0.000000e+00> : vector<8x128xf32>
    %70 = tpu.matmul %68, %69, %cst_26 {dimension_numbers = #tpu.dot_dimension_numbers<[1], [0], [0], [1], [0, 0, 1, 1], [], []>} : vector<8x32xbf16>, vector<32x128xbf16>, vector<8x128xf32> -> vector<8x128xf32>
    %71 = arith.addf %49, %70 : vector<8x128xf32>
    %72 = vector.extract_strided_slice %22 {offsets = [0, 64], sizes = [8, 32], strides = [1, 1]} : vector<8x128xbf16> to vector<8x32xbf16>
    %73 = vector.extract_strided_slice %23 {offsets = [0, 64], sizes = [8, 32], strides = [1, 1]} : vector<8x128xbf16> to vector<8x32xbf16>
    %cst_27 = arith.constant dense<0.000000e+00> : vector<8x8xf32>
    %74 = tpu.matmul %72, %73, %cst_27 {dimension_numbers = #tpu.dot_dimension_numbers<[1], [1], [0], [0], [0, 0, 1, 0], [], []>} : vector<8x32xbf16>, vector<8x32xbf16>, vector<8x8xf32> -> vector<8x8xf32>
    %75 = vector.broadcast %26 : vector<1x8xf32> to vector<8x8xf32>
    %76 = arith.addf %74, %75 : vector<8x8xf32>
    %cst_28 = arith.constant dense<0xFF800000> : vector<8xf32>
    %77 = vector.multi_reduction <maximumf>, %76, %cst_28 [1] : vector<8x8xf32> to vector<8xf32>
    %78 = vector.shape_cast %77 : vector<8xf32> to vector<8x1xf32>
    %79 = vector.broadcast %78 : vector<8x1xf32> to vector<8x8xf32>
    %80 = arith.subf %76, %79 : vector<8x8xf32>
    %81 = math.exp %80 : vector<8x8xf32>
    %cst_29 = arith.constant dense<0.000000e+00> : vector<8xf32>
    %82 = vector.multi_reduction <add>, %81, %cst_29 [1] : vector<8x8xf32> to vector<8xf32>
    %83 = vector.shape_cast %82 : vector<8xf32> to vector<8x1xf32>
    %84 = tpu.reciprocal %83 {approx = true} : vector<8x1xf32> -> vector<8x1xf32>
    %85 = vector.broadcast %84 : vector<8x1xf32> to vector<8x8xf32>
    %86 = arith.mulf %81, %85 : vector<8x8xf32>
    %87 = arith.truncf %86 : vector<8x8xf32> to vector<8x8xbf16>
    %88 = vector.extract_strided_slice %24 {offsets = [0, 64], sizes = [8, 32], strides = [1, 1]} : vector<8x128xbf16> to vector<8x32xbf16>
    %cst_30 = arith.constant dense<0.000000e+00> : vector<8x32xf32>
    %89 = tpu.matmul %87, %88, %cst_30 {dimension_numbers = #tpu.dot_dimension_numbers<[1], [0], [0], [1], [0, 0, 1, 1], [], []>} : vector<8x8xbf16>, vector<8x32xbf16>, vector<8x32xf32> -> vector<8x32xf32>
    %90 = arith.truncf %89 : vector<8x32xf32> to vector<8x32xbf16>
    %91 = vector.extract_strided_slice %21 {offsets = [64, 0], sizes = [32, 128], strides = [1, 1]} : vector<128x128xbf16> to vector<32x128xbf16>
    %cst_31 = arith.constant dense<0.000000e+00> : vector<8x128xf32>
    %92 = tpu.matmul %90, %91, %cst_31 {dimension_numbers = #tpu.dot_dimension_numbers<[1], [0], [0], [1], [0, 0, 1, 1], [], []>} : vector<8x32xbf16>, vector<32x128xbf16>, vector<8x128xf32> -> vector<8x128xf32>
    %93 = arith.addf %71, %92 : vector<8x128xf32>
    %94 = vector.extract_strided_slice %22 {offsets = [0, 96], sizes = [8, 32], strides = [1, 1]} : vector<8x128xbf16> to vector<8x32xbf16>
    %95 = vector.extract_strided_slice %23 {offsets = [0, 96], sizes = [8, 32], strides = [1, 1]} : vector<8x128xbf16> to vector<8x32xbf16>
    %cst_32 = arith.constant dense<0.000000e+00> : vector<8x8xf32>
    %96 = tpu.matmul %94, %95, %cst_32 {dimension_numbers = #tpu.dot_dimension_numbers<[1], [1], [0], [0], [0, 0, 1, 0], [], []>} : vector<8x32xbf16>, vector<8x32xbf16>, vector<8x8xf32> -> vector<8x8xf32>
    %97 = vector.broadcast %26 : vector<1x8xf32> to vector<8x8xf32>
    %98 = arith.addf %96, %97 : vector<8x8xf32>
    %cst_33 = arith.constant dense<0xFF800000> : vector<8xf32>
    %99 = vector.multi_reduction <maximumf>, %98, %cst_33 [1] : vector<8x8xf32> to vector<8xf32>
    %100 = vector.shape_cast %99 : vector<8xf32> to vector<8x1xf32>
    %101 = vector.broadcast %100 : vector<8x1xf32> to vector<8x8xf32>
    %102 = arith.subf %98, %101 : vector<8x8xf32>
    %103 = math.exp %102 : vector<8x8xf32>
    %cst_34 = arith.constant dense<0.000000e+00> : vector<8xf32>
    %104 = vector.multi_reduction <add>, %103, %cst_34 [1] : vector<8x8xf32> to vector<8xf32>
    %105 = vector.shape_cast %104 : vector<8xf32> to vector<8x1xf32>
    %106 = tpu.reciprocal %105 {approx = true} : vector<8x1xf32> -> vector<8x1xf32>
    %107 = vector.broadcast %106 : vector<8x1xf32> to vector<8x8xf32>
    %108 = arith.mulf %103, %107 : vector<8x8xf32>
    %109 = arith.truncf %108 : vector<8x8xf32> to vector<8x8xbf16>
    %110 = vector.extract_strided_slice %24 {offsets = [0, 96], sizes = [8, 32], strides = [1, 1]} : vector<8x128xbf16> to vector<8x32xbf16>
    %cst_35 = arith.constant dense<0.000000e+00> : vector<8x32xf32>
    %111 = tpu.matmul %109, %110, %cst_35 {dimension_numbers = #tpu.dot_dimension_numbers<[1], [0], [0], [1], [0, 0, 1, 1], [], []>} : vector<8x8xbf16>, vector<8x32xbf16>, vector<8x32xf32> -> vector<8x32xf32>
    %112 = arith.truncf %111 : vector<8x32xf32> to vector<8x32xbf16>
    %113 = vector.extract_strided_slice %21 {offsets = [96, 0], sizes = [32, 128], strides = [1, 1]} : vector<128x128xbf16> to vector<32x128xbf16>
    %cst_36 = arith.constant dense<0.000000e+00> : vector<8x128xf32>
    %114 = tpu.matmul %112, %113, %cst_36 {dimension_numbers = #tpu.dot_dimension_numbers<[1], [0], [0], [1], [0, 0, 1, 1], [], []>} : vector<8x32xbf16>, vector<32x128xbf16>, vector<8x128xf32> -> vector<8x128xf32>
    %115 = arith.addf %93, %114 : vector<8x128xf32>
    %116 = vector.extract_strided_slice %15 {offsets = [8, 0], sizes = [8, 128], strides = [1, 1]} : vector<16x128xbf16> to vector<8x128xbf16>
    %117 = vector.extract_strided_slice %17 {offsets = [8, 0], sizes = [8, 128], strides = [1, 1]} : vector<16x128xbf16> to vector<8x128xbf16>
    %118 = vector.extract_strided_slice %19 {offsets = [8, 0], sizes = [8, 128], strides = [1, 1]} : vector<16x128xbf16> to vector<8x128xbf16>
    %c1 = arith.constant 1 : index
    %c0_37 = arith.constant 0 : index
    %c0_38 = arith.constant 0 : index
    %119 = vector.load %arg2[%c1, %c0_37, %c0_38] : memref<2x1x8xf32, #tpu.memory_space<vmem>>, vector<1x1x8xf32>
    %120 = vector.shape_cast %119 : vector<1x1x8xf32> to vector<1x8xf32>
    %cst_39 = arith.constant 0.000000e+00 : f32
    %121 = vector.broadcast %cst_39 : f32 to vector<8x128xf32>
    %122 = vector.extract_strided_slice %116 {offsets = [0, 0], sizes = [8, 32], strides = [1, 1]} : vector<8x128xbf16> to vector<8x32xbf16>
    %123 = vector.extract_strided_slice %117 {offsets = [0, 0], sizes = [8, 32], strides = [1, 1]} : vector<8x128xbf16> to vector<8x32xbf16>
    %cst_40 = arith.constant dense<0.000000e+00> : vector<8x8xf32>
    %124 = tpu.matmul %122, %123, %cst_40 {dimension_numbers = #tpu.dot_dimension_numbers<[1], [1], [0], [0], [0, 0, 1, 0], [], []>} : vector<8x32xbf16>, vector<8x32xbf16>, vector<8x8xf32> -> vector<8x8xf32>
    %125 = vector.broadcast %120 : vector<1x8xf32> to vector<8x8xf32>
    %126 = arith.addf %124, %125 : vector<8x8xf32>
    %cst_41 = arith.constant dense<0xFF800000> : vector<8xf32>
    %127 = vector.multi_reduction <maximumf>, %126, %cst_41 [1] : vector<8x8xf32> to vector<8xf32>
    %128 = vector.shape_cast %127 : vector<8xf32> to vector<8x1xf32>
    %129 = vector.broadcast %128 : vector<8x1xf32> to vector<8x8xf32>
    %130 = arith.subf %126, %129 : vector<8x8xf32>
    %131 = math.exp %130 : vector<8x8xf32>
    %cst_42 = arith.constant dense<0.000000e+00> : vector<8xf32>
    %132 = vector.multi_reduction <add>, %131, %cst_42 [1] : vector<8x8xf32> to vector<8xf32>
    %133 = vector.shape_cast %132 : vector<8xf32> to vector<8x1xf32>
    %134 = tpu.reciprocal %133 {approx = true} : vector<8x1xf32> -> vector<8x1xf32>
    %135 = vector.broadcast %134 : vector<8x1xf32> to vector<8x8xf32>
    %136 = arith.mulf %131, %135 : vector<8x8xf32>
    %137 = arith.truncf %136 : vector<8x8xf32> to vector<8x8xbf16>
    %138 = vector.extract_strided_slice %118 {offsets = [0, 0], sizes = [8, 32], strides = [1, 1]} : vector<8x128xbf16> to vector<8x32xbf16>
    %cst_43 = arith.constant dense<0.000000e+00> : vector<8x32xf32>
    %139 = tpu.matmul %137, %138, %cst_43 {dimension_numbers = #tpu.dot_dimension_numbers<[1], [0], [0], [1], [0, 0, 1, 1], [], []>} : vector<8x8xbf16>, vector<8x32xbf16>, vector<8x32xf32> -> vector<8x32xf32>
    %140 = arith.truncf %139 : vector<8x32xf32> to vector<8x32xbf16>
    %141 = vector.extract_strided_slice %21 {offsets = [0, 0], sizes = [32, 128], strides = [1, 1]} : vector<128x128xbf16> to vector<32x128xbf16>
    %cst_44 = arith.constant dense<0.000000e+00> : vector<8x128xf32>
    %142 = tpu.matmul %140, %141, %cst_44 {dimension_numbers = #tpu.dot_dimension_numbers<[1], [0], [0], [1], [0, 0, 1, 1], [], []>} : vector<8x32xbf16>, vector<32x128xbf16>, vector<8x128xf32> -> vector<8x128xf32>
    %143 = arith.addf %121, %142 : vector<8x128xf32>
    %144 = vector.extract_strided_slice %116 {offsets = [0, 32], sizes = [8, 32], strides = [1, 1]} : vector<8x128xbf16> to vector<8x32xbf16>
    %145 = vector.extract_strided_slice %117 {offsets = [0, 32], sizes = [8, 32], strides = [1, 1]} : vector<8x128xbf16> to vector<8x32xbf16>
    %cst_45 = arith.constant dense<0.000000e+00> : vector<8x8xf32>
    %146 = tpu.matmul %144, %145, %cst_45 {dimension_numbers = #tpu.dot_dimension_numbers<[1], [1], [0], [0], [0, 0, 1, 0], [], []>} : vector<8x32xbf16>, vector<8x32xbf16>, vector<8x8xf32> -> vector<8x8xf32>
    %147 = vector.broadcast %120 : vector<1x8xf32> to vector<8x8xf32>
    %148 = arith.addf %146, %147 : vector<8x8xf32>
    %cst_46 = arith.constant dense<0xFF800000> : vector<8xf32>
    %149 = vector.multi_reduction <maximumf>, %148, %cst_46 [1] : vector<8x8xf32> to vector<8xf32>
    %150 = vector.shape_cast %149 : vector<8xf32> to vector<8x1xf32>
    %151 = vector.broadcast %150 : vector<8x1xf32> to vector<8x8xf32>
    %152 = arith.subf %148, %151 : vector<8x8xf32>
    %153 = math.exp %152 : vector<8x8xf32>
    %cst_47 = arith.constant dense<0.000000e+00> : vector<8xf32>
    %154 = vector.multi_reduction <add>, %153, %cst_47 [1] : vector<8x8xf32> to vector<8xf32>
    %155 = vector.shape_cast %154 : vector<8xf32> to vector<8x1xf32>
    %156 = tpu.reciprocal %155 {approx = true} : vector<8x1xf32> -> vector<8x1xf32>
    %157 = vector.broadcast %156 : vector<8x1xf32> to vector<8x8xf32>
    %158 = arith.mulf %153, %157 : vector<8x8xf32>
    %159 = arith.truncf %158 : vector<8x8xf32> to vector<8x8xbf16>
    %160 = vector.extract_strided_slice %118 {offsets = [0, 32], sizes = [8, 32], strides = [1, 1]} : vector<8x128xbf16> to vector<8x32xbf16>
    %cst_48 = arith.constant dense<0.000000e+00> : vector<8x32xf32>
    %161 = tpu.matmul %159, %160, %cst_48 {dimension_numbers = #tpu.dot_dimension_numbers<[1], [0], [0], [1], [0, 0, 1, 1], [], []>} : vector<8x8xbf16>, vector<8x32xbf16>, vector<8x32xf32> -> vector<8x32xf32>
    %162 = arith.truncf %161 : vector<8x32xf32> to vector<8x32xbf16>
    %163 = vector.extract_strided_slice %21 {offsets = [32, 0], sizes = [32, 128], strides = [1, 1]} : vector<128x128xbf16> to vector<32x128xbf16>
    %cst_49 = arith.constant dense<0.000000e+00> : vector<8x128xf32>
    %164 = tpu.matmul %162, %163, %cst_49 {dimension_numbers = #tpu.dot_dimension_numbers<[1], [0], [0], [1], [0, 0, 1, 1], [], []>} : vector<8x32xbf16>, vector<32x128xbf16>, vector<8x128xf32> -> vector<8x128xf32>
    %165 = arith.addf %143, %164 : vector<8x128xf32>
    %166 = vector.extract_strided_slice %116 {offsets = [0, 64], sizes = [8, 32], strides = [1, 1]} : vector<8x128xbf16> to vector<8x32xbf16>
    %167 = vector.extract_strided_slice %117 {offsets = [0, 64], sizes = [8, 32], strides = [1, 1]} : vector<8x128xbf16> to vector<8x32xbf16>
    %cst_50 = arith.constant dense<0.000000e+00> : vector<8x8xf32>
    %168 = tpu.matmul %166, %167, %cst_50 {dimension_numbers = #tpu.dot_dimension_numbers<[1], [1], [0], [0], [0, 0, 1, 0], [], []>} : vector<8x32xbf16>, vector<8x32xbf16>, vector<8x8xf32> -> vector<8x8xf32>
    %169 = vector.broadcast %120 : vector<1x8xf32> to vector<8x8xf32>
    %170 = arith.addf %168, %169 : vector<8x8xf32>
    %cst_51 = arith.constant dense<0xFF800000> : vector<8xf32>
    %171 = vector.multi_reduction <maximumf>, %170, %cst_51 [1] : vector<8x8xf32> to vector<8xf32>
    %172 = vector.shape_cast %171 : vector<8xf32> to vector<8x1xf32>
    %173 = vector.broadcast %172 : vector<8x1xf32> to vector<8x8xf32>
    %174 = arith.subf %170, %173 : vector<8x8xf32>
    %175 = math.exp %174 : vector<8x8xf32>
    %cst_52 = arith.constant dense<0.000000e+00> : vector<8xf32>
    %176 = vector.multi_reduction <add>, %175, %cst_52 [1] : vector<8x8xf32> to vector<8xf32>
    %177 = vector.shape_cast %176 : vector<8xf32> to vector<8x1xf32>
    %178 = tpu.reciprocal %177 {approx = true} : vector<8x1xf32> -> vector<8x1xf32>
    %179 = vector.broadcast %178 : vector<8x1xf32> to vector<8x8xf32>
    %180 = arith.mulf %175, %179 : vector<8x8xf32>
    %181 = arith.truncf %180 : vector<8x8xf32> to vector<8x8xbf16>
    %182 = vector.extract_strided_slice %118 {offsets = [0, 64], sizes = [8, 32], strides = [1, 1]} : vector<8x128xbf16> to vector<8x32xbf16>
    %cst_53 = arith.constant dense<0.000000e+00> : vector<8x32xf32>
    %183 = tpu.matmul %181, %182, %cst_53 {dimension_numbers = #tpu.dot_dimension_numbers<[1], [0], [0], [1], [0, 0, 1, 1], [], []>} : vector<8x8xbf16>, vector<8x32xbf16>, vector<8x32xf32> -> vector<8x32xf32>
    %184 = arith.truncf %183 : vector<8x32xf32> to vector<8x32xbf16>
    %185 = vector.extract_strided_slice %21 {offsets = [64, 0], sizes = [32, 128], strides = [1, 1]} : vector<128x128xbf16> to vector<32x128xbf16>
    %cst_54 = arith.constant dense<0.000000e+00> : vector<8x128xf32>
    %186 = tpu.matmul %184, %185, %cst_54 {dimension_numbers = #tpu.dot_dimension_numbers<[1], [0], [0], [1], [0, 0, 1, 1], [], []>} : vector<8x32xbf16>, vector<32x128xbf16>, vector<8x128xf32> -> vector<8x128xf32>
    %187 = arith.addf %165, %186 : vector<8x128xf32>
    %188 = vector.extract_strided_slice %116 {offsets = [0, 96], sizes = [8, 32], strides = [1, 1]} : vector<8x128xbf16> to vector<8x32xbf16>
    %189 = vector.extract_strided_slice %117 {offsets = [0, 96], sizes = [8, 32], strides = [1, 1]} : vector<8x128xbf16> to vector<8x32xbf16>
    %cst_55 = arith.constant dense<0.000000e+00> : vector<8x8xf32>
    %190 = tpu.matmul %188, %189, %cst_55 {dimension_numbers = #tpu.dot_dimension_numbers<[1], [1], [0], [0], [0, 0, 1, 0], [], []>} : vector<8x32xbf16>, vector<8x32xbf16>, vector<8x8xf32> -> vector<8x8xf32>
    %191 = vector.broadcast %120 : vector<1x8xf32> to vector<8x8xf32>
    %192 = arith.addf %190, %191 : vector<8x8xf32>
    %cst_56 = arith.constant dense<0xFF800000> : vector<8xf32>
    %193 = vector.multi_reduction <maximumf>, %192, %cst_56 [1] : vector<8x8xf32> to vector<8xf32>
    %194 = vector.shape_cast %193 : vector<8xf32> to vector<8x1xf32>
    %195 = vector.broadcast %194 : vector<8x1xf32> to vector<8x8xf32>
    %196 = arith.subf %192, %195 : vector<8x8xf32>
    %197 = math.exp %196 : vector<8x8xf32>
    %cst_57 = arith.constant dense<0.000000e+00> : vector<8xf32>
    %198 = vector.multi_reduction <add>, %197, %cst_57 [1] : vector<8x8xf32> to vector<8xf32>
    %199 = vector.shape_cast %198 : vector<8xf32> to vector<8x1xf32>
    %200 = tpu.reciprocal %199 {approx = true} : vector<8x1xf32> -> vector<8x1xf32>
    %201 = vector.broadcast %200 : vector<8x1xf32> to vector<8x8xf32>
    %202 = arith.mulf %197, %201 : vector<8x8xf32>
    %203 = arith.truncf %202 : vector<8x8xf32> to vector<8x8xbf16>
    %204 = vector.extract_strided_slice %118 {offsets = [0, 96], sizes = [8, 32], strides = [1, 1]} : vector<8x128xbf16> to vector<8x32xbf16>
    %cst_58 = arith.constant dense<0.000000e+00> : vector<8x32xf32>
    %205 = tpu.matmul %203, %204, %cst_58 {dimension_numbers = #tpu.dot_dimension_numbers<[1], [0], [0], [1], [0, 0, 1, 1], [], []>} : vector<8x8xbf16>, vector<8x32xbf16>, vector<8x32xf32> -> vector<8x32xf32>
    %206 = arith.truncf %205 : vector<8x32xf32> to vector<8x32xbf16>
    %207 = vector.extract_strided_slice %21 {offsets = [96, 0], sizes = [32, 128], strides = [1, 1]} : vector<128x128xbf16> to vector<32x128xbf16>
    %cst_59 = arith.constant dense<0.000000e+00> : vector<8x128xf32>
    %208 = tpu.matmul %206, %207, %cst_59 {dimension_numbers = #tpu.dot_dimension_numbers<[1], [0], [0], [1], [0, 0, 1, 1], [], []>} : vector<8x32xbf16>, vector<32x128xbf16>, vector<8x128xf32> -> vector<8x128xf32>
    %209 = arith.addf %187, %208 : vector<8x128xf32>
    %210 = tpu.concatenate %115, %209 in 0 : vector<8x128xf32>, vector<8x128xf32> -> vector<16x128xf32>
    %c0_60 = arith.constant 0 : index
    %c0_61 = arith.constant 0 : index
    %c0_62 = arith.constant 0 : index
    %211 = vector.load %arg6[%c0_60, %c0_61, %c0_62] : memref<1x1x128xf32, #tpu.memory_space<vmem>>, vector<1x1x128xf32>
    %212 = vector.shape_cast %211 : vector<1x1x128xf32> to vector<1x128xf32>
    %213 = vector.broadcast %212 : vector<1x128xf32> to vector<16x128xf32>
    %214 = arith.addf %210, %213 : vector<16x128xf32>
    %215 = arith.extf %4 : vector<16x128xbf16> to vector<16x128xf32>
    %216 = arith.addf %215, %214 : vector<16x128xf32>
    %c0_63 = arith.constant 0 : index
    %c0_64 = arith.constant 0 : index
    %c0_65 = arith.constant 0 : index
    %217 = vector.load %arg7[%c0_63, %c0_64, %c0_65] : memref<1x1x128xf32, #tpu.memory_space<vmem>>, vector<1x1x128xf32>
    %218 = vector.shape_cast %217 : vector<1x1x128xf32> to vector<1x128xf32>
    %c0_66 = arith.constant 0 : index
    %c0_67 = arith.constant 0 : index
    %c0_68 = arith.constant 0 : index
    %219 = vector.load %arg8[%c0_66, %c0_67, %c0_68] : memref<1x1x128xf32, #tpu.memory_space<vmem>>, vector<1x1x128xf32>
    %220 = vector.shape_cast %219 : vector<1x1x128xf32> to vector<1x128xf32>
    %cst_69 = arith.constant dense<0.000000e+00> : vector<16xf32>
    %221 = vector.multi_reduction <add>, %216, %cst_69 [1] : vector<16x128xf32> to vector<16xf32>
    %222 = vector.shape_cast %221 : vector<16xf32> to vector<16x1xf32>
    %cst_70 = arith.constant 1.280000e+02 : f32
    %223 = vector.broadcast %cst_70 : f32 to vector<16x1xf32>
    %224 = arith.divf %222, %223 : vector<16x1xf32>
    %225 = vector.broadcast %224 : vector<16x1xf32> to vector<16x128xf32>
    %226 = arith.subf %216, %225 : vector<16x128xf32>
    %227 = arith.mulf %226, %226 : vector<16x128xf32>
    %cst_71 = arith.constant dense<0.000000e+00> : vector<16xf32>
    %228 = vector.multi_reduction <add>, %227, %cst_71 [1] : vector<16x128xf32> to vector<16xf32>
    %229 = vector.shape_cast %228 : vector<16xf32> to vector<16x1xf32>
    %cst_72 = arith.constant 1.280000e+02 : f32
    %230 = vector.broadcast %cst_72 : f32 to vector<16x1xf32>
    %231 = arith.divf %229, %230 : vector<16x1xf32>
    %cst_73 = arith.constant 9.99999974E-6 : f32
    %232 = vector.broadcast %cst_73 : f32 to vector<16x1xf32>
    %233 = arith.addf %231, %232 : vector<16x1xf32>
    %234 = math.rsqrt %233 : vector<16x1xf32>
    %235 = vector.broadcast %234 : vector<16x1xf32> to vector<16x128xf32>
    %236 = arith.mulf %226, %235 : vector<16x128xf32>
    %237 = vector.broadcast %218 : vector<1x128xf32> to vector<16x128xf32>
    %238 = arith.mulf %236, %237 : vector<16x128xf32>
    %239 = vector.broadcast %220 : vector<1x128xf32> to vector<16x128xf32>
    %240 = arith.addf %238, %239 : vector<16x128xf32>
    %241 = arith.truncf %240 : vector<16x128xf32> to vector<16x128xbf16>
    %c0_74 = arith.constant 0 : index
    %c0_75 = arith.constant 0 : index
    %c0_76 = arith.constant 0 : index
    %242 = vector.load %arg9[%c0_74, %c0_75, %c0_76] : memref<1x128x128xbf16, #tpu.memory_space<vmem>>, vector<1x128x128xbf16>
    %243 = vector.shape_cast %242 : vector<1x128x128xbf16> to vector<128x128xbf16>
    %cst_77 = arith.constant dense<0.000000e+00> : vector<16x128xf32>
    %244 = tpu.matmul %241, %243, %cst_77 {dimension_numbers = #tpu.dot_dimension_numbers<[1], [0], [0], [1], [0, 0, 1, 1], [], []>} : vector<16x128xbf16>, vector<128x128xbf16>, vector<16x128xf32> -> vector<16x128xf32>
    %c0_78 = arith.constant 0 : index
    %c0_79 = arith.constant 0 : index
    %c0_80 = arith.constant 0 : index
    %245 = vector.load %arg10[%c0_78, %c0_79, %c0_80] : memref<1x1x128xf32, #tpu.memory_space<vmem>>, vector<1x1x128xf32>
    %246 = vector.shape_cast %245 : vector<1x1x128xf32> to vector<1x128xf32>
    %247 = vector.broadcast %246 : vector<1x128xf32> to vector<16x128xf32>
    %248 = arith.addf %244, %247 : vector<16x128xf32>
    %cst_81 = arith.constant 0.000000e+00 : f32
    %249 = vector.broadcast %cst_81 : f32 to vector<16x128xf32>
    %250 = arith.maximumf %248, %249 : vector<16x128xf32>
    %251 = arith.truncf %250 : vector<16x128xf32> to vector<16x128xbf16>
    %c0_82 = arith.constant 0 : index
    %c0_83 = arith.constant 0 : index
    %c0_84 = arith.constant 0 : index
    %252 = vector.load %arg11[%c0_82, %c0_83, %c0_84] : memref<1x128x128xbf16, #tpu.memory_space<vmem>>, vector<1x128x128xbf16>
    %253 = vector.shape_cast %252 : vector<1x128x128xbf16> to vector<128x128xbf16>
    %cst_85 = arith.constant dense<0.000000e+00> : vector<16x128xf32>
    %254 = tpu.matmul %251, %253, %cst_85 {dimension_numbers = #tpu.dot_dimension_numbers<[1], [0], [0], [1], [0, 0, 1, 1], [], []>} : vector<16x128xbf16>, vector<128x128xbf16>, vector<16x128xf32> -> vector<16x128xf32>
    %c0_86 = arith.constant 0 : index
    %c0_87 = arith.constant 0 : index
    %c0_88 = arith.constant 0 : index
    %255 = vector.load %arg12[%c0_86, %c0_87, %c0_88] : memref<1x1x128xf32, #tpu.memory_space<vmem>>, vector<1x1x128xf32>
    %256 = vector.shape_cast %255 : vector<1x1x128xf32> to vector<1x128xf32>
    %257 = vector.broadcast %256 : vector<1x128xf32> to vector<16x128xf32>
    %258 = arith.addf %254, %257 : vector<16x128xf32>
    %259 = arith.addf %240, %258 : vector<16x128xf32>
    %c0_89 = arith.constant 0 : index
    %c0_90 = arith.constant 0 : index
    %c0_91 = arith.constant 0 : index
    %260 = vector.load %arg13[%c0_89, %c0_90, %c0_91] : memref<1x1x128xf32, #tpu.memory_space<vmem>>, vector<1x1x128xf32>
    %261 = vector.shape_cast %260 : vector<1x1x128xf32> to vector<1x128xf32>
    %c0_92 = arith.constant 0 : index
    %c0_93 = arith.constant 0 : index
    %c0_94 = arith.constant 0 : index
    %262 = vector.load %arg14[%c0_92, %c0_93, %c0_94] : memref<1x1x128xf32, #tpu.memory_space<vmem>>, vector<1x1x128xf32>
    %263 = vector.shape_cast %262 : vector<1x1x128xf32> to vector<1x128xf32>
    %cst_95 = arith.constant dense<0.000000e+00> : vector<16xf32>
    %264 = vector.multi_reduction <add>, %259, %cst_95 [1] : vector<16x128xf32> to vector<16xf32>
    %265 = vector.shape_cast %264 : vector<16xf32> to vector<16x1xf32>
    %cst_96 = arith.constant 1.280000e+02 : f32
    %266 = vector.broadcast %cst_96 : f32 to vector<16x1xf32>
    %267 = arith.divf %265, %266 : vector<16x1xf32>
    %268 = vector.broadcast %267 : vector<16x1xf32> to vector<16x128xf32>
    %269 = arith.subf %259, %268 : vector<16x128xf32>
    %270 = arith.mulf %269, %269 : vector<16x128xf32>
    %cst_97 = arith.constant dense<0.000000e+00> : vector<16xf32>
    %271 = vector.multi_reduction <add>, %270, %cst_97 [1] : vector<16x128xf32> to vector<16xf32>
    %272 = vector.shape_cast %271 : vector<16xf32> to vector<16x1xf32>
    %cst_98 = arith.constant 1.280000e+02 : f32
    %273 = vector.broadcast %cst_98 : f32 to vector<16x1xf32>
    %274 = arith.divf %272, %273 : vector<16x1xf32>
    %cst_99 = arith.constant 9.99999974E-6 : f32
    %275 = vector.broadcast %cst_99 : f32 to vector<16x1xf32>
    %276 = arith.addf %274, %275 : vector<16x1xf32>
    %277 = math.rsqrt %276 : vector<16x1xf32>
    %278 = vector.broadcast %277 : vector<16x1xf32> to vector<16x128xf32>
    %279 = arith.mulf %269, %278 : vector<16x128xf32>
    %280 = vector.broadcast %261 : vector<1x128xf32> to vector<16x128xf32>
    %281 = arith.mulf %279, %280 : vector<16x128xf32>
    %282 = vector.broadcast %263 : vector<1x128xf32> to vector<16x128xf32>
    %283 = arith.addf %281, %282 : vector<16x128xf32>
    %284 = arith.truncf %283 : vector<16x128xf32> to vector<16x128xbf16>
    %285 = vector.shape_cast %284 : vector<16x128xbf16> to vector<2x8x128xbf16>
    %c0_100 = arith.constant 0 : index
    %c0_101 = arith.constant 0 : index
    %c0_102 = arith.constant 0 : index
    %286 = vector.load %arg23[%c0_100, %c0_101, %c0_102] : memref<2x8x128xbf16, #tpu.memory_space<vmem>>, vector<2x8x128xbf16>
    tpu.vector_store %arg23[%c0_100, %c0_101, %c0_102], %285 {strides = array<i32>} : memref<2x8x128xbf16, #tpu.memory_space<vmem>>, vector<2x8x128xbf16>,
    %c1_i32 = arith.constant 1 : i32
    %287 = arith.cmpi eq, %arg0, %c1_i32 : i32
    %288 = arith.extui %287 : i1 to i32
    %c0_i32_103 = arith.constant 0 : i32
    %289 = arith.cmpi ne, %288, %c0_i32_103 : i32
    scf.if %289 {
      %290 = arith.truncf %283 : vector<16x128xf32> to vector<16x128xbf16>
      %c0_104 = arith.constant 0 : index
      %c0_105 = arith.constant 0 : index
      %291 = vector.load %arg15[%c0_104, %c0_105] : memref<128x128xbf16, #tpu.memory_space<vmem>>, vector<128x128xbf16>
      %cst_106 = arith.constant dense<0.000000e+00> : vector<16x128xf32>
      %292 = tpu.matmul %290, %291, %cst_106 {dimension_numbers = #tpu.dot_dimension_numbers<[1], [0], [0], [1], [0, 0, 1, 1], [], []>} : vector<16x128xbf16>, vector<128x128xbf16>, vector<16x128xf32> -> vector<16x128xf32>
      %c0_107 = arith.constant 0 : index
      %c0_108 = arith.constant 0 : index
      %293 = vector.load %arg16[%c0_107, %c0_108] : memref<1x128xf32, #tpu.memory_space<vmem>>, vector<1x128xf32>
      %294 = vector.broadcast %293 : vector<1x128xf32> to vector<16x128xf32>
      %295 = arith.addf %292, %294 : vector<16x128xf32>
      %cst_109 = arith.constant 0.000000e+00 : f32
      %296 = vector.broadcast %cst_109 : f32 to vector<16x128xf32>
      %297 = arith.cmpf ogt, %295, %296 : vector<16x128xf32>
      %cst_110 = arith.constant 0.353553385 : f32
      %cst_111 = arith.constant -0.353553385 : f32
      %298 = vector.broadcast %cst_110 : f32 to vector<16x128xf32>
      %299 = vector.broadcast %cst_111 : f32 to vector<16x128xf32>
      %300 = arith.select %297, %298, %299 : vector<16x128xi1>, vector<16x128xf32>
      %301 = arith.truncf %300 : vector<16x128xf32> to vector<16x128xbf16>
      %c0_112 = arith.constant 0 : index
      %c0_113 = arith.constant 0 : index
      %302 = vector.load %arg17[%c0_112, %c0_113] : memref<128x128xbf16, #tpu.memory_space<vmem>>, vector<128x128xbf16>
      %cst_114 = arith.constant dense<0.000000e+00> : vector<16x128xf32>
      %303 = tpu.matmul %301, %302, %cst_114 {dimension_numbers = #tpu.dot_dimension_numbers<[1], [0], [0], [1], [0, 0, 1, 1], [], []>} : vector<16x128xbf16>, vector<128x128xbf16>, vector<16x128xf32> -> vector<16x128xf32>
      %c0_115 = arith.constant 0 : index
      %c0_116 = arith.constant 0 : index
      %304 = vector.load %arg18[%c0_115, %c0_116] : memref<1x128xf32, #tpu.memory_space<vmem>>, vector<1x128xf32>
      %305 = vector.broadcast %304 : vector<1x128xf32> to vector<16x128xf32>
      %306 = arith.addf %303, %305 : vector<16x128xf32>
      %307 = arith.truncf %306 : vector<16x128xf32> to vector<16x128xbf16>
      %c0_117 = arith.constant 0 : index
      %c0_118 = arith.constant 0 : index
      %308 = vector.load %arg19[%c0_117, %c0_118] : memref<128x128xbf16, #tpu.memory_space<vmem>>, vector<128x128xbf16>
      %cst_119 = arith.constant dense<0.000000e+00> : vector<16x128xf32>
      %309 = tpu.matmul %307, %308, %cst_119 {dimension_numbers = #tpu.dot_dimension_numbers<[1], [0], [0], [1], [0, 0, 1, 1], [], []>} : vector<16x128xbf16>, vector<128x128xbf16>, vector<16x128xf32> -> vector<16x128xf32>
      %c0_120 = arith.constant 0 : index
      %c0_121 = arith.constant 0 : index
      %310 = vector.load %arg20[%c0_120, %c0_121] : memref<1x128xf32, #tpu.memory_space<vmem>>, vector<1x128xf32>
      %311 = vector.broadcast %310 : vector<1x128xf32> to vector<16x128xf32>
      %312 = arith.addf %309, %311 : vector<16x128xf32>
      %313 = vector.shape_cast %312 : vector<16x128xf32> to vector<2x8x128xf32>
      %c0_122 = arith.constant 0 : index
      %c0_123 = arith.constant 0 : index
      %c0_124 = arith.constant 0 : index
      %314 = vector.load %arg21[%c0_122, %c0_123, %c0_124] : memref<1x8x128xbf16, #tpu.memory_space<vmem>>, vector<1x8x128xbf16>
      %315 = arith.extf %314 : vector<1x8x128xbf16> to vector<1x8x128xf32>
      %316 = vector.broadcast %315 : vector<1x8x128xf32> to vector<2x8x128xf32>
      %317 = arith.addf %313, %316 : vector<2x8x128xf32>
      %318 = arith.truncf %317 : vector<2x8x128xf32> to vector<2x8x128xbf16>
      %c0_125 = arith.constant 0 : index
      %c0_126 = arith.constant 0 : index
      %c0_127 = arith.constant 0 : index
      %319 = vector.load %arg22[%c0_125, %c0_126, %c0_127] : memref<2x8x128xbf16, #tpu.memory_space<vmem>>, vector<2x8x128xbf16>
      tpu.vector_store %arg22[%c0_125, %c0_126, %c0_127], %318 {strides = array<i32>} : memref<2x8x128xbf16, #tpu.memory_space<vmem>>, vector<2x8x128xbf16>,
    } else {
    }
    return
  }
  func.func @transform_0(%arg0: i32) -> (i32, i32, i32) {
    %c0_i32 = arith.constant 0 : i32
    %c0_i32_0 = arith.constant 0 : i32
    %c0_i32_1 = arith.constant 0 : i32
    %c0_i32_2 = arith.constant 0 : i32
    return %c0_i32, %c0_i32_0, %c0_i32_1 : i32, i32, i32
  }
  func.func @transform_1(%arg0: i32) -> (i32, i32, i32) {
    %c0_i32 = arith.constant 0 : i32
    %c0_i32_0 = arith.constant 0 : i32
    %c0_i32_1 = arith.constant 0 : i32
    %c0_i32_2 = arith.constant 0 : i32
    return %c0_i32, %c0_i32_0, %c0_i32_1 : i32, i32, i32
  }
  func.func @transform_2(%arg0: i32) -> (i32, i32, i32) {
    %c0_i32 = arith.constant 0 : i32
    %c0_i32_0 = arith.constant 0 : i32
    %c0_i32_1 = arith.constant 0 : i32
    return %arg0, %c0_i32, %c0_i32_0 : i32, i32, i32
  }
  func.func @transform_3(%arg0: i32) -> (i32, i32, i32) {
    %c0_i32 = arith.constant 0 : i32
    %c0_i32_0 = arith.constant 0 : i32
    %c0_i32_1 = arith.constant 0 : i32
    return %arg0, %c0_i32, %c0_i32_0 : i32, i32, i32
  }
  func.func @transform_4(%arg0: i32) -> (i32, i32, i32) {
    %c0_i32 = arith.constant 0 : i32
    %c0_i32_0 = arith.constant 0 : i32
    %c0_i32_1 = arith.constant 0 : i32
    return %arg0, %c0_i32, %c0_i32_0 : i32, i32, i32
  }
  func.func @transform_5(%arg0: i32) -> (i32, i32, i32) {
    %c0_i32 = arith.constant 0 : i32
    %c0_i32_0 = arith.constant 0 : i32
    %c0_i32_1 = arith.constant 0 : i32
    return %arg0, %c0_i32, %c0_i32_0 : i32, i32, i32
  }
  func.func @transform_6(%arg0: i32) -> (i32, i32, i32) {
    %c0_i32 = arith.constant 0 : i32
    %c0_i32_0 = arith.constant 0 : i32
    %c0_i32_1 = arith.constant 0 : i32
    return %arg0, %c0_i32, %c0_i32_0 : i32, i32, i32
  }
  func.func @transform_7(%arg0: i32) -> (i32, i32, i32) {
    %c0_i32 = arith.constant 0 : i32
    %c0_i32_0 = arith.constant 0 : i32
    %c0_i32_1 = arith.constant 0 : i32
    return %arg0, %c0_i32, %c0_i32_0 : i32, i32, i32
  }
  func.func @transform_8(%arg0: i32) -> (i32, i32, i32) {
    %c0_i32 = arith.constant 0 : i32
    %c0_i32_0 = arith.constant 0 : i32
    %c0_i32_1 = arith.constant 0 : i32
    return %arg0, %c0_i32, %c0_i32_0 : i32, i32, i32
  }
  func.func @transform_9(%arg0: i32) -> (i32, i32, i32) {
    %c0_i32 = arith.constant 0 : i32
    %c0_i32_0 = arith.constant 0 : i32
    %c0_i32_1 = arith.constant 0 : i32
    return %arg0, %c0_i32, %c0_i32_0 : i32, i32, i32
  }
  func.func @transform_10(%arg0: i32) -> (i32, i32, i32) {
    %c0_i32 = arith.constant 0 : i32
    %c0_i32_0 = arith.constant 0 : i32
    %c0_i32_1 = arith.constant 0 : i32
    return %arg0, %c0_i32, %c0_i32_0 : i32, i32, i32
  }
  func.func @transform_11(%arg0: i32) -> (i32, i32, i32) {
    %c0_i32 = arith.constant 0 : i32
    %c0_i32_0 = arith.constant 0 : i32
    %c0_i32_1 = arith.constant 0 : i32
    return %arg0, %c0_i32, %c0_i32_0 : i32, i32, i32
  }
  func.func @transform_12(%arg0: i32) -> (i32, i32, i32) {
    %c0_i32 = arith.constant 0 : i32
    %c0_i32_0 = arith.constant 0 : i32
    %c0_i32_1 = arith.constant 0 : i32
    return %arg0, %c0_i32, %c0_i32_0 : i32, i32, i32
  }
  func.func @transform_13(%arg0: i32) -> (i32, i32, i32) {
    %c0_i32 = arith.constant 0 : i32
    %c0_i32_0 = arith.constant 0 : i32
    %c0_i32_1 = arith.constant 0 : i32
    return %arg0, %c0_i32, %c0_i32_0 : i32, i32, i32
  }
  func.func @transform_14(%arg0: i32) -> (i32, i32) {
    %c0_i32 = arith.constant 0 : i32
    %c0_i32_0 = arith.constant 0 : i32
    %c0_i32_1 = arith.constant 0 : i32
    return %c0_i32, %c0_i32_0 : i32, i32
  }
  func.func @transform_15(%arg0: i32) -> (i32, i32) {
    %c0_i32 = arith.constant 0 : i32
    %c0_i32_0 = arith.constant 0 : i32
    %c0_i32_1 = arith.constant 0 : i32
    return %c0_i32, %c0_i32_0 : i32, i32
  }
  func.func @transform_16(%arg0: i32) -> (i32, i32) {
    %c0_i32 = arith.constant 0 : i32
    %c0_i32_0 = arith.constant 0 : i32
    %c0_i32_1 = arith.constant 0 : i32
    return %c0_i32, %c0_i32_0 : i32, i32
  }
  func.func @transform_17(%arg0: i32) -> (i32, i32) {
    %c0_i32 = arith.constant 0 : i32
    %c0_i32_0 = arith.constant 0 : i32
    %c0_i32_1 = arith.constant 0 : i32
    return %c0_i32, %c0_i32_0 : i32, i32
  }
  func.func @transform_18(%arg0: i32) -> (i32, i32) {
    %c0_i32 = arith.constant 0 : i32
    %c0_i32_0 = arith.constant 0 : i32
    %c0_i32_1 = arith.constant 0 : i32
    return %c0_i32, %c0_i32_0 : i32, i32
  }
  func.func @transform_19(%arg0: i32) -> (i32, i32) {
    %c0_i32 = arith.constant 0 : i32
    %c0_i32_0 = arith.constant 0 : i32
    %c0_i32_1 = arith.constant 0 : i32
    return %c0_i32, %c0_i32_0 : i32, i32
  }
  func.func @transform_20(%arg0: i32) -> (i32, i32, i32) {
    %c0_i32 = arith.constant 0 : i32
    %c0_i32_0 = arith.constant 0 : i32
    %c0_i32_1 = arith.constant 0 : i32
    %c0_i32_2 = arith.constant 0 : i32
    return %c0_i32, %c0_i32_0, %c0_i32_1 : i32, i32, i32
  }
  func.func @transform_21(%arg0: i32) -> (i32, i32, i32) {
    %c0_i32 = arith.constant 0 : i32
    %c0_i32_0 = arith.constant 0 : i32
    %c0_i32_1 = arith.constant 0 : i32
    %c0_i32_2 = arith.constant 0 : i32
    return %c0_i32, %c0_i32_0, %c0_i32_1 : i32, i32, i32
  }
}

module attributes {stable_mosaic.version = 11 : i64} {
  func.func @_decoder_stack_kernel(%arg0: i32, %arg1: memref<2x8x128xbf16, #tpu.memory_space<vmem>>, %arg2: memref<2x8x128xbf16, #tpu.memory_space<vmem>>, %arg3: memref<2x1x8xf32, #tpu.memory_space<vmem>>, %arg4: memref<2x1x8xf32, #tpu.memory_space<vmem>>, %arg5: memref<1x128x384xbf16, #tpu.memory_space<vmem>>, %arg6: memref<1x1x384xf32, #tpu.memory_space<vmem>>, %arg7: memref<1x128x128xbf16, #tpu.memory_space<vmem>>, %arg8: memref<1x1x128xf32, #tpu.memory_space<vmem>>, %arg9: memref<1x1x128xf32, #tpu.memory_space<vmem>>, %arg10: memref<1x1x128xf32, #tpu.memory_space<vmem>>, %arg11: memref<1x128x128xbf16, #tpu.memory_space<vmem>>, %arg12: memref<1x1x128xf32, #tpu.memory_space<vmem>>, %arg13: memref<1x128x256xbf16, #tpu.memory_space<vmem>>, %arg14: memref<1x1x256xf32, #tpu.memory_space<vmem>>, %arg15: memref<1x128x128xbf16, #tpu.memory_space<vmem>>, %arg16: memref<1x1x128xf32, #tpu.memory_space<vmem>>, %arg17: memref<1x1x128xf32, #tpu.memory_space<vmem>>, %arg18: memref<1x1x128xf32, #tpu.memory_space<vmem>>, %arg19: memref<1x128x128xbf16, #tpu.memory_space<vmem>>, %arg20: memref<1x1x128xf32, #tpu.memory_space<vmem>>, %arg21: memref<1x128x128xbf16, #tpu.memory_space<vmem>>, %arg22: memref<1x1x128xf32, #tpu.memory_space<vmem>>, %arg23: memref<1x1x128xf32, #tpu.memory_space<vmem>>, %arg24: memref<1x1x128xf32, #tpu.memory_space<vmem>>, %arg25: memref<128x128xbf16, #tpu.memory_space<vmem>>, %arg26: memref<1x128xf32, #tpu.memory_space<vmem>>, %arg27: memref<2x8x128xf32, #tpu.memory_space<vmem>>, %arg28: memref<2x8x128xbf16, #tpu.memory_space<vmem>>) attributes {dimension_semantics = [#tpu.dimension_semantics<arbitrary>], iteration_bounds = array<i64: 2>, scalar_prefetch = 0 : i64, scratch_operands = 1 : i64, tpu.core_type = #tpu.core_type<tc>, window_params = [{pipeline_mode = #tpu.pipeline_mode<synchronous>, transform_indices = @transform_0, window_bounds = array<i64: 2, 8, 128>}, {pipeline_mode = #tpu.pipeline_mode<synchronous>, transform_indices = @transform_1, window_bounds = array<i64: 2, 8, 128>}, {pipeline_mode = #tpu.pipeline_mode<synchronous>, transform_indices = @transform_2, window_bounds = array<i64: 2, 1, 8>}, {pipeline_mode = #tpu.pipeline_mode<synchronous>, transform_indices = @transform_3, window_bounds = array<i64: 2, 1, 8>}, {transform_indices = @transform_4, window_bounds = array<i64: 1, 128, 384>}, {transform_indices = @transform_5, window_bounds = array<i64: 1, 1, 384>}, {transform_indices = @transform_6, window_bounds = array<i64: 1, 128, 128>}, {transform_indices = @transform_7, window_bounds = array<i64: 1, 1, 128>}, {transform_indices = @transform_8, window_bounds = array<i64: 1, 1, 128>}, {transform_indices = @transform_9, window_bounds = array<i64: 1, 1, 128>}, {transform_indices = @transform_10, window_bounds = array<i64: 1, 128, 128>}, {transform_indices = @transform_11, window_bounds = array<i64: 1, 1, 128>}, {transform_indices = @transform_12, window_bounds = array<i64: 1, 128, 256>}, {transform_indices = @transform_13, window_bounds = array<i64: 1, 1, 256>}, {transform_indices = @transform_14, window_bounds = array<i64: 1, 128, 128>}, {transform_indices = @transform_15, window_bounds = array<i64: 1, 1, 128>}, {transform_indices = @transform_16, window_bounds = array<i64: 1, 1, 128>}, {transform_indices = @transform_17, window_bounds = array<i64: 1, 1, 128>}, {transform_indices = @transform_18, window_bounds = array<i64: 1, 128, 128>}, {transform_indices = @transform_19, window_bounds = array<i64: 1, 1, 128>}, {transform_indices = @transform_20, window_bounds = array<i64: 1, 128, 128>}, {transform_indices = @transform_21, window_bounds = array<i64: 1, 1, 128>}, {transform_indices = @transform_22, window_bounds = array<i64: 1, 1, 128>}, {transform_indices = @transform_23, window_bounds = array<i64: 1, 1, 128>}, {pipeline_mode = #tpu.pipeline_mode<synchronous>, transform_indices = @transform_24, window_bounds = array<i64: 128, 128>}, {pipeline_mode = #tpu.pipeline_mode<synchronous>, transform_indices = @transform_25, window_bounds = array<i64: 1, 128>}, {pipeline_mode = #tpu.pipeline_mode<synchronous>, transform_indices = @transform_26, window_bounds = array<i64: 2, 8, 128>}]} {
    %c0_i32 = arith.constant 0 : i32
    %0 = arith.cmpi eq, %arg0, %c0_i32 : i32
    %1 = arith.extui %0 : i1 to i32
    %c0_i32_0 = arith.constant 0 : i32
    %2 = arith.cmpi ne, %1, %c0_i32_0 : i32
    scf.if %2 {
      %c0_189 = arith.constant 0 : index
      %c0_190 = arith.constant 0 : index
      %c0_191 = arith.constant 0 : index
      %536 = vector.load %arg1[%c0_189, %c0_190, %c0_191] : memref<2x8x128xbf16, #tpu.memory_space<vmem>>, vector<2x8x128xbf16>
      %c0_192 = arith.constant 0 : index
      %c0_193 = arith.constant 0 : index
      %c0_194 = arith.constant 0 : index
      %537 = vector.load %arg28[%c0_192, %c0_193, %c0_194] : memref<2x8x128xbf16, #tpu.memory_space<vmem>>, vector<2x8x128xbf16>
      tpu.vector_store %arg28[%c0_192, %c0_193, %c0_194], %536 {strides = array<i32>} : memref<2x8x128xbf16, #tpu.memory_space<vmem>>, vector<2x8x128xbf16>,
    } else {
    }
    %c0 = arith.constant 0 : index
    %c0_1 = arith.constant 0 : index
    %c0_2 = arith.constant 0 : index
    %3 = vector.load %arg28[%c0, %c0_1, %c0_2] : memref<2x8x128xbf16, #tpu.memory_space<vmem>>, vector<2x8x128xbf16>
    %4 = vector.shape_cast %3 : vector<2x8x128xbf16> to vector<16x128xbf16>
    %c0_3 = arith.constant 0 : index
    %c0_4 = arith.constant 0 : index
    %c0_5 = arith.constant 0 : index
    %5 = vector.load %arg2[%c0_3, %c0_4, %c0_5] : memref<2x8x128xbf16, #tpu.memory_space<vmem>>, vector<2x8x128xbf16>
    %6 = vector.shape_cast %5 : vector<2x8x128xbf16> to vector<16x128xbf16>
    %7 = tpu.iota {dimensions = array<i32: 0>} : vector<8x8xi32>
    %8 = tpu.iota {dimensions = array<i32: 1>} : vector<8x8xi32>
    %9 = arith.cmpi sgt, %8, %7 : vector<8x8xi32>
    %cst = arith.constant -1.000000e+09 : f32
    %cst_6 = arith.constant 0.000000e+00 : f32
    %10 = vector.broadcast %cst : f32 to vector<8x8xf32>
    %11 = vector.broadcast %cst_6 : f32 to vector<8x8xf32>
    %12 = arith.select %9, %10, %11 : vector<8x8xi1>, vector<8x8xf32>
    %c0_7 = arith.constant 0 : index
    %c0_8 = arith.constant 0 : index
    %c0_9 = arith.constant 0 : index
    %13 = vector.load %arg5[%c0_7, %c0_8, %c0_9] : memref<1x128x384xbf16, #tpu.memory_space<vmem>>, vector<1x128x384xbf16>
    %14 = vector.shape_cast %13 : vector<1x128x384xbf16> to vector<128x384xbf16>
    %cst_10 = arith.constant dense<0.000000e+00> : vector<16x384xf32>
    %15 = tpu.matmul %4, %14, %cst_10 {dimension_numbers = #tpu.dot_dimension_numbers<[1], [0], [0], [1], [0, 0, 1, 1], [], []>} : vector<16x128xbf16>, vector<128x384xbf16>, vector<16x384xf32> -> vector<16x384xf32>
    %c0_11 = arith.constant 0 : index
    %c0_12 = arith.constant 0 : index
    %c0_13 = arith.constant 0 : index
    %16 = vector.load %arg6[%c0_11, %c0_12, %c0_13] : memref<1x1x384xf32, #tpu.memory_space<vmem>>, vector<1x1x384xf32>
    %17 = vector.shape_cast %16 : vector<1x1x384xf32> to vector<1x384xf32>
    %18 = vector.broadcast %17 : vector<1x384xf32> to vector<16x384xf32>
    %19 = arith.addf %15, %18 : vector<16x384xf32>
    %20 = vector.extract_strided_slice %19 {offsets = [0, 0], sizes = [16, 128], strides = [1, 1]} : vector<16x384xf32> to vector<16x128xf32>
    %cst_14 = arith.constant 0.176776692 : f32
    %21 = vector.broadcast %cst_14 : f32 to vector<16x128xf32>
    %22 = arith.mulf %20, %21 : vector<16x128xf32>
    %23 = arith.truncf %22 : vector<16x128xf32> to vector<16x128xbf16>
    %24 = vector.extract_strided_slice %19 {offsets = [0, 128], sizes = [16, 128], strides = [1, 1]} : vector<16x384xf32> to vector<16x128xf32>
    %25 = arith.truncf %24 : vector<16x128xf32> to vector<16x128xbf16>
    %26 = vector.extract_strided_slice %19 {offsets = [0, 256], sizes = [16, 128], strides = [1, 1]} : vector<16x384xf32> to vector<16x128xf32>
    %27 = arith.truncf %26 : vector<16x128xf32> to vector<16x128xbf16>
    %c0_15 = arith.constant 0 : index
    %c0_16 = arith.constant 0 : index
    %c0_17 = arith.constant 0 : index
    %28 = vector.load %arg7[%c0_15, %c0_16, %c0_17] : memref<1x128x128xbf16, #tpu.memory_space<vmem>>, vector<1x128x128xbf16>
    %29 = vector.shape_cast %28 : vector<1x128x128xbf16> to vector<128x128xbf16>
    %30 = vector.extract_strided_slice %23 {offsets = [0, 0], sizes = [8, 128], strides = [1, 1]} : vector<16x128xbf16> to vector<8x128xbf16>
    %31 = vector.extract_strided_slice %25 {offsets = [0, 0], sizes = [8, 128], strides = [1, 1]} : vector<16x128xbf16> to vector<8x128xbf16>
    %32 = vector.extract_strided_slice %27 {offsets = [0, 0], sizes = [8, 128], strides = [1, 1]} : vector<16x128xbf16> to vector<8x128xbf16>
    %c0_18 = arith.constant 0 : index
    %c0_19 = arith.constant 0 : index
    %c0_20 = arith.constant 0 : index
    %33 = vector.load %arg3[%c0_18, %c0_19, %c0_20] : memref<2x1x8xf32, #tpu.memory_space<vmem>>, vector<1x1x8xf32>
    %34 = vector.shape_cast %33 : vector<1x1x8xf32> to vector<1x8xf32>
    %35 = vector.broadcast %34 : vector<1x8xf32> to vector<8x8xf32>
    %36 = arith.addf %12, %35 : vector<8x8xf32>
    %cst_21 = arith.constant 0.000000e+00 : f32
    %37 = vector.broadcast %cst_21 : f32 to vector<8x128xf32>
    %38 = vector.extract_strided_slice %30 {offsets = [0, 0], sizes = [8, 32], strides = [1, 1]} : vector<8x128xbf16> to vector<8x32xbf16>
    %39 = vector.extract_strided_slice %31 {offsets = [0, 0], sizes = [8, 32], strides = [1, 1]} : vector<8x128xbf16> to vector<8x32xbf16>
    %cst_22 = arith.constant dense<0.000000e+00> : vector<8x8xf32>
    %40 = tpu.matmul %38, %39, %cst_22 {dimension_numbers = #tpu.dot_dimension_numbers<[1], [1], [0], [0], [0, 0, 1, 0], [], []>} : vector<8x32xbf16>, vector<8x32xbf16>, vector<8x8xf32> -> vector<8x8xf32>
    %41 = arith.addf %40, %36 : vector<8x8xf32>
    %cst_23 = arith.constant dense<0xFF800000> : vector<8xf32>
    %42 = vector.multi_reduction <maximumf>, %41, %cst_23 [1] : vector<8x8xf32> to vector<8xf32>
    %43 = vector.shape_cast %42 : vector<8xf32> to vector<8x1xf32>
    %44 = vector.broadcast %43 : vector<8x1xf32> to vector<8x8xf32>
    %45 = arith.subf %41, %44 : vector<8x8xf32>
    %46 = math.exp %45 : vector<8x8xf32>
    %cst_24 = arith.constant dense<0.000000e+00> : vector<8xf32>
    %47 = vector.multi_reduction <add>, %46, %cst_24 [1] : vector<8x8xf32> to vector<8xf32>
    %48 = vector.shape_cast %47 : vector<8xf32> to vector<8x1xf32>
    %49 = tpu.reciprocal %48 {approx = true} : vector<8x1xf32> -> vector<8x1xf32>
    %50 = vector.broadcast %49 : vector<8x1xf32> to vector<8x8xf32>
    %51 = arith.mulf %46, %50 : vector<8x8xf32>
    %52 = arith.truncf %51 : vector<8x8xf32> to vector<8x8xbf16>
    %53 = vector.extract_strided_slice %32 {offsets = [0, 0], sizes = [8, 32], strides = [1, 1]} : vector<8x128xbf16> to vector<8x32xbf16>
    %cst_25 = arith.constant dense<0.000000e+00> : vector<8x32xf32>
    %54 = tpu.matmul %52, %53, %cst_25 {dimension_numbers = #tpu.dot_dimension_numbers<[1], [0], [0], [1], [0, 0, 1, 1], [], []>} : vector<8x8xbf16>, vector<8x32xbf16>, vector<8x32xf32> -> vector<8x32xf32>
    %55 = arith.truncf %54 : vector<8x32xf32> to vector<8x32xbf16>
    %56 = vector.extract_strided_slice %29 {offsets = [0, 0], sizes = [32, 128], strides = [1, 1]} : vector<128x128xbf16> to vector<32x128xbf16>
    %cst_26 = arith.constant dense<0.000000e+00> : vector<8x128xf32>
    %57 = tpu.matmul %55, %56, %cst_26 {dimension_numbers = #tpu.dot_dimension_numbers<[1], [0], [0], [1], [0, 0, 1, 1], [], []>} : vector<8x32xbf16>, vector<32x128xbf16>, vector<8x128xf32> -> vector<8x128xf32>
    %58 = arith.addf %37, %57 : vector<8x128xf32>
    %59 = vector.extract_strided_slice %30 {offsets = [0, 32], sizes = [8, 32], strides = [1, 1]} : vector<8x128xbf16> to vector<8x32xbf16>
    %60 = vector.extract_strided_slice %31 {offsets = [0, 32], sizes = [8, 32], strides = [1, 1]} : vector<8x128xbf16> to vector<8x32xbf16>
    %cst_27 = arith.constant dense<0.000000e+00> : vector<8x8xf32>
    %61 = tpu.matmul %59, %60, %cst_27 {dimension_numbers = #tpu.dot_dimension_numbers<[1], [1], [0], [0], [0, 0, 1, 0], [], []>} : vector<8x32xbf16>, vector<8x32xbf16>, vector<8x8xf32> -> vector<8x8xf32>
    %62 = arith.addf %61, %36 : vector<8x8xf32>
    %cst_28 = arith.constant dense<0xFF800000> : vector<8xf32>
    %63 = vector.multi_reduction <maximumf>, %62, %cst_28 [1] : vector<8x8xf32> to vector<8xf32>
    %64 = vector.shape_cast %63 : vector<8xf32> to vector<8x1xf32>
    %65 = vector.broadcast %64 : vector<8x1xf32> to vector<8x8xf32>
    %66 = arith.subf %62, %65 : vector<8x8xf32>
    %67 = math.exp %66 : vector<8x8xf32>
    %cst_29 = arith.constant dense<0.000000e+00> : vector<8xf32>
    %68 = vector.multi_reduction <add>, %67, %cst_29 [1] : vector<8x8xf32> to vector<8xf32>
    %69 = vector.shape_cast %68 : vector<8xf32> to vector<8x1xf32>
    %70 = tpu.reciprocal %69 {approx = true} : vector<8x1xf32> -> vector<8x1xf32>
    %71 = vector.broadcast %70 : vector<8x1xf32> to vector<8x8xf32>
    %72 = arith.mulf %67, %71 : vector<8x8xf32>
    %73 = arith.truncf %72 : vector<8x8xf32> to vector<8x8xbf16>
    %74 = vector.extract_strided_slice %32 {offsets = [0, 32], sizes = [8, 32], strides = [1, 1]} : vector<8x128xbf16> to vector<8x32xbf16>
    %cst_30 = arith.constant dense<0.000000e+00> : vector<8x32xf32>
    %75 = tpu.matmul %73, %74, %cst_30 {dimension_numbers = #tpu.dot_dimension_numbers<[1], [0], [0], [1], [0, 0, 1, 1], [], []>} : vector<8x8xbf16>, vector<8x32xbf16>, vector<8x32xf32> -> vector<8x32xf32>
    %76 = arith.truncf %75 : vector<8x32xf32> to vector<8x32xbf16>
    %77 = vector.extract_strided_slice %29 {offsets = [32, 0], sizes = [32, 128], strides = [1, 1]} : vector<128x128xbf16> to vector<32x128xbf16>
    %cst_31 = arith.constant dense<0.000000e+00> : vector<8x128xf32>
    %78 = tpu.matmul %76, %77, %cst_31 {dimension_numbers = #tpu.dot_dimension_numbers<[1], [0], [0], [1], [0, 0, 1, 1], [], []>} : vector<8x32xbf16>, vector<32x128xbf16>, vector<8x128xf32> -> vector<8x128xf32>
    %79 = arith.addf %58, %78 : vector<8x128xf32>
    %80 = vector.extract_strided_slice %30 {offsets = [0, 64], sizes = [8, 32], strides = [1, 1]} : vector<8x128xbf16> to vector<8x32xbf16>
    %81 = vector.extract_strided_slice %31 {offsets = [0, 64], sizes = [8, 32], strides = [1, 1]} : vector<8x128xbf16> to vector<8x32xbf16>
    %cst_32 = arith.constant dense<0.000000e+00> : vector<8x8xf32>
    %82 = tpu.matmul %80, %81, %cst_32 {dimension_numbers = #tpu.dot_dimension_numbers<[1], [1], [0], [0], [0, 0, 1, 0], [], []>} : vector<8x32xbf16>, vector<8x32xbf16>, vector<8x8xf32> -> vector<8x8xf32>
    %83 = arith.addf %82, %36 : vector<8x8xf32>
    %cst_33 = arith.constant dense<0xFF800000> : vector<8xf32>
    %84 = vector.multi_reduction <maximumf>, %83, %cst_33 [1] : vector<8x8xf32> to vector<8xf32>
    %85 = vector.shape_cast %84 : vector<8xf32> to vector<8x1xf32>
    %86 = vector.broadcast %85 : vector<8x1xf32> to vector<8x8xf32>
    %87 = arith.subf %83, %86 : vector<8x8xf32>
    %88 = math.exp %87 : vector<8x8xf32>
    %cst_34 = arith.constant dense<0.000000e+00> : vector<8xf32>
    %89 = vector.multi_reduction <add>, %88, %cst_34 [1] : vector<8x8xf32> to vector<8xf32>
    %90 = vector.shape_cast %89 : vector<8xf32> to vector<8x1xf32>
    %91 = tpu.reciprocal %90 {approx = true} : vector<8x1xf32> -> vector<8x1xf32>
    %92 = vector.broadcast %91 : vector<8x1xf32> to vector<8x8xf32>
    %93 = arith.mulf %88, %92 : vector<8x8xf32>
    %94 = arith.truncf %93 : vector<8x8xf32> to vector<8x8xbf16>
    %95 = vector.extract_strided_slice %32 {offsets = [0, 64], sizes = [8, 32], strides = [1, 1]} : vector<8x128xbf16> to vector<8x32xbf16>
    %cst_35 = arith.constant dense<0.000000e+00> : vector<8x32xf32>
    %96 = tpu.matmul %94, %95, %cst_35 {dimension_numbers = #tpu.dot_dimension_numbers<[1], [0], [0], [1], [0, 0, 1, 1], [], []>} : vector<8x8xbf16>, vector<8x32xbf16>, vector<8x32xf32> -> vector<8x32xf32>
    %97 = arith.truncf %96 : vector<8x32xf32> to vector<8x32xbf16>
    %98 = vector.extract_strided_slice %29 {offsets = [64, 0], sizes = [32, 128], strides = [1, 1]} : vector<128x128xbf16> to vector<32x128xbf16>
    %cst_36 = arith.constant dense<0.000000e+00> : vector<8x128xf32>
    %99 = tpu.matmul %97, %98, %cst_36 {dimension_numbers = #tpu.dot_dimension_numbers<[1], [0], [0], [1], [0, 0, 1, 1], [], []>} : vector<8x32xbf16>, vector<32x128xbf16>, vector<8x128xf32> -> vector<8x128xf32>
    %100 = arith.addf %79, %99 : vector<8x128xf32>
    %101 = vector.extract_strided_slice %30 {offsets = [0, 96], sizes = [8, 32], strides = [1, 1]} : vector<8x128xbf16> to vector<8x32xbf16>
    %102 = vector.extract_strided_slice %31 {offsets = [0, 96], sizes = [8, 32], strides = [1, 1]} : vector<8x128xbf16> to vector<8x32xbf16>
    %cst_37 = arith.constant dense<0.000000e+00> : vector<8x8xf32>
    %103 = tpu.matmul %101, %102, %cst_37 {dimension_numbers = #tpu.dot_dimension_numbers<[1], [1], [0], [0], [0, 0, 1, 0], [], []>} : vector<8x32xbf16>, vector<8x32xbf16>, vector<8x8xf32> -> vector<8x8xf32>
    %104 = arith.addf %103, %36 : vector<8x8xf32>
    %cst_38 = arith.constant dense<0xFF800000> : vector<8xf32>
    %105 = vector.multi_reduction <maximumf>, %104, %cst_38 [1] : vector<8x8xf32> to vector<8xf32>
    %106 = vector.shape_cast %105 : vector<8xf32> to vector<8x1xf32>
    %107 = vector.broadcast %106 : vector<8x1xf32> to vector<8x8xf32>
    %108 = arith.subf %104, %107 : vector<8x8xf32>
    %109 = math.exp %108 : vector<8x8xf32>
    %cst_39 = arith.constant dense<0.000000e+00> : vector<8xf32>
    %110 = vector.multi_reduction <add>, %109, %cst_39 [1] : vector<8x8xf32> to vector<8xf32>
    %111 = vector.shape_cast %110 : vector<8xf32> to vector<8x1xf32>
    %112 = tpu.reciprocal %111 {approx = true} : vector<8x1xf32> -> vector<8x1xf32>
    %113 = vector.broadcast %112 : vector<8x1xf32> to vector<8x8xf32>
    %114 = arith.mulf %109, %113 : vector<8x8xf32>
    %115 = arith.truncf %114 : vector<8x8xf32> to vector<8x8xbf16>
    %116 = vector.extract_strided_slice %32 {offsets = [0, 96], sizes = [8, 32], strides = [1, 1]} : vector<8x128xbf16> to vector<8x32xbf16>
    %cst_40 = arith.constant dense<0.000000e+00> : vector<8x32xf32>
    %117 = tpu.matmul %115, %116, %cst_40 {dimension_numbers = #tpu.dot_dimension_numbers<[1], [0], [0], [1], [0, 0, 1, 1], [], []>} : vector<8x8xbf16>, vector<8x32xbf16>, vector<8x32xf32> -> vector<8x32xf32>
    %118 = arith.truncf %117 : vector<8x32xf32> to vector<8x32xbf16>
    %119 = vector.extract_strided_slice %29 {offsets = [96, 0], sizes = [32, 128], strides = [1, 1]} : vector<128x128xbf16> to vector<32x128xbf16>
    %cst_41 = arith.constant dense<0.000000e+00> : vector<8x128xf32>
    %120 = tpu.matmul %118, %119, %cst_41 {dimension_numbers = #tpu.dot_dimension_numbers<[1], [0], [0], [1], [0, 0, 1, 1], [], []>} : vector<8x32xbf16>, vector<32x128xbf16>, vector<8x128xf32> -> vector<8x128xf32>
    %121 = arith.addf %100, %120 : vector<8x128xf32>
    %122 = vector.extract_strided_slice %23 {offsets = [8, 0], sizes = [8, 128], strides = [1, 1]} : vector<16x128xbf16> to vector<8x128xbf16>
    %123 = vector.extract_strided_slice %25 {offsets = [8, 0], sizes = [8, 128], strides = [1, 1]} : vector<16x128xbf16> to vector<8x128xbf16>
    %124 = vector.extract_strided_slice %27 {offsets = [8, 0], sizes = [8, 128], strides = [1, 1]} : vector<16x128xbf16> to vector<8x128xbf16>
    %c1 = arith.constant 1 : index
    %c0_42 = arith.constant 0 : index
    %c0_43 = arith.constant 0 : index
    %125 = vector.load %arg3[%c1, %c0_42, %c0_43] : memref<2x1x8xf32, #tpu.memory_space<vmem>>, vector<1x1x8xf32>
    %126 = vector.shape_cast %125 : vector<1x1x8xf32> to vector<1x8xf32>
    %127 = vector.broadcast %126 : vector<1x8xf32> to vector<8x8xf32>
    %128 = arith.addf %12, %127 : vector<8x8xf32>
    %cst_44 = arith.constant 0.000000e+00 : f32
    %129 = vector.broadcast %cst_44 : f32 to vector<8x128xf32>
    %130 = vector.extract_strided_slice %122 {offsets = [0, 0], sizes = [8, 32], strides = [1, 1]} : vector<8x128xbf16> to vector<8x32xbf16>
    %131 = vector.extract_strided_slice %123 {offsets = [0, 0], sizes = [8, 32], strides = [1, 1]} : vector<8x128xbf16> to vector<8x32xbf16>
    %cst_45 = arith.constant dense<0.000000e+00> : vector<8x8xf32>
    %132 = tpu.matmul %130, %131, %cst_45 {dimension_numbers = #tpu.dot_dimension_numbers<[1], [1], [0], [0], [0, 0, 1, 0], [], []>} : vector<8x32xbf16>, vector<8x32xbf16>, vector<8x8xf32> -> vector<8x8xf32>
    %133 = arith.addf %132, %128 : vector<8x8xf32>
    %cst_46 = arith.constant dense<0xFF800000> : vector<8xf32>
    %134 = vector.multi_reduction <maximumf>, %133, %cst_46 [1] : vector<8x8xf32> to vector<8xf32>
    %135 = vector.shape_cast %134 : vector<8xf32> to vector<8x1xf32>
    %136 = vector.broadcast %135 : vector<8x1xf32> to vector<8x8xf32>
    %137 = arith.subf %133, %136 : vector<8x8xf32>
    %138 = math.exp %137 : vector<8x8xf32>
    %cst_47 = arith.constant dense<0.000000e+00> : vector<8xf32>
    %139 = vector.multi_reduction <add>, %138, %cst_47 [1] : vector<8x8xf32> to vector<8xf32>
    %140 = vector.shape_cast %139 : vector<8xf32> to vector<8x1xf32>
    %141 = tpu.reciprocal %140 {approx = true} : vector<8x1xf32> -> vector<8x1xf32>
    %142 = vector.broadcast %141 : vector<8x1xf32> to vector<8x8xf32>
    %143 = arith.mulf %138, %142 : vector<8x8xf32>
    %144 = arith.truncf %143 : vector<8x8xf32> to vector<8x8xbf16>
    %145 = vector.extract_strided_slice %124 {offsets = [0, 0], sizes = [8, 32], strides = [1, 1]} : vector<8x128xbf16> to vector<8x32xbf16>
    %cst_48 = arith.constant dense<0.000000e+00> : vector<8x32xf32>
    %146 = tpu.matmul %144, %145, %cst_48 {dimension_numbers = #tpu.dot_dimension_numbers<[1], [0], [0], [1], [0, 0, 1, 1], [], []>} : vector<8x8xbf16>, vector<8x32xbf16>, vector<8x32xf32> -> vector<8x32xf32>
    %147 = arith.truncf %146 : vector<8x32xf32> to vector<8x32xbf16>
    %148 = vector.extract_strided_slice %29 {offsets = [0, 0], sizes = [32, 128], strides = [1, 1]} : vector<128x128xbf16> to vector<32x128xbf16>
    %cst_49 = arith.constant dense<0.000000e+00> : vector<8x128xf32>
    %149 = tpu.matmul %147, %148, %cst_49 {dimension_numbers = #tpu.dot_dimension_numbers<[1], [0], [0], [1], [0, 0, 1, 1], [], []>} : vector<8x32xbf16>, vector<32x128xbf16>, vector<8x128xf32> -> vector<8x128xf32>
    %150 = arith.addf %129, %149 : vector<8x128xf32>
    %151 = vector.extract_strided_slice %122 {offsets = [0, 32], sizes = [8, 32], strides = [1, 1]} : vector<8x128xbf16> to vector<8x32xbf16>
    %152 = vector.extract_strided_slice %123 {offsets = [0, 32], sizes = [8, 32], strides = [1, 1]} : vector<8x128xbf16> to vector<8x32xbf16>
    %cst_50 = arith.constant dense<0.000000e+00> : vector<8x8xf32>
    %153 = tpu.matmul %151, %152, %cst_50 {dimension_numbers = #tpu.dot_dimension_numbers<[1], [1], [0], [0], [0, 0, 1, 0], [], []>} : vector<8x32xbf16>, vector<8x32xbf16>, vector<8x8xf32> -> vector<8x8xf32>
    %154 = arith.addf %153, %128 : vector<8x8xf32>
    %cst_51 = arith.constant dense<0xFF800000> : vector<8xf32>
    %155 = vector.multi_reduction <maximumf>, %154, %cst_51 [1] : vector<8x8xf32> to vector<8xf32>
    %156 = vector.shape_cast %155 : vector<8xf32> to vector<8x1xf32>
    %157 = vector.broadcast %156 : vector<8x1xf32> to vector<8x8xf32>
    %158 = arith.subf %154, %157 : vector<8x8xf32>
    %159 = math.exp %158 : vector<8x8xf32>
    %cst_52 = arith.constant dense<0.000000e+00> : vector<8xf32>
    %160 = vector.multi_reduction <add>, %159, %cst_52 [1] : vector<8x8xf32> to vector<8xf32>
    %161 = vector.shape_cast %160 : vector<8xf32> to vector<8x1xf32>
    %162 = tpu.reciprocal %161 {approx = true} : vector<8x1xf32> -> vector<8x1xf32>
    %163 = vector.broadcast %162 : vector<8x1xf32> to vector<8x8xf32>
    %164 = arith.mulf %159, %163 : vector<8x8xf32>
    %165 = arith.truncf %164 : vector<8x8xf32> to vector<8x8xbf16>
    %166 = vector.extract_strided_slice %124 {offsets = [0, 32], sizes = [8, 32], strides = [1, 1]} : vector<8x128xbf16> to vector<8x32xbf16>
    %cst_53 = arith.constant dense<0.000000e+00> : vector<8x32xf32>
    %167 = tpu.matmul %165, %166, %cst_53 {dimension_numbers = #tpu.dot_dimension_numbers<[1], [0], [0], [1], [0, 0, 1, 1], [], []>} : vector<8x8xbf16>, vector<8x32xbf16>, vector<8x32xf32> -> vector<8x32xf32>
    %168 = arith.truncf %167 : vector<8x32xf32> to vector<8x32xbf16>
    %169 = vector.extract_strided_slice %29 {offsets = [32, 0], sizes = [32, 128], strides = [1, 1]} : vector<128x128xbf16> to vector<32x128xbf16>
    %cst_54 = arith.constant dense<0.000000e+00> : vector<8x128xf32>
    %170 = tpu.matmul %168, %169, %cst_54 {dimension_numbers = #tpu.dot_dimension_numbers<[1], [0], [0], [1], [0, 0, 1, 1], [], []>} : vector<8x32xbf16>, vector<32x128xbf16>, vector<8x128xf32> -> vector<8x128xf32>
    %171 = arith.addf %150, %170 : vector<8x128xf32>
    %172 = vector.extract_strided_slice %122 {offsets = [0, 64], sizes = [8, 32], strides = [1, 1]} : vector<8x128xbf16> to vector<8x32xbf16>
    %173 = vector.extract_strided_slice %123 {offsets = [0, 64], sizes = [8, 32], strides = [1, 1]} : vector<8x128xbf16> to vector<8x32xbf16>
    %cst_55 = arith.constant dense<0.000000e+00> : vector<8x8xf32>
    %174 = tpu.matmul %172, %173, %cst_55 {dimension_numbers = #tpu.dot_dimension_numbers<[1], [1], [0], [0], [0, 0, 1, 0], [], []>} : vector<8x32xbf16>, vector<8x32xbf16>, vector<8x8xf32> -> vector<8x8xf32>
    %175 = arith.addf %174, %128 : vector<8x8xf32>
    %cst_56 = arith.constant dense<0xFF800000> : vector<8xf32>
    %176 = vector.multi_reduction <maximumf>, %175, %cst_56 [1] : vector<8x8xf32> to vector<8xf32>
    %177 = vector.shape_cast %176 : vector<8xf32> to vector<8x1xf32>
    %178 = vector.broadcast %177 : vector<8x1xf32> to vector<8x8xf32>
    %179 = arith.subf %175, %178 : vector<8x8xf32>
    %180 = math.exp %179 : vector<8x8xf32>
    %cst_57 = arith.constant dense<0.000000e+00> : vector<8xf32>
    %181 = vector.multi_reduction <add>, %180, %cst_57 [1] : vector<8x8xf32> to vector<8xf32>
    %182 = vector.shape_cast %181 : vector<8xf32> to vector<8x1xf32>
    %183 = tpu.reciprocal %182 {approx = true} : vector<8x1xf32> -> vector<8x1xf32>
    %184 = vector.broadcast %183 : vector<8x1xf32> to vector<8x8xf32>
    %185 = arith.mulf %180, %184 : vector<8x8xf32>
    %186 = arith.truncf %185 : vector<8x8xf32> to vector<8x8xbf16>
    %187 = vector.extract_strided_slice %124 {offsets = [0, 64], sizes = [8, 32], strides = [1, 1]} : vector<8x128xbf16> to vector<8x32xbf16>
    %cst_58 = arith.constant dense<0.000000e+00> : vector<8x32xf32>
    %188 = tpu.matmul %186, %187, %cst_58 {dimension_numbers = #tpu.dot_dimension_numbers<[1], [0], [0], [1], [0, 0, 1, 1], [], []>} : vector<8x8xbf16>, vector<8x32xbf16>, vector<8x32xf32> -> vector<8x32xf32>
    %189 = arith.truncf %188 : vector<8x32xf32> to vector<8x32xbf16>
    %190 = vector.extract_strided_slice %29 {offsets = [64, 0], sizes = [32, 128], strides = [1, 1]} : vector<128x128xbf16> to vector<32x128xbf16>
    %cst_59 = arith.constant dense<0.000000e+00> : vector<8x128xf32>
    %191 = tpu.matmul %189, %190, %cst_59 {dimension_numbers = #tpu.dot_dimension_numbers<[1], [0], [0], [1], [0, 0, 1, 1], [], []>} : vector<8x32xbf16>, vector<32x128xbf16>, vector<8x128xf32> -> vector<8x128xf32>
    %192 = arith.addf %171, %191 : vector<8x128xf32>
    %193 = vector.extract_strided_slice %122 {offsets = [0, 96], sizes = [8, 32], strides = [1, 1]} : vector<8x128xbf16> to vector<8x32xbf16>
    %194 = vector.extract_strided_slice %123 {offsets = [0, 96], sizes = [8, 32], strides = [1, 1]} : vector<8x128xbf16> to vector<8x32xbf16>
    %cst_60 = arith.constant dense<0.000000e+00> : vector<8x8xf32>
    %195 = tpu.matmul %193, %194, %cst_60 {dimension_numbers = #tpu.dot_dimension_numbers<[1], [1], [0], [0], [0, 0, 1, 0], [], []>} : vector<8x32xbf16>, vector<8x32xbf16>, vector<8x8xf32> -> vector<8x8xf32>
    %196 = arith.addf %195, %128 : vector<8x8xf32>
    %cst_61 = arith.constant dense<0xFF800000> : vector<8xf32>
    %197 = vector.multi_reduction <maximumf>, %196, %cst_61 [1] : vector<8x8xf32> to vector<8xf32>
    %198 = vector.shape_cast %197 : vector<8xf32> to vector<8x1xf32>
    %199 = vector.broadcast %198 : vector<8x1xf32> to vector<8x8xf32>
    %200 = arith.subf %196, %199 : vector<8x8xf32>
    %201 = math.exp %200 : vector<8x8xf32>
    %cst_62 = arith.constant dense<0.000000e+00> : vector<8xf32>
    %202 = vector.multi_reduction <add>, %201, %cst_62 [1] : vector<8x8xf32> to vector<8xf32>
    %203 = vector.shape_cast %202 : vector<8xf32> to vector<8x1xf32>
    %204 = tpu.reciprocal %203 {approx = true} : vector<8x1xf32> -> vector<8x1xf32>
    %205 = vector.broadcast %204 : vector<8x1xf32> to vector<8x8xf32>
    %206 = arith.mulf %201, %205 : vector<8x8xf32>
    %207 = arith.truncf %206 : vector<8x8xf32> to vector<8x8xbf16>
    %208 = vector.extract_strided_slice %124 {offsets = [0, 96], sizes = [8, 32], strides = [1, 1]} : vector<8x128xbf16> to vector<8x32xbf16>
    %cst_63 = arith.constant dense<0.000000e+00> : vector<8x32xf32>
    %209 = tpu.matmul %207, %208, %cst_63 {dimension_numbers = #tpu.dot_dimension_numbers<[1], [0], [0], [1], [0, 0, 1, 1], [], []>} : vector<8x8xbf16>, vector<8x32xbf16>, vector<8x32xf32> -> vector<8x32xf32>
    %210 = arith.truncf %209 : vector<8x32xf32> to vector<8x32xbf16>
    %211 = vector.extract_strided_slice %29 {offsets = [96, 0], sizes = [32, 128], strides = [1, 1]} : vector<128x128xbf16> to vector<32x128xbf16>
    %cst_64 = arith.constant dense<0.000000e+00> : vector<8x128xf32>
    %212 = tpu.matmul %210, %211, %cst_64 {dimension_numbers = #tpu.dot_dimension_numbers<[1], [0], [0], [1], [0, 0, 1, 1], [], []>} : vector<8x32xbf16>, vector<32x128xbf16>, vector<8x128xf32> -> vector<8x128xf32>
    %213 = arith.addf %192, %212 : vector<8x128xf32>
    %214 = tpu.concatenate %121, %213 in 0 : vector<8x128xf32>, vector<8x128xf32> -> vector<16x128xf32>
    %c0_65 = arith.constant 0 : index
    %c0_66 = arith.constant 0 : index
    %c0_67 = arith.constant 0 : index
    %215 = vector.load %arg8[%c0_65, %c0_66, %c0_67] : memref<1x1x128xf32, #tpu.memory_space<vmem>>, vector<1x1x128xf32>
    %216 = vector.shape_cast %215 : vector<1x1x128xf32> to vector<1x128xf32>
    %217 = vector.broadcast %216 : vector<1x128xf32> to vector<16x128xf32>
    %218 = arith.addf %214, %217 : vector<16x128xf32>
    %219 = arith.extf %4 : vector<16x128xbf16> to vector<16x128xf32>
    %220 = arith.addf %219, %218 : vector<16x128xf32>
    %c0_68 = arith.constant 0 : index
    %c0_69 = arith.constant 0 : index
    %c0_70 = arith.constant 0 : index
    %221 = vector.load %arg9[%c0_68, %c0_69, %c0_70] : memref<1x1x128xf32, #tpu.memory_space<vmem>>, vector<1x1x128xf32>
    %222 = vector.shape_cast %221 : vector<1x1x128xf32> to vector<1x128xf32>
    %c0_71 = arith.constant 0 : index
    %c0_72 = arith.constant 0 : index
    %c0_73 = arith.constant 0 : index
    %223 = vector.load %arg10[%c0_71, %c0_72, %c0_73] : memref<1x1x128xf32, #tpu.memory_space<vmem>>, vector<1x1x128xf32>
    %224 = vector.shape_cast %223 : vector<1x1x128xf32> to vector<1x128xf32>
    %cst_74 = arith.constant dense<0.000000e+00> : vector<16xf32>
    %225 = vector.multi_reduction <add>, %220, %cst_74 [1] : vector<16x128xf32> to vector<16xf32>
    %226 = vector.shape_cast %225 : vector<16xf32> to vector<16x1xf32>
    %cst_75 = arith.constant 1.280000e+02 : f32
    %227 = vector.broadcast %cst_75 : f32 to vector<16x1xf32>
    %228 = arith.divf %226, %227 : vector<16x1xf32>
    %229 = vector.broadcast %228 : vector<16x1xf32> to vector<16x128xf32>
    %230 = arith.subf %220, %229 : vector<16x128xf32>
    %231 = arith.mulf %230, %230 : vector<16x128xf32>
    %cst_76 = arith.constant dense<0.000000e+00> : vector<16xf32>
    %232 = vector.multi_reduction <add>, %231, %cst_76 [1] : vector<16x128xf32> to vector<16xf32>
    %233 = vector.shape_cast %232 : vector<16xf32> to vector<16x1xf32>
    %cst_77 = arith.constant 1.280000e+02 : f32
    %234 = vector.broadcast %cst_77 : f32 to vector<16x1xf32>
    %235 = arith.divf %233, %234 : vector<16x1xf32>
    %cst_78 = arith.constant 9.99999974E-6 : f32
    %236 = vector.broadcast %cst_78 : f32 to vector<16x1xf32>
    %237 = arith.addf %235, %236 : vector<16x1xf32>
    %238 = math.rsqrt %237 : vector<16x1xf32>
    %239 = vector.broadcast %238 : vector<16x1xf32> to vector<16x128xf32>
    %240 = arith.mulf %230, %239 : vector<16x128xf32>
    %241 = vector.broadcast %222 : vector<1x128xf32> to vector<16x128xf32>
    %242 = arith.mulf %240, %241 : vector<16x128xf32>
    %243 = vector.broadcast %224 : vector<1x128xf32> to vector<16x128xf32>
    %244 = arith.addf %242, %243 : vector<16x128xf32>
    %245 = arith.truncf %244 : vector<16x128xf32> to vector<16x128xbf16>
    %c0_79 = arith.constant 0 : index
    %c0_80 = arith.constant 0 : index
    %c0_81 = arith.constant 0 : index
    %246 = vector.load %arg11[%c0_79, %c0_80, %c0_81] : memref<1x128x128xbf16, #tpu.memory_space<vmem>>, vector<1x128x128xbf16>
    %247 = vector.shape_cast %246 : vector<1x128x128xbf16> to vector<128x128xbf16>
    %cst_82 = arith.constant dense<0.000000e+00> : vector<16x128xf32>
    %248 = tpu.matmul %245, %247, %cst_82 {dimension_numbers = #tpu.dot_dimension_numbers<[1], [0], [0], [1], [0, 0, 1, 1], [], []>} : vector<16x128xbf16>, vector<128x128xbf16>, vector<16x128xf32> -> vector<16x128xf32>
    %c0_83 = arith.constant 0 : index
    %c0_84 = arith.constant 0 : index
    %c0_85 = arith.constant 0 : index
    %249 = vector.load %arg12[%c0_83, %c0_84, %c0_85] : memref<1x1x128xf32, #tpu.memory_space<vmem>>, vector<1x1x128xf32>
    %250 = vector.shape_cast %249 : vector<1x1x128xf32> to vector<1x128xf32>
    %251 = vector.broadcast %250 : vector<1x128xf32> to vector<16x128xf32>
    %252 = arith.addf %248, %251 : vector<16x128xf32>
    %cst_86 = arith.constant 0.176776692 : f32
    %253 = vector.broadcast %cst_86 : f32 to vector<16x128xf32>
    %254 = arith.mulf %252, %253 : vector<16x128xf32>
    %255 = arith.truncf %254 : vector<16x128xf32> to vector<16x128xbf16>
    %c0_87 = arith.constant 0 : index
    %c0_88 = arith.constant 0 : index
    %c0_89 = arith.constant 0 : index
    %256 = vector.load %arg13[%c0_87, %c0_88, %c0_89] : memref<1x128x256xbf16, #tpu.memory_space<vmem>>, vector<1x128x256xbf16>
    %257 = vector.shape_cast %256 : vector<1x128x256xbf16> to vector<128x256xbf16>
    %cst_90 = arith.constant dense<0.000000e+00> : vector<16x256xf32>
    %258 = tpu.matmul %6, %257, %cst_90 {dimension_numbers = #tpu.dot_dimension_numbers<[1], [0], [0], [1], [0, 0, 1, 1], [], []>} : vector<16x128xbf16>, vector<128x256xbf16>, vector<16x256xf32> -> vector<16x256xf32>
    %c0_91 = arith.constant 0 : index
    %c0_92 = arith.constant 0 : index
    %c0_93 = arith.constant 0 : index
    %259 = vector.load %arg14[%c0_91, %c0_92, %c0_93] : memref<1x1x256xf32, #tpu.memory_space<vmem>>, vector<1x1x256xf32>
    %260 = vector.shape_cast %259 : vector<1x1x256xf32> to vector<1x256xf32>
    %261 = vector.broadcast %260 : vector<1x256xf32> to vector<16x256xf32>
    %262 = arith.addf %258, %261 : vector<16x256xf32>
    %263 = vector.extract_strided_slice %262 {offsets = [0, 0], sizes = [16, 128], strides = [1, 1]} : vector<16x256xf32> to vector<16x128xf32>
    %264 = arith.truncf %263 : vector<16x128xf32> to vector<16x128xbf16>
    %265 = vector.extract_strided_slice %262 {offsets = [0, 128], sizes = [16, 128], strides = [1, 1]} : vector<16x256xf32> to vector<16x128xf32>
    %266 = arith.truncf %265 : vector<16x128xf32> to vector<16x128xbf16>
    %c0_94 = arith.constant 0 : index
    %c0_95 = arith.constant 0 : index
    %c0_96 = arith.constant 0 : index
    %267 = vector.load %arg15[%c0_94, %c0_95, %c0_96] : memref<1x128x128xbf16, #tpu.memory_space<vmem>>, vector<1x128x128xbf16>
    %268 = vector.shape_cast %267 : vector<1x128x128xbf16> to vector<128x128xbf16>
    %269 = vector.extract_strided_slice %255 {offsets = [0, 0], sizes = [8, 128], strides = [1, 1]} : vector<16x128xbf16> to vector<8x128xbf16>
    %270 = vector.extract_strided_slice %264 {offsets = [0, 0], sizes = [8, 128], strides = [1, 1]} : vector<16x128xbf16> to vector<8x128xbf16>
    %271 = vector.extract_strided_slice %266 {offsets = [0, 0], sizes = [8, 128], strides = [1, 1]} : vector<16x128xbf16> to vector<8x128xbf16>
    %c0_97 = arith.constant 0 : index
    %c0_98 = arith.constant 0 : index
    %c0_99 = arith.constant 0 : index
    %272 = vector.load %arg4[%c0_97, %c0_98, %c0_99] : memref<2x1x8xf32, #tpu.memory_space<vmem>>, vector<1x1x8xf32>
    %273 = vector.shape_cast %272 : vector<1x1x8xf32> to vector<1x8xf32>
    %cst_100 = arith.constant 0.000000e+00 : f32
    %274 = vector.broadcast %cst_100 : f32 to vector<8x128xf32>
    %275 = vector.extract_strided_slice %269 {offsets = [0, 0], sizes = [8, 32], strides = [1, 1]} : vector<8x128xbf16> to vector<8x32xbf16>
    %276 = vector.extract_strided_slice %270 {offsets = [0, 0], sizes = [8, 32], strides = [1, 1]} : vector<8x128xbf16> to vector<8x32xbf16>
    %cst_101 = arith.constant dense<0.000000e+00> : vector<8x8xf32>
    %277 = tpu.matmul %275, %276, %cst_101 {dimension_numbers = #tpu.dot_dimension_numbers<[1], [1], [0], [0], [0, 0, 1, 0], [], []>} : vector<8x32xbf16>, vector<8x32xbf16>, vector<8x8xf32> -> vector<8x8xf32>
    %278 = vector.broadcast %273 : vector<1x8xf32> to vector<8x8xf32>
    %279 = arith.addf %277, %278 : vector<8x8xf32>
    %cst_102 = arith.constant dense<0xFF800000> : vector<8xf32>
    %280 = vector.multi_reduction <maximumf>, %279, %cst_102 [1] : vector<8x8xf32> to vector<8xf32>
    %281 = vector.shape_cast %280 : vector<8xf32> to vector<8x1xf32>
    %282 = vector.broadcast %281 : vector<8x1xf32> to vector<8x8xf32>
    %283 = arith.subf %279, %282 : vector<8x8xf32>
    %284 = math.exp %283 : vector<8x8xf32>
    %cst_103 = arith.constant dense<0.000000e+00> : vector<8xf32>
    %285 = vector.multi_reduction <add>, %284, %cst_103 [1] : vector<8x8xf32> to vector<8xf32>
    %286 = vector.shape_cast %285 : vector<8xf32> to vector<8x1xf32>
    %287 = tpu.reciprocal %286 {approx = true} : vector<8x1xf32> -> vector<8x1xf32>
    %288 = vector.broadcast %287 : vector<8x1xf32> to vector<8x8xf32>
    %289 = arith.mulf %284, %288 : vector<8x8xf32>
    %290 = arith.truncf %289 : vector<8x8xf32> to vector<8x8xbf16>
    %291 = vector.extract_strided_slice %271 {offsets = [0, 0], sizes = [8, 32], strides = [1, 1]} : vector<8x128xbf16> to vector<8x32xbf16>
    %cst_104 = arith.constant dense<0.000000e+00> : vector<8x32xf32>
    %292 = tpu.matmul %290, %291, %cst_104 {dimension_numbers = #tpu.dot_dimension_numbers<[1], [0], [0], [1], [0, 0, 1, 1], [], []>} : vector<8x8xbf16>, vector<8x32xbf16>, vector<8x32xf32> -> vector<8x32xf32>
    %293 = arith.truncf %292 : vector<8x32xf32> to vector<8x32xbf16>
    %294 = vector.extract_strided_slice %268 {offsets = [0, 0], sizes = [32, 128], strides = [1, 1]} : vector<128x128xbf16> to vector<32x128xbf16>
    %cst_105 = arith.constant dense<0.000000e+00> : vector<8x128xf32>
    %295 = tpu.matmul %293, %294, %cst_105 {dimension_numbers = #tpu.dot_dimension_numbers<[1], [0], [0], [1], [0, 0, 1, 1], [], []>} : vector<8x32xbf16>, vector<32x128xbf16>, vector<8x128xf32> -> vector<8x128xf32>
    %296 = arith.addf %274, %295 : vector<8x128xf32>
    %297 = vector.extract_strided_slice %269 {offsets = [0, 32], sizes = [8, 32], strides = [1, 1]} : vector<8x128xbf16> to vector<8x32xbf16>
    %298 = vector.extract_strided_slice %270 {offsets = [0, 32], sizes = [8, 32], strides = [1, 1]} : vector<8x128xbf16> to vector<8x32xbf16>
    %cst_106 = arith.constant dense<0.000000e+00> : vector<8x8xf32>
    %299 = tpu.matmul %297, %298, %cst_106 {dimension_numbers = #tpu.dot_dimension_numbers<[1], [1], [0], [0], [0, 0, 1, 0], [], []>} : vector<8x32xbf16>, vector<8x32xbf16>, vector<8x8xf32> -> vector<8x8xf32>
    %300 = vector.broadcast %273 : vector<1x8xf32> to vector<8x8xf32>
    %301 = arith.addf %299, %300 : vector<8x8xf32>
    %cst_107 = arith.constant dense<0xFF800000> : vector<8xf32>
    %302 = vector.multi_reduction <maximumf>, %301, %cst_107 [1] : vector<8x8xf32> to vector<8xf32>
    %303 = vector.shape_cast %302 : vector<8xf32> to vector<8x1xf32>
    %304 = vector.broadcast %303 : vector<8x1xf32> to vector<8x8xf32>
    %305 = arith.subf %301, %304 : vector<8x8xf32>
    %306 = math.exp %305 : vector<8x8xf32>
    %cst_108 = arith.constant dense<0.000000e+00> : vector<8xf32>
    %307 = vector.multi_reduction <add>, %306, %cst_108 [1] : vector<8x8xf32> to vector<8xf32>
    %308 = vector.shape_cast %307 : vector<8xf32> to vector<8x1xf32>
    %309 = tpu.reciprocal %308 {approx = true} : vector<8x1xf32> -> vector<8x1xf32>
    %310 = vector.broadcast %309 : vector<8x1xf32> to vector<8x8xf32>
    %311 = arith.mulf %306, %310 : vector<8x8xf32>
    %312 = arith.truncf %311 : vector<8x8xf32> to vector<8x8xbf16>
    %313 = vector.extract_strided_slice %271 {offsets = [0, 32], sizes = [8, 32], strides = [1, 1]} : vector<8x128xbf16> to vector<8x32xbf16>
    %cst_109 = arith.constant dense<0.000000e+00> : vector<8x32xf32>
    %314 = tpu.matmul %312, %313, %cst_109 {dimension_numbers = #tpu.dot_dimension_numbers<[1], [0], [0], [1], [0, 0, 1, 1], [], []>} : vector<8x8xbf16>, vector<8x32xbf16>, vector<8x32xf32> -> vector<8x32xf32>
    %315 = arith.truncf %314 : vector<8x32xf32> to vector<8x32xbf16>
    %316 = vector.extract_strided_slice %268 {offsets = [32, 0], sizes = [32, 128], strides = [1, 1]} : vector<128x128xbf16> to vector<32x128xbf16>
    %cst_110 = arith.constant dense<0.000000e+00> : vector<8x128xf32>
    %317 = tpu.matmul %315, %316, %cst_110 {dimension_numbers = #tpu.dot_dimension_numbers<[1], [0], [0], [1], [0, 0, 1, 1], [], []>} : vector<8x32xbf16>, vector<32x128xbf16>, vector<8x128xf32> -> vector<8x128xf32>
    %318 = arith.addf %296, %317 : vector<8x128xf32>
    %319 = vector.extract_strided_slice %269 {offsets = [0, 64], sizes = [8, 32], strides = [1, 1]} : vector<8x128xbf16> to vector<8x32xbf16>
    %320 = vector.extract_strided_slice %270 {offsets = [0, 64], sizes = [8, 32], strides = [1, 1]} : vector<8x128xbf16> to vector<8x32xbf16>
    %cst_111 = arith.constant dense<0.000000e+00> : vector<8x8xf32>
    %321 = tpu.matmul %319, %320, %cst_111 {dimension_numbers = #tpu.dot_dimension_numbers<[1], [1], [0], [0], [0, 0, 1, 0], [], []>} : vector<8x32xbf16>, vector<8x32xbf16>, vector<8x8xf32> -> vector<8x8xf32>
    %322 = vector.broadcast %273 : vector<1x8xf32> to vector<8x8xf32>
    %323 = arith.addf %321, %322 : vector<8x8xf32>
    %cst_112 = arith.constant dense<0xFF800000> : vector<8xf32>
    %324 = vector.multi_reduction <maximumf>, %323, %cst_112 [1] : vector<8x8xf32> to vector<8xf32>
    %325 = vector.shape_cast %324 : vector<8xf32> to vector<8x1xf32>
    %326 = vector.broadcast %325 : vector<8x1xf32> to vector<8x8xf32>
    %327 = arith.subf %323, %326 : vector<8x8xf32>
    %328 = math.exp %327 : vector<8x8xf32>
    %cst_113 = arith.constant dense<0.000000e+00> : vector<8xf32>
    %329 = vector.multi_reduction <add>, %328, %cst_113 [1] : vector<8x8xf32> to vector<8xf32>
    %330 = vector.shape_cast %329 : vector<8xf32> to vector<8x1xf32>
    %331 = tpu.reciprocal %330 {approx = true} : vector<8x1xf32> -> vector<8x1xf32>
    %332 = vector.broadcast %331 : vector<8x1xf32> to vector<8x8xf32>
    %333 = arith.mulf %328, %332 : vector<8x8xf32>
    %334 = arith.truncf %333 : vector<8x8xf32> to vector<8x8xbf16>
    %335 = vector.extract_strided_slice %271 {offsets = [0, 64], sizes = [8, 32], strides = [1, 1]} : vector<8x128xbf16> to vector<8x32xbf16>
    %cst_114 = arith.constant dense<0.000000e+00> : vector<8x32xf32>
    %336 = tpu.matmul %334, %335, %cst_114 {dimension_numbers = #tpu.dot_dimension_numbers<[1], [0], [0], [1], [0, 0, 1, 1], [], []>} : vector<8x8xbf16>, vector<8x32xbf16>, vector<8x32xf32> -> vector<8x32xf32>
    %337 = arith.truncf %336 : vector<8x32xf32> to vector<8x32xbf16>
    %338 = vector.extract_strided_slice %268 {offsets = [64, 0], sizes = [32, 128], strides = [1, 1]} : vector<128x128xbf16> to vector<32x128xbf16>
    %cst_115 = arith.constant dense<0.000000e+00> : vector<8x128xf32>
    %339 = tpu.matmul %337, %338, %cst_115 {dimension_numbers = #tpu.dot_dimension_numbers<[1], [0], [0], [1], [0, 0, 1, 1], [], []>} : vector<8x32xbf16>, vector<32x128xbf16>, vector<8x128xf32> -> vector<8x128xf32>
    %340 = arith.addf %318, %339 : vector<8x128xf32>
    %341 = vector.extract_strided_slice %269 {offsets = [0, 96], sizes = [8, 32], strides = [1, 1]} : vector<8x128xbf16> to vector<8x32xbf16>
    %342 = vector.extract_strided_slice %270 {offsets = [0, 96], sizes = [8, 32], strides = [1, 1]} : vector<8x128xbf16> to vector<8x32xbf16>
    %cst_116 = arith.constant dense<0.000000e+00> : vector<8x8xf32>
    %343 = tpu.matmul %341, %342, %cst_116 {dimension_numbers = #tpu.dot_dimension_numbers<[1], [1], [0], [0], [0, 0, 1, 0], [], []>} : vector<8x32xbf16>, vector<8x32xbf16>, vector<8x8xf32> -> vector<8x8xf32>
    %344 = vector.broadcast %273 : vector<1x8xf32> to vector<8x8xf32>
    %345 = arith.addf %343, %344 : vector<8x8xf32>
    %cst_117 = arith.constant dense<0xFF800000> : vector<8xf32>
    %346 = vector.multi_reduction <maximumf>, %345, %cst_117 [1] : vector<8x8xf32> to vector<8xf32>
    %347 = vector.shape_cast %346 : vector<8xf32> to vector<8x1xf32>
    %348 = vector.broadcast %347 : vector<8x1xf32> to vector<8x8xf32>
    %349 = arith.subf %345, %348 : vector<8x8xf32>
    %350 = math.exp %349 : vector<8x8xf32>
    %cst_118 = arith.constant dense<0.000000e+00> : vector<8xf32>
    %351 = vector.multi_reduction <add>, %350, %cst_118 [1] : vector<8x8xf32> to vector<8xf32>
    %352 = vector.shape_cast %351 : vector<8xf32> to vector<8x1xf32>
    %353 = tpu.reciprocal %352 {approx = true} : vector<8x1xf32> -> vector<8x1xf32>
    %354 = vector.broadcast %353 : vector<8x1xf32> to vector<8x8xf32>
    %355 = arith.mulf %350, %354 : vector<8x8xf32>
    %356 = arith.truncf %355 : vector<8x8xf32> to vector<8x8xbf16>
    %357 = vector.extract_strided_slice %271 {offsets = [0, 96], sizes = [8, 32], strides = [1, 1]} : vector<8x128xbf16> to vector<8x32xbf16>
    %cst_119 = arith.constant dense<0.000000e+00> : vector<8x32xf32>
    %358 = tpu.matmul %356, %357, %cst_119 {dimension_numbers = #tpu.dot_dimension_numbers<[1], [0], [0], [1], [0, 0, 1, 1], [], []>} : vector<8x8xbf16>, vector<8x32xbf16>, vector<8x32xf32> -> vector<8x32xf32>
    %359 = arith.truncf %358 : vector<8x32xf32> to vector<8x32xbf16>
    %360 = vector.extract_strided_slice %268 {offsets = [96, 0], sizes = [32, 128], strides = [1, 1]} : vector<128x128xbf16> to vector<32x128xbf16>
    %cst_120 = arith.constant dense<0.000000e+00> : vector<8x128xf32>
    %361 = tpu.matmul %359, %360, %cst_120 {dimension_numbers = #tpu.dot_dimension_numbers<[1], [0], [0], [1], [0, 0, 1, 1], [], []>} : vector<8x32xbf16>, vector<32x128xbf16>, vector<8x128xf32> -> vector<8x128xf32>
    %362 = arith.addf %340, %361 : vector<8x128xf32>
    %363 = vector.extract_strided_slice %255 {offsets = [8, 0], sizes = [8, 128], strides = [1, 1]} : vector<16x128xbf16> to vector<8x128xbf16>
    %364 = vector.extract_strided_slice %264 {offsets = [8, 0], sizes = [8, 128], strides = [1, 1]} : vector<16x128xbf16> to vector<8x128xbf16>
    %365 = vector.extract_strided_slice %266 {offsets = [8, 0], sizes = [8, 128], strides = [1, 1]} : vector<16x128xbf16> to vector<8x128xbf16>
    %c1_121 = arith.constant 1 : index
    %c0_122 = arith.constant 0 : index
    %c0_123 = arith.constant 0 : index
    %366 = vector.load %arg4[%c1_121, %c0_122, %c0_123] : memref<2x1x8xf32, #tpu.memory_space<vmem>>, vector<1x1x8xf32>
    %367 = vector.shape_cast %366 : vector<1x1x8xf32> to vector<1x8xf32>
    %cst_124 = arith.constant 0.000000e+00 : f32
    %368 = vector.broadcast %cst_124 : f32 to vector<8x128xf32>
    %369 = vector.extract_strided_slice %363 {offsets = [0, 0], sizes = [8, 32], strides = [1, 1]} : vector<8x128xbf16> to vector<8x32xbf16>
    %370 = vector.extract_strided_slice %364 {offsets = [0, 0], sizes = [8, 32], strides = [1, 1]} : vector<8x128xbf16> to vector<8x32xbf16>
    %cst_125 = arith.constant dense<0.000000e+00> : vector<8x8xf32>
    %371 = tpu.matmul %369, %370, %cst_125 {dimension_numbers = #tpu.dot_dimension_numbers<[1], [1], [0], [0], [0, 0, 1, 0], [], []>} : vector<8x32xbf16>, vector<8x32xbf16>, vector<8x8xf32> -> vector<8x8xf32>
    %372 = vector.broadcast %367 : vector<1x8xf32> to vector<8x8xf32>
    %373 = arith.addf %371, %372 : vector<8x8xf32>
    %cst_126 = arith.constant dense<0xFF800000> : vector<8xf32>
    %374 = vector.multi_reduction <maximumf>, %373, %cst_126 [1] : vector<8x8xf32> to vector<8xf32>
    %375 = vector.shape_cast %374 : vector<8xf32> to vector<8x1xf32>
    %376 = vector.broadcast %375 : vector<8x1xf32> to vector<8x8xf32>
    %377 = arith.subf %373, %376 : vector<8x8xf32>
    %378 = math.exp %377 : vector<8x8xf32>
    %cst_127 = arith.constant dense<0.000000e+00> : vector<8xf32>
    %379 = vector.multi_reduction <add>, %378, %cst_127 [1] : vector<8x8xf32> to vector<8xf32>
    %380 = vector.shape_cast %379 : vector<8xf32> to vector<8x1xf32>
    %381 = tpu.reciprocal %380 {approx = true} : vector<8x1xf32> -> vector<8x1xf32>
    %382 = vector.broadcast %381 : vector<8x1xf32> to vector<8x8xf32>
    %383 = arith.mulf %378, %382 : vector<8x8xf32>
    %384 = arith.truncf %383 : vector<8x8xf32> to vector<8x8xbf16>
    %385 = vector.extract_strided_slice %365 {offsets = [0, 0], sizes = [8, 32], strides = [1, 1]} : vector<8x128xbf16> to vector<8x32xbf16>
    %cst_128 = arith.constant dense<0.000000e+00> : vector<8x32xf32>
    %386 = tpu.matmul %384, %385, %cst_128 {dimension_numbers = #tpu.dot_dimension_numbers<[1], [0], [0], [1], [0, 0, 1, 1], [], []>} : vector<8x8xbf16>, vector<8x32xbf16>, vector<8x32xf32> -> vector<8x32xf32>
    %387 = arith.truncf %386 : vector<8x32xf32> to vector<8x32xbf16>
    %388 = vector.extract_strided_slice %268 {offsets = [0, 0], sizes = [32, 128], strides = [1, 1]} : vector<128x128xbf16> to vector<32x128xbf16>
    %cst_129 = arith.constant dense<0.000000e+00> : vector<8x128xf32>
    %389 = tpu.matmul %387, %388, %cst_129 {dimension_numbers = #tpu.dot_dimension_numbers<[1], [0], [0], [1], [0, 0, 1, 1], [], []>} : vector<8x32xbf16>, vector<32x128xbf16>, vector<8x128xf32> -> vector<8x128xf32>
    %390 = arith.addf %368, %389 : vector<8x128xf32>
    %391 = vector.extract_strided_slice %363 {offsets = [0, 32], sizes = [8, 32], strides = [1, 1]} : vector<8x128xbf16> to vector<8x32xbf16>
    %392 = vector.extract_strided_slice %364 {offsets = [0, 32], sizes = [8, 32], strides = [1, 1]} : vector<8x128xbf16> to vector<8x32xbf16>
    %cst_130 = arith.constant dense<0.000000e+00> : vector<8x8xf32>
    %393 = tpu.matmul %391, %392, %cst_130 {dimension_numbers = #tpu.dot_dimension_numbers<[1], [1], [0], [0], [0, 0, 1, 0], [], []>} : vector<8x32xbf16>, vector<8x32xbf16>, vector<8x8xf32> -> vector<8x8xf32>
    %394 = vector.broadcast %367 : vector<1x8xf32> to vector<8x8xf32>
    %395 = arith.addf %393, %394 : vector<8x8xf32>
    %cst_131 = arith.constant dense<0xFF800000> : vector<8xf32>
    %396 = vector.multi_reduction <maximumf>, %395, %cst_131 [1] : vector<8x8xf32> to vector<8xf32>
    %397 = vector.shape_cast %396 : vector<8xf32> to vector<8x1xf32>
    %398 = vector.broadcast %397 : vector<8x1xf32> to vector<8x8xf32>
    %399 = arith.subf %395, %398 : vector<8x8xf32>
    %400 = math.exp %399 : vector<8x8xf32>
    %cst_132 = arith.constant dense<0.000000e+00> : vector<8xf32>
    %401 = vector.multi_reduction <add>, %400, %cst_132 [1] : vector<8x8xf32> to vector<8xf32>
    %402 = vector.shape_cast %401 : vector<8xf32> to vector<8x1xf32>
    %403 = tpu.reciprocal %402 {approx = true} : vector<8x1xf32> -> vector<8x1xf32>
    %404 = vector.broadcast %403 : vector<8x1xf32> to vector<8x8xf32>
    %405 = arith.mulf %400, %404 : vector<8x8xf32>
    %406 = arith.truncf %405 : vector<8x8xf32> to vector<8x8xbf16>
    %407 = vector.extract_strided_slice %365 {offsets = [0, 32], sizes = [8, 32], strides = [1, 1]} : vector<8x128xbf16> to vector<8x32xbf16>
    %cst_133 = arith.constant dense<0.000000e+00> : vector<8x32xf32>
    %408 = tpu.matmul %406, %407, %cst_133 {dimension_numbers = #tpu.dot_dimension_numbers<[1], [0], [0], [1], [0, 0, 1, 1], [], []>} : vector<8x8xbf16>, vector<8x32xbf16>, vector<8x32xf32> -> vector<8x32xf32>
    %409 = arith.truncf %408 : vector<8x32xf32> to vector<8x32xbf16>
    %410 = vector.extract_strided_slice %268 {offsets = [32, 0], sizes = [32, 128], strides = [1, 1]} : vector<128x128xbf16> to vector<32x128xbf16>
    %cst_134 = arith.constant dense<0.000000e+00> : vector<8x128xf32>
    %411 = tpu.matmul %409, %410, %cst_134 {dimension_numbers = #tpu.dot_dimension_numbers<[1], [0], [0], [1], [0, 0, 1, 1], [], []>} : vector<8x32xbf16>, vector<32x128xbf16>, vector<8x128xf32> -> vector<8x128xf32>
    %412 = arith.addf %390, %411 : vector<8x128xf32>
    %413 = vector.extract_strided_slice %363 {offsets = [0, 64], sizes = [8, 32], strides = [1, 1]} : vector<8x128xbf16> to vector<8x32xbf16>
    %414 = vector.extract_strided_slice %364 {offsets = [0, 64], sizes = [8, 32], strides = [1, 1]} : vector<8x128xbf16> to vector<8x32xbf16>
    %cst_135 = arith.constant dense<0.000000e+00> : vector<8x8xf32>
    %415 = tpu.matmul %413, %414, %cst_135 {dimension_numbers = #tpu.dot_dimension_numbers<[1], [1], [0], [0], [0, 0, 1, 0], [], []>} : vector<8x32xbf16>, vector<8x32xbf16>, vector<8x8xf32> -> vector<8x8xf32>
    %416 = vector.broadcast %367 : vector<1x8xf32> to vector<8x8xf32>
    %417 = arith.addf %415, %416 : vector<8x8xf32>
    %cst_136 = arith.constant dense<0xFF800000> : vector<8xf32>
    %418 = vector.multi_reduction <maximumf>, %417, %cst_136 [1] : vector<8x8xf32> to vector<8xf32>
    %419 = vector.shape_cast %418 : vector<8xf32> to vector<8x1xf32>
    %420 = vector.broadcast %419 : vector<8x1xf32> to vector<8x8xf32>
    %421 = arith.subf %417, %420 : vector<8x8xf32>
    %422 = math.exp %421 : vector<8x8xf32>
    %cst_137 = arith.constant dense<0.000000e+00> : vector<8xf32>
    %423 = vector.multi_reduction <add>, %422, %cst_137 [1] : vector<8x8xf32> to vector<8xf32>
    %424 = vector.shape_cast %423 : vector<8xf32> to vector<8x1xf32>
    %425 = tpu.reciprocal %424 {approx = true} : vector<8x1xf32> -> vector<8x1xf32>
    %426 = vector.broadcast %425 : vector<8x1xf32> to vector<8x8xf32>
    %427 = arith.mulf %422, %426 : vector<8x8xf32>
    %428 = arith.truncf %427 : vector<8x8xf32> to vector<8x8xbf16>
    %429 = vector.extract_strided_slice %365 {offsets = [0, 64], sizes = [8, 32], strides = [1, 1]} : vector<8x128xbf16> to vector<8x32xbf16>
    %cst_138 = arith.constant dense<0.000000e+00> : vector<8x32xf32>
    %430 = tpu.matmul %428, %429, %cst_138 {dimension_numbers = #tpu.dot_dimension_numbers<[1], [0], [0], [1], [0, 0, 1, 1], [], []>} : vector<8x8xbf16>, vector<8x32xbf16>, vector<8x32xf32> -> vector<8x32xf32>
    %431 = arith.truncf %430 : vector<8x32xf32> to vector<8x32xbf16>
    %432 = vector.extract_strided_slice %268 {offsets = [64, 0], sizes = [32, 128], strides = [1, 1]} : vector<128x128xbf16> to vector<32x128xbf16>
    %cst_139 = arith.constant dense<0.000000e+00> : vector<8x128xf32>
    %433 = tpu.matmul %431, %432, %cst_139 {dimension_numbers = #tpu.dot_dimension_numbers<[1], [0], [0], [1], [0, 0, 1, 1], [], []>} : vector<8x32xbf16>, vector<32x128xbf16>, vector<8x128xf32> -> vector<8x128xf32>
    %434 = arith.addf %412, %433 : vector<8x128xf32>
    %435 = vector.extract_strided_slice %363 {offsets = [0, 96], sizes = [8, 32], strides = [1, 1]} : vector<8x128xbf16> to vector<8x32xbf16>
    %436 = vector.extract_strided_slice %364 {offsets = [0, 96], sizes = [8, 32], strides = [1, 1]} : vector<8x128xbf16> to vector<8x32xbf16>
    %cst_140 = arith.constant dense<0.000000e+00> : vector<8x8xf32>
    %437 = tpu.matmul %435, %436, %cst_140 {dimension_numbers = #tpu.dot_dimension_numbers<[1], [1], [0], [0], [0, 0, 1, 0], [], []>} : vector<8x32xbf16>, vector<8x32xbf16>, vector<8x8xf32> -> vector<8x8xf32>
    %438 = vector.broadcast %367 : vector<1x8xf32> to vector<8x8xf32>
    %439 = arith.addf %437, %438 : vector<8x8xf32>
    %cst_141 = arith.constant dense<0xFF800000> : vector<8xf32>
    %440 = vector.multi_reduction <maximumf>, %439, %cst_141 [1] : vector<8x8xf32> to vector<8xf32>
    %441 = vector.shape_cast %440 : vector<8xf32> to vector<8x1xf32>
    %442 = vector.broadcast %441 : vector<8x1xf32> to vector<8x8xf32>
    %443 = arith.subf %439, %442 : vector<8x8xf32>
    %444 = math.exp %443 : vector<8x8xf32>
    %cst_142 = arith.constant dense<0.000000e+00> : vector<8xf32>
    %445 = vector.multi_reduction <add>, %444, %cst_142 [1] : vector<8x8xf32> to vector<8xf32>
    %446 = vector.shape_cast %445 : vector<8xf32> to vector<8x1xf32>
    %447 = tpu.reciprocal %446 {approx = true} : vector<8x1xf32> -> vector<8x1xf32>
    %448 = vector.broadcast %447 : vector<8x1xf32> to vector<8x8xf32>
    %449 = arith.mulf %444, %448 : vector<8x8xf32>
    %450 = arith.truncf %449 : vector<8x8xf32> to vector<8x8xbf16>
    %451 = vector.extract_strided_slice %365 {offsets = [0, 96], sizes = [8, 32], strides = [1, 1]} : vector<8x128xbf16> to vector<8x32xbf16>
    %cst_143 = arith.constant dense<0.000000e+00> : vector<8x32xf32>
    %452 = tpu.matmul %450, %451, %cst_143 {dimension_numbers = #tpu.dot_dimension_numbers<[1], [0], [0], [1], [0, 0, 1, 1], [], []>} : vector<8x8xbf16>, vector<8x32xbf16>, vector<8x32xf32> -> vector<8x32xf32>
    %453 = arith.truncf %452 : vector<8x32xf32> to vector<8x32xbf16>
    %454 = vector.extract_strided_slice %268 {offsets = [96, 0], sizes = [32, 128], strides = [1, 1]} : vector<128x128xbf16> to vector<32x128xbf16>
    %cst_144 = arith.constant dense<0.000000e+00> : vector<8x128xf32>
    %455 = tpu.matmul %453, %454, %cst_144 {dimension_numbers = #tpu.dot_dimension_numbers<[1], [0], [0], [1], [0, 0, 1, 1], [], []>} : vector<8x32xbf16>, vector<32x128xbf16>, vector<8x128xf32> -> vector<8x128xf32>
    %456 = arith.addf %434, %455 : vector<8x128xf32>
    %457 = tpu.concatenate %362, %456 in 0 : vector<8x128xf32>, vector<8x128xf32> -> vector<16x128xf32>
    %c0_145 = arith.constant 0 : index
    %c0_146 = arith.constant 0 : index
    %c0_147 = arith.constant 0 : index
    %458 = vector.load %arg16[%c0_145, %c0_146, %c0_147] : memref<1x1x128xf32, #tpu.memory_space<vmem>>, vector<1x1x128xf32>
    %459 = vector.shape_cast %458 : vector<1x1x128xf32> to vector<1x128xf32>
    %460 = vector.broadcast %459 : vector<1x128xf32> to vector<16x128xf32>
    %461 = arith.addf %457, %460 : vector<16x128xf32>
    %462 = arith.addf %244, %461 : vector<16x128xf32>
    %c0_148 = arith.constant 0 : index
    %c0_149 = arith.constant 0 : index
    %c0_150 = arith.constant 0 : index
    %463 = vector.load %arg17[%c0_148, %c0_149, %c0_150] : memref<1x1x128xf32, #tpu.memory_space<vmem>>, vector<1x1x128xf32>
    %464 = vector.shape_cast %463 : vector<1x1x128xf32> to vector<1x128xf32>
    %c0_151 = arith.constant 0 : index
    %c0_152 = arith.constant 0 : index
    %c0_153 = arith.constant 0 : index
    %465 = vector.load %arg18[%c0_151, %c0_152, %c0_153] : memref<1x1x128xf32, #tpu.memory_space<vmem>>, vector<1x1x128xf32>
    %466 = vector.shape_cast %465 : vector<1x1x128xf32> to vector<1x128xf32>
    %cst_154 = arith.constant dense<0.000000e+00> : vector<16xf32>
    %467 = vector.multi_reduction <add>, %462, %cst_154 [1] : vector<16x128xf32> to vector<16xf32>
    %468 = vector.shape_cast %467 : vector<16xf32> to vector<16x1xf32>
    %cst_155 = arith.constant 1.280000e+02 : f32
    %469 = vector.broadcast %cst_155 : f32 to vector<16x1xf32>
    %470 = arith.divf %468, %469 : vector<16x1xf32>
    %471 = vector.broadcast %470 : vector<16x1xf32> to vector<16x128xf32>
    %472 = arith.subf %462, %471 : vector<16x128xf32>
    %473 = arith.mulf %472, %472 : vector<16x128xf32>
    %cst_156 = arith.constant dense<0.000000e+00> : vector<16xf32>
    %474 = vector.multi_reduction <add>, %473, %cst_156 [1] : vector<16x128xf32> to vector<16xf32>
    %475 = vector.shape_cast %474 : vector<16xf32> to vector<16x1xf32>
    %cst_157 = arith.constant 1.280000e+02 : f32
    %476 = vector.broadcast %cst_157 : f32 to vector<16x1xf32>
    %477 = arith.divf %475, %476 : vector<16x1xf32>
    %cst_158 = arith.constant 9.99999974E-6 : f32
    %478 = vector.broadcast %cst_158 : f32 to vector<16x1xf32>
    %479 = arith.addf %477, %478 : vector<16x1xf32>
    %480 = math.rsqrt %479 : vector<16x1xf32>
    %481 = vector.broadcast %480 : vector<16x1xf32> to vector<16x128xf32>
    %482 = arith.mulf %472, %481 : vector<16x128xf32>
    %483 = vector.broadcast %464 : vector<1x128xf32> to vector<16x128xf32>
    %484 = arith.mulf %482, %483 : vector<16x128xf32>
    %485 = vector.broadcast %466 : vector<1x128xf32> to vector<16x128xf32>
    %486 = arith.addf %484, %485 : vector<16x128xf32>
    %487 = arith.truncf %486 : vector<16x128xf32> to vector<16x128xbf16>
    %c0_159 = arith.constant 0 : index
    %c0_160 = arith.constant 0 : index
    %c0_161 = arith.constant 0 : index
    %488 = vector.load %arg19[%c0_159, %c0_160, %c0_161] : memref<1x128x128xbf16, #tpu.memory_space<vmem>>, vector<1x128x128xbf16>
    %489 = vector.shape_cast %488 : vector<1x128x128xbf16> to vector<128x128xbf16>
    %cst_162 = arith.constant dense<0.000000e+00> : vector<16x128xf32>
    %490 = tpu.matmul %487, %489, %cst_162 {dimension_numbers = #tpu.dot_dimension_numbers<[1], [0], [0], [1], [0, 0, 1, 1], [], []>} : vector<16x128xbf16>, vector<128x128xbf16>, vector<16x128xf32> -> vector<16x128xf32>
    %c0_163 = arith.constant 0 : index
    %c0_164 = arith.constant 0 : index
    %c0_165 = arith.constant 0 : index
    %491 = vector.load %arg20[%c0_163, %c0_164, %c0_165] : memref<1x1x128xf32, #tpu.memory_space<vmem>>, vector<1x1x128xf32>
    %492 = vector.shape_cast %491 : vector<1x1x128xf32> to vector<1x128xf32>
    %493 = vector.broadcast %492 : vector<1x128xf32> to vector<16x128xf32>
    %494 = arith.addf %490, %493 : vector<16x128xf32>
    %cst_166 = arith.constant 0.000000e+00 : f32
    %495 = vector.broadcast %cst_166 : f32 to vector<16x128xf32>
    %496 = arith.maximumf %494, %495 : vector<16x128xf32>
    %497 = arith.truncf %496 : vector<16x128xf32> to vector<16x128xbf16>
    %c0_167 = arith.constant 0 : index
    %c0_168 = arith.constant 0 : index
    %c0_169 = arith.constant 0 : index
    %498 = vector.load %arg21[%c0_167, %c0_168, %c0_169] : memref<1x128x128xbf16, #tpu.memory_space<vmem>>, vector<1x128x128xbf16>
    %499 = vector.shape_cast %498 : vector<1x128x128xbf16> to vector<128x128xbf16>
    %cst_170 = arith.constant dense<0.000000e+00> : vector<16x128xf32>
    %500 = tpu.matmul %497, %499, %cst_170 {dimension_numbers = #tpu.dot_dimension_numbers<[1], [0], [0], [1], [0, 0, 1, 1], [], []>} : vector<16x128xbf16>, vector<128x128xbf16>, vector<16x128xf32> -> vector<16x128xf32>
    %c0_171 = arith.constant 0 : index
    %c0_172 = arith.constant 0 : index
    %c0_173 = arith.constant 0 : index
    %501 = vector.load %arg22[%c0_171, %c0_172, %c0_173] : memref<1x1x128xf32, #tpu.memory_space<vmem>>, vector<1x1x128xf32>
    %502 = vector.shape_cast %501 : vector<1x1x128xf32> to vector<1x128xf32>
    %503 = vector.broadcast %502 : vector<1x128xf32> to vector<16x128xf32>
    %504 = arith.addf %500, %503 : vector<16x128xf32>
    %505 = arith.addf %486, %504 : vector<16x128xf32>
    %c0_174 = arith.constant 0 : index
    %c0_175 = arith.constant 0 : index
    %c0_176 = arith.constant 0 : index
    %506 = vector.load %arg23[%c0_174, %c0_175, %c0_176] : memref<1x1x128xf32, #tpu.memory_space<vmem>>, vector<1x1x128xf32>
    %507 = vector.shape_cast %506 : vector<1x1x128xf32> to vector<1x128xf32>
    %c0_177 = arith.constant 0 : index
    %c0_178 = arith.constant 0 : index
    %c0_179 = arith.constant 0 : index
    %508 = vector.load %arg24[%c0_177, %c0_178, %c0_179] : memref<1x1x128xf32, #tpu.memory_space<vmem>>, vector<1x1x128xf32>
    %509 = vector.shape_cast %508 : vector<1x1x128xf32> to vector<1x128xf32>
    %cst_180 = arith.constant dense<0.000000e+00> : vector<16xf32>
    %510 = vector.multi_reduction <add>, %505, %cst_180 [1] : vector<16x128xf32> to vector<16xf32>
    %511 = vector.shape_cast %510 : vector<16xf32> to vector<16x1xf32>
    %cst_181 = arith.constant 1.280000e+02 : f32
    %512 = vector.broadcast %cst_181 : f32 to vector<16x1xf32>
    %513 = arith.divf %511, %512 : vector<16x1xf32>
    %514 = vector.broadcast %513 : vector<16x1xf32> to vector<16x128xf32>
    %515 = arith.subf %505, %514 : vector<16x128xf32>
    %516 = arith.mulf %515, %515 : vector<16x128xf32>
    %cst_182 = arith.constant dense<0.000000e+00> : vector<16xf32>
    %517 = vector.multi_reduction <add>, %516, %cst_182 [1] : vector<16x128xf32> to vector<16xf32>
    %518 = vector.shape_cast %517 : vector<16xf32> to vector<16x1xf32>
    %cst_183 = arith.constant 1.280000e+02 : f32
    %519 = vector.broadcast %cst_183 : f32 to vector<16x1xf32>
    %520 = arith.divf %518, %519 : vector<16x1xf32>
    %cst_184 = arith.constant 9.99999974E-6 : f32
    %521 = vector.broadcast %cst_184 : f32 to vector<16x1xf32>
    %522 = arith.addf %520, %521 : vector<16x1xf32>
    %523 = math.rsqrt %522 : vector<16x1xf32>
    %524 = vector.broadcast %523 : vector<16x1xf32> to vector<16x128xf32>
    %525 = arith.mulf %515, %524 : vector<16x128xf32>
    %526 = vector.broadcast %507 : vector<1x128xf32> to vector<16x128xf32>
    %527 = arith.mulf %525, %526 : vector<16x128xf32>
    %528 = vector.broadcast %509 : vector<1x128xf32> to vector<16x128xf32>
    %529 = arith.addf %527, %528 : vector<16x128xf32>
    %530 = arith.truncf %529 : vector<16x128xf32> to vector<16x128xbf16>
    %531 = vector.shape_cast %530 : vector<16x128xbf16> to vector<2x8x128xbf16>
    %c0_185 = arith.constant 0 : index
    %c0_186 = arith.constant 0 : index
    %c0_187 = arith.constant 0 : index
    %532 = vector.load %arg28[%c0_185, %c0_186, %c0_187] : memref<2x8x128xbf16, #tpu.memory_space<vmem>>, vector<2x8x128xbf16>
    tpu.vector_store %arg28[%c0_185, %c0_186, %c0_187], %531 {strides = array<i32>} : memref<2x8x128xbf16, #tpu.memory_space<vmem>>, vector<2x8x128xbf16>,
    %c1_i32 = arith.constant 1 : i32
    %533 = arith.cmpi eq, %arg0, %c1_i32 : i32
    %534 = arith.extui %533 : i1 to i32
    %c0_i32_188 = arith.constant 0 : i32
    %535 = arith.cmpi ne, %534, %c0_i32_188 : i32
    scf.if %535 {
      %536 = arith.truncf %529 : vector<16x128xf32> to vector<16x128xbf16>
      %c0_189 = arith.constant 0 : index
      %c0_190 = arith.constant 0 : index
      %537 = vector.load %arg25[%c0_189, %c0_190] : memref<128x128xbf16, #tpu.memory_space<vmem>>, vector<128x128xbf16>
      %cst_191 = arith.constant dense<0.000000e+00> : vector<16x128xf32>
      %538 = tpu.matmul %536, %537, %cst_191 {dimension_numbers = #tpu.dot_dimension_numbers<[1], [0], [0], [1], [0, 0, 1, 1], [], []>} : vector<16x128xbf16>, vector<128x128xbf16>, vector<16x128xf32> -> vector<16x128xf32>
      %c0_192 = arith.constant 0 : index
      %c0_193 = arith.constant 0 : index
      %539 = vector.load %arg26[%c0_192, %c0_193] : memref<1x128xf32, #tpu.memory_space<vmem>>, vector<1x128xf32>
      %540 = vector.broadcast %539 : vector<1x128xf32> to vector<16x128xf32>
      %541 = arith.addf %538, %540 : vector<16x128xf32>
      %542 = vector.shape_cast %541 : vector<16x128xf32> to vector<2x8x128xf32>
      %c0_194 = arith.constant 0 : index
      %c0_195 = arith.constant 0 : index
      %c0_196 = arith.constant 0 : index
      %543 = vector.load %arg27[%c0_194, %c0_195, %c0_196] : memref<2x8x128xf32, #tpu.memory_space<vmem>>, vector<2x8x128xf32>
      tpu.vector_store %arg27[%c0_194, %c0_195, %c0_196], %542 {strides = array<i32>} : memref<2x8x128xf32, #tpu.memory_space<vmem>>, vector<2x8x128xf32>,
    } else {
    }
    return
  }
  func.func @transform_0(%arg0: i32) -> (i32, i32, i32) {
    %c0_i32 = arith.constant 0 : i32
    %c0_i32_0 = arith.constant 0 : i32
    %c0_i32_1 = arith.constant 0 : i32
    %c0_i32_2 = arith.constant 0 : i32
    return %c0_i32, %c0_i32_0, %c0_i32_1 : i32, i32, i32
  }
  func.func @transform_1(%arg0: i32) -> (i32, i32, i32) {
    %c0_i32 = arith.constant 0 : i32
    %c0_i32_0 = arith.constant 0 : i32
    %c0_i32_1 = arith.constant 0 : i32
    %c0_i32_2 = arith.constant 0 : i32
    return %c0_i32, %c0_i32_0, %c0_i32_1 : i32, i32, i32
  }
  func.func @transform_2(%arg0: i32) -> (i32, i32, i32) {
    %c0_i32 = arith.constant 0 : i32
    %c0_i32_0 = arith.constant 0 : i32
    %c0_i32_1 = arith.constant 0 : i32
    %c0_i32_2 = arith.constant 0 : i32
    return %c0_i32, %c0_i32_0, %c0_i32_1 : i32, i32, i32
  }
  func.func @transform_3(%arg0: i32) -> (i32, i32, i32) {
    %c0_i32 = arith.constant 0 : i32
    %c0_i32_0 = arith.constant 0 : i32
    %c0_i32_1 = arith.constant 0 : i32
    %c0_i32_2 = arith.constant 0 : i32
    return %c0_i32, %c0_i32_0, %c0_i32_1 : i32, i32, i32
  }
  func.func @transform_4(%arg0: i32) -> (i32, i32, i32) {
    %c0_i32 = arith.constant 0 : i32
    %c0_i32_0 = arith.constant 0 : i32
    %c0_i32_1 = arith.constant 0 : i32
    return %arg0, %c0_i32, %c0_i32_0 : i32, i32, i32
  }
  func.func @transform_5(%arg0: i32) -> (i32, i32, i32) {
    %c0_i32 = arith.constant 0 : i32
    %c0_i32_0 = arith.constant 0 : i32
    %c0_i32_1 = arith.constant 0 : i32
    return %arg0, %c0_i32, %c0_i32_0 : i32, i32, i32
  }
  func.func @transform_6(%arg0: i32) -> (i32, i32, i32) {
    %c0_i32 = arith.constant 0 : i32
    %c0_i32_0 = arith.constant 0 : i32
    %c0_i32_1 = arith.constant 0 : i32
    return %arg0, %c0_i32, %c0_i32_0 : i32, i32, i32
  }
  func.func @transform_7(%arg0: i32) -> (i32, i32, i32) {
    %c0_i32 = arith.constant 0 : i32
    %c0_i32_0 = arith.constant 0 : i32
    %c0_i32_1 = arith.constant 0 : i32
    return %arg0, %c0_i32, %c0_i32_0 : i32, i32, i32
  }
  func.func @transform_8(%arg0: i32) -> (i32, i32, i32) {
    %c0_i32 = arith.constant 0 : i32
    %c0_i32_0 = arith.constant 0 : i32
    %c0_i32_1 = arith.constant 0 : i32
    return %arg0, %c0_i32, %c0_i32_0 : i32, i32, i32
  }
  func.func @transform_9(%arg0: i32) -> (i32, i32, i32) {
    %c0_i32 = arith.constant 0 : i32
    %c0_i32_0 = arith.constant 0 : i32
    %c0_i32_1 = arith.constant 0 : i32
    return %arg0, %c0_i32, %c0_i32_0 : i32, i32, i32
  }
  func.func @transform_10(%arg0: i32) -> (i32, i32, i32) {
    %c0_i32 = arith.constant 0 : i32
    %c0_i32_0 = arith.constant 0 : i32
    %c0_i32_1 = arith.constant 0 : i32
    return %arg0, %c0_i32, %c0_i32_0 : i32, i32, i32
  }
  func.func @transform_11(%arg0: i32) -> (i32, i32, i32) {
    %c0_i32 = arith.constant 0 : i32
    %c0_i32_0 = arith.constant 0 : i32
    %c0_i32_1 = arith.constant 0 : i32
    return %arg0, %c0_i32, %c0_i32_0 : i32, i32, i32
  }
  func.func @transform_12(%arg0: i32) -> (i32, i32, i32) {
    %c0_i32 = arith.constant 0 : i32
    %c0_i32_0 = arith.constant 0 : i32
    %c0_i32_1 = arith.constant 0 : i32
    return %arg0, %c0_i32, %c0_i32_0 : i32, i32, i32
  }
  func.func @transform_13(%arg0: i32) -> (i32, i32, i32) {
    %c0_i32 = arith.constant 0 : i32
    %c0_i32_0 = arith.constant 0 : i32
    %c0_i32_1 = arith.constant 0 : i32
    return %arg0, %c0_i32, %c0_i32_0 : i32, i32, i32
  }
  func.func @transform_14(%arg0: i32) -> (i32, i32, i32) {
    %c0_i32 = arith.constant 0 : i32
    %c0_i32_0 = arith.constant 0 : i32
    %c0_i32_1 = arith.constant 0 : i32
    return %arg0, %c0_i32, %c0_i32_0 : i32, i32, i32
  }
  func.func @transform_15(%arg0: i32) -> (i32, i32, i32) {
    %c0_i32 = arith.constant 0 : i32
    %c0_i32_0 = arith.constant 0 : i32
    %c0_i32_1 = arith.constant 0 : i32
    return %arg0, %c0_i32, %c0_i32_0 : i32, i32, i32
  }
  func.func @transform_16(%arg0: i32) -> (i32, i32, i32) {
    %c0_i32 = arith.constant 0 : i32
    %c0_i32_0 = arith.constant 0 : i32
    %c0_i32_1 = arith.constant 0 : i32
    return %arg0, %c0_i32, %c0_i32_0 : i32, i32, i32
  }
  func.func @transform_17(%arg0: i32) -> (i32, i32, i32) {
    %c0_i32 = arith.constant 0 : i32
    %c0_i32_0 = arith.constant 0 : i32
    %c0_i32_1 = arith.constant 0 : i32
    return %arg0, %c0_i32, %c0_i32_0 : i32, i32, i32
  }
  func.func @transform_18(%arg0: i32) -> (i32, i32, i32) {
    %c0_i32 = arith.constant 0 : i32
    %c0_i32_0 = arith.constant 0 : i32
    %c0_i32_1 = arith.constant 0 : i32
    return %arg0, %c0_i32, %c0_i32_0 : i32, i32, i32
  }
  func.func @transform_19(%arg0: i32) -> (i32, i32, i32) {
    %c0_i32 = arith.constant 0 : i32
    %c0_i32_0 = arith.constant 0 : i32
    %c0_i32_1 = arith.constant 0 : i32
    return %arg0, %c0_i32, %c0_i32_0 : i32, i32, i32
  }
  func.func @transform_20(%arg0: i32) -> (i32, i32, i32) {
    %c0_i32 = arith.constant 0 : i32
    %c0_i32_0 = arith.constant 0 : i32
    %c0_i32_1 = arith.constant 0 : i32
    return %arg0, %c0_i32, %c0_i32_0 : i32, i32, i32
  }
  func.func @transform_21(%arg0: i32) -> (i32, i32, i32) {
    %c0_i32 = arith.constant 0 : i32
    %c0_i32_0 = arith.constant 0 : i32
    %c0_i32_1 = arith.constant 0 : i32
    return %arg0, %c0_i32, %c0_i32_0 : i32, i32, i32
  }
  func.func @transform_22(%arg0: i32) -> (i32, i32, i32) {
    %c0_i32 = arith.constant 0 : i32
    %c0_i32_0 = arith.constant 0 : i32
    %c0_i32_1 = arith.constant 0 : i32
    return %arg0, %c0_i32, %c0_i32_0 : i32, i32, i32
  }
  func.func @transform_23(%arg0: i32) -> (i32, i32, i32) {
    %c0_i32 = arith.constant 0 : i32
    %c0_i32_0 = arith.constant 0 : i32
    %c0_i32_1 = arith.constant 0 : i32
    return %arg0, %c0_i32, %c0_i32_0 : i32, i32, i32
  }
  func.func @transform_24(%arg0: i32) -> (i32, i32) {
    %c0_i32 = arith.constant 0 : i32
    %c0_i32_0 = arith.constant 0 : i32
    %c0_i32_1 = arith.constant 0 : i32
    return %c0_i32, %c0_i32_0 : i32, i32
  }
  func.func @transform_25(%arg0: i32) -> (i32, i32) {
    %c0_i32 = arith.constant 0 : i32
    %c0_i32_0 = arith.constant 0 : i32
    %c0_i32_1 = arith.constant 0 : i32
    return %c0_i32, %c0_i32_0 : i32, i32
  }
  func.func @transform_26(%arg0: i32) -> (i32, i32, i32) {
    %c0_i32 = arith.constant 0 : i32
    %c0_i32_0 = arith.constant 0 : i32
    %c0_i32_1 = arith.constant 0 : i32
    %c0_i32_2 = arith.constant 0 : i32
    return %c0_i32, %c0_i32_0, %c0_i32_1 : i32, i32, i32
  }
}

</mosaic_0001>

<bundles_post_ra>
// kernel: ideal_translator_forward.2
= control target key start
LH: loop header
LB: loop body
LE: loop exit
PB: predicated region body
PF: predicated region fallthrough
CT: control target
= control target key end

     0   :  { %s4016_s0 = inlined_call_operand.vmem [shape: bf16[2,8,128], index: 0, kind: input, shape index: {}]   ;;  %s4017_s1 = inlined_call_operand.vmem [shape: f32[2,1,8], index: 1, kind: input, shape index: {}]   ;;  %s4018_s2 = inlined_call_operand.hbm [shape: bf16[2,128,384], index: 2, kind: input, shape index: {}]   ;;  %s4019_s3 = inlined_call_operand.vmem [shape: f32[2,1,384], index: 3, kind: input, shape index: {}]   ;;  %s4020_s4 = inlined_call_operand.vmem [shape: bf16[2,128,128], index: 4, kind: input, shape index: {}]   ;;  %s4021_s5 = inlined_call_operand.vmem [shape: f32[2,1,128], index: 5, kind: input, shape index: {}]   ;;  %s4022_s6 = inlined_call_operand.vmem [shape: f32[2,1,128], index: 6, kind: input, shape index: {}]   ;;  %s4023_s7 = inlined_call_operand.vmem [shape: f32[2,1,128], index: 7, kind: input, shape index: {}]   ;;  %s4024_s8 = inlined_call_operand.hbm [shape: bf16[2,128,128], index: 8, kind: input, shape index: {}]   ;;  %s4025_s9 = inlined_call_operand.vmem [shape: f32[2,1,128], index: 9, kind: input, shape index: {}]   ;;  %s4026_s10 = inlined_call_operand.hbm [shape: bf16[2,128,128], index: 10, kind: input, shape index: {}]   ;;  %s4027_s11 = inlined_call_operand.vmem [shape: f32[2,1,128], index: 11, kind: input, shape index: {}]   ;;  %s4028_s12 = inlined_call_operand.vmem [shape: f32[2,1,128], index: 12, kind: input, shape index: {}]   ;;  %s4029_s13 = inlined_call_operand.vmem [shape: f32[2,1,128], index: 13, kind: input, shape index: {}]   ;;  %s4030_s14 = inlined_call_operand.vmem [shape: bf16[128,128], index: 14, kind: input, shape index: {}]   ;;  %s4031_s15 = inlined_call_operand.vmem [shape: f32[1,128], index: 15, kind: input, shape index: {}]   ;;  %s4032_s16 = inlined_call_operand.hbm [shape: bf16[128,128], index: 16, kind: input, shape index: {}]   ;;  %s4033_s17 = inlined_call_operand.vmem [shape: f32[1,128], index: 17, kind: input, shape index: {}]   ;;  %s4034_s18 = inlined_call_operand.hbm [shape: bf16[128,128], index: 18, kind: input, shape index: {}]   ;;  %s4035_s19 = inlined_call_operand.vmem [shape: f32[1,128], index: 19, kind: input, shape index: {}]   ;;  %s4036_s20 = inlined_call_operand.vmem [shape: bf16[1,8,128], index: 20, kind: input, shape index: {}]   ;;  %s4037_s21 = inlined_call_operand.vmem [shape: bf16[2,8,128], index: 21, kind: output, shape index: {}]  }
   0x1   :  { %4049 = sst [smem:[#allocation17_spill]] %s4016_s0 }
   0x2   :  { %4050 = sst [smem:[#allocation18_spill]] %s4017_s1 }
   0x3   :  { %4051 = sst [smem:[#allocation19_spill]] %s4018_s2 }
   0x4   :  { %4052 = sst [smem:[#allocation20_spill]] %s4019_s3 }
   0x5   :  { %4053 = sst [smem:[#allocation21_spill]] %s4020_s4 }
   0x6   :  { %4054 = sst [smem:[#allocation22_spill]] %s4021_s5 }
   0x7   :  { %4055 = sst [smem:[#allocation23_spill]] %s4024_s8 }
   0x8   :  { %4056 = sst [smem:[#allocation24_spill]] %s4027_s11 }
   0x9   :  { %4057 = sst [smem:[#allocation25_spill]] %s4028_s12 }
   0xa   :  { %4058 = sst [smem:[#allocation26_spill]] %s4029_s13 }
   0xb   :  { %4059 = sst [smem:[#allocation27_spill]] %s4030_s14 }
   0xc   :  { %4060 = sst [smem:[#allocation28_spill]] %s4031_s15 }
   0xd   :  { %4061 = sst [smem:[#allocation29_spill]] %s4032_s16 }
   0xe   :  { %4062 = sst [smem:[#allocation30_spill]] %s4033_s17 }
   0xf   :  { %4063 = sst [smem:[#allocation31_spill]] %s4034_s18 }
  0x10   :  { %4064 = sst [smem:[#allocation32_spill]] %s4035_s19 }
  0x11   :  { %4065 = sst [smem:[#allocation33_spill]] %s4036_s20 }
  0x12   :  { %4066 = sst [smem:[#allocation34_spill]] %s4037_s21 }
  0x13   :  { %26 = vsyncpa [#allocation4], 0 }
  0x14   :  { %28 = vsyncpa [#allocation4 + $0x1], 0 }
  0x15   :  { %29 = vsyncpa [#allocation6], 0 }
  0x16   :  { %31 = vsyncpa [#allocation6 + $0x1], 0 }
  0x17   :  { %32 = vsyncpa [#allocation9], 0  ;;  %s3449_s2 = smov 0   ;;  %s3451_s25 = smov 0  }
  0x18   :  { %s3453_s26 = smov 0   ;;  %s3455_s27 = smov 0  }
  0x19 LB: > { %4067 = sst [smem:[#allocation14_spill]] %s3322_s26  ;;  %s3468_s3 = sadd.s32 4294967295, %s3326_s27   ;;  %s3326_s27 = sphi %s3455_s27, %s4100_s27   ;;  %s3322_s26 = sphi %s3453_s26, %s4102_s26   ;;  %s3318_s25 = sphi %s3451_s25, %s4104_s25   ;;  %s3314_s2 = sphi %s3449_s2, %s4103_s2  }
  0x1a   : > { %p100_p0 = scmp.ne.s32.totalorder %s3318_s25, %s3314_s2  ;;  %p101_p1 = scmp.eq.s32.totalorder %s3468_s3, 0 }
  0x1b   : > { %p2572_p2 = scmp.ge.s32.totalorder %s3326_s27, 1  ;;  %p565_p3 = scmp.lt.s32.totalorder %s3326_s27, 3 }
  0x1c   : > { %p2573_p4 = scmp.ne.s32.totalorder %s3468_s3, 0  ;;  %p3477_p5 = por %p101_p1, %p100_p0 }
  0x1d   : > { %s4069_s16 = sld [smem:[#allocation29_spill]]  ;;  %p3484_p6 = pnand %p2572_p2, %p565_p3 }
  0x1e   : > { %s3328_s5 = smov [#allocation8]   ;;  %s3497_s1 = sadd.s32 1, %s3326_s27  }
  0x1f   : > { %p3015_p7 = pneg %p3484_p6  ;;  %s590_s22 = sshll.u32 %s3328_s5, 4  ;;  %s591_s22 = int_to_ptr.vmem [resolvable:$true] %s590_s22 }
  0x20   : > { %4072 = sst [smem:[#allocation15_spill]] %s3497_s1  ;;  %s4040_s24 = smov 64  }
  0x21   : > { %p3492_p8 = pnand %p3015_p7, %p101_p1  ;;  %s4042_s2 = smov 4  }
  0x22   : > { %s84_s29 = ssub.s32 %s3326_s27, %s3497_s1  ;;  %s87_s0 = sadd.s32 1, %s3322_s26 }
  0x23   : > { %s588_s4 = sshll.u32 %s4069_s16, 4  ;;  %p85_p9 = scmp.eq.s32.totalorder %s84_s29, 0  ;;  %s589_s4 = int_to_ptr.hbm [resolvable:$true] %s588_s4 }
  0x24   : > { %3018 = dma.hbm_to_vmem [thread:$0]  (!%p3492_p8), %s589_s4, 1024, %s591_s22, [#allocation9], %s4040_s24, %s4040_s24, %s4042_s2  }
  0x25   : > { %p94_p10 = scmp.ne.s32.totalorder %s3322_s26, %s3318_s25  ;;  %p95_p11 = scmp.eq.s32.totalorder %s3326_s27, 0 }
  0x26   : > { %p3034_p12 = scmp.lt.s32.totalorder %s3326_s27, 2  ;;  %s3515_s16 = sand.u32 1, %s3322_s26  }
  0x27   : > { %s3512_s5 = scalar_select %p85_p9, %s3322_s26, %s87_s0  }
  0x28   : > { %p96_p13 = por %p95_p11, %p94_p10  ;;  %s682_s21 = sand.u32 1, %s3326_s27  }
  0x29   : > { %4073 = sst [smem:[#allocation16_spill]] %s3512_s5  ;;  %s2577_s20 = sshll.u32 %s3515_s16, 6 }
  0x2a   : > { %p3519_p0 = pnand %p3034_p12, %p96_p13  ;;  %s2911_s4 = sshll.u32 %s3326_s27, 6 }
  0x2b   : > { %s4075_s8 = sld [smem:[#allocation23_spill]]  ;;  %s686_s0 = scalar_lea.vmem [#allocation5], %s2577_s20 }
  0x2c   : > { %s694_s5 = sshll.u32 %s686_s0, 4  ;;  %s3527_s26 = scalar_lea.sflag [#allocation6], %s682_s21  ;;  %s695_s5 = int_to_ptr.vmem [resolvable:$true] %s694_s5 }
  0x2d   : > { %p3168_p3 = pneg %p3519_p0 }
  0x31   : > { %s691_s24 = scalar_lea.hbm %s4075_s8, %s2911_s4 }
  0x32   : > { %s692_s2 = sshll.u32 %s691_s24, 4  ;;  %s3171_s24 = scalar_lea.hbm %s4075_s8, 128  ;;  %s693_s2 = int_to_ptr.hbm [resolvable:$true] %s692_s2 }
  0x33   : > { %s3164_s1 = sshra.s32 %s693_s2, 4  ;;  %s3165_s1 = int_to_ptr.hbm [resolvable:$true] %s3164_s1 }
  0x34   : > { %s3166_s17 = scalar_lea.hbm %s3165_s1, 64  ;;  %p3172_p10 = scmp.lt.s32.totalorder %s3165_s1, %s4075_s8 }
  0x35   : > { %p3167_p2 = scmp.ne.s32.totalorder %s3165_s1, %s3166_s17  ;;  %p3173_p11 = scmp.lt.s32.totalorder %s3171_s24, %s3166_s17 }
  0x37   : > { %p3169_p7 = pnand %p3168_p3, %p3167_p2  ;;  %p3174_p12 = por %p3173_p11, %p3172_p10 }
  0x39   : > { %p3170_p9 = pneg %p3169_p7 }
  0x3b   : > { %p3175_p13 = pnand %p3174_p12, %p3170_p9 }
  0x3d   : > { %3178 = shalt.err (!%p3175_p13)
}
  0x3e   : > { %s4076_s21 = smov 4   ;;  %s4077_s14 = smov 64  }
  0x3f   : > { %3028 = dma.hbm_to_vmem [thread:$0]  (!%p3519_p0), %s693_s2, 1024, %s695_s5, %s3527_s26, %s4077_s14, %s4077_s14, %s4076_s21  }
  0x40   : > { %s719_s13 = scalar_lea.hbm %s4026_s10, %s2911_s4  ;;  %s714_s17 = scalar_lea.vmem [#allocation7], %s2577_s20 }
  0x41   : > { %s720_s29 = sshll.u32 %s719_s13, 4  ;;  %s722_s1 = sshll.u32 %s714_s17, 4  ;;  %s3549_s29 = int_to_ptr.hbm [resolvable:$true] %s720_s29  ;;  %s3554_s1 = int_to_ptr.vmem [resolvable:$true] %s722_s1 }
  0x42   : > { %s4078_s18 = sld [smem:[#allocation31_spill]]  ;;  %s3331_s12 = smov [#allocation10]  }
  0x43   : > { %s607_s11 = sshll.u32 %s3331_s12, 4  ;;  %s2997_s13 = smul.u32 192, %s3515_s16  ;;  %s608_s11 = int_to_ptr.vmem [resolvable:$true] %s607_s11 }
  0x44   : > { %s2998_s20 = smul.u32 192, %s3326_s27  ;;  %s4079_s4 = sld [smem:[#allocation19_spill]] }
  0x45   : > { %s631_s22 = scalar_lea.vmem [#allocation3], %s2997_s13  ;;  %s628_s12 = scalar_lea.sflag [#allocation4], %s3515_s16 }
  0x46   : > { %s639_s17 = sshll.u32 %s631_s22, 4  ;;  %s640_s17 = int_to_ptr.vmem [resolvable:$true] %s639_s17 }
  0x48   : > { %s605_s8 = sshll.u32 %s4078_s18, 4  ;;  %s606_s8 = int_to_ptr.hbm [resolvable:$true] %s605_s8 }
  0x49   : > { %3021 = dma.hbm_to_vmem [thread:$0]  (!%p3492_p8), %s606_s8, 1024, %s608_s11, [#allocation9], %s4077_s14, %s4077_s14, %s4076_s21  }
  0x4a   : > { %s636_s15 = scalar_lea.hbm %s4079_s4, %s2998_s20  ;;  %s3231_s27 = scalar_lea.hbm %s4079_s4, 384 }
  0x4b   : > { %s637_s24 = sshll.u32 %s636_s15, 4  ;;  %s638_s24 = int_to_ptr.hbm [resolvable:$true] %s637_s24 }
  0x4c   : > { %s3224_s0 = sshra.s32 %s638_s24, 4  ;;  %s3225_s0 = int_to_ptr.hbm [resolvable:$true] %s3224_s0 }
  0x4d   : > { %s3226_s18 = scalar_lea.hbm %s3225_s0, 192  ;;  %p3232_p9 = scmp.lt.s32.totalorder %s3225_s0, %s4079_s4 }
  0x4e   : > { %p3227_p2 = scmp.ne.s32.totalorder %s3225_s0, %s3226_s18  ;;  %p3233_p10 = scmp.lt.s32.totalorder %s3231_s27, %s3226_s18 }
  0x50   : > { %p3229_p7 = pnand %p3227_p2, %p3168_p3  ;;  %p3234_p11 = por %p3233_p10, %p3232_p9 }
  0x52   : > { %p3230_p8 = pneg %p3229_p7 }
  0x54   : > { %p3235_p12 = pnand %p3234_p11, %p3230_p8 }
  0x56   : > { %3238 = shalt.err (!%p3235_p12)
}
  0x57   : > { %s3332_s16 = smov 192   ;;  %s3333_s13 = smov 12  }
  0x58   : > { %3025 = dma.hbm_to_vmem [thread:$0]  (!%p3519_p0), %s638_s24, 3072, %s640_s17, %s628_s12, %s3332_s16, %s3332_s16, %s3333_s13  }
  0x59   : > { %s3254_s2 = sshra.s32 %s3549_s29, 4  ;;  %s3261_s22 = scalar_lea.hbm %s4026_s10, 128  ;;  %s3255_s2 = int_to_ptr.hbm [resolvable:$true] %s3254_s2 }
  0x5a   : > { %s3256_s5 = scalar_lea.hbm %s3255_s2, 64  ;;  %p3262_p8 = scmp.lt.s32.totalorder %s3255_s2, %s4026_s10 }
  0x5b   : > { %p3257_p13 = scmp.ne.s32.totalorder %s3255_s2, %s3256_s5  ;;  %p3263_p9 = scmp.lt.s32.totalorder %s3261_s22, %s3256_s5 }
  0x5d   : > { %p3259_p2 = pnand %p3257_p13, %p3168_p3  ;;  %p3264_p10 = por %p3263_p9, %p3262_p8 }
  0x5f   : > { %p3260_p7 = pneg %p3259_p2 }
  0x61   : > { %p3265_p11 = pnand %p3264_p10, %p3260_p7 }
  0x63   : > { %3268 = shalt.err (!%p3265_p11)
}
  0x64   : > { %3031 = dma.hbm_to_vmem [thread:$0]  (!%p3519_p0), %s3549_s29, 1024, %s3554_s1, %s3527_s26, %s4077_s14, %s4077_s14, %s4076_s21  }
  0x65   : > { %752 = sbr.rel (%p3484_p6) target bundleno = 4269 (0x10ad), region = 104  ;;  %s754_s17 = sand.u32 (!%p3484_p6), 1, %s3318_s25  }
  0x66   : > { %s2999_s24 = smul.u32 (!%p3484_p6), 192, %s754_s17  ;;  %s755_s12 = scalar_lea.sflag (!%p3484_p6), [#allocation4], %s754_s17 }
  0x68   : > { %s3599_s11 = scalar_lea.vmem (!%p3484_p6), [#allocation3], %s2999_s24 }
  0x6a   : > { %3301 = dma.done.wait (%p3477_p5), %s755_s12, 3072  }
  0x6b   : > { %3303 = vsyncadd (%p3477_p5), %s755_s12, 4294964224  ;;  %s764_s19 = sand.u32 1, %s3468_s3   ;;  %s2584_s27 = sshll.u32 %s754_s17, 6 }
  0x6c   : > { %s765_s14 = scalar_lea.sflag [#allocation6], %s764_s19  ;;  %s3606_s26 = scalar_lea.vmem [#allocation5], %s2584_s27 }
  0x6d   : > { %3305 = dma.done.wait (%p3477_p5), %s765_s14, 2048  }
  0x6e   : > { %3307 = vsyncadd (%p3477_p5), %s765_s14, 4294965248  ;;  %s3612_s30 = scalar_lea.vmem [#allocation7], %s2584_s27 }
  0x6f   : > { %3309 = dma.done.wait (%p101_p1), [#allocation9], 2048  }
  0x70   : > { %3311 = vsyncadd (%p101_p1), [#allocation9], 4294965248  ;;  %p883_p6 = scmp.lt.s32.totalorder %s3468_s3, 1  ;;  %s4080_s20 = sld [smem:[#allocation21_spill]] }
  0x71   : > { %s4082_s0 = sld [smem:[#allocation20_spill]] }
  0x72   : > { %s3620_s21 = scalar_select %p883_p6, %s3468_s3, 1 }
  0x73   : > { %s4083_s2 = sld [smem:[#allocation24_spill]] }
  0x74   : > { %s3000_s28 = smul.u32 3, %s3620_s21  ;;  %s2913_s29 = sshll.u32 %s3620_s21, 6 }
  0x75   : > { %s897_s12 = scalar_lea.vmem %s4022_s6, %s3620_s21  ;;  %s903_s23 = scalar_lea.vmem %s4025_s9, %s3620_s21 }
  0x76   : > { %s3627_s16 = scalar_lea.vmem %s4080_s20, %s2913_s29  ;;  %s4085_s17 = sld [smem:[#allocation26_spill]] }
  0x77   : > { %s3636_s8 = scalar_lea.vmem %s4082_s0, %s3000_s28  ;;  %s4084_s28 = sld [smem:[#allocation25_spill]] }
  0x78   : > { %s4086_s14 = sld [smem:[#allocation17_spill]] (!%p2573_p4) }
  0x79   : > { %s906_s5 = scalar_lea.vmem %s4083_s2, %s3620_s21  ;;  %917 = sbr.rel (%p2573_p4) target bundleno = 128 (0x80), region = 128 }
  0x7c   : > { %s912_s24 = scalar_lea.vmem %s4085_s17, %s3620_s21 }
  0x7d   : > { %s909_s22 = scalar_lea.vmem %s4084_s28, %s3620_s21 }
  0x7e   : > { %v918_v0 = vld [vmem:[%s4086_s14] sm:$0xff]  }
  0x7f   : > { %920 = vst [vmem:[#allocation2] sm:$0xff] %v918_v0  }
  0x80 PF: > { %v2681_v1 = vld [vmem:[%s3599_s11 + $0xa8] sm:$0xf]  ;;  %v2937_v2 = vld [vmem:[%s3599_s11 + $0xb0] sm:$0xf0]  ;;  %v2936_v3 = vld [vmem:[%s3599_s11 + $0xac] sm:$0xf]  ;;  %s4090_s19 = scalar_lea.vmem %s4023_s7, %s3620_s21 }
  0x81   : > { %v2682_v4 = vor.u32 %v2937_v2, %v2681_v1  ;;  %v2683_v5 = vld [vmem:[%s3599_s11 + $0xb4] sm:$0xf0]  ;;  %v2669_v6 = vld [vmem:[%s3599_s11 + $0x90] sm:$0xf]  ;;  %v2934_v7 = vld [vmem:[%s3599_s11 + $0x98] sm:$0xf0] }
  0x82   : > { %v2686_v8 = vor.u32 %v2936_v3, %v2683_v5  ;;  %v2933_v9 = vld [vmem:[%s3599_s11 + $0x94] sm:$0xf]  ;;  %v2671_v10 = vld [vmem:[%s3599_s11 + $0x9c] sm:$0xf0]  ;;  %v2670_v11 = vor.u32 %v2934_v7, %v2669_v6  ;;  %v2657_v13 = vld [vmem:[%s3599_s11 + $0x78] sm:$0xf] }
  0x83   : > { %1098 = vmatpush.bf16.msra.mxu0 %v2682_v4  ;;  %v2674_v12 = vor.u32 %v2933_v9, %v2671_v10  ;;  %v2931_v14 = vld [vmem:[%s3599_s11 + $0x80] sm:$0xf0]  ;;  %v2930_v15 = vld [vmem:[%s3599_s11 + $0x7c] sm:$0xf]  ;;  %v2659_v16 = vld [vmem:[%s3599_s11 + $0x84] sm:$0xf0] }
  0x84   : > { %1112 = vmatpush.bf16.msra.mxu1 %v2686_v8  ;;  %v2658_v17 = vor.u32 %v2931_v14, %v2657_v13  ;;  %v2662_v18 = vor.u32 %v2930_v15, %v2659_v16  ;;  %v2645_v19 = vld [vmem:[%s3599_s11 + $0x60] sm:$0xf]  ;;  %v2928_v20 = vld [vmem:[%s3599_s11 + $0x68] sm:$0xf0]  ;;  %v2927_v21 = vld [vmem:[%s3599_s11 + $0x64] sm:$0xf] }
  0x85   : > { %v2647_v22 = vld [vmem:[%s3599_s11 + $0x6c] sm:$0xf0]  ;;  %v2646_v23 = vor.u32 %v2928_v20, %v2645_v19  ;;  %v2938_v25 = vld [vmem:[%s3599_s11 + $0xb8] sm:$0xf0]  ;;  %v2677_v26 = vld [vmem:[%s3599_s11 + $0x98] sm:$0xf] }
  0x86   : > { %v2689_v24 = vld [vmem:[%s3599_s11 + $0xb0] sm:$0xf]  ;;  %v2650_v27 = vor.u32 %v2927_v21, %v2647_v22  ;;  %v2633_v28 = vld [vmem:[%s3599_s11 + $0x48] sm:$0xf]  ;;  %v2925_v29 = vld [vmem:[%s3599_s11 + $0x50] sm:$0xf0] }
  0x87   : > { %1099 = vmatpush.bf16.msra.mxu0 %v2670_v11  ;;  %v2690_v30 = vor.u32 %v2938_v25, %v2689_v24  ;;  %v2935_v31 = vld [vmem:[%s3599_s11 + $0xa0] sm:$0xf0]  ;;  %v2924_v32 = vld [vmem:[%s3599_s11 + $0x4c] sm:$0xf]  ;;  %v2635_v33 = vld [vmem:[%s3599_s11 + $0x54] sm:$0xf0]  ;;  %v2634_v36 = vor.u32 %v2925_v29, %v2633_v28 }
  0x88   : > { %1113 = vmatpush.bf16.msra.mxu1 %v2674_v12  ;;  %v2621_v34 = vld [vmem:[%s3599_s11 + $0x30] sm:$0xf]  ;;  %v2678_v35 = vor.u32 %v2935_v31, %v2677_v26  ;;  %v2922_v37 = vld [vmem:[%s3599_s11 + $0x38] sm:$0xf0]  ;;  %v2665_v38 = vld [vmem:[%s3599_s11 + $0x80] sm:$0xf]  ;;  %v2638_v40 = vor.u32 %v2924_v32, %v2635_v33 }
  0x89   : > { %1126 = vmatpush.bf16.msra.mxu2 %v2690_v30  ;;  %v2932_v39 = vld [vmem:[%s3599_s11 + $0x88] sm:$0xf0]  ;;  %v2921_v41 = vld [vmem:[%s3599_s11 + $0x34] sm:$0xf]  ;;  %v2623_v42 = vld [vmem:[%s3599_s11 + $0x3c] sm:$0xf0]  ;;  %v2622_v46 = vor.u32 %v2922_v37, %v2621_v34 }
  0x8a   : > { %v2653_v43 = vld [vmem:[%s3599_s11 + $0x68] sm:$0xf]  ;;  %v2929_v44 = vld [vmem:[%s3599_s11 + $0x70] sm:$0xf0]  ;;  %v2666_v45 = vor.u32 %v2932_v39, %v2665_v38  ;;  %v2626_v47 = vor.u32 %v2921_v41, %v2623_v42  ;;  %v2609_v48 = vld [vmem:[%s3599_s11 + $0x18] sm:$0xf] }
  0x8b   : > { %1100 = vmatpush.bf16.msra.mxu0 %v2658_v17  ;;  %v2919_v49 = vld [vmem:[%s3599_s11 + $0x20] sm:$0xf0]  ;;  %v2918_v50 = vld [vmem:[%s3599_s11 + $0x1c] sm:$0xf]  ;;  %v2611_v51 = vld [vmem:[%s3599_s11 + $0x24] sm:$0xf0]  ;;  %v2654_v52 = vor.u32 %v2929_v44, %v2653_v43 }
  0x8c   : > { %1114 = vmatpush.bf16.msra.mxu1 %v2662_v18  ;;  %v2610_v53 = vor.u32 %v2919_v49, %v2609_v48  ;;  %v2641_v54 = vld [vmem:[%s3599_s11 + $0x50] sm:$0xf]  ;;  %v2926_v55 = vld [vmem:[%s3599_s11 + $0x58] sm:$0xf0]  ;;  %v2614_v56 = vor.u32 %v2918_v50, %v2611_v51  ;;  %v2597_v57 = vld [vmem:[%s3599_s11] sm:$0xf] }
  0x8d   : > { %1127 = vmatpush.bf16.msra.mxu2 %v2678_v35  ;;  %v2916_v58 = vld [vmem:[%s3599_s11 + $0x8] sm:$0xf0]  ;;  %v2915_v59 = vld [vmem:[%s3599_s11 + $0x4] sm:$0xf]  ;;  %v2599_v60 = vld [vmem:[%s3599_s11 + $0xc] sm:$0xf0]  ;;  %v2642_v61 = vor.u32 %v2926_v55, %v2641_v54 }
  0x8e   : > { %v2598_v62 = vor.u32 %v2916_v58, %v2597_v57  ;;  %v2629_v63 = vld [vmem:[%s3599_s11 + $0x38] sm:$0xf]  ;;  %v2923_v0 = vld [vmem:[%s3599_s11 + $0x40] sm:$0xf0]  ;;  %v2602_v1 = vor.u32 %v2915_v59, %v2599_v60  ;;  %v2617_v4 = vld [vmem:[%s3599_s11 + $0x20] sm:$0xf] }
  0x8f   : > { %1101 = vmatpush.bf16.msra.mxu0 %v2646_v23  ;;  %v2914_v2 = vld [vmem:[#allocation2] sm:$0xff]  ;;  %v2630_v3 = vor.u32 %v2923_v0, %v2629_v63  ;;  %v2920_v5 = vld [vmem:[%s3599_s11 + $0x28] sm:$0xf0]  ;;  %v2605_v7 = vld [vmem:[%s3599_s11 + $0x8] sm:$0xf]  ;;  %vm1168_vm0 = vcmask 261120  }
  0x90   : > { %1115 = vmatpush.bf16.msra.mxu1 %v2650_v27  ;;  %v2618_v6 = vor.u32 %v2920_v5, %v2617_v4  ;;  %v2917_v8 = vld [vmem:[%s3599_s11 + $0x10] sm:$0xf0]  ;;  %v3716_v10 = vld [vmem:[%s3627_s16 + $0x28] sm:$0xff]  ;;  %v3720_v11 = vld [vmem:[%s3627_s16 + $0x20] sm:$0xff]  ;;  %s3334_s4 = smov 96   ;;  %s3335_s11 = smov 64  }
  0x91   : > { %1128 = vmatpush.bf16.msra.mxu2 %v2666_v45  ;;  %v2606_v9 = vor.u32 %v2917_v8, %v2605_v7  ;;  %v3724_v12 = vld [vmem:[%s3636_s8] sm:$0x7]  ;;  %vm1204_vm1 = vcmask 1043456   ;;  %s4087_s14 = sld [smem:[#allocation18_spill]]  ;;  %vm1188_vm2 = vcmask 64512   ;;  %v3764_v50 = vld [vmem:[%s3627_s16 + $0x8] sm:$0xff] }
  0x92   : > { %v958_v13 = vperm.slane %v3724_v12, 0  ;;  %v959_v14 = vperm.slane %v3724_v12, 1  ;;  %v960_v31 = vperm.slane %v3724_v12, 2  ;;  %v3768_v54 = vld [vmem:[%s3627_s16 + $0x18] sm:$0xff]  ;;  %s3336_s1 = smov 32   ;;  %s4088_s2 = sld [smem:[#allocation22_spill]] }
  0x93   : > { %1102 = vmatpush.bf16.msra.mxu0 %v2634_v36  ;;  %p2812_p1 = scmp.ne.s32.totalorder %s3468_s3, 1 }
  0x94   : > { %1116 = vmatpush.bf16.msra.mxu1 %v2638_v40  ;;  %s4096_s8 = sld [smem:[#allocation30_spill]] (!%p2812_p1) }
  0x95   : > { %1129 = vmatpush.bf16.msra.mxu2 %v2654_v52  ;;  %s4099_s3 = sld [smem:[#allocation34_spill]] (!%p2812_p1) }
  0x97   : > { %1103 = vmatpush.bf16.msra.mxu0 %v2622_v46  ;;  %v3754_v38 = vld [vmem:[%s4087_s14] ss:$0 sm:$0xff] }
  0x98   : > { %1117 = vmatpush.bf16.msra.mxu1 %v2626_v47  ;;  %s4089_s18 = scalar_lea.vmem %s4088_s2, %s3620_s21  ;;  %s4097_s21 = sld [smem:[#allocation32_spill]] (!%p2812_p1) }
  0x99   : > { %1130 = vmatpush.bf16.msra.mxu2 %v2642_v61 }
  0x9b   : > { %1104 = vmatpush.bf16.msra.mxu0 %v2610_v53 }
  0x9c   : > { %1118 = vmatpush.bf16.msra.mxu1 %v2614_v56  ;;  %v3773_v56 = vld [vmem:[%s3627_s16 + $0x10] sm:$0xff] }
  0x9d   : > { %1131 = vmatpush.bf16.msra.mxu2 %v2630_v3 }
  0x9f   : > { %1105 = vmatpush.bf16.msra.mxu0 %v2598_v62  ;;  %v2939_v62 = vld [vmem:[%s3627_s16] sm:$0xff] }
  0xa0   : > { %1119 = vmatpush.bf16.msra.mxu1 %v2602_v1 }
  0xa1   : > { %1132 = vmatpush.bf16.msra.mxu2 %v2618_v6 }
  0xa2   : > { %1106 = vmatmul.bf16.vlgmr.msra.gmra.mxu0 %v2914_v2 }
  0xa3   : > { %1120 = vmatmul.bf16.vlgmr.msra.gmra.mxu1 %v2914_v2 }
  0xa4   : > { %1422 = vmatpush.bf16.msrb.mxu1 %v3716_v10 }
  0xa5   : > { %1133 = vmatpush.bf16.msra.mxu2 %v2606_v9 }
  0xa8   : > { %1134 = vmatmul.bf16.vlgmr.msra.gmra.mxu2 %v2914_v2  ;;  %1423 = vmatpush.bf16.msrb.mxu1 %v3720_v11 }
  0xa9   : > { %1337 = vmatpush.bf16.msrb.mxu2 %v3764_v50 }
  0xad   : > { %1338 = vmatpush.bf16.msrb.mxu2 %v2939_v62 }
 0x11f   : > { %v1107_v15 = vpop.f32.mrf.mxu0 }
 0x120   : > { %v1108_v16 = vadd.f32 %v1107_v15, %v958_v13  ;;  %v1121_v17 = vpop.f32.mrf.mxu1 }
 0x121   : > { %v1122_v18 = vadd.f32 %v1121_v17, %v959_v14 }
 0x122   : > { %v1140_v19 = vmul.f32 0.17677669, %v1108_v16 }
 0x123   : > { %v1144_v20 = vpack.c.bf16 %v1122_v18, %v1122_v18 }
 0x124   : > { %v1142_v21 = vpack.c.bf16 %v1140_v19, %v1140_v19 }
 0x125   : > { %v1228_v22 = vunpack.c.l.b16 %v1144_v20  ;;  %v1173_v23 = vsel %vm1168_vm0, %v1144_v20, 0 }
 0x126   : > { %1182 = vmatpush.bf16.xpose.msra.mxu3 %v1173_v23  ;;  %v1223_v26 = vunpack.c.l.b16 %v1142_v21 }
 0x127   : > { %v3731_v24 = vpack.c.b16 %v1228_v22, %v1228_v22 }
 0x128   : > { %v1123_v25 = vpop.f32.mrf.mxu1  ;;  %v3740_v30 = vpack.c.b16 %v1223_v26, %v1223_v26 }
 0x129   : > { %v1124_v27 = vadd.f32 %v1123_v25, %v959_v14  ;;  %1230 = vrot.lane.b32.xlu1 %v3731_v24, %s3334_s4 }
 0x12b   : > { %v3735_v28 = vpack.c.bf16 %v1124_v27, %v1124_v27  ;;  %v1135_v32 = vpop.f32.mrf.mxu2 }
 0x12c   : > { %v1136_v33 = vadd.f32 %v1135_v32, %v960_v31 }
 0x12d   : > { %v1525_v29 = vsel %vm1168_vm0, %v3735_v28, 0  ;;  %2691 = vmatmul.msk.bf16.vlgmr.msra.gmra.mxu3 %vm1168_vm0, %v1142_v21 }
 0x12e   : > { %1534 = vmatpush.bf16.xpose.msra.mxu1 %v1525_v29  ;;  %v1146_v34 = vpack.c.bf16 %v1136_v33, %v1136_v33  ;;  %v1109_v33 = vpop.f32.mrf.mxu0 }
 0x130   : > { %v1206_v35 = vsel %vm1204_vm1, %v1146_v34, 0  ;;  %v1264_v48 = vunpack.c.l.b16 %v1146_v34 }
 0x131   : > { %1225 = vrot.lane.b32.xlu1 %v3740_v30, %s3334_s4  ;;  %1215 = vmatpush.bf16.msrb.mxu3 %v1206_v35 }
 0x132   : > { %v3759_v49 = vpack.c.b16 %v1264_v48, %v1264_v48 }
 0x133   : > { %v1137_v6 = vpop.f32.mrf.mxu2 }
 0x134   : > { %v1138_v26 = vadd.f32 %v1137_v6, %v960_v31 }
 0x136   : > { %v3798_v27 = vpack.c.bf16 %v1138_v26, %v1138_v26 }
 0x139   : > { %1346 = vrot.lane.b32.xlu1 %v3731_v24, %s3335_s11 }
 0x19b   : > { %v1231_v36 = vpop.permute.xlu1 %1230 }
 0x19c   : > { %v1236_v37 = vsel %vm1168_vm0, %v1231_v36, 0 }
 0x19d   : > { %1245 = vmatpush.bf16.xpose.msra.mxu3 %v1236_v37 }
 0x1a3   : > { %v1226_v57 = vpop.permute.xlu1 %1225 }
 0x1ab   : > { %v1347_v60 = vpop.permute.xlu1 %1346 }
 0x1ac   : > { %v1352_v61 = vsel %vm1168_vm0, %v1347_v60, 0  ;;  %v1110_v60 = vadd.f32 %v1109_v33, %v958_v13 }
 0x1b0   : > { %v1184_v39 = vpop.f32.mrf.mxu3 }
 0x1b1   : > { %v1185_v40 = vadd.f32 %v3754_v38, %v1184_v39 }
 0x1b3   : > { %v1189_v41 = vsel %vm1188_vm2, %v1185_v40, -inf }
 0x1b4   : > { %1190 = vmax.xlane.f32.xlu0 %v1189_v41 }
 0x1b8   : > { %v1186_v42 = vpop.f32.mrf.mxu3 }
 0x227   : > { %v1191_v43 = vpop.xlane.xlu0 %1190 }
 0x228   : > { %v1192_v44 = vsub.f32 %v1185_v40, %v1191_v43 }
 0x22a   : > { %v1193_v45 = vmul.f32 1.442695, %v1192_v44 }
 0x22c   : > { %3089 = vpow2.f32 %v1193_v45 }
 0x232   : > { %v3090_v46 = vpop.eup %3089 }
 0x233   : > { %v1195_v47 = vsel %vm1188_vm2, %v3090_v46, 0.0 }
 0x234   : > { %1196 = vadd.xlane.f32.xlu0 %v1195_v47 }
 0x248   : > { %1266 = vrot.lane.b32.xlu0 %v3759_v49, %s3334_s4 }
 0x2a7   : > { %v1197_v51 = vpop.xlane.xlu0 %1196 }
 0x2a8   : > { %3091 = vrcp.f32 %v1197_v51 }
 0x2ae   : > { %v3092_v52 = vpop.eup %3091 }
 0x2af   : > { %v1199_v53 = vmul.f32 %v3092_v52, %v3090_v46 }
 0x2b1   : > { %v1200_v55 = vpack.c.bf16 %v1199_v53, %v1199_v53 }
 0x2b3   : > { %2692 = vmatmul.msk.bf16.vlgmr.msrb.gmra.mxu3 %vm1188_vm2, %v1200_v55 }
 0x2b4   : > { %1309 = vmatpush.bf16.msrb.mxu3 %v3768_v54 }
 0x2b8   : > { %1310 = vmatpush.bf16.msrb.mxu3 %v3773_v56 }
 0x2ba   : > { %v1267_v58 = vpop.permute.xlu0 %1266 }
 0x2bb   : > { %v1272_v59 = vsel %vm1204_vm1, %v1267_v58, 0 }
 0x2bc   : > { %1281 = vmatpush.bf16.msrb.mxu0 %v1272_v59 }
 0x2c3   : > { %2693 = vmatmul.msk.bf16.vlgmr.msra.gmra.mxu3 %vm1168_vm0, %v1226_v57 }
 0x2c4   : > { %1361 = vmatpush.bf16.xpose.msra.mxu3 %v1352_v61  ;;  %v1141_v61 = vmul.f32 0.17677669, %v1110_v60 }
 0x336   : > { %v1217_v63 = vpop.f32.mrf.mxu3 }
 0x337   : > { %v1221_v0 = vpack.c.bf16 %v1217_v63, %v1217_v63 }
 0x339   : > { %2712 = vmatmul.msk.bf16.vlgmr.msrb.gmra.mxu2 %vm1168_vm0, %v1221_v0 }
 0x33e   : > { %v1219_v1 = vpop.f32.mrf.mxu3 }
 0x346   : > { %v1247_v2 = vpop.f32.mrf.mxu3 }
 0x347   : > { %v1248_v3 = vadd.f32 %v3754_v38, %v1247_v2 }
 0x349   : > { %v1251_v4 = vsel %vm1188_vm2, %v1248_v3, -inf }
 0x34a   : > { %1252 = vmax.xlane.f32.xlu2 %v1251_v4 }
 0x34e   : > { %v1249_v5 = vpop.f32.mrf.mxu3 }
 0x3bc   : > { %v3783_v7 = vpop.f32.mrf.mxu2 }
 0x3bd   : > { %v1253_v8 = vpop.xlane.xlu2 %1252 }
 0x3be   : > { %v1254_v9 = vsub.f32 %v1248_v3, %v1253_v8 }
 0x3c0   : > { %v1255_v14 = vmul.f32 1.442695, %v1254_v9 }
 0x3c2   : > { %3093 = vpow2.f32 %v1255_v14 }
 0x3c4   : > { %v1342_v15 = vpop.f32.mrf.mxu2 }
 0x3c5   : > { %v1578_v15 = vunpack.c.l.b16 %v3735_v28 }
 0x3c8   : > { %v3094_v16 = vpop.eup %3093 }
 0x3c9   : > { %v1257_v17 = vsel %vm1188_vm2, %v3094_v16, 0.0 }
 0x3ca   : > { %1258 = vadd.xlane.f32.xlu2 %v1257_v17 }
 0x3e2   : > { %1344 = vrot.lane.b32.xlu2 %v3740_v30, %s3335_s11 }
 0x3ea   : > { %1379 = vrot.lane.b32.xlu2 %v3759_v49, %s3335_s11 }
 0x3f2   : > { %1432 = vrot.lane.b32.xlu2 %v3731_v24, %s3336_s1 }
 0x3fa   : > { %1430 = vrot.lane.b32.xlu2 %v3740_v30, %s3336_s1  ;;  %v1556_v30 = vsel %vm1204_vm1, %v3798_v27, 0 }
 0x43d   : > { %v1259_v18 = vpop.xlane.xlu2 %1258 }
 0x43e   : > { %3095 = vrcp.f32 %v1259_v18 }
 0x444   : > { %v3096_v19 = vpop.eup %3095 }
 0x445   : > { %v1261_v20 = vmul.f32 %v3096_v19, %v3094_v16  ;;  %v1345_v21 = vpop.permute.xlu2 %1344  ;;  %v1579_v16 = vpack.c.b16 %v1578_v15, %v1578_v15 }
 0x447   : > { %v1262_v22 = vpack.c.bf16 %v1261_v20, %v1261_v20 }
 0x449   : > { %2694 = vmatmul.msk.bf16.vlgmr.msrb.gmra.mxu0 %vm1188_vm2, %v1262_v22 }
 0x44d   : > { %v1380_v23 = vpop.permute.xlu2 %1379 }
 0x44e   : > { %v1385_v25 = vsel %vm1204_vm1, %v1380_v23, 0 }
 0x44f   : > { %1394 = vmatpush.bf16.msra.mxu0 %v1385_v25 }
 0x455   : > { %v1433_v24 = vpop.permute.xlu2 %1432 }
 0x456   : > { %v1438_v29 = vsel %vm1168_vm0, %v1433_v24, 0 }
 0x457   : > { %1447 = vmatpush.bf16.xpose.msra.mxu2 %v1438_v29 }
 0x45d   : > { %v1431_v32 = vpop.permute.xlu2 %1430 }
 0x45e   : > { %2724 = vmatmul.msk.bf16.vlgmr.msra.gmra.mxu2 %vm1168_vm0, %v1431_v32 }
 0x45f   : > { %1565 = vmatpush.bf16.msrb.mxu2 %v1556_v30 }
 0x463   : > { %1663 = vmatpush.bf16.msra.mxu2 %v3764_v50 }
 0x467   : > { %1664 = vmatpush.bf16.msra.mxu2 %v2939_v62  ;;  %v1143_v62 = vpack.c.bf16 %v1141_v61, %v1141_v61 }
 0x469   : > { %v1573_v3 = vunpack.c.l.b16 %v1143_v62 }
 0x4c6   : > { %v1283_v34 = vpop.f32.mrf.mxu0 }
 0x4c7   : > { %v1287_v31 = vpack.c.bf16 %v1283_v34, %v1283_v34  ;;  %v3847_v34 = vld [vmem:[%s3627_s16 + $0x38] sm:$0xff] }
 0x4c8   : > { %1508 = vmatpush.bf16.msrb.mxu0 %v3847_v34 }
 0x4c9   : > { %2703 = vmatmul.msk.bf16.vlgmr.msrb.gmra.mxu3 %vm1168_vm0, %v1287_v31 }
 0x4ce   : > { %v1285_v35 = vpop.f32.mrf.mxu0 }
 0x4d9   : > { %2713 = vmatmul.msk.bf16.vlgmr.msra.gmra.mxu3 %vm1168_vm0, %v1345_v21 }
 0x4e1   : > { %v1449_v36 = vpop.f32.mrf.mxu2 }
 0x4e2   : > { %v1450_v9 = vadd.f32 %v3754_v38, %v1449_v36 }
 0x4e4   : > { %v1453_v14 = vsel %vm1188_vm2, %v1450_v9, -inf }
 0x4e9   : > { %v1451_v37 = vpop.f32.mrf.mxu2 }
 0x54c   : > { %v1312_v39 = vpop.f32.mrf.mxu3 }
 0x54d   : > { %v1341_v63 = vadd.f32 %v3783_v7, %v1312_v39 }
 0x554   : > { %v1314_v40 = vpop.f32.mrf.mxu3 }
 0x55c   : > { %v1363_v41 = vpop.f32.mrf.mxu3 }
 0x55d   : > { %v1364_v42 = vadd.f32 %v3754_v38, %v1363_v41 }
 0x55f   : > { %v1367_v43 = vsel %vm1188_vm2, %v1364_v42, -inf }
 0x560   : > { %1368 = vmax.xlane.f32.xlu1 %v1367_v43 }
 0x564   : > { %v1365_v44 = vpop.f32.mrf.mxu3 }
 0x5d3   : > { %v1369_v45 = vpop.xlane.xlu1 %1368 }
 0x5d4   : > { %v1370_v46 = vsub.f32 %v1364_v42, %v1369_v45  ;;  %v3857_v45 = vld [vmem:[%s3627_s16 + $0x30] sm:$0xff]  ;;  %s4098_s16 = sld [smem:[#allocation33_spill]] (!%p2812_p1) }
 0x5d5   : > { %1509 = vmatpush.bf16.msrb.mxu0 %v3857_v45 }
 0x5d6   : > { %v1371_v47 = vmul.f32 1.442695, %v1370_v46 }
 0x5d8   : > { %3097 = vpow2.f32 %v1371_v47 }
 0x5de   : > { %v3098_v48 = vpop.eup %3097 }
 0x5df   : > { %v1373_v50 = vsel %vm1188_vm2, %v3098_v48, 0.0 }
 0x5e0   : > { %1374 = vadd.xlane.f32.xlu0 %v1373_v50 }
 0x653   : > { %v1375_v51 = vpop.xlane.xlu0 %1374 }
 0x654   : > { %3099 = vrcp.f32 %v1375_v51 }
 0x65a   : > { %v3100_v52 = vpop.eup %3099 }
 0x65b   : > { %v1377_v53 = vmul.f32 %v3100_v52, %v3098_v48 }
 0x65d   : > { %v1378_v55 = vpack.c.bf16 %v1377_v53, %v1377_v53 }
 0x65f   : > { %2714 = vmatmul.msk.bf16.vlgmr.msra.gmra.mxu0 %vm1188_vm2, %v1378_v55 }
 0x6dc   : > { %v1396_v57 = vpop.f32.mrf.mxu0 }
 0x6dd   : > { %v1400_v58 = vpack.c.bf16 %v1396_v57, %v1396_v57 }
 0x6df   : > { %2723 = vmatmul.msk.bf16.vlgmr.msrb.gmra.mxu1 %vm1168_vm0, %v1400_v58 }
 0x6e0   : > { %1647 = vmatpush.bf16.msrb.mxu1 %v3768_v54 }
 0x6e4   : > { %v1398_v59 = vpop.f32.mrf.mxu0  ;;  %1648 = vmatpush.bf16.msrb.mxu1 %v3773_v56  ;;  %v3825_v56 = vld [vmem:[%s4087_s14 + $0x1] ss:$0 sm:$0xff] }
 0x6ef   : > { %2736 = vmatmul.msk.bf16.vlgmr.msra.gmra.mxu1 %vm1168_vm0, %v1143_v62 }
 0x6f0   : > { %1736 = vmatpush.bf16.msra.mxu1 %v3716_v10 }
 0x6f4   : > { %1737 = vmatpush.bf16.msra.mxu1 %v3720_v11  ;;  %v1574_v11 = vpack.c.b16 %v1573_v3, %v1573_v3 }
 0x75c   : > { %v1425_v0 = vpop.f32.mrf.mxu1 }
 0x75d   : > { %v3820_v1 = vadd.f32 %v1425_v0, %v1341_v63 }
 0x764   : > { %v1427_v54 = vpop.f32.mrf.mxu1 }
 0x76c   : > { %v1536_v12 = vpop.f32.mrf.mxu1 }
 0x76d   : > { %v1537_v13 = vadd.f32 %v3825_v56, %v1536_v12  ;;  %v1614_v12 = vunpack.c.l.b16 %v3798_v27 }
 0x76f   : > { %v1540_v2 = vsel %vm1188_vm2, %v1537_v13, -inf }
 0x770   : > { %1541 = vmax.xlane.f32.xlu2 %v1540_v2  ;;  %v3871_v2 = vld [vmem:[#allocation2] sm:$0xff]  }
 0x774   : > { %v1538_v10 = vpop.f32.mrf.mxu1 }
 0x775   : > { %v3878_v10 = vld [vmem:[%s4089_s18] ss:$0 sm:$0xff] }
 0x788   : > { %1575 = vrot.lane.b32.xlu2 %v1574_v11, %s3334_s4 }
 0x7e3   : > { %v1542_v4 = vpop.xlane.xlu2 %1541 }
 0x7e4   : > { %v1543_v5 = vsub.f32 %v1537_v13, %v1542_v4  ;;  %v1615_v13 = vpack.c.b16 %v1614_v12, %v1614_v12 }
 0x7e6   : > { %v1544_v6 = vmul.f32 1.442695, %v1543_v5 }
 0x7e8   : > { %3101 = vpow2.f32 %v1544_v6 }
 0x7eb   : > { %v1576_v40 = vpop.permute.xlu2 %1575 }
 0x7ee   : > { %v3102_v7 = vpop.eup %3101 }
 0x7ef   : > { %v1546_v8 = vsel %vm1188_vm2, %v3102_v7, 0.0 }
 0x7f0   : > { %1547 = vadd.xlane.f32.xlu1 %v1546_v8 }
 0x7f8   : > { %1454 = vmax.xlane.f32.xlu1 %v1453_v14 }
 0x811   : > { %1465 = vrot.lane.b32.xlu1 %v3759_v49, %s3336_s1 }
 0x819   : > { %1672 = vrot.lane.b32.xlu1 %v1579_v16, %s3335_s11 }
 0x821   : > { %1670 = vrot.lane.b32.xlu1 %v1574_v11, %s3335_s11 }
 0x863   : > { %v1548_v17 = vpop.xlane.xlu1 %1547 }
 0x864   : > { %3103 = vrcp.f32 %v1548_v17 }
 0x86a   : > { %v3104_v18 = vpop.eup %3103 }
 0x86b   : > { %v1550_v19 = vmul.f32 %v3104_v18, %v3102_v7  ;;  %v1455_v20 = vpop.xlane.xlu1 %1454 }
 0x86c   : > { %v1456_v21 = vsub.f32 %v1450_v9, %v1455_v20 }
 0x86d   : > { %v1551_v38 = vpack.c.bf16 %v1550_v19, %v1550_v19 }
 0x86e   : > { %v1457_v22 = vmul.f32 1.442695, %v1456_v21 }
 0x86f   : > { %2737 = vmatmul.msk.bf16.vlgmr.msrb.gmra.mxu2 %vm1188_vm2, %v1551_v38 }
 0x870   : > { %3105 = vpow2.f32 %v1457_v22 }
 0x876   : > { %v3106_v23 = vpop.eup %3105 }
 0x877   : > { %v1459_v49 = vsel %vm1188_vm2, %v3106_v23, 0.0 }
 0x878   : > { %1460 = vadd.xlane.f32.xlu0 %v1459_v49 }
 0x883   : > { %v1466_v28 = vpop.permute.xlu1 %1465 }
 0x884   : > { %v1471_v25 = vsel %vm1204_vm1, %v1466_v28, 0  ;;  %v3337_v28 = vmov 128.0  }
 0x885   : > { %1480 = vmatpush.bf16.msrb.mxu3 %v1471_v25 }
 0x88b   : > { %v1673_v35 = vpop.permute.xlu1 %1672 }
 0x88c   : > { %1580 = vrot.lane.b32.xlu0 %v1579_v16, %s3334_s4  ;;  %v1678_v39 = vsel %vm1168_vm0, %v1673_v35, 0 }
 0x893   : > { %v1671_v44 = vpop.permute.xlu1 %1670 }
 0x894   : > { %1746 = vrot.lane.b32.xlu0 %v1579_v16, %s3336_s1 }
 0x89c   : > { %1744 = vrot.lane.b32.xlu0 %v1574_v11, %s3336_s1  ;;  %v1824_v11 = vunpack.c.l.bf16 %v3871_v2 }
 0x8eb   : > { %v1461_v26 = vpop.xlane.xlu0 %1460 }
 0x8ec   : > { %3107 = vrcp.f32 %v1461_v26 }
 0x8f2   : > { %v3108_v24 = vpop.eup %3107  ;;  %v1567_v29 = vpop.f32.mrf.mxu2 }
 0x8f3   : > { %v1463_v30 = vmul.f32 %v3108_v24, %v3106_v23  ;;  %v1571_v32 = vpack.c.bf16 %v1567_v29, %v1567_v29 }
 0x8f5   : > { %v1464_v33 = vpack.c.bf16 %v1463_v30, %v1463_v30  ;;  %2741 = vmatmul.msk.bf16.vlgmr.msra.gmra.mxu2 %vm1168_vm0, %v1571_v32 }
 0x8f7   : > { %2725 = vmatmul.msk.bf16.vlgmr.msrb.gmra.mxu3 %vm1188_vm2, %v1464_v33 }
 0x8fa   : > { %v1569_v31 = vpop.f32.mrf.mxu2 }
 0x8fe   : > { %v1581_v36 = vpop.permute.xlu0 %1580 }
 0x8ff   : > { %v1586_v37 = vsel %vm1168_vm0, %v1581_v36, 0 }
 0x900   : > { %1595 = vmatpush.bf16.xpose.msra.mxu3 %v1586_v37 }
 0x906   : > { %v1747_v41 = vpop.permute.xlu0 %1746 }
 0x907   : > { %v1752_v42 = vsel %vm1168_vm0, %v1747_v41, 0  ;;  %2738 = vmatmul.msk.bf16.vlgmr.msra.gmra.mxu3 %vm1168_vm0, %v1576_v40 }
 0x908   : > { %1687 = vmatpush.bf16.xpose.msrb.mxu3 %v1678_v39  ;;  %1761 = vmatpush.bf16.xpose.msrb.mxu2 %v1752_v42 }
 0x90e   : > { %v1745_v43 = vpop.permute.xlu0 %1744 }
 0x90f   : > { %2745 = vmatmul.msk.bf16.vlgmr.msrb.gmra.mxu2 %vm1168_vm0, %v1745_v43 }
 0x917   : > { %2742 = vmatmul.msk.bf16.vlgmr.msrb.gmra.mxu3 %vm1168_vm0, %v1671_v44 }
 0x978   : > { %v3860_v46 = vpop.f32.mrf.mxu2 }
 0x97a   : > { %v1482_v47 = vpop.f32.mrf.mxu3 }
 0x97b   : > { %v1486_v48 = vpack.c.bf16 %v1482_v47, %v1482_v47 }
 0x97d   : > { %2734 = vmatmul.msk.bf16.vlgmr.msrb.gmra.mxu0 %vm1168_vm0, %v1486_v48 }
 0x980   : > { %v1668_v50 = vpop.f32.mrf.mxu2 }
 0x982   : > { %v1484_v51 = vpop.f32.mrf.mxu3 }
 0x98a   : > { %v1597_v52 = vpop.f32.mrf.mxu3 }
 0x98b   : > { %v1598_v53 = vadd.f32 %v3825_v56, %v1597_v52 }
 0x98d   : > { %v1601_v55 = vsel %vm1188_vm2, %v1598_v53, -inf }
 0x98e   : > { %1602 = vmax.xlane.f32.xlu0 %v1601_v55 }
 0x992   : > { %v1599_v57 = vpop.f32.mrf.mxu3  ;;  %v1763_v58 = vpop.f32.mrf.mxu2 }
 0x993   : > { %v1764_v59 = vadd.f32 %v3825_v56, %v1763_v58 }
 0x995   : > { %v1767_v60 = vsel %vm1188_vm2, %v1764_v59, -inf }
 0x996   : > { %1768 = vmax.xlane.f32.xlu1 %v1767_v60 }
 0x99a   : > { %v1689_v61 = vpop.f32.mrf.mxu3  ;;  %v1765_v62 = vpop.f32.mrf.mxu2 }
 0x99b   : > { %v1690_v63 = vadd.f32 %v3825_v56, %v1689_v61 }
 0x99d   : > { %v1693_v0 = vsel %vm1188_vm2, %v1690_v63, -inf }
 0x99e   : > { %1694 = vmax.xlane.f32.xlu2 %v1693_v0 }
 0x9a2   : > { %v1691_v54 = vpop.f32.mrf.mxu3 }
 0x9af   : > { %1616 = vrot.lane.b32.xlu1 %v1615_v13, %s3334_s4 }
 0x9fa   : > { %v1511_v3 = vpop.f32.mrf.mxu0 }
 0x9fb   : > { %v1515_v56 = vadd.f32 %v1511_v3, %v3820_v1 }
 0x9fd   : > { %v1822_v4 = vadd.f32 %v3878_v10, %v1515_v56 }
 0x9ff   : > { %v1826_v5 = vadd.f32 %v1824_v11, %v1822_v4 }
 0xa01   : > { %v1603_v27 = vpop.xlane.xlu0 %1602  ;;  %1830 = vadd.xlane.f32.xlu1 %v1826_v5 }
 0xa02   : > { %v1604_v6 = vsub.f32 %v1598_v53, %v1603_v27  ;;  %v1513_v7 = vpop.f32.mrf.mxu0 }
 0xa04   : > { %v1605_v8 = vmul.f32 1.442695, %v1604_v6  ;;  %v1825_v6 = vunpack.c.h.bf16 %v3871_v2  ;;  %v2952_v2 = vld [vmem:[%s3606_s26 + $0x28] sm:$0xff] }
 0xa06   : > { %3109 = vpow2.f32 %v1605_v8 }
 0xa09   : > { %v1769_v9 = vpop.xlane.xlu1 %1768 }
 0xa0a   : > { %v1770_v14 = vsub.f32 %v1764_v59, %v1769_v9 }
 0xa0c   : > { %v3110_v15 = vpop.eup %3109  ;;  %v1771_v16 = vmul.f32 1.442695, %v1770_v14  ;;  %v2954_v14 = vld [vmem:[%s3606_s26 + $0x38] sm:$0xff] }
 0xa0d   : > { %v1607_v17 = vsel %vm1188_vm2, %v3110_v15, 0.0 }
 0xa0e   : > { %3111 = vpow2.f32 %v1771_v16  ;;  %1608 = vadd.xlane.f32.xlu0 %v1607_v17 }
 0xa11   : > { %v1695_v1 = vpop.xlane.xlu2 %1694 }
 0xa12   : > { %v1696_v18 = vsub.f32 %v1690_v63, %v1695_v1  ;;  %v2953_v1 = vld [vmem:[%s3606_s26 + $0x30] sm:$0xff] }
 0xa14   : > { %v3112_v19 = vpop.eup %3111  ;;  %v1697_v20 = vmul.f32 1.442695, %v1696_v18 }
 0xa15   : > { %v1773_v21 = vsel %vm1188_vm2, %v3112_v19, 0.0 }
 0xa16   : > { %3113 = vpow2.f32 %v1697_v20  ;;  %1774 = vadd.xlane.f32.xlu2 %v1773_v21  ;;  %v2950_v21 = vld [vmem:[%s3606_s26 + $0x18] sm:$0xff] }
 0xa17   : > { %3115 = vrcp.f32 %v3337_v28 }
 0xa1c   : > { %v3114_v38 = vpop.eup %3113 }
 0xa1d   : > { %v1699_v22 = vsel %vm1188_vm2, %v3114_v38, 0.0  ;;  %v3116_v25 = vpop.eup %3115 }
 0xa1e   : > { %1700 = vadd.xlane.f32.xlu0 %v1699_v22  ;;  %v1835_v26 = vmul.f32 128.0, %v3116_v25  ;;  %vm1839_vm3 = vweird.f32 %v3116_v25  ;;  %v2948_v22 = vld [vmem:[%s3606_s26 + $0x8] sm:$0xff] }
 0xa20   : > { %v1836_v24 = vsub.f32 1.0, %v1835_v26 }
 0xa21   : > { %v1617_v23 = vpop.permute.xlu1 %1616 }
 0xa22   : > { %v1622_v49 = vsel %vm1204_vm1, %v1617_v23, 0  ;;  %v1837_v29 = vmul.f32 %v3116_v25, %v1836_v24 }
 0xa23   : > { %1631 = vmatpush.bf16.msra.mxu0 %v1622_v49  ;;  %v2947_v49 = vld [vmem:[%s3606_s26] sm:$0xff] }
 0xa24   : > { %v1838_v30 = vadd.f32 %v3116_v25, %v1837_v29 }
 0xa26   : > { %v3889_v32 = vsel %vm1839_vm3, %v3116_v25, %v1838_v30  ;;  %v2962_v25 = vld [vmem:[%s3612_s30 + $0x38] sm:$0xff]  ;;  %v2961_v30 = vld [vmem:[%s3612_s30 + $0x30] sm:$0xff] }
 0xa27   : > { %2041 = vmatpush.bf16.msra.mxu2 %v2962_v25 }
 0xa2b   : > { %2042 = vmatpush.bf16.msra.mxu2 %v2961_v30 }
 0xa2e   : > { %1779 = vrot.lane.b32.xlu2 %v1615_v13, %s3336_s1 }
 0xa32   : > { %1705 = vrot.lane.b32.xlu0 %v1615_v13, %s3335_s11 }
 0xa74   : > { %v1831_v33 = vpop.xlane.xlu1 %1830 }
 0xa75   : > { %v1841_v31 = vmul.f32 %v3889_v32, %v1831_v33 }
 0xa77   : > { %v3892_v35 = vsub.f32 %v1826_v5, %v1841_v31 }
 0xa79   : > { %v1845_v36 = vmul.f32 %v3892_v35, %v3892_v35 }
 0xa7b   : > { %1847 = vadd.xlane.f32.xlu2 %v1845_v36  ;;  %v2960_v36 = vld [vmem:[%s3612_s30 + $0x28] sm:$0xff] }
 0xa7c   : > { %2043 = vmatpush.bf16.msra.mxu2 %v2960_v36 }
 0xa81   : > { %v1609_v37 = vpop.xlane.xlu0 %1608 }
 0xa82   : > { %3117 = vrcp.f32 %v1609_v37 }
 0xa88   : > { %v3118_v39 = vpop.eup %3117 }
 0xa89   : > { %v1611_v40 = vmul.f32 %v3118_v39, %v3110_v15  ;;  %v1775_v41 = vpop.xlane.xlu2 %1774  ;;  %v2959_v39 = vld [vmem:[%s3612_s30 + $0x20] sm:$0xff] }
 0xa8a   : > { %3119 = vrcp.f32 %v1775_v41  ;;  %2044 = vmatpush.bf16.msra.mxu2 %v2959_v39 }
 0xa8b   : > { %v1612_v42 = vpack.c.bf16 %v1611_v40, %v1611_v40 }
 0xa8d   : > { %2739 = vmatmul.msk.bf16.vlgmr.msra.gmra.mxu0 %vm1188_vm2, %v1612_v42 }
 0xa90   : > { %v3120_v43 = vpop.eup %3119 }
 0xa91   : > { %v1777_v44 = vmul.f32 %v3120_v43, %v3112_v19  ;;  %v1780_v47 = vpop.permute.xlu2 %1779  ;;  %v1701_v51 = vpop.xlane.xlu0 %1700  ;;  %v2951_v19 = vld [vmem:[%s3606_s26 + $0x20] sm:$0xff] }
 0xa92   : > { %v1785_v48 = vsel %vm1204_vm1, %v1780_v47, 0  ;;  %3121 = vrcp.f32 %v1701_v51  ;;  %v3083_v51 = vld [vmem:[%s897_s12] ss:$0 sm:$0xff] }
 0xa93   : > { %v1778_v50 = vpack.c.bf16 %v1777_v44, %v1777_v44  ;;  %1794 = vmatpush.bf16.msra.mxu3 %v1785_v48 }
 0xa96   : > { %2746 = vmatmul.msk.bf16.vlgmr.msra.gmra.mxu3 %vm1188_vm2, %v1778_v50 }
 0xa98   : > { %v3122_v52 = vpop.eup %3121 }
 0xa99   : > { %v1703_v53 = vmul.f32 %v3122_v52, %v3114_v38  ;;  %v2949_v38 = vld [vmem:[%s3606_s26 + $0x10] sm:$0xff] }
 0xa9b   : > { %v1704_v58 = vpack.c.bf16 %v1703_v53, %v1703_v53 }
 0xaa4   : > { %v1706_v55 = vpop.permute.xlu0 %1705 }
 0xaa5   : > { %v1711_v57 = vsel %vm1204_vm1, %v1706_v55, 0 }
 0xaa6   : > { %1720 = vmatpush.bf16.msrb.mxu0 %v1711_v57 }
 0xaa9   : > { %2743 = vmatmul.msk.bf16.vlgmr.msrb.gmra.mxu0 %vm1188_vm2, %v1704_v58 }
 0xaaa   : > { %1810 = vmatpush.bf16.msra.mxu0 %v3847_v34 }
 0xaae   : > { %1811 = vmatpush.bf16.msra.mxu0 %v3857_v45 }
 0xb0a   : > { %v1633_v59 = vpop.f32.mrf.mxu0 }
 0xb0b   : > { %v1637_v60 = vpack.c.bf16 %v1633_v59, %v1633_v59 }
 0xb0d   : > { %2740 = vmatmul.msk.bf16.vlgmr.msrb.gmra.mxu1 %vm1168_vm0, %v1637_v60 }
 0xb0e   : > { %1956 = vmatpush.bf16.msrb.mxu1 %v2954_v14 }
 0xb12   : > { %v1635_v61 = vpop.f32.mrf.mxu0  ;;  %1957 = vmatpush.bf16.msrb.mxu1 %v2953_v1 }
 0xb16   : > { %1958 = vmatpush.bf16.msrb.mxu1 %v2952_v2 }
 0xb19   : > { %v1796_v62 = vpop.f32.mrf.mxu3 }
 0xb1a   : > { %v1800_v63 = vpack.c.bf16 %v1796_v62, %v1796_v62  ;;  %1959 = vmatpush.bf16.msrb.mxu1 %v2951_v19  ;;  %v2958_v62 = vld [vmem:[%s3612_s30 + $0x18] sm:$0xff] }
 0xb1b   : > { %2045 = vmatpush.bf16.msra.mxu2 %v2958_v62 }
 0xb1c   : > { %2747 = vmatmul.msk.bf16.vlgmr.msra.gmra.mxu0 %vm1168_vm0, %v1800_v63  ;;  %v2957_v63 = vld [vmem:[%s3612_s30 + $0x10] sm:$0xff] }
 0xb1e   : > { %1960 = vmatpush.bf16.msrb.mxu1 %v2950_v21 }
 0xb1f   : > { %2046 = vmatpush.bf16.msra.mxu2 %v2957_v63 }
 0xb21   : > { %v1798_v0 = vpop.f32.mrf.mxu3 }
 0xb22   : > { %1961 = vmatpush.bf16.msrb.mxu1 %v2949_v38  ;;  %v2956_v0 = vld [vmem:[%s3612_s30 + $0x8] sm:$0xff] }
 0xb23   : > { %2047 = vmatpush.bf16.msra.mxu2 %v2956_v0 }
 0xb26   : > { %v1722_v54 = vpop.f32.mrf.mxu0  ;;  %1962 = vmatpush.bf16.msrb.mxu1 %v2948_v22 }
 0xb27   : > { %v1726_v12 = vpack.c.bf16 %v1722_v54, %v1722_v54  ;;  %v2955_v54 = vld [vmem:[%s3612_s30] sm:$0xff]  ;;  %s4095_s30 = sld [smem:[#allocation28_spill]] (!%p2812_p1) }
 0xb28   : > { %2048 = vmatpush.bf16.msra.mxu2 %v2955_v54 }
 0xb29   : > { %2744 = vmatmul.msk.bf16.vlgmr.msra.gmra.mxu1 %vm1168_vm0, %v1726_v12 }
 0xb2a   : > { %1963 = vmatpush.bf16.msrb.mxu1 %v2947_v49 }
 0xb2e   : > { %v1724_v34 = vpop.f32.mrf.mxu0 }
 0xb2f   : > { %v3085_v34 = vld [vmem:[%s903_s23] ss:$0 sm:$0xff] }
 0xb8a   : > { %v1650_v13 = vpop.f32.mrf.mxu1 }
 0xb8b   : > { %v1667_v11 = vadd.f32 %v3860_v46, %v1650_v13 }
 0xb92   : > { %v1652_v3 = vpop.f32.mrf.mxu1 }
 0xb99   : > { %v1813_v56 = vpop.f32.mrf.mxu0 }
 0xba1   : > { %v1815_v45 = vpop.f32.mrf.mxu0 }
 0xba6   : > { %v1739_v4 = vpop.f32.mrf.mxu1 }
 0xba7   : > { %v1743_v5 = vadd.f32 %v1739_v4, %v1667_v11 }
 0xba9   : > { %v1817_v27 = vadd.f32 %v1813_v56, %v1743_v5  ;;  %v3086_v5 = vld [vmem:[%s906_s5] ss:$0 sm:$0xff] }
 0xbab   : > { %v1823_v7 = vadd.f32 %v3878_v10, %v1817_v27  ;;  %v1848_v10 = vpop.xlane.xlu2 %1847 }
 0xbac   : > { %v1851_v18 = vmul.f32 %v1848_v10, %v3889_v32 }
 0xbad   : > { %v1827_v8 = vadd.f32 %v1825_v6, %v1823_v7 }
 0xbae   : > { %v1741_v9 = vpop.f32.mrf.mxu1  ;;  %v1853_v20 = vadd.f32 1e-05, %v1851_v18 }
 0xbaf   : > { %1832 = vadd.xlane.f32.xlu0 %v1827_v8 }
 0xbb0   : > { %3123 = vrsqrt.f32 %v1853_v20  ;;  %vm1861_vm5 = vweird.f32 %v1853_v20 }
 0xbb6   : > { %v3124_v23 = vpop.eup %3123 }
 0xbb7   : > { %v1856_v28 = vmul.f32 %v3124_v23, %v1853_v20  ;;  %vm1862_vm4 = vweird.f32 %v3124_v23 }
 0xbb8   : > { %vm1863_vm6 = vmor %vm1861_vm5, %vm1862_vm4 }
 0xbb9   : > { %v1857_v26 = vmul.f32 %v3124_v23, %v1856_v28 }
 0xbbb   : > { %v1858_v31 = vmul.f32 0.5, %v1857_v26 }
 0xbbd   : > { %v1859_v37 = vsub.f32 1.5, %v1858_v31  ;;  %v3087_v31 = vld [vmem:[%s909_s22] ss:$0 sm:$0xff] }
 0xbbf   : > { %v1860_v41 = vmul.f32 %v3124_v23, %v1859_v37  ;;  %v3088_v37 = vld [vmem:[%s912_s24] ss:$0 sm:$0xff]  ;;  %s4094_s24 = sld [smem:[#allocation27_spill]] (!%p2812_p1) }
 0xbc1   : > { %v1864_v44 = vsel %vm1863_vm6, %v3124_v23, %v1860_v41 }
 0xbc2   : > { %v1875_v50 = vmul.f32 %v1864_v44, %v3892_v35  ;;  %v3084_v35 = vld [vmem:[%s4090_s19] ss:$0 sm:$0xff] }
 0xbc4   : > { %v1880_v57 = vmul.f32 %v3083_v51, %v1875_v50 }
 0xbc6   : > { %v1885_v59 = vadd.f32 %v3084_v35, %v1880_v57 }
 0xc22   : > { %v1833_v15 = vpop.xlane.xlu0 %1832 }
 0xc23   : > { %v1842_v16 = vmul.f32 %v3889_v32, %v1833_v15 }
 0xc25   : > { %v1844_v46 = vsub.f32 %v1827_v8, %v1842_v16 }
 0xc27   : > { %v1846_v17 = vmul.f32 %v1844_v46, %v1844_v46 }
 0xc29   : > { %1849 = vadd.xlane.f32.xlu1 %v1846_v17 }
 0xc9c   : > { %v1850_v24 = vpop.xlane.xlu1 %1849 }
 0xc9d   : > { %v1852_v29 = vmul.f32 %v1850_v24, %v3889_v32 }
 0xc9f   : > { %v1854_v33 = vadd.f32 1e-05, %v1852_v29 }
 0xca1   : > { %3125 = vrsqrt.f32 %v1854_v33  ;;  %vm1871_vm8 = vweird.f32 %v1854_v33 }
 0xca7   : > { %v3126_v40 = vpop.eup %3125 }
 0xca8   : > { %v1866_v42 = vmul.f32 %v3126_v40, %v1854_v33  ;;  %vm1872_vm7 = vweird.f32 %v3126_v40 }
 0xca9   : > { %vm1873_vm9 = vmor %vm1871_vm8, %vm1872_vm7 }
 0xcaa   : > { %v1867_v43 = vmul.f32 %v3126_v40, %v1866_v42 }
 0xcac   : > { %v1868_v47 = vmul.f32 0.5, %v1867_v43 }
 0xcae   : > { %v1869_v48 = vsub.f32 1.5, %v1868_v47 }
 0xcb0   : > { %v1870_v52 = vmul.f32 %v3126_v40, %v1869_v48 }
 0xcb2   : > { %v1874_v53 = vsel %vm1873_vm9, %v3126_v40, %v1870_v52 }
 0xcb3   : > { %v1876_v55 = vmul.f32 %v1874_v53, %v1844_v46 }
 0xcb5   : > { %v1881_v58 = vmul.f32 %v3083_v51, %v1876_v55 }
 0xcb7   : > { %v1886_v60 = vadd.f32 %v3084_v35, %v1881_v58 }
 0xcb9   : > { %v1887_v61 = vpack.c.bf16 %v1886_v60, %v1885_v59 }
 0xcbb   : > { %1964 = vmatmul.bf16.vlgmr.msrb.gmra.mxu1 %v1887_v61 }
 0xd38   : > { %v1965_v12 = vpop.f32.mrf.mxu1 }
 0xd39   : > { %v1966_v13 = vadd.f32 %v3085_v34, %v1965_v12 }
 0xd3b   : > { %v1970_v45 = vmax.f32 %v1966_v13, 0.0 }
 0xd40   : > { %v1967_v3 = vpop.f32.mrf.mxu1 }
 0xd41   : > { %v1968_v56 = vadd.f32 %v3085_v34, %v1967_v3 }
 0xd43   : > { %v1971_v11 = vmax.f32 %v1968_v56, 0.0 }
 0xd45   : > { %v1972_v4 = vpack.c.bf16 %v1971_v11, %v1970_v45 }
 0xd47   : > { %2049 = vmatmul.bf16.vlgmr.msra.gmra.mxu2 %v1972_v4 }
 0xdca   : > { %v2050_v27 = vpop.f32.mrf.mxu2 }
 0xdcb   : > { %v2051_v6 = vadd.f32 %v3086_v5, %v2050_v27 }
 0xdcd   : > { %v2055_v7 = vadd.f32 %v2051_v6, %v1885_v59 }
 0xdcf   : > { %2059 = vadd.xlane.f32.xlu1 %v2055_v7 }
 0xdd2   : > { %v2052_v8 = vpop.f32.mrf.mxu2 }
 0xdd3   : > { %v2053_v9 = vadd.f32 %v3086_v5, %v2052_v8 }
 0xdd5   : > { %v2056_v14 = vadd.f32 %v2053_v9, %v1886_v60 }
 0xdd7   : > { %2061 = vadd.xlane.f32.xlu0 %v2056_v14 }
 0xe42   : > { %v2060_v15 = vpop.xlane.xlu1 %2059 }
 0xe43   : > { %v2063_v16 = vmul.f32 %v2060_v15, %v3889_v32 }
 0xe45   : > { %v2065_v46 = vsub.f32 %v2055_v7, %v2063_v16 }
 0xe47   : > { %v2067_v17 = vmul.f32 %v2065_v46, %v2065_v46 }
 0xe49   : > { %2069 = vadd.xlane.f32.xlu2 %v2067_v17 }
 0xe4a   : > { %v2062_v1 = vpop.xlane.xlu0 %2061 }
 0xe4b   : > { %v2064_v2 = vmul.f32 %v2062_v1, %v3889_v32 }
 0xe4d   : > { %v2066_v10 = vsub.f32 %v2056_v14, %v2064_v2 }
 0xe4f   : > { %v2068_v18 = vmul.f32 %v2066_v10, %v2066_v10 }
 0xe51   : > { %2071 = vadd.xlane.f32.xlu1 %v2068_v18 }
 0xebc   : > { %v2070_v19 = vpop.xlane.xlu2 %2069 }
 0xebd   : > { %v2073_v20 = vmul.f32 %v2070_v19, %v3889_v32 }
 0xebf   : > { %v2075_v21 = vadd.f32 1e-05, %v2073_v20 }
 0xec1   : > { %3127 = vrsqrt.f32 %v2075_v21  ;;  %vm2083_vm11 = vweird.f32 %v2075_v21 }
 0xec4   : > { %v2072_v38 = vpop.xlane.xlu1 %2071 }
 0xec5   : > { %v2074_v22 = vmul.f32 %v2072_v38, %v3889_v32 }
 0xec7   : > { %v3128_v23 = vpop.eup %3127  ;;  %v2076_v49 = vadd.f32 1e-05, %v2074_v22 }
 0xec8   : > { %v2078_v28 = vmul.f32 %v3128_v23, %v2075_v21  ;;  %vm2084_vm10 = vweird.f32 %v3128_v23 }
 0xec9   : > { %3129 = vrsqrt.f32 %v2076_v49  ;;  %vm2085_vm12 = vmor %vm2083_vm11, %vm2084_vm10  ;;  %vm2093_vm14 = vweird.f32 %v2076_v49 }
 0xeca   : > { %v2079_v25 = vmul.f32 %v3128_v23, %v2078_v28 }
 0xecc   : > { %v2080_v26 = vmul.f32 0.5, %v2079_v25 }
 0xece   : > { %v2081_v24 = vsub.f32 1.5, %v2080_v26 }
 0xecf   : > { %v3130_v29 = vpop.eup %3129 }
 0xed0   : > { %v2082_v30 = vmul.f32 %v3128_v23, %v2081_v24  ;;  %v2088_v33 = vmul.f32 %v3130_v29, %v2076_v49  ;;  %vm2094_vm13 = vweird.f32 %v3130_v29 }
 0xed1   : > { %vm2095_vm15 = vmor %vm2093_vm14, %vm2094_vm13 }
 0xed2   : > { %v2086_v32 = vsel %vm2085_vm12, %v3128_v23, %v2082_v30  ;;  %v2089_v36 = vmul.f32 %v3130_v29, %v2088_v33 }
 0xed3   : > { %v2097_v39 = vmul.f32 %v2086_v32, %v2065_v46 }
 0xed4   : > { %v2090_v40 = vmul.f32 0.5, %v2089_v36 }
 0xed5   : > { %v2102_v41 = vmul.f32 %v3087_v31, %v2097_v39 }
 0xed6   : > { %v2091_v42 = vsub.f32 1.5, %v2090_v40 }
 0xed7   : > { %v2107_v43 = vadd.f32 %v3088_v37, %v2102_v41 }
 0xed8   : > { %v2092_v44 = vmul.f32 %v3130_v29, %v2091_v42 }
 0xed9   : > { %v2109_v47 = vpack.c.bf16 %v2107_v43, %v2107_v43 }
 0xeda   : > { %v2096_v48 = vsel %vm2095_vm15, %v3130_v29, %v2092_v44 }
 0xedb   : > { %v2098_v50 = vmul.f32 %v2096_v48, %v2066_v10 }
 0xedd   : > { %v2103_v51 = vmul.f32 %v3087_v31, %v2098_v50 }
 0xedf   : > { %v2108_v52 = vadd.f32 %v3088_v37, %v2103_v51  ;;  %2116 = sbr.rel (%p2812_p1) target bundleno = 4269 (0x10ad), region = 132 }
 0xee1   : > { %v2110_v53 = vpack.c.bf16 %v2108_v52, %v2108_v52  ;;  %v2990_v55 = vpack.c.bf16 %v2108_v52, %v2107_v43 }
 0xee3   : > { %2991 = vst [vmem:[#allocation2] sm:$0xff] %v2990_v55  }
 0xee4   : > { %v2970_v57 = vld [vmem:[%s4094_s24 + $0x38] sm:$0xff]  ;;  %v2969_v35 = vld [vmem:[%s4094_s24 + $0x30] sm:$0xff]  ;;  %v2978_v58 = vld [vmem:[#allocation8 + $0x38] sm:$0xff]  ;;  %v2139_v34 = vunpack.c.l.b16 %v2109_v47  ;;  %v2140_v13 = vunpack.c.l.b16 %v2110_v53  ;;  %v3338_v1 = vmov -0.35355338  }
 0xee5   : > { %2191 = vmatpush.bf16.msra.mxu0 %v2970_v57  ;;  %2278 = vmatpush.bf16.msra.mxu1 %v2978_v58  ;;  %v2977_v59 = vld [vmem:[#allocation8 + $0x30] sm:$0xff]  ;;  %v2968_v60 = vld [vmem:[%s4094_s24 + $0x28] sm:$0xff]  ;;  %v2976_v61 = vld [vmem:[#allocation8 + $0x28] sm:$0xff] }
 0xee6   : > { %v2967_v62 = vld [vmem:[%s4094_s24 + $0x20] sm:$0xff]  ;;  %v2975_v63 = vld [vmem:[#allocation8 + $0x20] sm:$0xff]  ;;  %v2966_v0 = vld [vmem:[%s4094_s24 + $0x18] sm:$0xff]  ;;  %v2141_v56 = vpack.c.b16 %v2140_v13, %v2139_v34 }
 0xee7   : > { %v2965_v54 = vld [vmem:[%s4094_s24 + $0x10] sm:$0xff]  ;;  %v2964_v12 = vld [vmem:[%s4094_s24 + $0x8] sm:$0xff]  ;;  %v2963_v3 = vld [vmem:[%s4094_s24] sm:$0xff] }
 0xee8   : > { %v2974_v45 = vld [vmem:[#allocation8 + $0x18] sm:$0xff]  ;;  %v2973_v11 = vld [vmem:[#allocation8 + $0x10] sm:$0xff]  ;;  %v2972_v4 = vld [vmem:[#allocation8 + $0x8] sm:$0xff] }
 0xee9   : > { %2192 = vmatpush.bf16.msra.mxu0 %v2969_v35  ;;  %2279 = vmatpush.bf16.msra.mxu1 %v2977_v59  ;;  %v2971_v5 = vld [vmem:[#allocation8] sm:$0xff]  ;;  %v2986_v27 = vld [vmem:[#allocation10 + $0x38] sm:$0xff]  ;;  %v2985_v6 = vld [vmem:[#allocation10 + $0x30] sm:$0xff] }
 0xeea   : > { %2361 = vmatpush.bf16.msra.mxu2 %v2986_v27  ;;  %v2984_v7 = vld [vmem:[#allocation10 + $0x28] sm:$0xff]  ;;  %v2983_v8 = vld [vmem:[#allocation10 + $0x20] sm:$0xff]  ;;  %v2982_v9 = vld [vmem:[#allocation10 + $0x18] sm:$0xff] }
 0xeeb   : > { %v3131_v15 = vld [vmem:[%s4095_s30] ss:$0 sm:$0xff]  ;;  %v2981_v19 = vld [vmem:[#allocation10 + $0x10] sm:$0xff]  ;;  %v2980_v20 = vld [vmem:[#allocation10 + $0x8] sm:$0xff] }
 0xeec   : > { %v2979_v21 = vld [vmem:[#allocation10] sm:$0xff]  ;;  %v3132_v22 = vld [vmem:[%s4096_s8] ss:$0 sm:$0xff] }
 0xeed   : > { %2193 = vmatpush.bf16.msra.mxu0 %v2968_v60  ;;  %2280 = vmatpush.bf16.msra.mxu1 %v2976_v61  ;;  %v3133_v24 = vld [vmem:[%s4097_s21] ss:$0 sm:$0xff] }
 0xeee   : > { %2362 = vmatpush.bf16.msra.mxu2 %v2985_v6  ;;  %v2375_v29 = vld [vmem:[%s4098_s16] sm:$0xf] }
 0xeef   : > { %v2376_v33 = vunpack.c.l.bf16 %v2375_v29 }
 0xef1   : > { %2194 = vmatpush.bf16.msra.mxu0 %v2967_v62  ;;  %2281 = vmatpush.bf16.msra.mxu1 %v2975_v63 }
 0xef2   : > { %2363 = vmatpush.bf16.msra.mxu2 %v2984_v7 }
 0xef5   : > { %2195 = vmatpush.bf16.msra.mxu0 %v2966_v0  ;;  %2282 = vmatpush.bf16.msra.mxu1 %v2974_v45 }
 0xef6   : > { %2364 = vmatpush.bf16.msra.mxu2 %v2983_v8 }
 0xef9   : > { %2196 = vmatpush.bf16.msra.mxu0 %v2965_v54  ;;  %2283 = vmatpush.bf16.msra.mxu1 %v2973_v11 }
 0xefa   : > { %2365 = vmatpush.bf16.msra.mxu2 %v2982_v9 }
 0xefd   : > { %2197 = vmatpush.bf16.msra.mxu0 %v2964_v12  ;;  %2284 = vmatpush.bf16.msra.mxu1 %v2972_v4 }
 0xefe   : > { %2366 = vmatpush.bf16.msra.mxu2 %v2981_v19 }
 0xf01   : > { %2198 = vmatpush.bf16.msra.mxu0 %v2963_v3  ;;  %2285 = vmatpush.bf16.msra.mxu1 %v2971_v5 }
 0xf02   : > { %2367 = vmatpush.bf16.msra.mxu2 %v2980_v20 }
 0xf04   : > { %2199 = vmatmul.bf16.vlgmr.msra.gmra.mxu0 %v2141_v56 }
 0xf06   : > { %2368 = vmatpush.bf16.msra.mxu2 %v2979_v21 }
 0xf81   : > { %v2200_v14 = vpop.f32.mrf.mxu0 }
 0xf82   : > { %v2201_v16 = vadd.f32 %v3131_v15, %v2200_v14 }
 0xf84   : > { %vm2205_vm0 = vcmp.gt.f32.partialorder %v2201_v16, 0.0 }
 0xf85   : > { %v2207_v2 = vsel %vm2205_vm0, 0.35355338, %v3338_v1 }
 0xf89   : > { %v2202_v46 = vpop.f32.mrf.mxu0 }
 0xf8a   : > { %v2203_v17 = vadd.f32 %v3131_v15, %v2202_v46 }
 0xf8c   : > { %vm2206_vm1 = vcmp.gt.f32.partialorder %v2203_v17, 0.0 }
 0xf8d   : > { %v2208_v10 = vsel %vm2206_vm1, 0.35355338, %v3338_v1 }
 0xf8e   : > { %v2209_v18 = vpack.c.bf16 %v2208_v10, %v2207_v2 }
 0xf90   : > { %2286 = vmatmul.bf16.vlgmr.msra.gmra.mxu1 %v2209_v18 }
0x100d   : > { %v2287_v38 = vpop.f32.mrf.mxu1 }
0x100e   : > { %v2288_v49 = vadd.f32 %v3132_v22, %v2287_v38 }
0x1015   : > { %v2289_v23 = vpop.f32.mrf.mxu1 }
0x1016   : > { %v2290_v28 = vadd.f32 %v3132_v22, %v2289_v23 }
0x1018   : > { %v2292_v25 = vpack.c.bf16 %v2290_v28, %v2288_v49 }
0x101a   : > { %2369 = vmatmul.bf16.vlgmr.msra.gmra.mxu2 %v2292_v25 }
0x109d   : > { %v2370_v26 = vpop.f32.mrf.mxu2 }
0x109e   : > { %v2371_v30 = vadd.f32 %v3133_v24, %v2370_v26 }
0x10a0   : > { %v2377_v36 = vadd.f32 %v2376_v33, %v2371_v30 }
0x10a5   : > { %v2372_v31 = vpop.f32.mrf.mxu2 }
0x10a6   : > { %v2373_v32 = vadd.f32 %v3133_v24, %v2372_v31 }
0x10a8   : > { %v2378_v37 = vadd.f32 %v2376_v33, %v2373_v32 }
0x10aa   : > { %v2995_v39 = vpack.c.bf16 %v2378_v37, %v2377_v36 }
0x10ac   : > { %2996 = vst [vmem:[%s4099_s3] sm:$0xff] %v2995_v39  }
0x10ad PF: > { %s4100_s27 = sld [smem:[#allocation15_spill]]  ;;  %s4103_s2 = smov %s3318_s25 }
0x10ae   : > { %s4101_s18 = sld [smem:[#allocation14_spill]] }
0x10af   : > { %s4102_s26 = sld [smem:[#allocation16_spill]] }
0x10b3   : > { %p35_p4 = scmp.ge.s32.totalorder %s4100_s27, 4  }
0x10b4   : > { %s4104_s25 = smov %s4101_s18 }
0x10b5   :  { %37 = sbr.rel (!%p35_p4) target bundleno = 25 (0x19), region = 208 }
0x10ba   :  { %2394 = vsyncpa [#allocation4], 1 }
0x10bb   :  { %2396 = vsyncpa [#allocation4 + $0x1], 1 }
0x10bc   :  { %2397 = vsyncpa [#allocation6], 1 }
0x10bd   :  { %2399 = vsyncpa [#allocation6 + $0x1], 1 }
0x10be   :  { %2400 = vsyncpa [#allocation9], 1 }

// kernel: ideal_translator_forward.3
= control target key start
LH: loop header
LB: loop body
LE: loop exit
PB: predicated region body
PF: predicated region fallthrough
CT: control target
= control target key end

     0   :  { %s6018_s0 = inlined_call_operand.vmem [shape: bf16[2,8,128], index: 0, kind: input, shape index: {}]   ;;  %s6019_s1 = inlined_call_operand.vmem [shape: bf16[2,8,128], index: 1, kind: input, shape index: {}]   ;;  %s6020_s2 = inlined_call_operand.vmem [shape: f32[2,1,8], index: 2, kind: input, shape index: {}]   ;;  %s6021_s3 = inlined_call_operand.vmem [shape: f32[2,1,8], index: 3, kind: input, shape index: {}]   ;;  %s6022_s4 = inlined_call_operand.hbm [shape: bf16[2,128,384], index: 4, kind: input, shape index: {}]   ;;  %s6023_s5 = inlined_call_operand.vmem [shape: f32[2,1,384], index: 5, kind: input, shape index: {}]   ;;  %s6024_s6 = inlined_call_operand.hbm [shape: bf16[2,128,128], index: 6, kind: input, shape index: {}]   ;;  %s6025_s7 = inlined_call_operand.vmem [shape: f32[2,1,128], index: 7, kind: input, shape index: {}]   ;;  %s6026_s8 = inlined_call_operand.vmem [shape: f32[2,1,128], index: 8, kind: input, shape index: {}]   ;;  %s6027_s9 = inlined_call_operand.vmem [shape: f32[2,1,128], index: 9, kind: input, shape index: {}]   ;;  %s6028_s10 = inlined_call_operand.hbm [shape: bf16[2,128,128], index: 10, kind: input, shape index: {}]   ;;  %s6029_s11 = inlined_call_operand.vmem [shape: f32[2,1,128], index: 11, kind: input, shape index: {}]   ;;  %s6030_s12 = inlined_call_operand.hbm [shape: bf16[2,128,256], index: 12, kind: input, shape index: {}]   ;;  %s6031_s13 = inlined_call_operand.vmem [shape: f32[2,1,256], index: 13, kind: input, shape index: {}]   ;;  %s6032_s14 = inlined_call_operand.hbm [shape: bf16[2,128,128], index: 14, kind: input, shape index: {}]   ;;  %s6033_s15 = inlined_call_operand.vmem [shape: f32[2,1,128], index: 15, kind: input, shape index: {}]   ;;  %s6034_s16 = inlined_call_operand.vmem [shape: f32[2,1,128], index: 16, kind: input, shape index: {}]   ;;  %s6035_s17 = inlined_call_operand.vmem [shape: f32[2,1,128], index: 17, kind: input, shape index: {}]   ;;  %s6036_s18 = inlined_call_operand.hbm [shape: bf16[2,128,128], index: 18, kind: input, shape index: {}]   ;;  %s6037_s19 = inlined_call_operand.vmem [shape: f32[2,1,128], index: 19, kind: input, shape index: {}]   ;;  %s6038_s20 = inlined_call_operand.hbm [shape: bf16[2,128,128], index: 20, kind: input, shape index: {}]   ;;  %s6039_s21 = inlined_call_operand.vmem [shape: f32[2,1,128], index: 21, kind: input, shape index: {}]   ;;  %s6040_s22 = inlined_call_operand.vmem [shape: f32[2,1,128], index: 22, kind: input, shape index: {}]   ;;  %s6041_s23 = inlined_call_operand.vmem [shape: f32[2,1,128], index: 23, kind: input, shape index: {}]   ;;  %s6042_s24 = inlined_call_operand.hbm [shape: bf16[128,128], index: 24, kind: input, shape index: {}]   ;;  %s6043_s25 = inlined_call_operand.hbm [shape: f32[1,128], index: 25, kind: input, shape index: {}]   ;;  %s6044_s26 = inlined_call_operand.hbm [shape: f32[2,8,128], index: 26, kind: output, shape index: {}]  }
   0x1   :  { %6069 = sst [smem:[#allocation33_spill]] %s6018_s0 }
   0x2   :  { %6070 = sst [smem:[#allocation34_spill]] %s6019_s1 }
   0x3   :  { %6071 = sst [smem:[#allocation35_spill]] %s6020_s2 }
   0x4   :  { %6072 = sst [smem:[#allocation36_spill]] %s6021_s3 }
   0x5   :  { %6073 = sst [smem:[#allocation37_spill]] %s6022_s4 }
   0x6   :  { %6074 = sst [smem:[#allocation38_spill]] %s6023_s5 }
   0x7   :  { %6075 = sst [smem:[#allocation39_spill]] %s6024_s6 }
   0x8   :  { %6076 = sst [smem:[#allocation40_spill]] %s6025_s7 }
   0x9   :  { %6077 = sst [smem:[#allocation41_spill]] %s6026_s8 }
   0xa   :  { %6078 = sst [smem:[#allocation42_spill]] %s6027_s9 }
   0xb   :  { %6079 = sst [smem:[#allocation43_spill]] %s6028_s10 }
   0xc   :  { %6080 = sst [smem:[#allocation44_spill]] %s6029_s11 }
   0xd   :  { %6081 = sst [smem:[#allocation45_spill]] %s6030_s12 }
   0xe   :  { %6082 = sst [smem:[#allocation46_spill]] %s6031_s13 }
   0xf   :  { %6083 = sst [smem:[#allocation47_spill]] %s6032_s14 }
  0x10   :  { %6084 = sst [smem:[#allocation48_spill]] %s6033_s15 }
  0x11   :  { %6085 = sst [smem:[#allocation49_spill]] %s6034_s16 }
  0x12   :  { %6086 = sst [smem:[#allocation50_spill]] %s6035_s17 }
  0x13   :  { %6087 = sst [smem:[#allocation51_spill]] %s6036_s18 }
  0x14   :  { %6088 = sst [smem:[#allocation52_spill]] %s6037_s19 }
  0x15   :  { %6089 = sst [smem:[#allocation53_spill]] %s6038_s20 }
  0x16   :  { %6090 = sst [smem:[#allocation54_spill]] %s6039_s21 }
  0x17   :  { %6091 = sst [smem:[#allocation55_spill]] %s6040_s22 }
  0x18   :  { %6092 = sst [smem:[#allocation56_spill]] %s6041_s23 }
  0x19   :  { %6093 = sst [smem:[#allocation57_spill]] %s6042_s24 }
  0x1a   :  { %6094 = sst [smem:[#allocation58_spill]] %s6043_s25 }
  0x1b   :  { %6095 = sst [smem:[#allocation59_spill]] %s6044_s26 }
  0x1c   :  { %31 = vsyncpa [#allocation4], 0 }
  0x1d   :  { %33 = vsyncpa [#allocation4 + $0x1], 0 }
  0x1e   :  { %34 = vsyncpa [#allocation7], 0 }
  0x1f   :  { %36 = vsyncpa [#allocation7 + $0x1], 0 }
  0x20   :  { %37 = vsyncpa [#allocation10], 0 }
  0x21   :  { %39 = vsyncpa [#allocation10 + $0x1], 0 }
  0x22   :  { %40 = vsyncpa [#allocation13], 0 }
  0x23   :  { %42 = vsyncpa [#allocation13 + $0x1], 0 }
  0x24   :  { %43 = vsyncpa [#allocation16], 0 }
  0x25   :  { %44 = vsyncpa [#allocation5], 0  ;;  %s5116_s27 = smov 0   ;;  %s5118_s3 = smov 0  }
  0x26   :  { %s5120_s7 = smov 0   ;;  %s5122_s28 = smov 0  }
  0x27 LB: > { %6096 = sst [smem:[#allocation25_spill]] %s4955_s3  ;;  %s5135_s8 = sadd.s32 4294967295, %s4963_s28   ;;  %s4963_s28 = sphi %s5122_s28, %s6166_s28   ;;  %s4959_s7 = sphi %s5120_s7, %s6169_s7   ;;  %s4955_s3 = sphi %s5118_s3, %s6168_s3   ;;  %s4951_s27 = sphi %s5116_s27, %s6167_s27  }
  0x28   : > { %6097 = sst [smem:[#allocation26_spill]] %s4959_s7  ;;  %s5138_s4 = sadd.s32 1, %s4963_s28  }
  0x29   : > { %6098 = sst [smem:[#allocation27_spill]] %s5135_s8  ;;  %s138_s29 = ssub.s32 %s4963_s28, %s5138_s4 }
  0x2a   : > { %6099 = sst [smem:[#allocation28_spill]] %s5138_s4  ;;  %s141_s0 = sadd.s32 1, %s4959_s7 }
  0x2b   : > { %p139_p0 = scmp.eq.s32.totalorder %s138_s29, 0  ;;  %p148_p1 = scmp.ne.s32.totalorder %s4959_s7, %s4955_s3 }
  0x2c   : > { %p149_p2 = scmp.eq.s32.totalorder %s4963_s28, 0  ;;  %p154_p3 = scmp.ne.s32.totalorder %s4955_s3, %s4951_s27 }
  0x2d   : > { %s5148_s9 = scalar_select %p139_p0, %s4959_s7, %s141_s0  }
  0x2e   : > { %p5150_p4 = por %p149_p2, %p148_p1  ;;  %p155_p5 = scmp.eq.s32.totalorder %s5135_s8, 0 }
  0x2f   : > { %6100 = sst [smem:[#allocation29_spill]] %s5148_s9  ;;  %p3853_p6 = scmp.ge.s32.totalorder %s4963_s28, 1 }
  0x30   : > { %p722_p7 = scmp.lt.s32.totalorder %s4963_s28, 3  ;;  %p5159_p8 = por %p155_p5, %p154_p3 }
  0x31   : > { %p3854_p9 = scmp.ne.s32.totalorder %s5135_s8, 0  ;;  %s6105_s24 = sld [smem:[#allocation57_spill]] }
  0x32   : > { %s6102_s2 = scalar_select %p5159_p8, 1, 0 }
  0x33   : > { %p5164_p10 = pnand %p3853_p6, %p722_p7  ;;  %s4965_s27 = smov [#allocation15]  }
  0x34   : > { %6103 = sst [smem:[#allocation30_spill]] %s6102_s2  ;;  %s747_s29 = sshll.u32 %s4965_s27, 4  ;;  %s748_s29 = int_to_ptr.vmem [resolvable:$true] %s747_s29 }
  0x35   : > { %p4433_p11 = pneg %p5164_p10  ;;  %p4464_p13 = scmp.lt.s32.totalorder %s4963_s28, 2 }
  0x36   : > { %s5181_s9 = sand.u32 1, %s4959_s7   ;;  %s6053_s10 = smov 64  }
  0x37   : > { %s745_s1 = sshll.u32 %s6105_s24, 4  ;;  %p5175_p12 = pnand %p4433_p11, %p155_p5  ;;  %s746_s1 = int_to_ptr.hbm [resolvable:$true] %s745_s1 }
  0x38   : > { %s6055_s6 = smov 4   ;;  %p5190_p0 = pnand %p4464_p13, %p5150_p4 }
  0x39   : > { %4436 = dma.hbm_to_vmem [thread:$0]  (!%p5175_p12), %s746_s1, 1024, %s748_s29, [#allocation16], %s6053_s10, %s6053_s10, %s6055_s6  }
  0x3a   : > { %s5195_s24 = sand.u32 1, %s4963_s28   ;;  %s5198_s7 = sshll.u32 %s5181_s9, 6 }
  0x3b   : > { %s5201_s4 = sshll.u32 %s4963_s28, 6  ;;  %s806_s26 = scalar_lea.vmem [#allocation6], %s5198_s7 }
  0x3c   : > { %s814_s23 = sshll.u32 %s806_s26, 4  ;;  %s6108_s1 = sld [smem:[#allocation39_spill]]  ;;  %s815_s23 = int_to_ptr.vmem [resolvable:$true] %s814_s23 }
  0x3d   : > { %s3864_s10 = sshll.u32 %s5181_s9, 7  ;;  %p5212_p2 = pneg %p5190_p0 }
  0x42   : > { %s811_s30 = scalar_lea.hbm %s6108_s1, %s5201_s4  ;;  %s4648_s26 = scalar_lea.hbm %s6108_s1, 128 }
  0x43   : > { %s812_s29 = sshll.u32 %s811_s30, 4  ;;  %s813_s29 = int_to_ptr.hbm [resolvable:$true] %s812_s29 }
  0x44   : > { %s4641_s19 = sshra.s32 %s813_s29, 4  ;;  %s4642_s19 = int_to_ptr.hbm [resolvable:$true] %s4641_s19 }
  0x45   : > { %s4643_s17 = scalar_lea.hbm %s4642_s19, 64  ;;  %p4649_p6 = scmp.lt.s32.totalorder %s4642_s19, %s6108_s1 }
  0x46   : > { %p4644_p1 = scmp.ne.s32.totalorder %s4642_s19, %s4643_s17  ;;  %p4650_p7 = scmp.lt.s32.totalorder %s4648_s26, %s4643_s17 }
  0x48   : > { %p4646_p3 = pnand %p5212_p2, %p4644_p1  ;;  %p4651_p11 = por %p4650_p7, %p4649_p6 }
  0x4a   : > { %p4647_p4 = pneg %p4646_p3 }
  0x4c   : > { %p4652_p13 = pnand %p4651_p11, %p4647_p4 }
  0x4e   : > { %4655 = shalt.err (!%p4652_p13)
}
  0x4f   : > { %s6110_s6 = smov 4   ;;  %s6111_s15 = smov 64  }
  0x50   : > { %s6112_s11 = scalar_lea.sflag [#allocation7], %s5195_s24  ;;  %s4304_s21 = sshll.u32 %s4963_s28, 7 }
  0x51   : > { %4446 = dma.hbm_to_vmem [thread:$0]  (!%p5190_p0), %s813_s29, 1024, %s815_s23, %s6112_s11, %s6111_s15, %s6111_s15, %s6110_s6  }
  0x52   : > { %s6113_s12 = sld [smem:[#allocation45_spill]]  ;;  %s874_s17 = scalar_lea.vmem [#allocation9], %s3864_s10 }
  0x53   : > { %s882_s19 = sshll.u32 %s874_s17, 4  ;;  %s6064_s30 = scalar_lea.sflag [#allocation10], %s5195_s24  ;;  %s883_s19 = int_to_ptr.vmem [resolvable:$true] %s882_s19 }
  0x58   : > { %s879_s13 = scalar_lea.hbm %s6113_s12, %s4304_s21  ;;  %s4678_s23 = scalar_lea.hbm %s6113_s12, 256 }
  0x59   : > { %s880_s26 = sshll.u32 %s879_s13, 4  ;;  %s881_s26 = int_to_ptr.hbm [resolvable:$true] %s880_s26 }
  0x5a   : > { %s4671_s1 = sshra.s32 %s881_s26, 4  ;;  %s4672_s1 = int_to_ptr.hbm [resolvable:$true] %s4671_s1 }
  0x5b   : > { %s4673_s2 = scalar_lea.hbm %s4672_s1, 128  ;;  %p4679_p6 = scmp.lt.s32.totalorder %s4672_s1, %s6113_s12 }
  0x5c   : > { %p4674_p1 = scmp.ne.s32.totalorder %s4672_s1, %s4673_s2  ;;  %p4680_p7 = scmp.lt.s32.totalorder %s4678_s23, %s4673_s2 }
  0x5e   : > { %p4676_p3 = pnand %p4674_p1, %p5212_p2  ;;  %p4681_p11 = por %p4680_p7, %p4679_p6 }
  0x60   : > { %p4677_p4 = pneg %p4676_p3 }
  0x62   : > { %p4682_p13 = pnand %p4681_p11, %p4677_p4 }
  0x64   : > { %4685 = shalt.err (!%p4682_p13)
}
  0x65   : > { %s4968_s10 = smov 128   ;;  %s4969_s21 = smov 8  }
  0x66   : > { %4452 = dma.hbm_to_vmem [thread:$0]  (!%p5190_p0), %s881_s26, 2048, %s883_s19, %s6064_s30, %s4968_s10, %s4968_s10, %s4969_s21  }
  0x67   : > { %s6114_s18 = sld [smem:[#allocation51_spill]]  ;;  %s943_s2 = scalar_lea.vmem [#allocation12], %s5198_s7 }
  0x68   : > { %s951_s17 = sshll.u32 %s943_s2, 4  ;;  %s6063_s11 = scalar_lea.sflag [#allocation13], %s5195_s24  ;;  %s952_s17 = int_to_ptr.vmem [resolvable:$true] %s951_s17 }
  0x6d   : > { %s948_s13 = scalar_lea.hbm %s6114_s18, %s5201_s4  ;;  %s4708_s19 = scalar_lea.hbm %s6114_s18, 128 }
  0x6e   : > { %s949_s1 = sshll.u32 %s948_s13, 4  ;;  %s950_s1 = int_to_ptr.hbm [resolvable:$true] %s949_s1 }
  0x6f   : > { %s4701_s23 = sshra.s32 %s950_s1, 4  ;;  %s4702_s23 = int_to_ptr.hbm [resolvable:$true] %s4701_s23 }
  0x70   : > { %s4703_s29 = scalar_lea.hbm %s4702_s23, 64  ;;  %p4709_p6 = scmp.lt.s32.totalorder %s4702_s23, %s6114_s18 }
  0x71   : > { %p4704_p1 = scmp.ne.s32.totalorder %s4702_s23, %s4703_s29  ;;  %p4710_p7 = scmp.lt.s32.totalorder %s4708_s19, %s4703_s29 }
  0x73   : > { %p4706_p3 = pnand %p4704_p1, %p5212_p2  ;;  %p4711_p11 = por %p4710_p7, %p4709_p6 }
  0x75   : > { %p4707_p4 = pneg %p4706_p3 }
  0x77   : > { %p4712_p13 = pnand %p4711_p11, %p4707_p4 }
  0x79   : > { %4715 = shalt.err (!%p4712_p13)
}
  0x7a   : > { %4458 = dma.hbm_to_vmem [thread:$0]  (!%p5190_p0), %s950_s1, 1024, %s952_s17, %s6063_s11, %s6111_s15, %s6111_s15, %s6110_s6  }
  0x7b   : > { %s6115_s25 = sld [smem:[#allocation58_spill]]  ;;  %s4970_s22 = smov [#allocation17]  }
  0x7c   : > { %s762_s13 = sshll.u32 %s4970_s22, 4  ;;  %s4403_s2 = smul.u32 192, %s5181_s9  ;;  %s763_s13 = int_to_ptr.vmem [resolvable:$true] %s762_s13 }
  0x7d   : > { %s4404_s23 = smul.u32 192, %s4963_s28  ;;  %s6116_s19 = sld [smem:[#allocation37_spill]] }
  0x7e   : > { %s777_s10 = scalar_lea.vmem [#allocation3], %s4403_s2  ;;  %s6117_s11 = sld [smem:[#allocation43_spill]] }
  0x7f   : > { %s785_s1 = sshll.u32 %s777_s10, 4  ;;  %s774_s22 = scalar_lea.sflag [#allocation4], %s5181_s9  ;;  %s786_s1 = int_to_ptr.vmem [resolvable:$true] %s785_s1 }
  0x81   : > { %s760_s3 = sshll.u32 %s6115_s25, 4  ;;  %s761_s3 = int_to_ptr.hbm [resolvable:$true] %s760_s3 }
  0x82   : > { %4439 = dma.hbm_to_vmem [thread:$0]  (!%p5175_p12), %s761_s3, 16, %s763_s13, [#allocation16]  }
  0x83   : > { %s782_s26 = scalar_lea.hbm %s6116_s19, %s4404_s23  ;;  %s4768_s13 = scalar_lea.hbm %s6116_s19, 384 }
  0x84   : > { %s783_s17 = sshll.u32 %s782_s26, 4  ;;  %s851_s30 = scalar_lea.hbm %s6117_s11, %s5201_s4  ;;  %s784_s17 = int_to_ptr.hbm [resolvable:$true] %s783_s17 }
  0x85   : > { %s4761_s18 = sshra.s32 %s784_s17, 4  ;;  %s4762_s18 = int_to_ptr.hbm [resolvable:$true] %s4761_s18 }
  0x86   : > { %s4763_s0 = scalar_lea.hbm %s4762_s18, 192  ;;  %p4769_p4 = scmp.lt.s32.totalorder %s4762_s18, %s6116_s19 }
  0x87   : > { %p4764_p12 = scmp.ne.s32.totalorder %s4762_s18, %s4763_s0  ;;  %p4770_p6 = scmp.lt.s32.totalorder %s4768_s13, %s4763_s0 }
  0x89   : > { %p4766_p1 = pnand %p4764_p12, %p5212_p2  ;;  %p4771_p7 = por %p4770_p6, %p4769_p4 }
  0x8b   : > { %p4767_p3 = pneg %p4766_p1 }
  0x8d   : > { %p4772_p11 = pnand %p4771_p7, %p4767_p3 }
  0x8f   : > { %4775 = shalt.err (!%p4772_p11)
}
  0x90   : > { %s4971_s9 = smov 192   ;;  %s4972_s29 = smov 12  }
  0x91   : > { %4443 = dma.hbm_to_vmem [thread:$0]  (!%p5190_p0), %s784_s17, 3072, %s786_s1, %s774_s22, %s4971_s9, %s4971_s9, %s4972_s29  }
  0x92   : > { %s852_s8 = sshll.u32 %s851_s30, 4  ;;  %s846_s26 = scalar_lea.vmem [#allocation8], %s5198_s7  ;;  %s853_s8 = int_to_ptr.hbm [resolvable:$true] %s852_s8 }
  0x93   : > { %s854_s10 = sshll.u32 %s846_s26, 4  ;;  %s4791_s12 = sshra.s32 %s853_s8, 4  ;;  %s855_s10 = int_to_ptr.vmem [resolvable:$true] %s854_s10  ;;  %s4792_s12 = int_to_ptr.hbm [resolvable:$true] %s4791_s12 }
  0x94   : > { %s4793_s21 = scalar_lea.hbm %s4792_s12, 64  ;;  %s4798_s28 = scalar_lea.hbm %s6117_s11, 128 }
  0x95   : > { %p4794_p13 = scmp.ne.s32.totalorder %s4792_s12, %s4793_s21  ;;  %p4799_p3 = scmp.lt.s32.totalorder %s4792_s12, %s6117_s11 }
  0x96   : > { %p4800_p4 = scmp.lt.s32.totalorder %s4798_s28, %s4793_s21 }
  0x97   : > { %p4796_p12 = pnand %p4794_p13, %p5212_p2 }
  0x98   : > { %p4801_p6 = por %p4800_p4, %p4799_p3 }
  0x99   : > { %p4797_p1 = pneg %p4796_p12 }
  0x9b   : > { %p4802_p7 = pnand %p4801_p6, %p4797_p1 }
  0x9d   : > { %4805 = shalt.err (!%p4802_p7)
}
  0x9e   : > { %s6118_s30 = scalar_lea.sflag [#allocation7], %s5195_s24  ;;  %s6119_s14 = sld [smem:[#allocation47_spill]] }
  0x9f   : > { %4449 = dma.hbm_to_vmem [thread:$0]  (!%p5190_p0), %s853_s8, 1024, %s855_s10, %s6118_s30, %s6111_s15, %s6111_s15, %s6110_s6  }
  0xa0   : > { %s903_s23 = scalar_lea.vmem [#allocation11], %s5198_s7 }
  0xa1   : > { %s911_s9 = sshll.u32 %s903_s23, 4  ;;  %s912_s9 = int_to_ptr.vmem [resolvable:$true] %s911_s9 }
  0xa4   : > { %s908_s22 = scalar_lea.hbm %s6119_s14, %s5201_s4  ;;  %s4828_s8 = scalar_lea.hbm %s6119_s14, 128 }
  0xa5   : > { %s909_s2 = sshll.u32 %s908_s22, 4  ;;  %s910_s2 = int_to_ptr.hbm [resolvable:$true] %s909_s2 }
  0xa6   : > { %s4821_s29 = sshra.s32 %s910_s2, 4  ;;  %s4822_s29 = int_to_ptr.hbm [resolvable:$true] %s4821_s29 }
  0xa7   : > { %s4823_s26 = scalar_lea.hbm %s4822_s29, 64  ;;  %p4829_p1 = scmp.lt.s32.totalorder %s4822_s29, %s6119_s14 }
  0xa8   : > { %p4824_p11 = scmp.ne.s32.totalorder %s4822_s29, %s4823_s26  ;;  %p4830_p3 = scmp.lt.s32.totalorder %s4828_s8, %s4823_s26 }
  0xaa   : > { %p4826_p13 = pnand %p4824_p11, %p5212_p2  ;;  %p4831_p4 = por %p4830_p3, %p4829_p1 }
  0xac   : > { %p4827_p12 = pneg %p4826_p13 }
  0xae   : > { %p4832_p6 = pnand %p4831_p4, %p4827_p12 }
  0xb0   : > { %4835 = shalt.err (!%p4832_p6)
}
  0xb1   : > { %s6120_s0 = scalar_lea.sflag [#allocation10], %s5195_s24  ;;  %s6121_s20 = sld [smem:[#allocation53_spill]] }
  0xb2   : > { %4455 = dma.hbm_to_vmem [thread:$0]  (!%p5190_p0), %s910_s2, 1024, %s912_s9, %s6120_s0, %s6111_s15, %s6111_s15, %s6110_s6  }
  0xb3   : > { %s971_s1 = scalar_lea.vmem [#allocation14], %s5198_s7 }
  0xb4   : > { %s979_s17 = sshll.u32 %s971_s1, 4  ;;  %s980_s17 = int_to_ptr.vmem [resolvable:$true] %s979_s17 }
  0xb7   : > { %s976_s13 = scalar_lea.hbm %s6121_s20, %s5201_s4  ;;  %s4858_s2 = scalar_lea.hbm %s6121_s20, 128 }
  0xb8   : > { %s977_s30 = sshll.u32 %s976_s13, 4  ;;  %s978_s30 = int_to_ptr.hbm [resolvable:$true] %s977_s30 }
  0xb9   : > { %s4851_s22 = sshra.s32 %s978_s30, 4  ;;  %s4852_s22 = int_to_ptr.hbm [resolvable:$true] %s4851_s22 }
  0xba   : > { %s4853_s23 = scalar_lea.hbm %s4852_s22, 64  ;;  %p4859_p12 = scmp.lt.s32.totalorder %s4852_s22, %s6121_s20 }
  0xbb   : > { %p4854_p7 = scmp.ne.s32.totalorder %s4852_s22, %s4853_s23  ;;  %p4860_p1 = scmp.lt.s32.totalorder %s4858_s2, %s4853_s23 }
  0xbd   : > { %p4856_p11 = pnand %p4854_p7, %p5212_p2  ;;  %p4861_p3 = por %p4860_p1, %p4859_p12 }
  0xbf   : > { %p4857_p13 = pneg %p4856_p11 }
  0xc1   : > { %p4862_p4 = pnand %p4861_p3, %p4857_p13 }
  0xc3   : > { %4865 = shalt.err (!%p4862_p4)
}
  0xc4   : > { %s6122_s16 = scalar_lea.sflag [#allocation13], %s5195_s24  ;;  %1009 = sbr.rel (%p5164_p10) target bundleno = 5855 (0x16df), region = 124 }
  0xc5   : > { %4461 = dma.hbm_to_vmem [thread:$0]  (!%p5190_p0), %s978_s30, 1024, %s980_s17, %s6122_s16, %s6111_s15, %s6111_s15, %s6110_s6  }
  0xc9   : > { %s6123_s7 = sld [smem:[#allocation25_spill]] }
  0xcf   : > { %s1011_s21 = sand.u32 1, %s6123_s7  }
  0xd0   : > { %s4405_s8 = smul.u32 192, %s1011_s21  ;;  %s1012_s10 = scalar_lea.sflag [#allocation4], %s1011_s21 }
  0xd2   : > { %s5353_s18 = scalar_lea.vmem [#allocation3], %s4405_s8 }
  0xd3   : > { %4926 = dma.done.wait (%p5159_p8), %s1012_s10, 3072  }
  0xd4   : > { %4928 = vsyncadd (%p5159_p8), %s1012_s10, 4294964224  ;;  %s6125_s27 = sld [smem:[#allocation27_spill]]  ;;  %s3877_s24 = sshll.u32 %s1011_s21, 6 }
  0xd5   : > { %s5360_s6 = scalar_lea.vmem [#allocation6], %s3877_s24 }
  0xda   : > { %s1021_s0 = sand.u32 1, %s6125_s27  }
  0xdb   : > { %s1022_s15 = scalar_lea.sflag [#allocation7], %s1021_s0 }
  0xdc   : > { %4930 = dma.done.wait (%p5159_p8), %s1022_s15, 2048  }
  0xdd   : > { %4932 = vsyncadd (%p5159_p8), %s1022_s15, 4294965248  ;;  %s3879_s5 = sshll.u32 %s1011_s21, 7  ;;  %s5366_s28 = scalar_lea.vmem [#allocation8], %s3877_s24 }
  0xde   : > { %s1042_s3 = scalar_lea.sflag [#allocation10], %s1021_s0  ;;  %s5368_s13 = scalar_lea.vmem [#allocation9], %s3879_s5 }
  0xdf   : > { %4934 = dma.done.wait (%p5159_p8), %s1042_s3, 3072  }
  0xe0   : > { %4936 = vsyncadd (%p5159_p8), %s1042_s3, 4294964224  ;;  %s5374_s30 = scalar_lea.vmem [#allocation11], %s3877_s24  ;;  %s1062_s1 = scalar_lea.sflag [#allocation13], %s1021_s0 }
  0xe1   : > { %s5376_s17 = scalar_lea.vmem [#allocation12], %s3877_s24 }
  0xe2   : > { %6126 = sst [smem:[#allocation31_spill]] %s5376_s17 }
  0xe3   : > { %4938 = dma.done.wait (%p5159_p8), %s1062_s1, 2048  }
  0xe4   : > { %4940 = vsyncadd (%p5159_p8), %s1062_s1, 4294965248  ;;  %s5382_s22 = scalar_lea.vmem [#allocation14], %s3877_s24 }
  0xe5   : > { %6127 = sst [smem:[#allocation32_spill]] %s5382_s22 }
  0xe6   : > { %4942 = dma.done.wait (%p155_p5), [#allocation16], 1040  }
  0xe7   : > { %4944 = vsyncadd (%p155_p5), [#allocation16], 4294966256  ;;  %p1221_p10 = scmp.lt.s32.totalorder %s6125_s27, 1  ;;  %s6131_s3 = sld [smem:[#allocation38_spill]] }
  0xe8   : > { %s6134_s4 = sld [smem:[#allocation46_spill]] }
  0xe9   : > { %s5390_s23 = scalar_select %p1221_p10, %s6125_s27, 1 }
  0xea   : > { %s6135_s0 = sld [smem:[#allocation49_spill]] }
  0xeb   : > { %s4406_s29 = smul.u32 3, %s5390_s23  ;;  %s3885_s25 = sshll.u32 %s5390_s23, 1 }
  0xec   : > { %s6137_s19 = sld [smem:[#allocation52_spill]] }
  0xed   : > { %s5408_s1 = scalar_lea.vmem %s6131_s3, %s4406_s29  ;;  %s6136_s3 = sld [smem:[#allocation50_spill]] }
  0xee   : > { %s5422_s21 = scalar_lea.vmem %s6134_s4, %s3885_s25  ;;  %s6138_s2 = sld [smem:[#allocation54_spill]] }
  0xef   : > { %s6139_s25 = sld [smem:[#allocation55_spill]] }
  0xf0   : > { %s1246_s15 = scalar_lea.vmem %s6135_s0, %s5390_s23  ;;  %s6140_s8 = sld [smem:[#allocation56_spill]] }
  0xf1   : > { %s6141_s5 = sld [smem:[#allocation33_spill]] (!%p3854_p9) }
  0xf2   : > { %s1252_s20 = scalar_lea.vmem %s6137_s19, %s5390_s23  ;;  %1266 = sbr.rel (%p3854_p9) target bundleno = 249 (0xf9), region = 164 }
  0xf3   : > { %s1249_s24 = scalar_lea.vmem %s6136_s3, %s5390_s23 }
  0xf4   : > { %s1255_s9 = scalar_lea.vmem %s6138_s2, %s5390_s23 }
  0xf5   : > { %s1258_s7 = scalar_lea.vmem %s6139_s25, %s5390_s23 }
  0xf6   : > { %s1261_s10 = scalar_lea.vmem %s6140_s8, %s5390_s23 }
  0xf7   : > { %v1267_v0 = vld [vmem:[%s6141_s5] sm:$0xff]  }
  0xf8   : > { %1269 = vst [vmem:[#allocation2] sm:$0xff] %v1267_v0  }
  0xf9 PF: > { %v3977_v1 = vld [vmem:[%s5353_s18 + $0xa8] sm:$0xf]  ;;  %v4332_v2 = vld [vmem:[%s5353_s18 + $0xb0] sm:$0xf0]  ;;  %v4331_v3 = vld [vmem:[%s5353_s18 + $0xac] sm:$0xf] }
  0xfa   : > { %v3978_v4 = vor.u32 %v4332_v2, %v3977_v1  ;;  %v3979_v5 = vld [vmem:[%s5353_s18 + $0xb4] sm:$0xf0]  ;;  %v3965_v6 = vld [vmem:[%s5353_s18 + $0x90] sm:$0xf]  ;;  %v4329_v7 = vld [vmem:[%s5353_s18 + $0x98] sm:$0xf0] }
  0xfb   : > { %v3982_v8 = vor.u32 %v4331_v3, %v3979_v5  ;;  %v4328_v9 = vld [vmem:[%s5353_s18 + $0x94] sm:$0xf]  ;;  %v3967_v10 = vld [vmem:[%s5353_s18 + $0x9c] sm:$0xf0]  ;;  %v3966_v11 = vor.u32 %v4329_v7, %v3965_v6  ;;  %v3953_v13 = vld [vmem:[%s5353_s18 + $0x78] sm:$0xf] }
  0xfc   : > { %1455 = vmatpush.bf16.msra.mxu0 %v3978_v4  ;;  %v3970_v12 = vor.u32 %v4328_v9, %v3967_v10  ;;  %v4326_v14 = vld [vmem:[%s5353_s18 + $0x80] sm:$0xf0]  ;;  %v4325_v15 = vld [vmem:[%s5353_s18 + $0x7c] sm:$0xf]  ;;  %v3955_v16 = vld [vmem:[%s5353_s18 + $0x84] sm:$0xf0] }
  0xfd   : > { %1469 = vmatpush.bf16.msra.mxu1 %v3982_v8  ;;  %v3954_v17 = vor.u32 %v4326_v14, %v3953_v13  ;;  %v3958_v18 = vor.u32 %v4325_v15, %v3955_v16  ;;  %v3941_v19 = vld [vmem:[%s5353_s18 + $0x60] sm:$0xf]  ;;  %v4323_v20 = vld [vmem:[%s5353_s18 + $0x68] sm:$0xf0]  ;;  %v4322_v21 = vld [vmem:[%s5353_s18 + $0x64] sm:$0xf] }
  0xfe   : > { %v3943_v22 = vld [vmem:[%s5353_s18 + $0x6c] sm:$0xf0]  ;;  %v3942_v23 = vor.u32 %v4323_v20, %v3941_v19  ;;  %v4333_v25 = vld [vmem:[%s5353_s18 + $0xb8] sm:$0xf0]  ;;  %v3973_v26 = vld [vmem:[%s5353_s18 + $0x98] sm:$0xf] }
  0xff   : > { %v3985_v24 = vld [vmem:[%s5353_s18 + $0xb0] sm:$0xf]  ;;  %v3946_v27 = vor.u32 %v4322_v21, %v3943_v22  ;;  %v3929_v28 = vld [vmem:[%s5353_s18 + $0x48] sm:$0xf]  ;;  %v4320_v29 = vld [vmem:[%s5353_s18 + $0x50] sm:$0xf0] }
 0x100   : > { %1456 = vmatpush.bf16.msra.mxu0 %v3966_v11  ;;  %v3986_v30 = vor.u32 %v4333_v25, %v3985_v24  ;;  %v4330_v31 = vld [vmem:[%s5353_s18 + $0xa0] sm:$0xf0]  ;;  %v4319_v32 = vld [vmem:[%s5353_s18 + $0x4c] sm:$0xf]  ;;  %v3931_v33 = vld [vmem:[%s5353_s18 + $0x54] sm:$0xf0]  ;;  %v3930_v36 = vor.u32 %v4320_v29, %v3929_v28 }
 0x101   : > { %1470 = vmatpush.bf16.msra.mxu1 %v3970_v12  ;;  %v3917_v34 = vld [vmem:[%s5353_s18 + $0x30] sm:$0xf]  ;;  %v3974_v35 = vor.u32 %v4330_v31, %v3973_v26  ;;  %v4317_v37 = vld [vmem:[%s5353_s18 + $0x38] sm:$0xf0]  ;;  %v3961_v38 = vld [vmem:[%s5353_s18 + $0x80] sm:$0xf]  ;;  %v3934_v40 = vor.u32 %v4319_v32, %v3931_v33  ;;  %v1275_v32 = vlaneseq }
 0x102   : > { %1483 = vmatpush.bf16.msra.mxu2 %v3986_v30  ;;  %v4327_v39 = vld [vmem:[%s5353_s18 + $0x88] sm:$0xf0]  ;;  %v4316_v41 = vld [vmem:[%s5353_s18 + $0x34] sm:$0xf]  ;;  %v3919_v42 = vld [vmem:[%s5353_s18 + $0x3c] sm:$0xf0]  ;;  %v3918_v48 = vor.u32 %v4317_v37, %v3917_v34 }
 0x103   : > { %v3949_v43 = vld [vmem:[%s5353_s18 + $0x68] sm:$0xf]  ;;  %v4324_v44 = vld [vmem:[%s5353_s18 + $0x70] sm:$0xf0]  ;;  %v3905_v45 = vld [vmem:[%s5353_s18 + $0x18] sm:$0xf]  ;;  %v3962_v47 = vor.u32 %v4327_v39, %v3961_v38  ;;  %v3922_v51 = vor.u32 %v4316_v41, %v3919_v42 }
 0x104   : > { %1457 = vmatpush.bf16.msra.mxu0 %v3954_v17  ;;  %v4314_v46 = vld [vmem:[%s5353_s18 + $0x20] sm:$0xf0]  ;;  %v4313_v49 = vld [vmem:[%s5353_s18 + $0x1c] sm:$0xf]  ;;  %v3907_v50 = vld [vmem:[%s5353_s18 + $0x24] sm:$0xf0]  ;;  %v3950_v52 = vor.u32 %v4324_v44, %v3949_v43 }
 0x105   : > { %1471 = vmatpush.bf16.msra.mxu1 %v3958_v18  ;;  %v3906_v53 = vor.u32 %v4314_v46, %v3905_v45  ;;  %v3937_v54 = vld [vmem:[%s5353_s18 + $0x50] sm:$0xf]  ;;  %v4321_v55 = vld [vmem:[%s5353_s18 + $0x58] sm:$0xf0]  ;;  %v3910_v56 = vor.u32 %v4313_v49, %v3907_v50  ;;  %v3893_v57 = vld [vmem:[%s5353_s18] sm:$0xf] }
 0x106   : > { %1484 = vmatpush.bf16.msra.mxu2 %v3974_v35  ;;  %v4311_v58 = vld [vmem:[%s5353_s18 + $0x8] sm:$0xf0]  ;;  %v4310_v59 = vld [vmem:[%s5353_s18 + $0x4] sm:$0xf]  ;;  %v3895_v60 = vld [vmem:[%s5353_s18 + $0xc] sm:$0xf0]  ;;  %v3938_v61 = vor.u32 %v4321_v55, %v3937_v54 }
 0x107   : > { %v3894_v62 = vor.u32 %v4311_v58, %v3893_v57  ;;  %v3925_v63 = vld [vmem:[%s5353_s18 + $0x38] sm:$0xf]  ;;  %v4318_v0 = vld [vmem:[%s5353_s18 + $0x40] sm:$0xf0]  ;;  %v3898_v1 = vor.u32 %v4310_v59, %v3895_v60  ;;  %v3913_v4 = vld [vmem:[%s5353_s18 + $0x20] sm:$0xf] }
 0x108   : > { %1458 = vmatpush.bf16.msra.mxu0 %v3942_v23  ;;  %v4308_v2 = vld [vmem:[#allocation2] sm:$0xff]  ;;  %v3926_v3 = vor.u32 %v4318_v0, %v3925_v63  ;;  %v4315_v5 = vld [vmem:[%s5353_s18 + $0x28] sm:$0xf0]  ;;  %v3901_v7 = vld [vmem:[%s5353_s18 + $0x8] sm:$0xf]  ;;  %vm1526_vm0 = vcmask 261120  }
 0x109   : > { %1472 = vmatpush.bf16.msra.mxu1 %v3946_v27  ;;  %v3914_v6 = vor.u32 %v4315_v5, %v3913_v4  ;;  %v4312_v8 = vld [vmem:[%s5353_s18 + $0x10] sm:$0xf0]  ;;  %v5502_v10 = vld [vmem:[%s5408_s1] sm:$0x7]  ;;  %s4973_s18 = smov 64   ;;  %s4974_s27 = smov 96  }
 0x10a   : > { %1485 = vmatpush.bf16.msra.mxu2 %v3962_v47  ;;  %v3902_v9 = vor.u32 %v4312_v8, %v3901_v7  ;;  %v1315_v11 = vperm.slane %v5502_v10, 0  ;;  %v1316_v12 = vperm.slane %v5502_v10, 1  ;;  %v1317_v25 = vperm.slane %v5502_v10, 2  ;;  %s6142_s12 = sld [smem:[#allocation35_spill]]  ;;  %v5545_v55 = vld [vmem:[%s5360_s6 + $0x8] sm:$0xff]  ;;  %v5551_v58 = vld [vmem:[%s5360_s6] sm:$0xff] }
 0x10b   : > { %vm1562_vm1 = vcmask 1043456   ;;  %v1276_v33 = vshrl.u32 %v1275_v32, 7  ;;  %v1278_v34 = vand.u32 127, %v1275_v32  ;;  %v4975_v37 = vmov 0.0   ;;  %s4976_s1 = smov 32   ;;  %v4337_v32 = vld [vmem:[%s5360_s6 + $0x18] sm:$0xff] }
 0x10c   : > { %1459 = vmatpush.bf16.msra.mxu0 %v3930_v36  ;;  %vm1546_vm3 = vcmask 64512   ;;  %s6143_s19 = sld [smem:[#allocation40_spill]] }
 0x10d   : > { %1473 = vmatpush.bf16.msra.mxu1 %v3934_v40  ;;  %vm1279_vm2 = vcmp.gt.s32.totalorder %v1278_v34, %v1276_v33  ;;  %s6145_s25 = sld [smem:[#allocation34_spill]] }
 0x10e   : > { %1486 = vmatpush.bf16.msra.mxu2 %v3950_v52  ;;  %v5534_v38 = vsel %vm1279_vm2, -1e+09, %v4975_v37  ;;  %s6146_s8 = sld [smem:[#allocation41_spill]] }
 0x10f   : > { %s6148_s5 = sld [smem:[#allocation42_spill]] }
 0x110   : > { %1460 = vmatpush.bf16.msra.mxu0 %v3918_v48  ;;  %v4517_v36 = vld [vmem:[%s6142_s12] ss:$0 sm:$0xff]  ;;  %v4518_v10 = vld [vmem:[%s6142_s12 + $0x1] ss:$0 sm:$0xff]  ;;  %s6150_s14 = sld [smem:[#allocation44_spill]] }
 0x111   : > { %1474 = vmatpush.bf16.msra.mxu1 %v3922_v51  ;;  %v5537_v39 = vadd.f32 %v4517_v36, %v5534_v38 }
 0x112   : > { %1487 = vmatpush.bf16.msra.mxu2 %v3938_v61  ;;  %s6144_s26 = scalar_lea.vmem %s6143_s19, %s5390_s23  ;;  %s6152_s19 = sld [smem:[#allocation36_spill]] }
 0x114   : > { %1461 = vmatpush.bf16.msra.mxu0 %v3906_v53  ;;  %s6147_s0 = scalar_lea.vmem %s6146_s8, %s5390_s23 }
 0x115   : > { %1475 = vmatpush.bf16.msra.mxu1 %v3910_v56  ;;  %s6149_s17 = scalar_lea.vmem %s6148_s5, %s5390_s23 }
 0x116   : > { %1488 = vmatpush.bf16.msra.mxu2 %v3926_v3 }
 0x118   : > { %1462 = vmatpush.bf16.msra.mxu0 %v3894_v62 }
 0x119   : > { %1476 = vmatpush.bf16.msra.mxu1 %v3898_v1 }
 0x11a   : > { %1489 = vmatpush.bf16.msra.mxu2 %v3914_v6 }
 0x11b   : > { %1463 = vmatmul.bf16.vlgmr.msra.gmra.mxu0 %v4308_v2 }
 0x11c   : > { %1477 = vmatmul.bf16.vlgmr.msra.gmra.mxu1 %v4308_v2 }
 0x11e   : > { %1490 = vmatpush.bf16.msra.mxu2 %v3902_v9 }
 0x121   : > { %1491 = vmatmul.bf16.vlgmr.msra.gmra.mxu2 %v4308_v2 }
 0x198   : > { %v1464_v13 = vpop.f32.mrf.mxu0 }
 0x199   : > { %v1465_v14 = vadd.f32 %v1464_v13, %v1315_v11  ;;  %v1478_v15 = vpop.f32.mrf.mxu1 }
 0x19a   : > { %v1479_v16 = vadd.f32 %v1478_v15, %v1316_v12 }
 0x19b   : > { %v1497_v17 = vmul.f32 0.17677669, %v1465_v14 }
 0x19c   : > { %v1501_v18 = vpack.c.bf16 %v1479_v16, %v1479_v16 }
 0x19d   : > { %v1499_v19 = vpack.c.bf16 %v1497_v17, %v1497_v17 }
 0x19e   : > { %v1586_v20 = vunpack.c.l.b16 %v1501_v18  ;;  %v1531_v21 = vsel %vm1526_vm0, %v1501_v18, 0 }
 0x19f   : > { %1540 = vmatpush.bf16.xpose.msrb.mxu2 %v1531_v21  ;;  %v1581_v23 = vunpack.c.l.b16 %v1499_v19 }
 0x1a0   : > { %v5511_v22 = vpack.c.b16 %v1586_v20, %v1586_v20 }
 0x1a1   : > { %v5518_v24 = vpack.c.b16 %v1581_v23, %v1581_v23 }
 0x1a2   : > { %1704 = vrot.lane.b32.xlu2 %v5511_v22, %s4973_s18  ;;  %1588 = vrot.lane.b32.xlu1 %v5511_v22, %s4974_s27 }
 0x1a4   : > { %v1492_v26 = vpop.f32.mrf.mxu2 }
 0x1a5   : > { %v1493_v27 = vadd.f32 %v1492_v26, %v1317_v25 }
 0x1a6   : > { %3987 = vmatmul.msk.bf16.vlgmr.msrb.gmra.mxu2 %vm1526_vm0, %v1499_v19 }
 0x1a7   : > { %v1503_v28 = vpack.c.bf16 %v1493_v27, %v1493_v27  ;;  %1695 = vmatpush.bf16.msra.mxu2 %v5545_v55 }
 0x1a9   : > { %v1564_v29 = vsel %vm1562_vm1, %v1503_v28, 0  ;;  %v1622_v4 = vunpack.c.l.b16 %v1503_v28 }
 0x1aa   : > { %1702 = vrot.lane.b32.xlu2 %v5518_v24, %s4973_s18  ;;  %1583 = vrot.lane.b32.xlu1 %v5518_v24, %s4974_s27 }
 0x1ab   : > { %1573 = vmatpush.bf16.msra.mxu3 %v1564_v29  ;;  %1696 = vmatpush.bf16.msra.mxu2 %v5551_v58  ;;  %v5559_v6 = vpack.c.b16 %v1622_v4, %v1622_v4 }
 0x1ac   : > { %v5529_v35 = vpop.f32.mrf.mxu2 }
 0x1ad   : > { %v1495_v27 = vadd.f32 %v5529_v35, %v1317_v25  ;;  %v4336_v25 = vld [vmem:[%s5360_s6 + $0x10] sm:$0xff] }
 0x1af   : > { %v5575_v28 = vpack.c.bf16 %v1495_v27, %v1495_v27 }
 0x1fc   : > { %v1705_v52 = vpop.permute.xlu2 %1704 }
 0x1fd   : > { %v1710_v54 = vsel %vm1526_vm0, %v1705_v52, 0 }
 0x204   : > { %v1703_v57 = vpop.permute.xlu2 %1702 }
 0x214   : > { %v1589_v30 = vpop.permute.xlu1 %1588 }
 0x215   : > { %v1594_v31 = vsel %vm1526_vm0, %v1589_v30, 0 }
 0x216   : > { %1603 = vmatpush.bf16.xpose.msrb.mxu3 %v1594_v31  ;;  %v1915_v31 = vsel %vm1562_vm1, %v5575_v28, 0 }
 0x21c   : > { %v1584_v56 = vpop.permute.xlu1 %1583 }
 0x229   : > { %v1542_v40 = vpop.f32.mrf.mxu2 }
 0x22a   : > { %v1543_v41 = vadd.f32 %v1542_v40, %v5537_v39  ;;  %v4339_v40 = vld [vmem:[%s5360_s6 + $0x28] sm:$0xff] }
 0x22c   : > { %v1547_v42 = vsel %vm1546_vm3, %v1543_v41, -inf }
 0x22d   : > { %1548 = vmax.xlane.f32.xlu0 %v1547_v42 }
 0x231   : > { %v1544_v43 = vpop.f32.mrf.mxu2 }
 0x2a0   : > { %v1549_v44 = vpop.xlane.xlu0 %1548 }
 0x2a1   : > { %v1550_v45 = vsub.f32 %v1543_v41, %v1549_v44 }
 0x2a3   : > { %v1551_v46 = vmul.f32 1.442695, %v1550_v45 }
 0x2a5   : > { %4532 = vpow2.f32 %v1551_v46  ;;  %v4338_v46 = vld [vmem:[%s5360_s6 + $0x20] sm:$0xff] }
 0x2ab   : > { %v4533_v47 = vpop.eup %4532 }
 0x2ac   : > { %v1553_v48 = vsel %vm1546_vm3, %v4533_v47, 0.0 }
 0x2ad   : > { %1554 = vadd.xlane.f32.xlu0 %v1553_v48 }
 0x320   : > { %v1555_v49 = vpop.xlane.xlu0 %1554 }
 0x321   : > { %4534 = vrcp.f32 %v1555_v49 }
 0x327   : > { %v4535_v50 = vpop.eup %4534 }
 0x328   : > { %v1557_v51 = vmul.f32 %v4535_v50, %v4533_v47  ;;  %v1480_v47 = vpop.f32.mrf.mxu1 }
 0x329   : > { %v1481_v48 = vadd.f32 %v1480_v47, %v1316_v12  ;;  %v5632_v47 = vld [vmem:[%s5360_s6 + $0x38] sm:$0xff] }
 0x32a   : > { %v1558_v53 = vpack.c.bf16 %v1557_v51, %v1557_v51 }
 0x32b   : > { %v1502_v49 = vpack.c.bf16 %v1481_v48, %v1481_v48  ;;  %v5636_v48 = vld [vmem:[%s5360_s6 + $0x30] sm:$0xff]  ;;  %s6151_s6 = scalar_lea.vmem %s6150_s14, %s5390_s23 }
 0x32c   : > { %3988 = vmatmul.msk.bf16.vlgmr.msra.gmra.mxu3 %vm1546_vm3, %v1558_v53  ;;  %v1466_v53 = vpop.f32.mrf.mxu0 }
 0x32d   : > { %1719 = vmatpush.bf16.xpose.msra.mxu3 %v1710_v54  ;;  %v1884_v52 = vsel %vm1526_vm0, %v1502_v49, 0 }
 0x33c   : > { %3989 = vmatmul.msk.bf16.vlgmr.msrb.gmra.mxu3 %vm1526_vm0, %v1584_v56 }
 0x34c   : > { %4009 = vmatmul.msk.bf16.vlgmr.msra.gmra.mxu3 %vm1526_vm0, %v1703_v57 }
 0x3af   : > { %v1575_v59 = vpop.f32.mrf.mxu3 }
 0x3b0   : > { %v1579_v60 = vpack.c.bf16 %v1575_v59, %v1575_v59 }
 0x3b2   : > { %4008 = vmatmul.msk.bf16.vlgmr.msra.gmra.mxu2 %vm1526_vm0, %v1579_v60 }
 0x3b7   : > { %v1577_v61 = vpop.f32.mrf.mxu3 }
 0x3b8   : > { %v1467_v61 = vadd.f32 %v1466_v53, %v1315_v11  ;;  %v5610_v11 = vadd.f32 %v4518_v10, %v5534_v38 }
 0x3bf   : > { %v1605_v62 = vpop.f32.mrf.mxu3 }
 0x3c0   : > { %v1606_v63 = vadd.f32 %v1605_v62, %v5537_v39  ;;  %v1498_v62 = vmul.f32 0.17677669, %v1467_v61 }
 0x3c2   : > { %v1609_v0 = vsel %vm1546_vm3, %v1606_v63, -inf }
 0x3c3   : > { %1610 = vmax.xlane.f32.xlu0 %v1609_v0  ;;  %v1937_v0 = vunpack.c.l.b16 %v1502_v49 }
 0x3c7   : > { %v1607_v1 = vpop.f32.mrf.mxu3 }
 0x3cf   : > { %v1721_v2 = vpop.f32.mrf.mxu3 }
 0x3d0   : > { %v1722_v3 = vadd.f32 %v1721_v2, %v5537_v39 }
 0x3d2   : > { %v1725_v5 = vsel %vm1546_vm3, %v1722_v3, -inf }
 0x3d3   : > { %1726 = vmax.xlane.f32.xlu1 %v1725_v5 }
 0x3d7   : > { %v1723_v7 = vpop.f32.mrf.mxu3  ;;  %1624 = vrot.lane.b32.xlu0 %v5559_v6, %s4974_s27 }
 0x3ec   : > { %1790 = vrot.lane.b32.xlu1 %v5511_v22, %s4976_s1 }
 0x435   : > { %v5565_v8 = vpop.f32.mrf.mxu2 }
 0x436   : > { %v1611_v9 = vpop.xlane.xlu0 %1610 }
 0x437   : > { %v1612_v13 = vsub.f32 %v1606_v63, %v1611_v9  ;;  %v1500_v63 = vpack.c.bf16 %v1498_v62, %v1498_v62  ;;  %v1973_v62 = vunpack.c.l.b16 %v5575_v28 }
 0x439   : > { %v1613_v14 = vmul.f32 1.442695, %v1612_v13 }
 0x43b   : > { %4536 = vpow2.f32 %v1613_v14 }
 0x43d   : > { %v1700_v15 = vpop.f32.mrf.mxu2 }
 0x441   : > { %v4537_v16 = vpop.eup %4536 }
 0x442   : > { %v1615_v17 = vsel %vm1546_vm3, %v4537_v16, 0.0 }
 0x443   : > { %1616 = vadd.xlane.f32.xlu2 %v1615_v17 }
 0x446   : > { %v1727_v18 = vpop.xlane.xlu1 %1726 }
 0x447   : > { %v1728_v19 = vsub.f32 %v1722_v3, %v1727_v18 }
 0x449   : > { %v1729_v20 = vmul.f32 1.442695, %v1728_v19  ;;  %v1625_v21 = vpop.permute.xlu0 %1624 }
 0x44a   : > { %v1630_v23 = vsel %vm1562_vm1, %v1625_v21, 0 }
 0x44b   : > { %4538 = vpow2.f32 %v1729_v20  ;;  %1639 = vmatpush.bf16.msrb.mxu1 %v1630_v23 }
 0x44f   : > { %1667 = vmatpush.bf16.msra.mxu1 %v4337_v32 }
 0x451   : > { %v4539_v22 = vpop.eup %4538 }
 0x452   : > { %v1731_v26 = vsel %vm1546_vm3, %v4539_v22, 0.0 }
 0x453   : > { %1732 = vadd.xlane.f32.xlu0 %v1731_v26  ;;  %1668 = vmatpush.bf16.msra.mxu1 %v4336_v25 }
 0x45b   : > { %1737 = vrot.lane.b32.xlu2 %v5559_v6, %s4973_s18 }
 0x45e   : > { %v1791_v29 = vpop.permute.xlu1 %1790 }
 0x45f   : > { %v1796_v30 = vsel %vm1526_vm0, %v1791_v29, 0 }
 0x460   : > { %1805 = vmatpush.bf16.xpose.msrb.mxu2 %v1796_v30 }
 0x463   : > { %1788 = vrot.lane.b32.xlu2 %v5518_v24, %s4976_s1 }
 0x468   : > { %1924 = vmatpush.bf16.msra.mxu2 %v1915_v31 }
 0x4b6   : > { %v1617_v33 = vpop.xlane.xlu2 %1616 }
 0x4b7   : > { %4540 = vrcp.f32 %v1617_v33 }
 0x4bd   : > { %v4541_v34 = vpop.eup %4540 }
 0x4be   : > { %v1619_v35 = vmul.f32 %v4541_v34, %v4537_v16  ;;  %v1738_v36 = vpop.permute.xlu2 %1737  ;;  %v1932_v16 = vunpack.c.l.b16 %v1500_v63 }
 0x4bf   : > { %v1743_v37 = vsel %vm1562_vm1, %v1738_v36, 0 }
 0x4c0   : > { %1752 = vmatpush.bf16.msrb.mxu0 %v1743_v37  ;;  %v1620_v41 = vpack.c.bf16 %v1619_v35, %v1619_v35 }
 0x4c2   : > { %3990 = vmatmul.msk.bf16.vlgmr.msrb.gmra.mxu1 %vm1546_vm3, %v1620_v41 }
 0x4c3   : > { %1780 = vmatpush.bf16.msrb.mxu1 %v4339_v40 }
 0x4c4   : > { %1866 = vmatpush.bf16.msra.mxu0 %v5632_v47 }
 0x4c6   : > { %v1789_v42 = vpop.permute.xlu2 %1788  ;;  %v1733_v24 = vpop.xlane.xlu0 %1732 }
 0x4c7   : > { %4542 = vrcp.f32 %v1733_v24  ;;  %4020 = vmatmul.msk.bf16.vlgmr.msrb.gmra.mxu2 %vm1526_vm0, %v1789_v42  ;;  %1781 = vmatpush.bf16.msrb.mxu1 %v4338_v46 }
 0x4c8   : > { %2022 = vmatpush.bf16.msrb.mxu2 %v5545_v55  ;;  %1867 = vmatpush.bf16.msra.mxu0 %v5636_v48 }
 0x4cc   : > { %2023 = vmatpush.bf16.msrb.mxu2 %v5551_v58 }
 0x4cd   : > { %v4543_v43 = vpop.eup %4542 }
 0x4ce   : > { %v1735_v44 = vmul.f32 %v4543_v43, %v4539_v22 }
 0x4d0   : > { %v1736_v45 = vpack.c.bf16 %v1735_v44, %v1735_v44 }
 0x4d2   : > { %4010 = vmatmul.msk.bf16.vlgmr.msrb.gmra.mxu0 %vm1546_vm3, %v1736_v45 }
 0x53f   : > { %v1641_v50 = vpop.f32.mrf.mxu1 }
 0x540   : > { %v1645_v51 = vpack.c.bf16 %v1641_v50, %v1641_v50 }
 0x542   : > { %3999 = vmatmul.msk.bf16.vlgmr.msra.gmra.mxu1 %vm1526_vm0, %v1645_v51 }
 0x543   : > { %1893 = vmatpush.bf16.xpose.msra.mxu1 %v1884_v52 }
 0x547   : > { %v1643_v54 = vpop.f32.mrf.mxu1 }
 0x54a   : > { %v1807_v55 = vpop.f32.mrf.mxu2 }
 0x54b   : > { %v1808_v56 = vadd.f32 %v1807_v55, %v5537_v39  ;;  %v1938_v39 = vpack.c.b16 %v1937_v0, %v1937_v0 }
 0x54d   : > { %v1811_v57 = vsel %vm1546_vm3, %v1808_v56, -inf }
 0x54e   : > { %1812 = vmax.xlane.f32.xlu2 %v1811_v57 }
 0x54f   : > { %v1754_v58 = vpop.f32.mrf.mxu0 }
 0x550   : > { %v1758_v59 = vpack.c.bf16 %v1754_v58, %v1754_v58 }
 0x552   : > { %4019 = vmatmul.msk.bf16.vlgmr.msrb.gmra.mxu1 %vm1526_vm0, %v1758_v59  ;;  %v1809_v12 = vpop.f32.mrf.mxu2 }
 0x553   : > { %2006 = vmatpush.bf16.msrb.mxu1 %v4337_v32 }
 0x557   : > { %v1756_v60 = vpop.f32.mrf.mxu0  ;;  %2007 = vmatpush.bf16.msrb.mxu1 %v4336_v25 }
 0x562   : > { %4032 = vmatmul.msk.bf16.vlgmr.msra.gmra.mxu1 %vm1526_vm0, %v1500_v63  ;;  %v5647_v63 = vpack.c.b16 %v1973_v62, %v1973_v62 }
 0x563   : > { %2095 = vmatpush.bf16.msra.mxu1 %v4339_v40 }
 0x566   : > { %2031 = vrot.lane.b32.xlu2 %v1938_v39, %s4973_s18 }
 0x567   : > { %2096 = vmatpush.bf16.msra.mxu1 %v4338_v46 }
 0x5bf   : > { %v1670_v1 = vpop.f32.mrf.mxu1 }
 0x5c0   : > { %v1699_v3 = vadd.f32 %v5565_v8, %v1670_v1  ;;  %v1933_v8 = vpack.c.b16 %v1932_v16, %v1932_v16  ;;  %v5653_v1 = vld [vmem:[#allocation2] sm:$0xff]  }
 0x5c1   : > { %v1813_v17 = vpop.xlane.xlu2 %1812  ;;  %v2183_v28 = vunpack.c.l.bf16 %v5653_v1 }
 0x5c2   : > { %v1814_v20 = vsub.f32 %v1808_v56, %v1813_v17 }
 0x5c4   : > { %v1815_v23 = vmul.f32 1.442695, %v1814_v20 }
 0x5c7   : > { %v1672_v2 = vpop.f32.mrf.mxu1 }
 0x5c8   : > { %v5660_v2 = vld [vmem:[%s6144_s26] ss:$0 sm:$0xff] }
 0x5c9   : > { %v2032_v37 = vpop.permute.xlu2 %2031 }
 0x5ca   : > { %v2037_v42 = vsel %vm1526_vm0, %v2032_v37, 0 }
 0x5cf   : > { %v1783_v4 = vpop.f32.mrf.mxu1 }
 0x5d0   : > { %v5604_v5 = vadd.f32 %v1783_v4, %v1699_v3 }
 0x5d7   : > { %v1785_v7 = vpop.f32.mrf.mxu1 }
 0x5df   : > { %v1895_v9 = vpop.f32.mrf.mxu1 }
 0x5e0   : > { %v1896_v13 = vadd.f32 %v1895_v9, %v5610_v11 }
 0x5e2   : > { %v1899_v14 = vsel %vm1546_vm3, %v1896_v13, -inf }
 0x5e3   : > { %1900 = vmax.xlane.f32.xlu1 %v1899_v14 }
 0x5e7   : > { %v1897_v15 = vpop.f32.mrf.mxu1 }
 0x5fc   : > { %1934 = vrot.lane.b32.xlu1 %v1933_v8, %s4974_s27 }
 0x656   : > { %v1901_v18 = vpop.xlane.xlu1 %1900 }
 0x657   : > { %v1902_v19 = vsub.f32 %v1896_v13, %v1901_v18 }
 0x659   : > { %v1903_v21 = vmul.f32 1.442695, %v1902_v19 }
 0x65b   : > { %4544 = vpow2.f32 %v1903_v21 }
 0x65c   : > { %4546 = vpow2.f32 %v1815_v23 }
 0x661   : > { %v4545_v38 = vpop.eup %4544 }
 0x662   : > { %v1905_v22 = vsel %vm1546_vm3, %v4545_v38, 0.0  ;;  %v4547_v26 = vpop.eup %4546 }
 0x663   : > { %1906 = vadd.xlane.f32.xlu0 %v1905_v22  ;;  %v1817_v27 = vsel %vm1546_vm3, %v4547_v26, 0.0 }
 0x66b   : > { %1818 = vadd.xlane.f32.xlu0 %v1817_v27  ;;  %v4977_v27 = vmov 128.0  }
 0x66e   : > { %v1935_v44 = vpop.permute.xlu1 %1934 }
 0x67f   : > { %1823 = vrot.lane.b32.xlu0 %v5559_v6, %s4976_s1 }
 0x687   : > { %1939 = vrot.lane.b32.xlu0 %v1938_v39, %s4974_s27 }
 0x68f   : > { %2105 = vrot.lane.b32.xlu0 %v1938_v39, %s4976_s1 }
 0x697   : > { %2103 = vrot.lane.b32.xlu0 %v1933_v8, %s4976_s1 }
 0x69f   : > { %2029 = vrot.lane.b32.xlu0 %v1933_v8, %s4973_s18 }
 0x6d6   : > { %v1907_v29 = vpop.xlane.xlu0 %1906 }
 0x6d7   : > { %4548 = vrcp.f32 %v1907_v29 }
 0x6dd   : > { %v4549_v30 = vpop.eup %4548 }
 0x6de   : > { %v1909_v31 = vmul.f32 %v4549_v30, %v4545_v38  ;;  %v1819_v25 = vpop.xlane.xlu0 %1818 }
 0x6df   : > { %4550 = vrcp.f32 %v1819_v25 }
 0x6e0   : > { %v1910_v32 = vpack.c.bf16 %v1909_v31, %v1909_v31 }
 0x6e2   : > { %4033 = vmatmul.msk.bf16.vlgmr.msra.gmra.mxu2 %vm1546_vm3, %v1910_v32 }
 0x6e5   : > { %v4551_v33 = vpop.eup %4550 }
 0x6e6   : > { %v1821_v34 = vmul.f32 %v4551_v33, %v4547_v26 }
 0x6e8   : > { %v1822_v36 = vpack.c.bf16 %v1821_v34, %v1821_v34 }
 0x6f1   : > { %v1824_v6 = vpop.permute.xlu0 %1823 }
 0x6f2   : > { %v1829_v35 = vsel %vm1562_vm1, %v1824_v6, 0 }
 0x6f3   : > { %1838 = vmatpush.bf16.msrb.mxu3 %v1829_v35 }
 0x6f6   : > { %4021 = vmatmul.msk.bf16.vlgmr.msrb.gmra.mxu3 %vm1546_vm3, %v1822_v36 }
 0x6f9   : > { %v1940_v40 = vpop.permute.xlu0 %1939 }
 0x6fa   : > { %v1945_v41 = vsel %vm1526_vm0, %v1940_v40, 0 }
 0x6fb   : > { %1954 = vmatpush.bf16.xpose.msra.mxu3 %v1945_v41 }
 0x701   : > { %v2106_v24 = vpop.permute.xlu0 %2105 }
 0x702   : > { %v2111_v43 = vsel %vm1526_vm0, %v2106_v24, 0 }
 0x703   : > { %2046 = vmatpush.bf16.xpose.msrb.mxu3 %v2037_v42  ;;  %2120 = vmatpush.bf16.xpose.msra.mxu2 %v2111_v43 }
 0x706   : > { %4034 = vmatmul.msk.bf16.vlgmr.msra.gmra.mxu3 %vm1526_vm0, %v1935_v44 }
 0x709   : > { %v2104_v45 = vpop.permute.xlu0 %2103 }
 0x711   : > { %v2030_v46 = vpop.permute.xlu0 %2029 }
 0x716   : > { %4038 = vmatmul.msk.bf16.vlgmr.msrb.gmra.mxu3 %vm1526_vm0, %v2030_v46 }
 0x765   : > { %v1926_v49 = vpop.f32.mrf.mxu2 }
 0x766   : > { %v1930_v50 = vpack.c.bf16 %v1926_v49, %v1926_v49 }
 0x768   : > { %4037 = vmatmul.msk.bf16.vlgmr.msrb.gmra.mxu2 %vm1526_vm0, %v1930_v50 }
 0x76d   : > { %v1928_v51 = vpop.f32.mrf.mxu2 }
 0x778   : > { %4041 = vmatmul.msk.bf16.vlgmr.msra.gmra.mxu2 %vm1526_vm0, %v2104_v45 }
 0x779   : > { %v1840_v52 = vpop.f32.mrf.mxu3 }
 0x77a   : > { %v1844_v53 = vpack.c.bf16 %v1840_v52, %v1840_v52 }
 0x77c   : > { %4030 = vmatmul.msk.bf16.vlgmr.msra.gmra.mxu0 %vm1526_vm0, %v1844_v53 }
 0x781   : > { %v1842_v54 = vpop.f32.mrf.mxu3 }
 0x789   : > { %v1956_v55 = vpop.f32.mrf.mxu3 }
 0x78a   : > { %v1957_v56 = vadd.f32 %v1956_v55, %v5610_v11 }
 0x78c   : > { %v1960_v57 = vsel %vm1546_vm3, %v1957_v56, -inf }
 0x78d   : > { %1961 = vmax.xlane.f32.xlu1 %v1960_v57 }
 0x791   : > { %v1958_v58 = vpop.f32.mrf.mxu3 }
 0x799   : > { %v2048_v59 = vpop.f32.mrf.mxu3 }
 0x79a   : > { %v2049_v12 = vadd.f32 %v2048_v59, %v5610_v11 }
 0x79c   : > { %v2052_v60 = vsel %vm1546_vm3, %v2049_v12, -inf }
 0x79d   : > { %2053 = vmax.xlane.f32.xlu2 %v2052_v60 }
 0x7a1   : > { %v2050_v61 = vpop.f32.mrf.mxu3 }
 0x7b5   : > { %1975 = vrot.lane.b32.xlu2 %v5647_v63, %s4974_s27 }
 0x7eb   : > { %v5651_v0 = vpop.f32.mrf.mxu2 }
 0x7f3   : > { %v2027_v39 = vpop.f32.mrf.mxu2 }
 0x7f9   : > { %v1869_v3 = vpop.f32.mrf.mxu0 }
 0x7fa   : > { %v1873_v4 = vadd.f32 %v1869_v3, %v5604_v5 }
 0x7fb   : > { %v2122_v7 = vpop.f32.mrf.mxu2 }
 0x7fc   : > { %v2181_v10 = vadd.f32 %v5660_v2, %v1873_v4  ;;  %v2123_v9 = vadd.f32 %v2122_v7, %v5610_v11 }
 0x7fe   : > { %v2126_v13 = vsel %vm1546_vm3, %v2123_v9, -inf  ;;  %v2185_v14 = vadd.f32 %v2183_v28, %v2181_v10 }
 0x7ff   : > { %2127 = vmax.xlane.f32.xlu0 %v2126_v13 }
 0x800   : > { %v1962_v15 = vpop.xlane.xlu1 %1961  ;;  %2189 = vadd.xlane.f32.xlu2 %v2185_v14 }
 0x801   : > { %v1963_v16 = vsub.f32 %v1957_v56, %v1962_v15  ;;  %v1871_v8 = vpop.f32.mrf.mxu0 }
 0x802   : > { %v2184_v8 = vunpack.c.h.bf16 %v5653_v1  ;;  %v4361_v1 = vld [vmem:[%s5368_s13 + $0x54] sm:$0xf0] }
 0x803   : > { %v1964_v17 = vmul.f32 1.442695, %v1963_v16  ;;  %v2124_v18 = vpop.f32.mrf.mxu2 }
 0x805   : > { %4552 = vpow2.f32 %v1964_v17 }
 0x80b   : > { %v4553_v19 = vpop.eup %4552 }
 0x80c   : > { %v1966_v5 = vsel %vm1546_vm3, %v4553_v19, 0.0 }
 0x80d   : > { %1967 = vadd.xlane.f32.xlu1 %v1966_v5  ;;  %v4138_v5 = vld [vmem:[%s5368_s13 + $0x70] sm:$0xf] }
 0x810   : > { %v2054_v20 = vpop.xlane.xlu2 %2053 }
 0x811   : > { %v2055_v21 = vsub.f32 %v2049_v12, %v2054_v20  ;;  %v4365_v20 = vld [vmem:[%s5368_s13 + $0x74] sm:$0xf0] }
 0x813   : > { %v2056_v23 = vmul.f32 1.442695, %v2055_v21  ;;  %v4139_v21 = vor.u32 %v4365_v20, %v4138_v5 }
 0x815   : > { %4554 = vpow2.f32 %v2056_v23  ;;  %v4363_v23 = vld [vmem:[%s5368_s13 + $0x64] sm:$0xf0]  ;;  %2441 = vmatpush.bf16.msrb.mxu2 %v4139_v21 }
 0x816   : > { %4556 = vrcp.f32 %v4977_v27  ;;  %v4359_v27 = vld [vmem:[%s5368_s13 + $0x44] sm:$0xf0] }
 0x818   : > { %v1976_v11 = vpop.permute.xlu2 %1975 }
 0x819   : > { %v1981_v38 = vsel %vm1562_vm1, %v1976_v11, 0 }
 0x81a   : > { %1990 = vmatpush.bf16.msrb.mxu0 %v1981_v38  ;;  %v4122_v38 = vld [vmem:[%s5368_s13 + $0x50] sm:$0xf] }
 0x81b   : > { %v4555_v22 = vpop.eup %4554 }
 0x81c   : > { %v2058_v26 = vsel %vm1546_vm3, %v4555_v22, 0.0  ;;  %v4557_v29 = vpop.eup %4556 }
 0x81d   : > { %2059 = vadd.xlane.f32.xlu1 %v2058_v26  ;;  %v2194_v30 = vmul.f32 128.0, %v4557_v29  ;;  %vm2198_vm4 = vweird.f32 %v4557_v29  ;;  %v4114_v26 = vld [vmem:[%s5368_s13 + $0x40] sm:$0xf] }
 0x81f   : > { %v2195_v31 = vsub.f32 1.0, %v2194_v30  ;;  %v4106_v30 = vld [vmem:[%s5368_s13 + $0x30] sm:$0xf] }
 0x821   : > { %v2196_v32 = vmul.f32 %v4557_v29, %v2195_v31  ;;  %v4357_v31 = vld [vmem:[%s5368_s13 + $0x34] sm:$0xf0] }
 0x823   : > { %v2197_v25 = vadd.f32 %v4557_v29, %v2196_v32  ;;  %v4107_v32 = vor.u32 %v4357_v31, %v4106_v30  ;;  %v4362_v30 = vld [vmem:[%s5368_s13 + $0x64] sm:$0xf] }
 0x825   : > { %v5672_v33 = vsel %vm2198_vm4, %v4557_v29, %v2197_v25  ;;  %v4115_v29 = vor.u32 %v4359_v27, %v4114_v26  ;;  %v4098_v25 = vld [vmem:[%s5368_s13 + $0x20] sm:$0xf]  ;;  %v4364_v27 = vld [vmem:[%s5368_s13 + $0x74] sm:$0xf] }
 0x836   : > { %2064 = vrot.lane.b32.xlu1 %v5647_v63, %s4973_s18 }
 0x872   : > { %v2128_v34 = vpop.xlane.xlu0 %2127 }
 0x873   : > { %v2129_v6 = vsub.f32 %v2123_v9, %v2128_v34  ;;  %v2190_v35 = vpop.xlane.xlu2 %2189  ;;  %v4355_v34 = vld [vmem:[%s5368_s13 + $0x24] sm:$0xf0] }
 0x874   : > { %v2200_v36 = vmul.f32 %v5672_v33, %v2190_v35  ;;  %v4090_v35 = vld [vmem:[%s5368_s13 + $0x10] sm:$0xf] }
 0x875   : > { %v2130_v37 = vmul.f32 1.442695, %v2129_v6  ;;  %v4099_v6 = vor.u32 %v4355_v34, %v4098_v25 }
 0x876   : > { %v5675_v40 = vsub.f32 %v2185_v14, %v2200_v36  ;;  %v4353_v36 = vld [vmem:[%s5368_s13 + $0x14] sm:$0xf0] }
 0x877   : > { %4558 = vpow2.f32 %v2130_v37  ;;  %v4091_v37 = vor.u32 %v4353_v36, %v4090_v35 }
 0x878   : > { %v2204_v41 = vmul.f32 %v5675_v40, %v5675_v40 }
 0x87a   : > { %2206 = vadd.xlane.f32.xlu1 %v2204_v41  ;;  %v4082_v41 = vld [vmem:[%s5368_s13] sm:$0xf] }
 0x87d   : > { %v4559_v42 = vpop.eup %4558 }
 0x87e   : > { %v2132_v24 = vsel %vm1546_vm3, %v4559_v42, 0.0 }
 0x87f   : > { %2133 = vadd.xlane.f32.xlu0 %v2132_v24 }
 0x880   : > { %v1968_v43 = vpop.xlane.xlu1 %1967 }
 0x881   : > { %4560 = vrcp.f32 %v1968_v43 }
 0x887   : > { %v4561_v44 = vpop.eup %4560 }
 0x888   : > { %v1970_v45 = vmul.f32 %v4561_v44, %v4553_v19 }
 0x88a   : > { %v1971_v46 = vpack.c.bf16 %v1970_v45, %v1970_v45 }
 0x88c   : > { %4035 = vmatmul.msk.bf16.vlgmr.msrb.gmra.mxu0 %vm1546_vm3, %v1971_v46 }
 0x890   : > { %v2060_v49 = vpop.xlane.xlu1 %2059 }
 0x891   : > { %4562 = vrcp.f32 %v2060_v49  ;;  %v5716_v49 = vld [vmem:[%s6145_s25] sm:$0xff]  ;;  %s6153_s25 = sld [smem:[#allocation48_spill]] }
 0x893   : > { %2138 = vrot.lane.b32.xlu0 %v5647_v63, %s4976_s1 }
 0x897   : > { %v4563_v50 = vpop.eup %4562 }
 0x898   : > { %v2062_v51 = vmul.f32 %v4563_v50, %v4555_v22  ;;  %v4349_v22 = vld [vmem:[%s5366_s28 + $0x38] sm:$0xff]  ;;  %v4348_v50 = vld [vmem:[%s5366_s28 + $0x30] sm:$0xff] }
 0x89a   : > { %v2063_v54 = vpack.c.bf16 %v2062_v51, %v2062_v51  ;;  %v4347_v51 = vld [vmem:[%s5366_s28 + $0x28] sm:$0xff] }
 0x8a8   : > { %v2065_v52 = vpop.permute.xlu1 %2064 }
 0x8a9   : > { %v2070_v53 = vsel %vm1562_vm1, %v2065_v52, 0 }
 0x8aa   : > { %2079 = vmatpush.bf16.msra.mxu0 %v2070_v53 }
 0x8ad   : > { %4039 = vmatmul.msk.bf16.vlgmr.msra.gmra.mxu0 %vm1546_vm3, %v2063_v54  ;;  %v4346_v54 = vld [vmem:[%s5366_s28 + $0x20] sm:$0xff] }
 0x8ae   : > { %2169 = vmatpush.bf16.msrb.mxu0 %v5632_v47 }
 0x8b2   : > { %2170 = vmatpush.bf16.msrb.mxu0 %v5636_v48 }
 0x8ed   : > { %v2207_v52 = vpop.xlane.xlu1 %2206 }
 0x8ee   : > { %v2210_v53 = vmul.f32 %v2207_v52, %v5672_v33 }
 0x8f2   : > { %v2134_v55 = vpop.xlane.xlu0 %2133 }
 0x8f3   : > { %4564 = vrcp.f32 %v2134_v55  ;;  %v2212_v55 = vadd.f32 1e-05, %v2210_v53 }
 0x8f5   : > { %4566 = vrsqrt.f32 %v2212_v55  ;;  %vm2220_vm6 = vweird.f32 %v2212_v55 }
 0x8f9   : > { %v4565_v56 = vpop.eup %4564 }
 0x8fa   : > { %v2136_v57 = vmul.f32 %v4565_v56, %v4559_v42  ;;  %v4351_v42 = vld [vmem:[%s5368_s13 + $0x4] sm:$0xf0]  ;;  %v4345_v56 = vld [vmem:[%s5366_s28 + $0x18] sm:$0xff] }
 0x8fb   : > { %v4083_v44 = vor.u32 %v4351_v42, %v4082_v41  ;;  %v4124_v41 = vld [vmem:[%s5368_s13 + $0x58] sm:$0xf0] }
 0x8fc   : > { %v2137_v12 = vpack.c.bf16 %v2136_v57, %v2136_v57  ;;  %v4344_v57 = vld [vmem:[%s5366_s28 + $0x10] sm:$0xff] }
 0x905   : > { %v2139_v58 = vpop.permute.xlu0 %2138 }
 0x906   : > { %v2144_v59 = vsel %vm1562_vm1, %v2139_v58, 0  ;;  %v4343_v58 = vld [vmem:[%s5366_s28 + $0x8] sm:$0xff] }
 0x907   : > { %2153 = vmatpush.bf16.msra.mxu3 %v2144_v59  ;;  %v4567_v59 = vpop.eup %4566 }
 0x908   : > { %vm2221_vm5 = vweird.f32 %v4567_v59 }
 0x909   : > { %v1992_v60 = vpop.f32.mrf.mxu0  ;;  %vm2222_vm7 = vmor %vm2220_vm6, %vm2221_vm5 }
 0x90a   : > { %v1996_v61 = vpack.c.bf16 %v1992_v60, %v1992_v60  ;;  %4042 = vmatmul.msk.bf16.vlgmr.msra.gmra.mxu3 %vm1546_vm3, %v2137_v12  ;;  %v4342_v12 = vld [vmem:[%s5366_s28] sm:$0xff]  ;;  %v2215_v60 = vmul.f32 %v4567_v59, %v2212_v55  ;;  %s6154_s28 = scalar_lea.vmem %s6153_s25, %s5390_s23 }
 0x90c   : > { %4036 = vmatmul.msk.bf16.vlgmr.msrb.gmra.mxu1 %vm1526_vm0, %v1996_v61  ;;  %v2216_v61 = vmul.f32 %v4567_v59, %v2215_v60 }
 0x90d   : > { %2315 = vmatpush.bf16.msrb.mxu1 %v4349_v22 }
 0x911   : > { %v1994_v47 = vpop.f32.mrf.mxu0  ;;  %2316 = vmatpush.bf16.msrb.mxu1 %v4348_v50  ;;  %v5775_v50 = vld [vmem:[%s6151_s6] ss:$0 sm:$0xff] }
 0x915   : > { %2317 = vmatpush.bf16.msrb.mxu1 %v4347_v51 }
 0x919   : > { %2318 = vmatpush.bf16.msrb.mxu1 %v4346_v54 }
 0x91d   : > { %2319 = vmatpush.bf16.msrb.mxu1 %v4345_v56 }
 0x921   : > { %2320 = vmatpush.bf16.msrb.mxu1 %v4344_v57 }
 0x925   : > { %2321 = vmatpush.bf16.msrb.mxu1 %v4343_v58  ;;  %v4354_v58 = vld [vmem:[%s5368_s13 + $0x24] sm:$0xf] }
 0x929   : > { %2322 = vmatpush.bf16.msrb.mxu1 %v4342_v12  ;;  %v4352_v12 = vld [vmem:[%s5368_s13 + $0x14] sm:$0xf] }
 0x92a   : > { %v2081_v62 = vpop.f32.mrf.mxu0 }
 0x92b   : > { %v2085_v63 = vpack.c.bf16 %v2081_v62, %v2081_v62 }
 0x92d   : > { %4040 = vmatmul.msk.bf16.vlgmr.msra.gmra.mxu1 %vm1526_vm0, %v2085_v63 }
 0x932   : > { %v2083_v48 = vpop.f32.mrf.mxu0 }
 0x933   : > { %v2217_v48 = vmul.f32 0.5, %v2216_v61  ;;  %v4092_v61 = vld [vmem:[%s5368_s13 + $0x18] sm:$0xf0] }
 0x989   : > { %v2009_v39 = vpop.f32.mrf.mxu1 }
 0x98a   : > { %v2026_v10 = vadd.f32 %v5651_v0, %v2009_v39  ;;  %v4130_v0 = vld [vmem:[%s5368_s13 + $0x60] sm:$0xf]  ;;  %v2218_v39 = vsub.f32 1.5, %v2217_v48 }
 0x98b   : > { %v4131_v11 = vor.u32 %v4363_v23, %v4130_v0 }
 0x98d   : > { %v2155_v3 = vpop.f32.mrf.mxu3  ;;  %2442 = vmatpush.bf16.msrb.mxu2 %v4131_v11 }
 0x98e   : > { %v2159_v4 = vpack.c.bf16 %v2155_v3, %v2155_v3 }
 0x990   : > { %4043 = vmatmul.msk.bf16.vlgmr.msrb.gmra.mxu0 %vm1526_vm0, %v2159_v4  ;;  %v2219_v4 = vmul.f32 %v4567_v59, %v2218_v39 }
 0x991   : > { %v2011_v28 = vpop.f32.mrf.mxu1 }
 0x995   : > { %v2157_v7 = vpop.f32.mrf.mxu3 }
 0x996   : > { %v5729_v7 = vld [vmem:[%s5422_s21] sm:$0x3] }
 0x9aa   : > { %v2098_v9 = vpop.f32.mrf.mxu1 }
 0x9ab   : > { %v2102_v13 = vadd.f32 %v2098_v9, %v2026_v10  ;;  %v2351_v9 = vperm.slane %v5729_v7, 0 }
 0x9b2   : > { %v2100_v14 = vpop.f32.mrf.mxu1 }
 0xa0d   : > { %v2172_v15 = vpop.f32.mrf.mxu0 }
 0xa0e   : > { %v2176_v16 = vadd.f32 %v2172_v15, %v2102_v13  ;;  %v2223_v13 = vsel %vm2222_vm7, %v4567_v59, %v2219_v4  ;;  %v4100_v59 = vld [vmem:[%s5368_s13 + $0x28] sm:$0xf0] }
 0xa0f   : > { %v4103_v60 = vor.u32 %v4354_v58, %v4100_v59  ;;  %v4368_v59 = vld [vmem:[%s5374_s30 + $0x10] sm:$0xff] }
 0xa10   : > { %v2182_v17 = vadd.f32 %v5660_v2, %v2176_v16  ;;  %v4123_v2 = vor.u32 %v4361_v1, %v4122_v38 }
 0xa12   : > { %v2186_v18 = vadd.f32 %v2184_v8, %v2182_v17  ;;  %2443 = vmatpush.bf16.msrb.mxu2 %v4123_v2  ;;  %v2234_v8 = vmul.f32 %v2223_v13, %v5675_v40  ;;  %v4520_v17 = vld [vmem:[%s6147_s0] ss:$0 sm:$0xff] }
 0xa13   : > { %v4521_v40 = vld [vmem:[%s6149_s17] ss:$0 sm:$0xff] }
 0xa14   : > { %2191 = vadd.xlane.f32.xlu0 %v2186_v18  ;;  %v2239_v21 = vmul.f32 %v4520_v17, %v2234_v8 }
 0xa15   : > { %v2174_v19 = vpop.f32.mrf.mxu0 }
 0xa16   : > { %2444 = vmatpush.bf16.msrb.mxu2 %v4115_v29  ;;  %v5748_v22 = vadd.f32 %v4521_v40, %v2239_v21  ;;  %v4140_v29 = vld [vmem:[%s5368_s13 + $0x78] sm:$0xf0] }
 0xa17   : > { %v4143_v31 = vor.u32 %v4364_v27, %v4140_v29 }
 0xa19   : > { %2455 = vmatpush.bf16.msrb.mxu3 %v4143_v31 }
 0xa1a   : > { %2445 = vmatpush.bf16.msrb.mxu2 %v4107_v32  ;;  %v4132_v32 = vld [vmem:[%s5368_s13 + $0x68] sm:$0xf0] }
 0xa1e   : > { %2446 = vmatpush.bf16.msrb.mxu2 %v4099_v6  ;;  %v4135_v6 = vor.u32 %v4362_v30, %v4132_v32 }
 0xa20   : > { %2456 = vmatpush.bf16.msrb.mxu3 %v4135_v6 }
 0xa22   : > { %2447 = vmatpush.bf16.msrb.mxu2 %v4091_v37  ;;  %v4360_v37 = vld [vmem:[%s5368_s13 + $0x54] sm:$0xf] }
 0xa23   : > { %v4127_v42 = vor.u32 %v4360_v37, %v4124_v41 }
 0xa25   : > { %2457 = vmatpush.bf16.msrb.mxu3 %v4127_v42 }
 0xa26   : > { %2448 = vmatpush.bf16.msrb.mxu2 %v4083_v44 }
 0xa29   : > { %2449 = vmatmul.bf16.vlgmr.msrb.gmra.mxu2 %v5716_v49 }
 0xa87   : > { %v2192_v24 = vpop.xlane.xlu0 %2191 }
 0xa88   : > { %v2201_v43 = vmul.f32 %v5672_v33, %v2192_v24  ;;  %v4358_v24 = vld [vmem:[%s5368_s13 + $0x44] sm:$0xf] }
 0xa8a   : > { %v2203_v45 = vsub.f32 %v2186_v18, %v2201_v43  ;;  %v4116_v43 = vld [vmem:[%s5368_s13 + $0x48] sm:$0xf0] }
 0xa8b   : > { %v4119_v44 = vor.u32 %v4358_v24, %v4116_v43 }
 0xa8c   : > { %v2205_v46 = vmul.f32 %v2203_v45, %v2203_v45 }
 0xa8d   : > { %2458 = vmatpush.bf16.msrb.mxu3 %v4119_v44 }
 0xa8e   : > { %2208 = vadd.xlane.f32.xlu2 %v2205_v46  ;;  %v4108_v46 = vld [vmem:[%s5368_s13 + $0x38] sm:$0xf0] }
 0xaac   : > { %v2450_v16 = vpop.f32.mrf.mxu2 }
 0xaad   : > { %v2451_v18 = vadd.f32 %v2450_v16, %v2351_v9 }
 0xaaf   : > { %v2469_v5 = vpack.c.bf16 %v2451_v18, %v2451_v18 }
 0xab1   : > { %v2497_v23 = vsel %vm1526_vm0, %v2469_v5, 0  ;;  %v2550_v11 = vunpack.c.l.b16 %v2469_v5 }
 0xab2   : > { %2506 = vmatpush.bf16.xpose.msra.mxu0 %v2497_v23 }
 0xab3   : > { %v5746_v1 = vpack.c.b16 %v2550_v11, %v2550_v11 }
 0xab5   : > { %2552 = vrot.lane.b32.xlu0 %v5746_v1, %s4974_s27  ;;  %2668 = vrot.lane.b32.xlu1 %v5746_v1, %s4973_s18 }
 0xb01   : > { %v2209_v47 = vpop.xlane.xlu2 %2208 }
 0xb02   : > { %v2211_v62 = vmul.f32 %v2209_v47, %v5672_v33  ;;  %v4095_v47 = vor.u32 %v4352_v12, %v4092_v61  ;;  %v4371_v12 = vld [vmem:[%s5374_s30 + $0x28] sm:$0xff] }
 0xb04   : > { %v2213_v63 = vadd.f32 1e-05, %v2211_v62  ;;  %v4350_v62 = vld [vmem:[%s5368_s13 + $0x4] sm:$0xf] }
 0xb06   : > { %4568 = vrsqrt.f32 %v2213_v63  ;;  %vm2230_vm9 = vweird.f32 %v2213_v63 }
 0xb0c   : > { %v4569_v3 = vpop.eup %4568 }
 0xb0d   : > { %v2225_v28 = vmul.f32 %v4569_v3, %v2213_v63  ;;  %vm2231_vm8 = vweird.f32 %v4569_v3  ;;  %v4084_v63 = vld [vmem:[%s5368_s13 + $0x8] sm:$0xf0] }
 0xb0e   : > { %vm2232_vm10 = vmor %vm2230_vm9, %vm2231_vm8  ;;  %v4087_v48 = vor.u32 %v4350_v62, %v4084_v63  ;;  %v4367_v62 = vld [vmem:[%s5374_s30 + $0x8] sm:$0xff]  ;;  %v2452_v63 = vpop.f32.mrf.mxu2 }
 0xb0f   : > { %v2226_v10 = vmul.f32 %v4569_v3, %v2225_v28 }
 0xb11   : > { %v2227_v14 = vmul.f32 0.5, %v2226_v10  ;;  %v2352_v10 = vperm.slane %v5729_v7, 1 }
 0xb13   : > { %v2228_v15 = vsub.f32 1.5, %v2227_v14 }
 0xb15   : > { %v2229_v19 = vmul.f32 %v4569_v3, %v2228_v15 }
 0xb17   : > { %v2233_v20 = vsel %vm2232_vm10, %v4569_v3, %v2229_v19 }
 0xb18   : > { %v2235_v0 = vmul.f32 %v2233_v20, %v2203_v45  ;;  %v4356_v45 = vld [vmem:[%s5368_s13 + $0x34] sm:$0xf] }
 0xb19   : > { %v4111_v51 = vor.u32 %v4356_v45, %v4108_v46 }
 0xb1a   : > { %v2240_v38 = vmul.f32 %v4520_v17, %v2235_v0 }
 0xb1b   : > { %2459 = vmatpush.bf16.msrb.mxu3 %v4111_v51 }
 0xb1c   : > { %v5750_v2 = vadd.f32 %v4521_v40, %v2240_v38 }
 0xb1e   : > { %v2246_v26 = vpack.c.bf16 %v5750_v2, %v5748_v22 }
 0xb1f   : > { %2460 = vmatpush.bf16.msrb.mxu3 %v4103_v60 }
 0xb20   : > { %2323 = vmatmul.bf16.vlgmr.msrb.gmra.mxu1 %v2246_v26 }
 0xb23   : > { %2461 = vmatpush.bf16.msrb.mxu3 %v4095_v47  ;;  %v4370_v47 = vld [vmem:[%s5374_s30 + $0x20] sm:$0xff] }
 0xb27   : > { %v2553_v25 = vpop.permute.xlu0 %2552  ;;  %v2669_v34 = vpop.permute.xlu1 %2668  ;;  %2462 = vmatpush.bf16.msrb.mxu3 %v4087_v48  ;;  %v2453_v48 = vadd.f32 %v2452_v63, %v2351_v9 }
 0xb28   : > { %v2558_v35 = vsel %vm1526_vm0, %v2553_v25, 0  ;;  %v2674_v36 = vsel %vm1526_vm0, %v2669_v34, 0 }
 0xb29   : > { %2567 = vmatpush.bf16.xpose.msra.mxu1 %v2558_v35 }
 0xb2a   : > { %2463 = vmatmul.bf16.vlgmr.msrb.gmra.mxu3 %v5716_v49  ;;  %v5803_v49 = vld [vmem:[%s6152_s19] ss:$0 sm:$0xff] }
 0xb31   : > { %2683 = vmatpush.bf16.xpose.msrb.mxu1 %v2674_v36 }
 0xb9d   : > { %v2324_v52 = vpop.f32.mrf.mxu1 }
 0xb9e   : > { %v2325_v53 = vadd.f32 %v5775_v50, %v2324_v52 }
 0xba0   : > { %v2329_v54 = vmul.f32 0.17677669, %v2325_v53 }
 0xba2   : > { %v2331_v55 = vpack.c.bf16 %v2329_v54, %v2329_v54 }
 0xba4   : > { %v2545_v56 = vunpack.c.l.b16 %v2331_v55  ;;  %4144 = vmatmul.msk.bf16.vlgmr.msra.gmra.mxu0 %vm1526_vm0, %v2331_v55  ;;  %v4369_v55 = vld [vmem:[%s5374_s30 + $0x18] sm:$0xff] }
 0xba5   : > { %v5797_v16 = vpop.f32.mrf.mxu1  ;;  %2631 = vmatpush.bf16.msra.mxu3 %v4369_v55 }
 0xba6   : > { %v5779_v57 = vpack.c.b16 %v2545_v56, %v2545_v56 }
 0xba8   : > { %2666 = vrot.lane.b32.xlu0 %v5779_v57, %s4973_s18  ;;  %2547 = vrot.lane.b32.xlu2 %v5779_v57, %s4974_s27 }
 0xba9   : > { %2632 = vmatpush.bf16.msra.mxu3 %v4368_v59 }
 0xbad   : > { %v2464_v13 = vpop.f32.mrf.mxu3  ;;  %2744 = vmatpush.bf16.msrb.mxu3 %v4371_v12 }
 0xbae   : > { %v2465_v14 = vadd.f32 %v2464_v13, %v2352_v10 }
 0xbb0   : > { %v2471_v15 = vpack.c.bf16 %v2465_v14, %v2465_v14 }
 0xbb1   : > { %2745 = vmatpush.bf16.msrb.mxu3 %v4370_v47 }
 0xbb2   : > { %v2528_v8 = vsel %vm1562_vm1, %v2471_v15, 0  ;;  %v2586_v20 = vunpack.c.l.b16 %v2471_v15 }
 0xbb3   : > { %2537 = vmatpush.bf16.msrb.mxu0 %v2528_v8 }
 0xbb4   : > { %v5807_v0 = vpack.c.b16 %v2586_v20, %v2586_v20 }
 0xbb7   : > { %2659 = vmatpush.bf16.msra.mxu0 %v4367_v62 }
 0xc02   : > { %v2548_v39 = vpop.permute.xlu2 %2547 }
 0xc03   : > { %4146 = vmatmul.msk.bf16.vlgmr.msra.gmra.mxu1 %vm1526_vm0, %v2548_v39  ;;  %v4366_v39 = vld [vmem:[%s5374_s30] sm:$0xff] }
 0xc04   : > { %2660 = vmatpush.bf16.msra.mxu0 %v4366_v39 }
 0xc1a   : > { %v2667_v3 = vpop.permute.xlu0 %2666 }
 0xc1b   : > { %4166 = vmatmul.msk.bf16.vlgmr.msrb.gmra.mxu1 %vm1526_vm0, %v2667_v3  ;;  %v5836_v3 = vpack.c.bf16 %v2453_v48, %v2453_v48 }
 0xc1d   : > { %v2847_v13 = vsel %vm1526_vm0, %v5836_v3, 0 }
 0xc21   : > { %v2508_v4 = vpop.f32.mrf.mxu0 }
 0xc29   : > { %v2510_v28 = vpop.f32.mrf.mxu0 }
 0xc80   : > { %v2569_v17 = vpop.f32.mrf.mxu1 }
 0xc81   : > { %v2570_v18 = vadd.f32 %v5803_v49, %v2569_v17 }
 0xc83   : > { %v2573_v19 = vsel %vm1546_vm3, %v2570_v18, -inf }
 0xc84   : > { %2574 = vmax.xlane.f32.xlu2 %v2573_v19 }
 0xc88   : > { %v2571_v5 = vpop.f32.mrf.mxu1 }
 0xc98   : > { %v2685_v21 = vpop.f32.mrf.mxu1 }
 0xc99   : > { %v2686_v40 = vadd.f32 %v5803_v49, %v2685_v21  ;;  %v2327_v21 = vadd.f32 %v5775_v50, %v5797_v16 }
 0xc9b   : > { %v2689_v23 = vsel %vm1546_vm3, %v2686_v40, -inf }
 0xc9c   : > { %2690 = vmax.xlane.f32.xlu0 %v2689_v23  ;;  %2588 = vrot.lane.b32.xlu2 %v5807_v0, %s4974_s27 }
 0xca0   : > { %v2687_v11 = vpop.f32.mrf.mxu1 }
 0xca1   : > { %v2466_v11 = vpop.f32.mrf.mxu3 }
 0xca4   : > { %2754 = vrot.lane.b32.xlu2 %v5746_v1, %s4976_s1  ;;  %v2509_v1 = vadd.f32 %v5803_v49, %v2508_v4 }
 0xca6   : > { %v2512_v37 = vsel %vm1546_vm3, %v2509_v1, -inf }
 0xcf7   : > { %v2575_v38 = vpop.xlane.xlu2 %2574 }
 0xcf8   : > { %v2576_v26 = vsub.f32 %v2570_v18, %v2575_v38 }
 0xcfa   : > { %v2577_v27 = vmul.f32 1.442695, %v2576_v26 }
 0xcfc   : > { %4570 = vpow2.f32 %v2577_v27  ;;  %v2467_v27 = vadd.f32 %v2466_v11, %v2352_v10 }
 0xcff   : > { %v2589_v29 = vpop.permute.xlu2 %2588 }
 0xd00   : > { %v2594_v30 = vsel %vm1562_vm1, %v2589_v29, 0  ;;  %v5851_v29 = vpack.c.bf16 %v2467_v27, %v2467_v27 }
 0xd01   : > { %2603 = vmatpush.bf16.msra.mxu2 %v2594_v30 }
 0xd02   : > { %v4571_v31 = vpop.eup %4570  ;;  %v2878_v50 = vsel %vm1562_vm1, %v5851_v29, 0 }
 0xd03   : > { %v2579_v32 = vsel %vm1546_vm3, %v4571_v31, 0.0 }
 0xd04   : > { %2580 = vadd.xlane.f32.xlu1 %v2579_v32 }
 0xd07   : > { %v2755_v9 = vpop.permute.xlu2 %2754 }
 0xd08   : > { %v2760_v5 = vsel %vm1526_vm0, %v2755_v9, 0  ;;  %v5888_v9 = vld [vmem:[%s5374_s30 + $0x38] sm:$0xff] }
 0xd0f   : > { %v2691_v25 = vpop.xlane.xlu0 %2690 }
 0xd10   : > { %v2692_v34 = vsub.f32 %v2686_v40, %v2691_v25  ;;  %v2330_v40 = vmul.f32 0.17677669, %v2327_v21 }
 0xd12   : > { %v2693_v6 = vmul.f32 1.442695, %v2692_v34  ;;  %v2332_v23 = vpack.c.bf16 %v2330_v40, %v2330_v40  ;;  %v5861_v34 = vld [vmem:[%s6152_s19 + $0x1] ss:$0 sm:$0xff] }
 0xd14   : > { %4572 = vpow2.f32 %v2693_v6 }
 0xd1a   : > { %v4573_v35 = vpop.eup %4572 }
 0xd1b   : > { %v2695_v36 = vsel %vm1546_vm3, %v4573_v35, 0.0 }
 0xd1c   : > { %2696 = vadd.xlane.f32.xlu0 %v2695_v36 }
 0xd1d   : > { %2701 = vrot.lane.b32.xlu1 %v5807_v0, %s4973_s18 }
 0xd24   : > { %2513 = vmax.xlane.f32.xlu0 %v2512_v37 }
 0xd77   : > { %v2581_v41 = vpop.xlane.xlu1 %2580 }
 0xd78   : > { %4574 = vrcp.f32 %v2581_v41 }
 0xd7e   : > { %v4575_v42 = vpop.eup %4574 }
 0xd7f   : > { %v2583_v24 = vmul.f32 %v4575_v42, %v4571_v31 }
 0xd81   : > { %v2584_v43 = vpack.c.bf16 %v2583_v24, %v2583_v24 }
 0xd83   : > { %4147 = vmatmul.msk.bf16.vlgmr.msra.gmra.mxu2 %vm1546_vm3, %v2584_v43 }
 0xd8f   : > { %v2697_v44 = vpop.xlane.xlu0 %2696  ;;  %v2702_v45 = vpop.permute.xlu1 %2701 }
 0xd90   : > { %4576 = vrcp.f32 %v2697_v44  ;;  %v2707_v46 = vsel %vm1562_vm1, %v2702_v45, 0 }
 0xd91   : > { %2716 = vmatpush.bf16.msrb.mxu2 %v2707_v46 }
 0xd95   : > { %2830 = vmatpush.bf16.msra.mxu2 %v5888_v9 }
 0xd96   : > { %v4577_v51 = vpop.eup %4576 }
 0xd97   : > { %v2699_v52 = vmul.f32 %v4577_v51, %v4573_v35  ;;  %v2514_v53 = vpop.xlane.xlu0 %2513 }
 0xd98   : > { %v2515_v54 = vsub.f32 %v2509_v1, %v2514_v53  ;;  %v2895_v53 = vunpack.c.l.b16 %v2332_v23 }
 0xd99   : > { %v2700_v56 = vpack.c.bf16 %v2699_v52, %v2699_v52 }
 0xd9a   : > { %v2516_v58 = vmul.f32 1.442695, %v2515_v54  ;;  %v2896_v54 = vpack.c.b16 %v2895_v53, %v2895_v53 }
 0xd9b   : > { %4167 = vmatmul.msk.bf16.vlgmr.msrb.gmra.mxu2 %vm1546_vm3, %v2700_v56 }
 0xd9c   : > { %4578 = vpow2.f32 %v2516_v58 }
 0xda2   : > { %v4579_v60 = vpop.eup %4578 }
 0xda3   : > { %v2518_v61 = vsel %vm1546_vm3, %v4579_v60, 0.0 }
 0xda4   : > { %2519 = vadd.xlane.f32.xlu0 %v2518_v61 }
 0xdb8   : > { %2752 = vrot.lane.b32.xlu0 %v5779_v57, %s4976_s1 }
 0xe06   : > { %v2605_v4 = vpop.f32.mrf.mxu2 }
 0xe07   : > { %v2609_v28 = vpack.c.bf16 %v2605_v4, %v2605_v4 }
 0xe09   : > { %4156 = vmatmul.msk.bf16.vlgmr.msra.gmra.mxu3 %vm1526_vm0, %v2609_v28 }
 0xe0a   : > { %2856 = vmatpush.bf16.xpose.msra.mxu3 %v2847_v13 }
 0xe0e   : > { %v2607_v57 = vpop.f32.mrf.mxu2 }
 0xe17   : > { %v2520_v14 = vpop.xlane.xlu0 %2519 }
 0xe18   : > { %4580 = vrcp.f32 %v2520_v14 }
 0xe1e   : > { %v4581_v15 = vpop.eup %4580  ;;  %v2718_v8 = vpop.f32.mrf.mxu2 }
 0xe1f   : > { %v2522_v17 = vmul.f32 %v4581_v15, %v4579_v60  ;;  %v2722_v18 = vpack.c.bf16 %v2718_v8, %v2718_v8 }
 0xe21   : > { %v2523_v19 = vpack.c.bf16 %v2522_v17, %v2522_v17  ;;  %4176 = vmatmul.msk.bf16.vlgmr.msrb.gmra.mxu3 %vm1526_vm0, %v2722_v18 }
 0xe22   : > { %2969 = vmatpush.bf16.msrb.mxu3 %v4369_v55  ;;  %v2900_v55 = vunpack.c.l.b16 %v5836_v3 }
 0xe23   : > { %4145 = vmatmul.msk.bf16.vlgmr.msrb.gmra.mxu0 %vm1546_vm3, %v2523_v19 }
 0xe24   : > { %2769 = vmatpush.bf16.xpose.msrb.mxu0 %v2760_v5  ;;  %v2901_v56 = vpack.c.b16 %v2900_v55, %v2900_v55 }
 0xe26   : > { %v2720_v20 = vpop.f32.mrf.mxu2  ;;  %2970 = vmatpush.bf16.msrb.mxu3 %v4368_v59 }
 0xe2a   : > { %v2753_v7 = vpop.permute.xlu0 %2752 }
 0xe31   : > { %4189 = vmatmul.msk.bf16.vlgmr.msra.gmra.mxu3 %vm1526_vm0, %v2332_v23  ;;  %v5896_v23 = vld [vmem:[%s5374_s30 + $0x30] sm:$0xff] }
 0xe32   : > { %3058 = vmatpush.bf16.msra.mxu3 %v4371_v12  ;;  %2831 = vmatpush.bf16.msra.mxu2 %v5896_v23 }
 0xe36   : > { %3059 = vmatpush.bf16.msra.mxu3 %v4370_v47 }
 0xe8c   : > { %v5847_v38 = vpop.f32.mrf.mxu3 }
 0xe94   : > { %v2636_v26 = vpop.f32.mrf.mxu3 }
 0xea0   : > { %v2539_v30 = vpop.f32.mrf.mxu0 }
 0xea1   : > { %v2543_v31 = vpack.c.bf16 %v2539_v30, %v2539_v30 }
 0xea3   : > { %4165 = vmatmul.msk.bf16.vlgmr.msra.gmra.mxu0 %vm1526_vm0, %v2543_v31 }
 0xea4   : > { %2887 = vmatpush.bf16.msra.mxu0 %v2878_v50  ;;  %v5856_v16 = vpop.f32.mrf.mxu3 }
 0xea8   : > { %v2541_v32 = vpop.f32.mrf.mxu0 }
 0xeac   : > { %v2749_v25 = vpop.f32.mrf.mxu3 }
 0xeb3   : > { %4177 = vmatmul.msk.bf16.vlgmr.msrb.gmra.mxu0 %vm1526_vm0, %v2753_v7 }
 0xeb4   : > { %v2858_v10 = vpop.f32.mrf.mxu3  ;;  %2985 = vmatpush.bf16.msrb.mxu0 %v4367_v62 }
 0xeb5   : > { %v2859_v6 = vadd.f32 %v5861_v34, %v2858_v10 }
 0xeb7   : > { %v2862_v35 = vsel %vm1546_vm3, %v2859_v6, -inf }
 0xeb8   : > { %2863 = vmax.xlane.f32.xlu2 %v2862_v35  ;;  %2986 = vmatpush.bf16.msrb.mxu0 %v4366_v39 }
 0xebc   : > { %v2860_v36 = vpop.f32.mrf.mxu3 }
 0xf20   : > { %v5866_v1 = vpop.f32.mrf.mxu0 }
 0xf28   : > { %v2664_v37 = vpop.f32.mrf.mxu0 }
 0xf2b   : > { %v2864_v41 = vpop.xlane.xlu2 %2863 }
 0xf2c   : > { %v2865_v42 = vsub.f32 %v2859_v6, %v2864_v41 }
 0xf2e   : > { %v2866_v24 = vmul.f32 1.442695, %v2865_v42 }
 0xf30   : > { %4582 = vpow2.f32 %v2866_v24  ;;  %v2771_v43 = vpop.f32.mrf.mxu0 }
 0xf31   : > { %v2772_v44 = vadd.f32 %v5803_v49, %v2771_v43  ;;  %v2936_v43 = vunpack.c.l.b16 %v5851_v29 }
 0xf33   : > { %v2775_v45 = vsel %vm1546_vm3, %v2772_v44, -inf }
 0xf34   : > { %2776 = vmax.xlane.f32.xlu0 %v2775_v45  ;;  %v2663_v45 = vadd.f32 %v5866_v1, %v5847_v38 }
 0xf36   : > { %v4583_v46 = vpop.eup %4582 }
 0xf37   : > { %v2868_v51 = vsel %vm1546_vm3, %v4583_v46, 0.0 }
 0xf38   : > { %2869 = vadd.xlane.f32.xlu1 %v2868_v51  ;;  %v2773_v52 = vpop.f32.mrf.mxu0  ;;  %v5918_v51 = vld [vmem:[%s6154_s28] ss:$0 sm:$0xff] }
 0xf48   : > { %2897 = vrot.lane.b32.xlu0 %v2896_v54, %s4974_s27 }
 0xf50   : > { %3068 = vrot.lane.b32.xlu0 %v2901_v56, %s4976_s1 }
 0xf51   : > { %2787 = vrot.lane.b32.xlu1 %v5807_v0, %s4976_s1 }
 0xf59   : > { %2994 = vrot.lane.b32.xlu1 %v2901_v56, %s4973_s18 }
 0xf61   : > { %3066 = vrot.lane.b32.xlu1 %v2896_v54, %s4976_s1 }
 0xfa7   : > { %v2777_v49 = vpop.xlane.xlu0 %2776 }
 0xfa8   : > { %v2778_v58 = vsub.f32 %v2772_v44, %v2777_v49  ;;  %v2937_v44 = vpack.c.b16 %v2936_v43, %v2936_v43 }
 0xfaa   : > { %v2779_v59 = vmul.f32 1.442695, %v2778_v58 }
 0xfab   : > { %v2870_v12 = vpop.xlane.xlu1 %2869 }
 0xfac   : > { %4584 = vpow2.f32 %v2779_v59 }
 0xfad   : > { %4586 = vrcp.f32 %v2870_v12 }
 0xfb2   : > { %v4585_v60 = vpop.eup %4584 }
 0xfb3   : > { %v4587_v61 = vpop.eup %4586  ;;  %v2781_v47 = vsel %vm1546_vm3, %v4585_v60, 0.0 }
 0xfb4   : > { %v2872_v62 = vmul.f32 %v4587_v61, %v4583_v46  ;;  %2782 = vadd.xlane.f32.xlu2 %v2781_v47  ;;  %v2751_v46 = vadd.f32 %v5856_v16, %v2663_v45 }
 0xfb6   : > { %v2873_v63 = vpack.c.bf16 %v2872_v62, %v2872_v62 }
 0xfb8   : > { %4190 = vmatmul.msk.bf16.vlgmr.msra.gmra.mxu0 %vm1546_vm3, %v2873_v63 }
 0xfba   : > { %v2898_v0 = vpop.permute.xlu0 %2897 }
 0xfc2   : > { %v3069_v48 = vpop.permute.xlu0 %3068 }
 0xfc3   : > { %v3074_v39 = vsel %vm1526_vm0, %v3069_v48, 0  ;;  %v2788_v3 = vpop.permute.xlu1 %2787 }
 0xfc4   : > { %v2793_v4 = vsel %vm1562_vm1, %v2788_v3, 0  ;;  %3083 = vmatpush.bf16.xpose.msra.mxu0 %v3074_v39 }
 0xfc5   : > { %2802 = vmatpush.bf16.msra.mxu1 %v2793_v4 }
 0xfcb   : > { %v2995_v15 = vpop.permute.xlu1 %2994 }
 0xfcc   : > { %2902 = vrot.lane.b32.xlu2 %v2901_v56, %s4974_s27  ;;  %v3000_v18 = vsel %vm1526_vm0, %v2995_v15, 0 }
 0xfd3   : > { %v3067_v21 = vpop.permute.xlu1 %3066 }
 0xfd4   : > { %2992 = vrot.lane.b32.xlu2 %v2896_v54, %s4973_s18 }
0x1027   : > { %v2783_v28 = vpop.xlane.xlu2 %2782 }
0x1028   : > { %4588 = vrcp.f32 %v2783_v28 }
0x102e   : > { %v4589_v13 = vpop.eup %4588 }
0x102f   : > { %v2785_v57 = vmul.f32 %v4589_v13, %v4585_v60  ;;  %v2903_v14 = vpop.permute.xlu2 %2902 }
0x1030   : > { %v2908_v8 = vsel %vm1526_vm0, %v2903_v14, 0 }
0x1031   : > { %v2786_v17 = vpack.c.bf16 %v2785_v57, %v2785_v57  ;;  %2917 = vmatpush.bf16.xpose.msrb.mxu1 %v2908_v8 }
0x1033   : > { %4178 = vmatmul.msk.bf16.vlgmr.msra.gmra.mxu1 %vm1546_vm3, %v2786_v17 }
0x1035   : > { %v2889_v19 = vpop.f32.mrf.mxu0 }
0x1036   : > { %v2893_v5 = vpack.c.bf16 %v2889_v19, %v2889_v19 }
0x1037   : > { %v2993_v40 = vpop.permute.xlu2 %2992 }
0x1038   : > { %4194 = vmatmul.msk.bf16.vlgmr.msrb.gmra.mxu0 %vm1526_vm0, %v2893_v5 }
0x1039   : > { %3009 = vmatpush.bf16.xpose.msra.mxu1 %v3000_v18 }
0x103d   : > { %v2891_v20 = vpop.f32.mrf.mxu0 }
0x1043   : > { %4191 = vmatmul.msk.bf16.vlgmr.msrb.gmra.mxu1 %vm1526_vm0, %v2898_v0 }
0x1048   : > { %4198 = vmatmul.msk.bf16.vlgmr.msra.gmra.mxu0 %vm1526_vm0, %v3067_v21 }
0x1053   : > { %4195 = vmatmul.msk.bf16.vlgmr.msra.gmra.mxu1 %vm1526_vm0, %v2993_v40 }
0x10b0   : > { %v2804_v11 = vpop.f32.mrf.mxu1 }
0x10b1   : > { %v2808_v26 = vpack.c.bf16 %v2804_v11, %v2804_v11 }
0x10b3   : > { %4187 = vmatmul.msk.bf16.vlgmr.msra.gmra.mxu2 %vm1526_vm0, %v2808_v26 }
0x10b5   : > { %v5900_v27 = vpop.f32.mrf.mxu0 }
0x10b8   : > { %v2806_v30 = vpop.f32.mrf.mxu1 }
0x10bd   : > { %v2990_v31 = vpop.f32.mrf.mxu0 }
0x10c0   : > { %v2919_v50 = vpop.f32.mrf.mxu1 }
0x10c1   : > { %v2920_v32 = vadd.f32 %v5861_v34, %v2919_v50 }
0x10c3   : > { %v2923_v25 = vsel %vm1546_vm3, %v2920_v32, -inf }
0x10c4   : > { %2924 = vmax.xlane.f32.xlu2 %v2923_v25 }
0x10c5   : > { %v3085_v7 = vpop.f32.mrf.mxu0 }
0x10c6   : > { %v3086_v10 = vadd.f32 %v5861_v34, %v3085_v7 }
0x10c8   : > { %v2921_v6 = vpop.f32.mrf.mxu1  ;;  %v3089_v35 = vsel %vm1546_vm3, %v3086_v10, -inf }
0x10c9   : > { %3090 = vmax.xlane.f32.xlu1 %v3089_v35 }
0x10cd   : > { %v3087_v36 = vpop.f32.mrf.mxu0 }
0x10d0   : > { %v3011_v37 = vpop.f32.mrf.mxu1 }
0x10d1   : > { %v3012_v41 = vadd.f32 %v5861_v34, %v3011_v37 }
0x10d3   : > { %v3015_v42 = vsel %vm1546_vm3, %v3012_v41, -inf }
0x10d4   : > { %3016 = vmax.xlane.f32.xlu0 %v3015_v42 }
0x10d8   : > { %v3013_v24 = vpop.f32.mrf.mxu1 }
0x10e8   : > { %2938 = vrot.lane.b32.xlu0 %v2937_v44, %s4974_s27  ;;  %s6156_s27 = sld [smem:[#allocation32_spill]] }
0x1136   : > { %v2833_v34 = vpop.f32.mrf.mxu2 }
0x1137   : > { %v2837_v52 = vadd.f32 %v2833_v34, %v2751_v46  ;;  %v2925_v53 = vpop.xlane.xlu2 %2924 }
0x1138   : > { %v2926_v54 = vsub.f32 %v2920_v32, %v2925_v53 }
0x1139   : > { %v3144_v29 = vadd.f32 %v5918_v51, %v2837_v52 }
0x113a   : > { %v2927_v55 = vmul.f32 1.442695, %v2926_v54 }
0x113b   : > { %v3146_v56 = vadd.f32 %v3144_v29, %v5748_v22 }
0x113c   : > { %4590 = vpow2.f32 %v2927_v55  ;;  %v3091_v49 = vpop.xlane.xlu1 %3090 }
0x113d   : > { %3150 = vadd.xlane.f32.xlu0 %v3146_v56  ;;  %v3092_v12 = vsub.f32 %v3086_v10, %v3091_v49 }
0x113e   : > { %v2835_v38 = vpop.f32.mrf.mxu2 }
0x113f   : > { %v3093_v61 = vmul.f32 1.442695, %v3092_v12 }
0x1142   : > { %v4591_v1 = vpop.eup %4590 }
0x1143   : > { %v2929_v16 = vsel %vm1546_vm3, %v4591_v1, 0.0 }
0x1144   : > { %2930 = vadd.xlane.f32.xlu2 %v2929_v16 }
0x1147   : > { %v3017_v58 = vpop.xlane.xlu0 %3016 }
0x1148   : > { %v3018_v59 = vsub.f32 %v3012_v41, %v3017_v58 }
0x114a   : > { %v3019_v60 = vmul.f32 1.442695, %v3018_v59 }
0x114c   : > { %4592 = vpow2.f32 %v3019_v60 }
0x114d   : > { %4594 = vpow2.f32 %v3093_v61 }
0x1152   : > { %v4593_v47 = vpop.eup %4592 }
0x1153   : > { %v3021_v62 = vsel %vm1546_vm3, %v4593_v47, 0.0  ;;  %v4595_v22 = vpop.eup %4594 }
0x1154   : > { %3022 = vadd.xlane.f32.xlu1 %v3021_v62  ;;  %v3095_v48 = vsel %vm1546_vm3, %v4595_v22, 0.0 }
0x115a   : > { %v2939_v63 = vpop.permute.xlu0 %2938 }
0x115b   : > { %v2944_v0 = vsel %vm1562_vm1, %v2939_v63, 0 }
0x115c   : > { %3027 = vrot.lane.b32.xlu2 %v2937_v44, %s4973_s18  ;;  %3096 = vadd.xlane.f32.xlu1 %v3095_v48  ;;  %s6155_s18 = sld [smem:[#allocation31_spill]] }
0x115d   : > { %2953 = vmatpush.bf16.msrb.mxu2 %v2944_v0  ;;  %v4388_v0 = vld [vmem:[%s6156_s27 + $0x30] sm:$0xff] }
0x1162   : > { %v4381_v53 = vld [vmem:[%s6155_s18 + $0x38] sm:$0xff]  ;;  %v4376_v58 = vld [vmem:[%s6155_s18 + $0x10] sm:$0xff]  ;;  %v4375_v59 = vld [vmem:[%s6155_s18 + $0x8] sm:$0xff] }
0x1163   : > { %v4377_v49 = vld [vmem:[%s6155_s18 + $0x18] sm:$0xff]  ;;  %v4374_v60 = vld [vmem:[%s6155_s18] sm:$0xff] }
0x1175   : > { %3101 = vrot.lane.b32.xlu1 %v2937_v44, %s4976_s1 }
0x11b0   : > { %v3151_v39 = vpop.xlane.xlu0 %3150 }
0x11b1   : > { %v3154_v3 = vmul.f32 %v3151_v39, %v5672_v33 }
0x11b3   : > { %v5929_v4 = vsub.f32 %v3146_v56, %v3154_v3  ;;  %v4380_v56 = vld [vmem:[%s6155_s18 + $0x30] sm:$0xff]  ;;  %v4387_v3 = vld [vmem:[%s6156_s27 + $0x28] sm:$0xff] }
0x11b5   : > { %v3158_v28 = vmul.f32 %v5929_v4, %v5929_v4 }
0x11b7   : > { %v2931_v13 = vpop.xlane.xlu2 %2930  ;;  %3160 = vadd.xlane.f32.xlu1 %v3158_v28 }
0x11b8   : > { %4596 = vrcp.f32 %v2931_v13  ;;  %v4386_v13 = vld [vmem:[%s6156_s27 + $0x20] sm:$0xff] }
0x11be   : > { %v4597_v57 = vpop.eup %4596 }
0x11bf   : > { %v2933_v14 = vmul.f32 %v4597_v57, %v4591_v1  ;;  %v3028_v15 = vpop.permute.xlu2 %3027  ;;  %v4378_v1 = vld [vmem:[%s6155_s18 + $0x20] sm:$0xff] }
0x11c0   : > { %v3033_v8 = vsel %vm1562_vm1, %v3028_v15, 0 }
0x11c1   : > { %v2934_v17 = vpack.c.bf16 %v2933_v14, %v2933_v14  ;;  %3042 = vmatpush.bf16.msra.mxu2 %v3033_v8 }
0x11c3   : > { %4192 = vmatmul.msk.bf16.vlgmr.msrb.gmra.mxu2 %vm1546_vm3, %v2934_v17 }
0x11c5   : > { %3132 = vmatpush.bf16.msrb.mxu2 %v5888_v9 }
0x11c7   : > { %v3023_v18 = vpop.xlane.xlu1 %3022 }
0x11c8   : > { %4598 = vrcp.f32 %v3023_v18 }
0x11c9   : > { %3133 = vmatpush.bf16.msrb.mxu2 %v5896_v23 }
0x11ce   : > { %v4599_v19 = vpop.eup %4598 }
0x11cf   : > { %v3025_v5 = vmul.f32 %v4599_v19, %v4593_v47  ;;  %v3097_v21 = vpop.xlane.xlu1 %3096  ;;  %v4389_v47 = vld [vmem:[%s6156_s27 + $0x38] sm:$0xff] }
0x11d0   : > { %4600 = vrcp.f32 %v3097_v21  ;;  %3354 = vmatpush.bf16.msrb.mxu0 %v4389_v47 }
0x11d1   : > { %v3026_v20 = vpack.c.bf16 %v3025_v5, %v3025_v5  ;;  %v4526_v5 = vld [vmem:[%s1246_s15] ss:$0 sm:$0xff] }
0x11d3   : > { %4196 = vmatmul.msk.bf16.vlgmr.msra.gmra.mxu2 %vm1546_vm3, %v3026_v20 }
0x11d4   : > { %3355 = vmatpush.bf16.msrb.mxu0 %v4388_v0 }
0x11d6   : > { %v4601_v40 = vpop.eup %4600 }
0x11d7   : > { %v3099_v11 = vmul.f32 %v4601_v40, %v4595_v22 }
0x11d8   : > { %3356 = vmatpush.bf16.msrb.mxu0 %v4387_v3 }
0x11d9   : > { %v3100_v31 = vpack.c.bf16 %v3099_v11, %v3099_v11  ;;  %v4527_v11 = vld [vmem:[%s1249_s24] ss:$0 sm:$0xff] }
0x11dc   : > { %3357 = vmatpush.bf16.msrb.mxu0 %v4386_v13 }
0x11e7   : > { %v3102_v26 = vpop.permute.xlu1 %3101 }
0x11e8   : > { %v3107_v30 = vsel %vm1562_vm1, %v3102_v26, 0 }
0x11e9   : > { %3116 = vmatpush.bf16.msrb.mxu1 %v3107_v30 }
0x11ec   : > { %4199 = vmatmul.msk.bf16.vlgmr.msrb.gmra.mxu1 %vm1546_vm3, %v3100_v31 }
0x122a   : > { %v3161_v38 = vpop.xlane.xlu1 %3160 }
0x1246   : > { %v2955_v9 = vpop.f32.mrf.mxu2 }
0x1247   : > { %v2959_v50 = vpack.c.bf16 %v2955_v9, %v2955_v9 }
0x1249   : > { %4193 = vmatmul.msk.bf16.vlgmr.msrb.gmra.mxu3 %vm1526_vm0, %v2959_v50 }
0x124a   : > { %3269 = vmatpush.bf16.msrb.mxu3 %v4381_v53 }
0x124e   : > { %v2957_v23 = vpop.f32.mrf.mxu2  ;;  %3270 = vmatpush.bf16.msrb.mxu3 %v4380_v56 }
0x1256   : > { %v3044_v32 = vpop.f32.mrf.mxu2 }
0x1257   : > { %v3048_v25 = vpack.c.bf16 %v3044_v32, %v3044_v32  ;;  %v4384_v32 = vld [vmem:[%s6156_s27 + $0x10] sm:$0xff] }
0x1259   : > { %4197 = vmatmul.msk.bf16.vlgmr.msra.gmra.mxu3 %vm1526_vm0, %v3048_v25  ;;  %v4383_v25 = vld [vmem:[%s6156_s27 + $0x8] sm:$0xff] }
0x125e   : > { %v3046_v7 = vpop.f32.mrf.mxu2 }
0x125f   : > { %v4382_v7 = vld [vmem:[%s6156_s27] sm:$0xff] }
0x1269   : > { %v3118_v10 = vpop.f32.mrf.mxu1 }
0x126a   : > { %v3122_v6 = vpack.c.bf16 %v3118_v10, %v3118_v10 }
0x126c   : > { %4200 = vmatmul.msk.bf16.vlgmr.msrb.gmra.mxu2 %vm1526_vm0, %v3122_v6  ;;  %v4528_v6 = vld [vmem:[%s1252_s20] ss:$0 sm:$0xff] }
0x1271   : > { %v3120_v35 = vpop.f32.mrf.mxu1 }
0x12cc   : > { %v2972_v36 = vpop.f32.mrf.mxu3 }
0x12cd   : > { %v2989_v24 = vadd.f32 %v5900_v27, %v2972_v36 }
0x12d4   : > { %v2974_v37 = vpop.f32.mrf.mxu3 }
0x12dc   : > { %v3061_v41 = vpop.f32.mrf.mxu3 }
0x12dd   : > { %v3065_v43 = vadd.f32 %v3061_v41, %v2989_v24 }
0x12e4   : > { %v3063_v42 = vpop.f32.mrf.mxu3 }
0x12ef   : > { %v3135_v44 = vpop.f32.mrf.mxu2 }
0x12f0   : > { %v3139_v45 = vadd.f32 %v3135_v44, %v3065_v43  ;;  %v4529_v43 = vld [vmem:[%s1255_s9] ss:$0 sm:$0xff] }
0x12f2   : > { %v3145_v46 = vadd.f32 %v5918_v51, %v3139_v45  ;;  %v4379_v51 = vld [vmem:[%s6155_s18 + $0x28] sm:$0xff] }
0x12f3   : > { %3271 = vmatpush.bf16.msrb.mxu3 %v4379_v51 }
0x12f4   : > { %v3147_v34 = vadd.f32 %v3145_v46, %v5750_v2  ;;  %v3164_v2 = vmul.f32 %v3161_v38, %v5672_v33 }
0x12f6   : > { %3152 = vadd.xlane.f32.xlu2 %v3147_v34  ;;  %v3166_v16 = vadd.f32 1e-05, %v3164_v2 }
0x12f7   : > { %v3137_v52 = vpop.f32.mrf.mxu2  ;;  %3272 = vmatpush.bf16.msrb.mxu3 %v4378_v1 }
0x12f8   : > { %4602 = vrsqrt.f32 %v3166_v16  ;;  %vm3174_vm12 = vweird.f32 %v3166_v16 }
0x12fb   : > { %3273 = vmatpush.bf16.msrb.mxu3 %v4377_v49 }
0x12fe   : > { %v4603_v12 = vpop.eup %4602 }
0x12ff   : > { %3274 = vmatpush.bf16.msrb.mxu3 %v4376_v58  ;;  %v3169_v61 = vmul.f32 %v4603_v12, %v3166_v16  ;;  %vm3175_vm11 = vweird.f32 %v4603_v12 }
0x1300   : > { %vm3176_vm13 = vmor %vm3174_vm12, %vm3175_vm11 }
0x1301   : > { %v3170_v62 = vmul.f32 %v4603_v12, %v3169_v61 }
0x1303   : > { %3275 = vmatpush.bf16.msrb.mxu3 %v4375_v59  ;;  %v3171_v39 = vmul.f32 0.5, %v3170_v62 }
0x1305   : > { %v3172_v28 = vsub.f32 1.5, %v3171_v39  ;;  %v4530_v39 = vld [vmem:[%s1258_s7] ss:$0 sm:$0xff]  ;;  %s6163_s7 = sld [smem:[#allocation27_spill]] }
0x1307   : > { %3276 = vmatpush.bf16.msrb.mxu3 %v4374_v60  ;;  %v3173_v14 = vmul.f32 %v4603_v12, %v3172_v28  ;;  %v4531_v28 = vld [vmem:[%s1261_s10] ss:$0 sm:$0xff] }
0x1309   : > { %v3177_v17 = vsel %vm3176_vm13, %v4603_v12, %v3173_v14 }
0x130a   : > { %v3188_v20 = vmul.f32 %v3177_v17, %v5929_v4  ;;  %v4385_v4 = vld [vmem:[%s6156_s27 + $0x18] sm:$0xff] }
0x130b   : > { %3358 = vmatpush.bf16.msrb.mxu0 %v4385_v4  ;;  %p4265_p5 = scmp.ne.s32.totalorder %s6163_s7, 1 }
0x130c   : > { %v3193_v26 = vmul.f32 %v4526_v5, %v3188_v20 }
0x130e   : > { %v3198_v9 = vadd.f32 %v4527_v11, %v3193_v26 }
0x130f   : > { %3359 = vmatpush.bf16.msrb.mxu0 %v4384_v32 }
0x1313   : > { %3360 = vmatpush.bf16.msrb.mxu0 %v4383_v25 }
0x1317   : > { %3361 = vmatpush.bf16.msrb.mxu0 %v4382_v7 }
0x1369   : > { %v3153_v54 = vpop.xlane.xlu2 %3152 }
0x136a   : > { %v3155_v29 = vmul.f32 %v3153_v54, %v5672_v33 }
0x136c   : > { %v3157_v55 = vsub.f32 %v3147_v34, %v3155_v29 }
0x136e   : > { %v3159_v27 = vmul.f32 %v3157_v55, %v3157_v55 }
0x1370   : > { %3162 = vadd.xlane.f32.xlu0 %v3159_v27 }
0x13e3   : > { %v3163_v22 = vpop.xlane.xlu0 %3162 }
0x13e4   : > { %v3165_v63 = vmul.f32 %v3163_v22, %v5672_v33 }
0x13e6   : > { %v3167_v48 = vadd.f32 1e-05, %v3165_v63 }
0x13e8   : > { %4604 = vrsqrt.f32 %v3167_v48  ;;  %vm3184_vm15 = vweird.f32 %v3167_v48 }
0x13ee   : > { %v4605_v57 = vpop.eup %4604 }
0x13ef   : > { %v3179_v15 = vmul.f32 %v4605_v57, %v3167_v48  ;;  %vm3185_vm14 = vweird.f32 %v4605_v57 }
0x13f0   : > { %vm3186_vm0 = vmor %vm3184_vm15, %vm3185_vm14 }
0x13f1   : > { %v3180_v8 = vmul.f32 %v4605_v57, %v3179_v15 }
0x13f3   : > { %v3181_v18 = vmul.f32 0.5, %v3180_v8 }
0x13f5   : > { %v3182_v19 = vsub.f32 1.5, %v3181_v18 }
0x13f7   : > { %v3183_v21 = vmul.f32 %v4605_v57, %v3182_v19 }
0x13f9   : > { %v3187_v40 = vsel %vm3186_vm0, %v4605_v57, %v3183_v21 }
0x13fa   : > { %v3189_v30 = vmul.f32 %v3187_v40, %v3157_v55 }
0x13fc   : > { %v3194_v31 = vmul.f32 %v4526_v5, %v3189_v30 }
0x13fe   : > { %v3199_v50 = vadd.f32 %v4527_v11, %v3194_v31 }
0x1400   : > { %v3200_v23 = vpack.c.bf16 %v3199_v50, %v3198_v9 }
0x1402   : > { %3277 = vmatmul.bf16.vlgmr.msrb.gmra.mxu3 %v3200_v23 }
0x1485   : > { %v3278_v10 = vpop.f32.mrf.mxu3 }
0x1486   : > { %v3279_v35 = vadd.f32 %v4528_v6, %v3278_v10 }
0x1488   : > { %v3283_v41 = vmax.f32 %v3279_v35, 0.0 }
0x148d   : > { %v3280_v36 = vpop.f32.mrf.mxu3 }
0x148e   : > { %v3281_v37 = vadd.f32 %v4528_v6, %v3280_v36 }
0x1490   : > { %v3284_v42 = vmax.f32 %v3281_v37, 0.0 }
0x1492   : > { %v3285_v24 = vpack.c.bf16 %v3284_v42, %v3283_v41 }
0x1494   : > { %3362 = vmatmul.bf16.vlgmr.msrb.gmra.mxu0 %v3285_v24 }
0x1511   : > { %v3363_v44 = vpop.f32.mrf.mxu0 }
0x1512   : > { %v3364_v45 = vadd.f32 %v4529_v43, %v3363_v44 }
0x1514   : > { %v3368_v46 = vadd.f32 %v3364_v45, %v3198_v9 }
0x1516   : > { %3372 = vadd.xlane.f32.xlu2 %v3368_v46 }
0x1519   : > { %v3365_v34 = vpop.f32.mrf.mxu0 }
0x151a   : > { %v3366_v52 = vadd.f32 %v4529_v43, %v3365_v34 }
0x151c   : > { %v3369_v53 = vadd.f32 %v3366_v52, %v3199_v50 }
0x151e   : > { %3374 = vadd.xlane.f32.xlu0 %v3369_v53 }
0x1589   : > { %v3373_v54 = vpop.xlane.xlu2 %3372 }
0x158a   : > { %v3376_v29 = vmul.f32 %v3373_v54, %v5672_v33 }
0x158c   : > { %v3378_v55 = vsub.f32 %v3368_v46, %v3376_v29 }
0x158e   : > { %v3380_v27 = vmul.f32 %v3378_v55, %v3378_v55 }
0x1590   : > { %3382 = vadd.xlane.f32.xlu2 %v3380_v27 }
0x1591   : > { %v3375_v56 = vpop.xlane.xlu0 %3374 }
0x1592   : > { %v3377_v51 = vmul.f32 %v3375_v56, %v5672_v33 }
0x1594   : > { %v3379_v38 = vsub.f32 %v3369_v53, %v3377_v51 }
0x1596   : > { %v3381_v2 = vmul.f32 %v3379_v38, %v3379_v38 }
0x1598   : > { %3384 = vadd.xlane.f32.xlu0 %v3381_v2 }
0x1603   : > { %v3383_v1 = vpop.xlane.xlu2 %3382 }
0x1604   : > { %v3386_v16 = vmul.f32 %v3383_v1, %v5672_v33 }
0x1606   : > { %v3388_v49 = vadd.f32 1e-05, %v3386_v16 }
0x1608   : > { %4606 = vrsqrt.f32 %v3388_v49  ;;  %vm3396_vm2 = vweird.f32 %v3388_v49 }
0x160b   : > { %v3385_v58 = vpop.xlane.xlu0 %3384 }
0x160c   : > { %v3387_v59 = vmul.f32 %v3385_v58, %v5672_v33 }
0x160e   : > { %v4607_v12 = vpop.eup %4606  ;;  %v3389_v60 = vadd.f32 1e-05, %v3387_v59 }
0x160f   : > { %v3391_v61 = vmul.f32 %v4607_v12, %v3388_v49  ;;  %vm3397_vm1 = vweird.f32 %v4607_v12 }
0x1610   : > { %4608 = vrsqrt.f32 %v3389_v60  ;;  %vm3398_vm3 = vmor %vm3396_vm2, %vm3397_vm1  ;;  %vm3406_vm5 = vweird.f32 %v3389_v60 }
0x1611   : > { %v3392_v47 = vmul.f32 %v4607_v12, %v3391_v61 }
0x1613   : > { %v3393_v62 = vmul.f32 0.5, %v3392_v47 }
0x1615   : > { %v3394_v22 = vsub.f32 1.5, %v3393_v62 }
0x1616   : > { %v4609_v63 = vpop.eup %4608 }
0x1617   : > { %v3395_v0 = vmul.f32 %v4607_v12, %v3394_v22  ;;  %v3401_v48 = vmul.f32 %v4609_v63, %v3389_v60  ;;  %vm3407_vm4 = vweird.f32 %v4609_v63 }
0x1618   : > { %vm3408_vm6 = vmor %vm3406_vm5, %vm3407_vm4 }
0x1619   : > { %v3399_v33 = vsel %vm3398_vm3, %v4607_v12, %v3395_v0  ;;  %v3402_v3 = vmul.f32 %v4609_v63, %v3401_v48 }
0x161a   : > { %v3410_v13 = vmul.f32 %v3399_v33, %v3378_v55 }
0x161b   : > { %v3403_v57 = vmul.f32 0.5, %v3402_v3 }
0x161c   : > { %v3415_v14 = vmul.f32 %v4530_v39, %v3410_v13 }
0x161d   : > { %v3404_v15 = vsub.f32 1.5, %v3403_v57 }
0x161e   : > { %v3420_v8 = vadd.f32 %v4531_v28, %v3415_v14 }
0x161f   : > { %v3405_v17 = vmul.f32 %v4609_v63, %v3404_v15 }
0x1620   : > { %v3422_v18 = vpack.c.bf16 %v3420_v8, %v3420_v8 }
0x1621   : > { %v3409_v19 = vsel %vm3408_vm6, %v4609_v63, %v3405_v17 }
0x1622   : > { %v3411_v5 = vmul.f32 %v3409_v19, %v3379_v38 }
0x1624   : > { %v3416_v20 = vmul.f32 %v4530_v39, %v3411_v5 }
0x1626   : > { %v3421_v21 = vadd.f32 %v4531_v28, %v3416_v20  ;;  %3429 = sbr.rel (%p4265_p5) target bundleno = 5844 (0x16d4), region = 168 }
0x1628   : > { %v3423_v40 = vpack.c.bf16 %v3421_v21, %v3421_v21  ;;  %v4401_v11 = vpack.c.bf16 %v3421_v21, %v3420_v8 }
0x162a   : > { %4402 = vst [vmem:[#allocation2] sm:$0xff] %v4401_v11  }
0x162b   : > { %v4397_v26 = vld [vmem:[#allocation15 + $0x38] sm:$0xff]  ;;  %v4396_v30 = vld [vmem:[#allocation15 + $0x30] sm:$0xff]  ;;  %v4395_v31 = vld [vmem:[#allocation15 + $0x28] sm:$0xff]  ;;  %v3452_v32 = vunpack.c.l.b16 %v3422_v18  ;;  %v3453_v25 = vunpack.c.l.b16 %v3423_v40 }
0x162c   : > { %3504 = vmatpush.bf16.msra.mxu0 %v4397_v26  ;;  %v4394_v9 = vld [vmem:[#allocation15 + $0x20] sm:$0xff]  ;;  %v4393_v50 = vld [vmem:[#allocation15 + $0x18] sm:$0xff]  ;;  %v4392_v23 = vld [vmem:[#allocation15 + $0x10] sm:$0xff] }
0x162d   : > { %v4391_v4 = vld [vmem:[#allocation15 + $0x8] sm:$0xff]  ;;  %v4390_v7 = vld [vmem:[#allocation15] sm:$0xff]  ;;  %v3454_v10 = vpack.c.b16 %v3453_v25, %v3452_v32 }
0x162e   : > { %v4610_v6 = vld [vmem:[#allocation17] ss:$0 sm:$0xff] }
0x1630   : > { %3505 = vmatpush.bf16.msra.mxu0 %v4396_v30 }
0x1634   : > { %3506 = vmatpush.bf16.msra.mxu0 %v4395_v31 }
0x1638   : > { %3507 = vmatpush.bf16.msra.mxu0 %v4394_v9 }
0x163c   : > { %3508 = vmatpush.bf16.msra.mxu0 %v4393_v50 }
0x1640   : > { %3509 = vmatpush.bf16.msra.mxu0 %v4392_v23 }
0x1644   : > { %3510 = vmatpush.bf16.msra.mxu0 %v4391_v4 }
0x1648   : > { %3511 = vmatpush.bf16.msra.mxu0 %v4390_v7 }
0x164b   : > { %3512 = vmatmul.bf16.vlgmr.msra.gmra.mxu0 %v3454_v10 }
0x16c8   : > { %v3513_v35 = vpop.f32.mrf.mxu0 }
0x16c9   : > { %v3514_v36 = vadd.f32 %v4610_v6, %v3513_v35 }
0x16cb   : > { %3518 = vst [vmem:[#allocation18] sm:$0xff] %v3514_v36 }
0x16d0   : > { %v3515_v37 = vpop.f32.mrf.mxu0 }
0x16d1   : > { %v3516_v41 = vadd.f32 %v4610_v6, %v3515_v37 }
0x16d3   : > { %3519 = vst [vmem:[#allocation18 + $0x8] sm:$0xff] %v3516_v41 }
0x16d4 PF: > { %s6164_s23 = sld [smem:[#allocation27_spill]]  ;;  %s4978_s10 = smov [#allocation18]  }
0x16d5   : > { %s3525_s26 = sshll.u32 %s4978_s10, 4  ;;  %s6165_s16 = sld [smem:[#allocation59_spill]]  ;;  %s3526_s26 = int_to_ptr.vmem [resolvable:$true] %s3525_s26 }
0x16d6   : > { %s4979_s28 = smov 128   ;;  %s4980_s18 = smov 8  }
0x16da   : > { %p4467_p8 = scmp.eq.s32.totalorder %s6164_s23, 1 }
0x16db   : > { %s3527_s25 = sshll.u32 %s6165_s16, 4  ;;  %s3528_s25 = int_to_ptr.hbm [resolvable:$true] %s3527_s25 }
0x16dc   : > { %4430 = dma.vmem_to_hbm [thread:$0]  (%p4467_p8), %s3526_s26, 256, %s3528_s25, [#allocation5], %s4979_s28, %s4979_s28, %s4980_s18  }
0x16dd   : > { %4946 = dma.done.wait (%p4467_p8), [#allocation5], 256  }
0x16de   : > { %4948 = vsyncadd (%p4467_p8), [#allocation5], 4294967040 }
0x16df PF: > { %s6166_s28 = sld [smem:[#allocation28_spill]] }
0x16e0   : > { %s6167_s27 = sld [smem:[#allocation25_spill]] }
0x16e1   : > { %s6168_s3 = sld [smem:[#allocation26_spill]] }
0x16e2   : > { %s6169_s7 = sld [smem:[#allocation29_spill]] }
0x16e5   : > { %p47_p9 = scmp.ge.s32.totalorder %s6166_s28, 4  }
0x16e7   :  { %49 = sbr.rel (!%p47_p9) target bundleno = 39 (0x27), region = 290 }
0x16ec   :  { %3544 = vsyncpa [#allocation4], 1 }
0x16ed   :  { %3546 = vsyncpa [#allocation4 + $0x1], 1 }
0x16ee   :  { %3547 = vsyncpa [#allocation7], 1 }
0x16ef   :  { %3549 = vsyncpa [#allocation7 + $0x1], 1 }
0x16f0   :  { %3550 = vsyncpa [#allocation10], 1 }
0x16f1   :  { %3552 = vsyncpa [#allocation10 + $0x1], 1 }
0x16f2   :  { %3553 = vsyncpa [#allocation13], 1 }
0x16f3   :  { %3555 = vsyncpa [#allocation13 + $0x1], 1 }
0x16f4   :  { %3556 = vsyncpa [#allocation16], 1 }
0x16f5   :  { %3557 = vsyncpa [#allocation5], 1 }
0x16f6   :  { %3559 = vsyncpa [#allocation5 + $0x1], 1 }

</bundles_post_ra>
